<compile_context>
chip_gen: v6e
topology: v6e:2x2x1
jax: 0.10.0
libtpu: 0.0.40
codegen_flags: <defaults>
</compile_context>

<pallas_src>
import functools

import jax
import jax.numpy as jnp
from jax.experimental import pallas as pl
from jax.experimental.pallas import tpu as pltpu


# ----------------------------------------------------------------------------
# Fused Inception kernel (one grid step == one image)
# ----------------------------------------------------------------------------
def inception_kernel(x_ref, ws1_ref, bs1_ref, w2_ref, b2_ref, w3_ref, b3_ref,
                     w4_ref, b4_ref, o_ref,
                     p2pad_ref, p3pad_ref, pool_ref, col2_ref, col3_ref,
                     *, c1, c2a, c2b, c3a, c3b, c4):
    _, H, W, cin = x_ref.shape
    HW = H * W
    cdt = ws1_ref.dtype            # MXU input dtype (f32 or bf16)
    f32 = jnp.float32

    x = x_ref[0]                                   # (H, W, Cin)
    x2d = x.reshape(HW, cin)                       # layout no-op (minor dim kept)

    # ---- fused stage-1 1x1 convs: [p1_1 | p2_1 | p3_1] share one read of x ----
    s1 = jnp.dot(x2d, ws1_ref[...], preferred_element_type=f32)
    s1 = jnp.maximum(s1 + bs1_ref[...], 0.0)       # (HW, c1+c2a+c3a), f32
    p1 = s1[:, 0:c1]
    p2a = s1[:, c1:c1 + c2a].reshape(H, W, c2a)
    p3a = s1[:, c1 + c2a:c1 + c2a + c3a].reshape(H, W, c3a)

    # ---- branch 2: 3x3 conv (pad 1) -> relu, in-VMEM zero pad + im2col ----
    p2pad_ref[...] = jnp.zeros(p2pad_ref.shape, f32)
    p2pad_ref[1:H + 1, 1:W + 1, :] = p2a
    for kh in range(3):
        for kw in range(3):
            k = kh * 3 + kw
            col2_ref[:, :, k * c2a:(k + 1) * c2a] = (
                p2pad_ref[kh:kh + H, kw:kw + W, :].astype(cdt))
    p2 = jnp.dot(col2_ref[...].reshape(HW, 9 * c2a), w2_ref[...],
                 preferred_element_type=f32)
    p2 = jnp.maximum(p2 + b2_ref[...], 0.0)

    # ---- branch 3: 5x5 conv (pad 2) -> relu ----
    p3pad_ref[...] = jnp.zeros(p3pad_ref.shape, f32)
    p3pad_ref[2:H + 2, 2:W + 2, :] = p3a
    for kh in range(5):
        for kw in range(5):
            k = kh * 5 + kw
            col3_ref[:, :, k * c3a:(k + 1) * c3a] = (
                p3pad_ref[kh:kh + H, kw:kw + W, :].astype(cdt))
    p3 = jnp.dot(col3_ref[...].reshape(HW, 25 * c3a), w3_ref[...],
                 preferred_element_type=f32)
    p3 = jnp.maximum(p3 + b3_ref[...], 0.0)

    # ---- branch 4: 3x3 maxpool (stride 1, pad 1) fused with 1x1 conv -> relu ----
    pool_ref[...] = jnp.full(pool_ref.shape, -jnp.inf, f32)
    pool_ref[1:H + 1, 1:W + 1, :] = x.astype(f32)
    m = pool_ref[0:H, 0:W, :]
    for kh in range(3):
        for kw in range(3):
            if kh == 0 and kw == 0:
                continue
            m = jnp.maximum(m, pool_ref[kh:kh + H, kw:kw + W, :])
    p4 = jnp.dot(m.reshape(HW, cin).astype(cdt), w4_ref[...],
                 preferred_element_type=f32)
    p4 = jnp.maximum(p4 + b4_ref[...], 0.0)

    # ---- fused channel concat: write each branch at its channel offset ----
    odt = o_ref.dtype
    o_ref[0, :, 0:c1] = p1.astype(odt)
    o_ref[0, :, c1:c1 + c2b] = p2.astype(odt)
    o_ref[0, :, c1 + c2b:c1 + c2b + c3b] = p3.astype(odt)
    o_ref[0, :, c1 + c2b + c3b:c1 + c2b + c3b + c4] = p4.astype(odt)


# ----------------------------------------------------------------------------
# Wrapper: weight packing + pallas_call plumbing
# ----------------------------------------------------------------------------
def inception_forward(x_nchw, params, *, compute_dtype=jnp.float32):
    """Pallas implementation of the Inception block. x: NCHW -> out: NCHW."""
    N, Cin, H, W = x_nchw.shape
    c1 = params["p1_1_w"].shape[-1]
    c2a = params["p2_1_w"].shape[-1]
    c2b = params["p2_2_w"].shape[-1]
    c3a = params["p3_1_w"].shape[-1]
    c3b = params["p3_2_w"].shape[-1]
    c4 = params["p4_2_w"].shape[-1]
    ctot = c1 + c2b + c3b + c4
    HW = H * W
    cdt = compute_dtype

    # Fused stage-1 1x1 weights: columns = [p1_1 | p2_1 | p3_1].
    ws1 = jnp.concatenate(
        [params["p1_1_w"].reshape(Cin, c1),
         params["p2_1_w"].reshape(Cin, c2a),
         params["p3_1_w"].reshape(Cin, c3a)], axis=-1).astype(cdt)
    bs1 = jnp.concatenate(
        [params["p1_1_b"], params["p2_1_b"], params["p3_1_b"]]).reshape(1, -1)
    # KxK conv weights reshaped for im2col: row index = (kh*K + kw)*Cin + cin.
    w2 = params["p2_2_w"].reshape(9 * c2a, c2b).astype(cdt)
    b2 = params["p2_2_b"].reshape(1, -1)
    w3 = params["p3_2_w"].reshape(25 * c3a, c3b).astype(cdt)
    b3 = params["p3_2_b"].reshape(1, -1)
    w4 = params["p4_2_w"].reshape(Cin, c4).astype(cdt)
    b4 = params["p4_2_b"].reshape(1, -1)

    x_nhwc = jnp.transpose(x_nchw, (0, 2, 3, 1)).astype(cdt)

    kernel = functools.partial(
        inception_kernel, c1=c1, c2a=c2a, c2b=c2b, c3a=c3a, c3b=c3b, c4=c4)

    def full_spec(arr):
        zeros = (0,) * arr.ndim
        return pl.BlockSpec(arr.shape, lambda n: zeros)

    out = pl.pallas_call(
        kernel,
        out_shape=jax.ShapeDtypeStruct((N, HW, ctot), jnp.float32),
        grid=(N,),
        in_specs=[
            pl.BlockSpec((1, H, W, Cin), lambda n: (n, 0, 0, 0)),
            full_spec(ws1), full_spec(bs1),
            full_spec(w2), full_spec(b2),
            full_spec(w3), full_spec(b3),
            full_spec(w4), full_spec(b4),
        ],
        out_specs=pl.BlockSpec((1, HW, ctot), lambda n: (n, 0, 0)),
        scratch_shapes=[
            pltpu.VMEM((H + 2, W + 2, c2a), jnp.float32),   # zero-padded p2_1 out
            pltpu.VMEM((H + 4, W + 4, c3a), jnp.float32),   # zero-padded p3_1 out
            pltpu.VMEM((H + 2, W + 2, Cin), jnp.float32),   # -inf padded x (pool)
            pltpu.VMEM((H, W, 9 * c2a), cdt),               # im2col buffer, 3x3
            pltpu.VMEM((H, W, 25 * c3a), cdt),              # im2col buffer, 5x5
        ],
        compiler_params=pltpu.CompilerParams(
            dimension_semantics=("parallel",),   # shard batch across TCs (v7x)
            vmem_limit_bytes=32 * 1024 * 1024,
        ),
    )(x_nhwc, ws1, bs1, w2, b2, w3, b3, w4, b4)

    # (N, H*W, Ctot) -> NCHW (tiny final transpose on the output only).
    return jnp.transpose(out.reshape(N, H, W, ctot), (0, 3, 1, 2))


# ----------------------------------------------------------------------------
# Pure-JAX reference (for correctness check)
# ----------------------------------------------------------------------------
def _ref_conv_relu(x, w, b, pad):
    out = jax.lax.conv_general_dilated(
        x, w, window_strides=(1, 1),
        padding=[(pad, pad), (pad, pad)],
        dimension_numbers=("NHWC", "HWIO", "NHWC"),
    )
    return jnp.maximum(out + b, 0.0)


def _ref_forward(x_nchw, p):
    x = jnp.transpose(x_nchw, (0, 2, 3, 1))
    p1 = _ref_conv_relu(x, p["p1_1_w"], p["p1_1_b"], 0)
    p2 = _ref_conv_relu(x, p["p2_1_w"], p["p2_1_b"], 0)
    p2 = _ref_conv_relu(p2, p["p2_2_w"], p["p2_2_b"], 1)
    p3 = _ref_conv_relu(x, p["p3_1_w"], p["p3_1_b"], 0)
    p3 = _ref_conv_relu(p3, p["p3_2_w"], p["p3_2_b"], 2)
    p4 = jax.lax.reduce_window(
        x, -jnp.inf, jax.lax.max, (1, 3, 3, 1), (1, 1, 1, 1),
        padding=[(0, 0), (1, 1), (1, 1), (0, 0)],
    )
    p4 = _ref_conv_relu(p4, p["p4_2_w"], p["p4_2_b"], 0)
    out = jnp.concatenate((p1, p2, p3, p4), axis=-1)
    return jnp.transpose(out, (0, 3, 1, 2))


# ----------------------------------------------------------------------------
# Main
# ----------------------------------------------------------------------------
if __name__ == "__main__":
    key = jax.random.PRNGKey(0)

    # Small shapes consistent with the module.
    N, Cin, H, W = 2, 4, 16, 16
    c1, c2, c3, c4 = 4, (4, 8), (2, 4), 4

    def make_conv(key, k, cin, cout):
        kw_key, kb_key = jax.random.split(key)
        scale = 1.0 / jnp.sqrt(cin * k * k)
        w = jax.random.normal(kw_key, (k, k, cin, cout), jnp.float32) * scale
        b = jax.random.normal(kb_key, (cout,), jnp.float32) * scale
        return w, b

    keys = jax.random.split(key, 7)
    params = {}
    params["p1_1_w"], params["p1_1_b"] = make_conv(keys[0], 1, Cin, c1)
    params["p2_1_w"], params["p2_1_b"] = make_conv(keys[1], 1, Cin, c2[0])
    params["p2_2_w"], params["p2_2_b"] = make_conv(keys[2], 3, c2[0], c2[1])
    params["p3_1_w"], params["p3_1_b"] = make_conv(keys[3], 1, Cin, c3[0])
    params["p3_2_w"], params["p3_2_b"] = make_conv(keys[4], 5, c3[0], c3[1])
    params["p4_2_w"], params["p4_2_b"] = make_conv(keys[5], 1, Cin, c4)

    x = jax.random.normal(keys[6], (N, Cin, H, W), jnp.float32)
    ref = jax.block_until_ready(_ref_forward(x, params))
    expected_c = c1 + c2[1] + c3[1] + c4

    # f32 path: strict correctness check.
    out = jax.block_until_ready(jax.jit(inception_forward)(x, params))
    assert out.shape == (N, expected_c, H, W), out.shape
    assert jnp.allclose(out, ref, atol=1e-4, rtol=1e-4), (
        float(jnp.max(jnp.abs(out - ref))))

    # bf16 MXU path (fast path on v6e/v7x): bf16 inputs/weights, f32 accumulation.
    fwd_bf16 = jax.jit(functools.partial(inception_forward,
                                         compute_dtype=jnp.bfloat16))
    out_bf16 = jax.block_until_ready(fwd_bf16(x, params))
    assert out_bf16.shape == (N, expected_c, H, W), out_bf16.shape
    assert jnp.allclose(out_bf16, ref, atol=8e-2, rtol=8e-2), (
        float(jnp.max(jnp.abs(out_bf16 - ref))))

    print("KERNEL_OK")
</pallas_src>

<mosaic_0001>
module attributes {stable_mosaic.version = 11 : i64} {
  func.func @inception_kernel(%arg0: i32, %arg1: memref<1x16x16x4xf32, #tpu.memory_space<vmem>>, %arg2: memref<4x10xf32, #tpu.memory_space<vmem>>, %arg3: memref<1x10xf32, #tpu.memory_space<vmem>>, %arg4: memref<36x8xf32, #tpu.memory_space<vmem>>, %arg5: memref<1x8xf32, #tpu.memory_space<vmem>>, %arg6: memref<50x4xf32, #tpu.memory_space<vmem>>, %arg7: memref<1x4xf32, #tpu.memory_space<vmem>>, %arg8: memref<4x4xf32, #tpu.memory_space<vmem>>, %arg9: memref<1x4xf32, #tpu.memory_space<vmem>>, %arg10: memref<1x256x20xf32, #tpu.memory_space<vmem>>, %arg11: memref<18x18x4xf32, #tpu.memory_space<vmem>>, %arg12: memref<20x20x2xf32, #tpu.memory_space<vmem>>, %arg13: memref<18x18x4xf32, #tpu.memory_space<vmem>>, %arg14: memref<16x16x36xf32, #tpu.memory_space<vmem>>, %arg15: memref<16x16x50xf32, #tpu.memory_space<vmem>>) attributes {dimension_semantics = [#tpu.dimension_semantics<parallel>], iteration_bounds = array<i64: 2>, scalar_prefetch = 0 : i64, scratch_operands = 5 : i64, tpu.core_type = #tpu.core_type<tc>, window_params = [{transform_indices = @transform_0, window_bounds = array<i64: 1, 16, 16, 4>}, {pipeline_mode = #tpu.pipeline_mode<synchronous>, transform_indices = @transform_1, window_bounds = array<i64: 4, 10>}, {pipeline_mode = #tpu.pipeline_mode<synchronous>, transform_indices = @transform_2, window_bounds = array<i64: 1, 10>}, {pipeline_mode = #tpu.pipeline_mode<synchronous>, transform_indices = @transform_3, window_bounds = array<i64: 36, 8>}, {pipeline_mode = #tpu.pipeline_mode<synchronous>, transform_indices = @transform_4, window_bounds = array<i64: 1, 8>}, {pipeline_mode = #tpu.pipeline_mode<synchronous>, transform_indices = @transform_5, window_bounds = array<i64: 50, 4>}, {pipeline_mode = #tpu.pipeline_mode<synchronous>, transform_indices = @transform_6, window_bounds = array<i64: 1, 4>}, {pipeline_mode = #tpu.pipeline_mode<synchronous>, transform_indices = @transform_7, window_bounds = array<i64: 4, 4>}, {pipeline_mode = #tpu.pipeline_mode<synchronous>, transform_indices = @transform_8, window_bounds = array<i64: 1, 4>}, {transform_indices = @transform_9, window_bounds = array<i64: 1, 256, 20>}]} {
    %c0 = arith.constant 0 : index
    %c0_0 = arith.constant 0 : index
    %c0_1 = arith.constant 0 : index
    %c0_2 = arith.constant 0 : index
    %0 = vector.load %arg1[%c0, %c0_0, %c0_1, %c0_2] : memref<1x16x16x4xf32, #tpu.memory_space<vmem>>, vector<1x16x16x4xf32>
    %1 = vector.shape_cast %0 : vector<1x16x16x4xf32> to vector<16x16x4xf32>
    %2 = vector.shape_cast %1 : vector<16x16x4xf32> to vector<256x4xf32>
    %c0_3 = arith.constant 0 : index
    %c0_4 = arith.constant 0 : index
    %3 = vector.load %arg2[%c0_3, %c0_4] : memref<4x10xf32, #tpu.memory_space<vmem>>, vector<4x10xf32>
    %cst = arith.constant dense<0.000000e+00> : vector<256x10xf32>
    %4 = tpu.matmul %2, %3, %cst {dimension_numbers = #tpu.dot_dimension_numbers<[1], [0], [0], [1], [0, 0, 1, 1], [], []>} : vector<256x4xf32>, vector<4x10xf32>, vector<256x10xf32> -> vector<256x10xf32>
    %c0_5 = arith.constant 0 : index
    %c0_6 = arith.constant 0 : index
    %5 = vector.load %arg3[%c0_5, %c0_6] : memref<1x10xf32, #tpu.memory_space<vmem>>, vector<1x10xf32>
    %6 = vector.broadcast %5 : vector<1x10xf32> to vector<256x10xf32>
    %7 = arith.addf %4, %6 : vector<256x10xf32>
    %cst_7 = arith.constant 0.000000e+00 : f32
    %8 = vector.broadcast %cst_7 : f32 to vector<256x10xf32>
    %9 = arith.maximumf %7, %8 : vector<256x10xf32>
    %10 = vector.extract_strided_slice %9 {offsets = [0, 0], sizes = [256, 4], strides = [1, 1]} : vector<256x10xf32> to vector<256x4xf32>
    %11 = vector.extract_strided_slice %9 {offsets = [0, 4], sizes = [256, 4], strides = [1, 1]} : vector<256x10xf32> to vector<256x4xf32>
    %12 = vector.shape_cast %11 : vector<256x4xf32> to vector<16x16x4xf32>
    %13 = vector.extract_strided_slice %9 {offsets = [0, 8], sizes = [256, 2], strides = [1, 1]} : vector<256x10xf32> to vector<256x2xf32>
    %14 = vector.shape_cast %13 : vector<256x2xf32> to vector<16x16x2xf32>
    %cst_8 = arith.constant 0.000000e+00 : f32
    %15 = vector.broadcast %cst_8 : f32 to vector<18x18x4xf32>
    %c0_9 = arith.constant 0 : index
    %c0_10 = arith.constant 0 : index
    %c0_11 = arith.constant 0 : index
    %16 = vector.load %arg11[%c0_9, %c0_10, %c0_11] : memref<18x18x4xf32, #tpu.memory_space<vmem>>, vector<18x18x4xf32>
    tpu.vector_store %arg11[%c0_9, %c0_10, %c0_11], %15 {strides = array<i32>} : memref<18x18x4xf32, #tpu.memory_space<vmem>>, vector<18x18x4xf32>,
    %c1 = arith.constant 1 : index
    %c1_12 = arith.constant 1 : index
    %c0_13 = arith.constant 0 : index
    %17 = vector.load %arg11[%c1, %c1_12, %c0_13] : memref<18x18x4xf32, #tpu.memory_space<vmem>>, vector<16x16x4xf32>
    tpu.vector_store %arg11[%c1, %c1_12, %c0_13], %12 {strides = array<i32>} : memref<18x18x4xf32, #tpu.memory_space<vmem>>, vector<16x16x4xf32>,
    %c0_14 = arith.constant 0 : index
    %c0_15 = arith.constant 0 : index
    %c0_16 = arith.constant 0 : index
    %18 = vector.load %arg11[%c0_14, %c0_15, %c0_16] : memref<18x18x4xf32, #tpu.memory_space<vmem>>, vector<16x16x4xf32>
    %c0_17 = arith.constant 0 : index
    %c0_18 = arith.constant 0 : index
    %c0_19 = arith.constant 0 : index
    %19 = vector.load %arg14[%c0_17, %c0_18, %c0_19] : memref<16x16x36xf32, #tpu.memory_space<vmem>>, vector<16x16x4xf32>
    tpu.vector_store %arg14[%c0_17, %c0_18, %c0_19], %18 {strides = array<i32>} : memref<16x16x36xf32, #tpu.memory_space<vmem>>, vector<16x16x4xf32>,
    %c0_20 = arith.constant 0 : index
    %c1_21 = arith.constant 1 : index
    %c0_22 = arith.constant 0 : index
    %20 = vector.load %arg11[%c0_20, %c1_21, %c0_22] : memref<18x18x4xf32, #tpu.memory_space<vmem>>, vector<16x16x4xf32>
    %c0_23 = arith.constant 0 : index
    %c0_24 = arith.constant 0 : index
    %c4 = arith.constant 4 : index
    %21 = vector.load %arg14[%c0_23, %c0_24, %c4] : memref<16x16x36xf32, #tpu.memory_space<vmem>>, vector<16x16x4xf32>
    tpu.vector_store %arg14[%c0_23, %c0_24, %c4], %20 {strides = array<i32>} : memref<16x16x36xf32, #tpu.memory_space<vmem>>, vector<16x16x4xf32>,
    %c0_25 = arith.constant 0 : index
    %c2 = arith.constant 2 : index
    %c0_26 = arith.constant 0 : index
    %22 = vector.load %arg11[%c0_25, %c2, %c0_26] : memref<18x18x4xf32, #tpu.memory_space<vmem>>, vector<16x16x4xf32>
    %c0_27 = arith.constant 0 : index
    %c0_28 = arith.constant 0 : index
    %c8 = arith.constant 8 : index
    %23 = vector.load %arg14[%c0_27, %c0_28, %c8] : memref<16x16x36xf32, #tpu.memory_space<vmem>>, vector<16x16x4xf32>
    tpu.vector_store %arg14[%c0_27, %c0_28, %c8], %22 {strides = array<i32>} : memref<16x16x36xf32, #tpu.memory_space<vmem>>, vector<16x16x4xf32>,
    %c1_29 = arith.constant 1 : index
    %c0_30 = arith.constant 0 : index
    %c0_31 = arith.constant 0 : index
    %24 = vector.load %arg11[%c1_29, %c0_30, %c0_31] : memref<18x18x4xf32, #tpu.memory_space<vmem>>, vector<16x16x4xf32>
    %c0_32 = arith.constant 0 : index
    %c0_33 = arith.constant 0 : index
    %c12 = arith.constant 12 : index
    %25 = vector.load %arg14[%c0_32, %c0_33, %c12] : memref<16x16x36xf32, #tpu.memory_space<vmem>>, vector<16x16x4xf32>
    tpu.vector_store %arg14[%c0_32, %c0_33, %c12], %24 {strides = array<i32>} : memref<16x16x36xf32, #tpu.memory_space<vmem>>, vector<16x16x4xf32>,
    %c1_34 = arith.constant 1 : index
    %c1_35 = arith.constant 1 : index
    %c0_36 = arith.constant 0 : index
    %26 = vector.load %arg11[%c1_34, %c1_35, %c0_36] : memref<18x18x4xf32, #tpu.memory_space<vmem>>, vector<16x16x4xf32>
    %c0_37 = arith.constant 0 : index
    %c0_38 = arith.constant 0 : index
    %c16 = arith.constant 16 : index
    %27 = vector.load %arg14[%c0_37, %c0_38, %c16] : memref<16x16x36xf32, #tpu.memory_space<vmem>>, vector<16x16x4xf32>
    tpu.vector_store %arg14[%c0_37, %c0_38, %c16], %26 {strides = array<i32>} : memref<16x16x36xf32, #tpu.memory_space<vmem>>, vector<16x16x4xf32>,
    %c1_39 = arith.constant 1 : index
    %c2_40 = arith.constant 2 : index
    %c0_41 = arith.constant 0 : index
    %28 = vector.load %arg11[%c1_39, %c2_40, %c0_41] : memref<18x18x4xf32, #tpu.memory_space<vmem>>, vector<16x16x4xf32>
    %c0_42 = arith.constant 0 : index
    %c0_43 = arith.constant 0 : index
    %c20 = arith.constant 20 : index
    %29 = vector.load %arg14[%c0_42, %c0_43, %c20] : memref<16x16x36xf32, #tpu.memory_space<vmem>>, vector<16x16x4xf32>
    tpu.vector_store %arg14[%c0_42, %c0_43, %c20], %28 {strides = array<i32>} : memref<16x16x36xf32, #tpu.memory_space<vmem>>, vector<16x16x4xf32>,
    %c2_44 = arith.constant 2 : index
    %c0_45 = arith.constant 0 : index
    %c0_46 = arith.constant 0 : index
    %30 = vector.load %arg11[%c2_44, %c0_45, %c0_46] : memref<18x18x4xf32, #tpu.memory_space<vmem>>, vector<16x16x4xf32>
    %c0_47 = arith.constant 0 : index
    %c0_48 = arith.constant 0 : index
    %c24 = arith.constant 24 : index
    %31 = vector.load %arg14[%c0_47, %c0_48, %c24] : memref<16x16x36xf32, #tpu.memory_space<vmem>>, vector<16x16x4xf32>
    tpu.vector_store %arg14[%c0_47, %c0_48, %c24], %30 {strides = array<i32>} : memref<16x16x36xf32, #tpu.memory_space<vmem>>, vector<16x16x4xf32>,
    %c2_49 = arith.constant 2 : index
    %c1_50 = arith.constant 1 : index
    %c0_51 = arith.constant 0 : index
    %32 = vector.load %arg11[%c2_49, %c1_50, %c0_51] : memref<18x18x4xf32, #tpu.memory_space<vmem>>, vector<16x16x4xf32>
    %c0_52 = arith.constant 0 : index
    %c0_53 = arith.constant 0 : index
    %c28 = arith.constant 28 : index
    %33 = vector.load %arg14[%c0_52, %c0_53, %c28] : memref<16x16x36xf32, #tpu.memory_space<vmem>>, vector<16x16x4xf32>
    tpu.vector_store %arg14[%c0_52, %c0_53, %c28], %32 {strides = array<i32>} : memref<16x16x36xf32, #tpu.memory_space<vmem>>, vector<16x16x4xf32>,
    %c2_54 = arith.constant 2 : index
    %c2_55 = arith.constant 2 : index
    %c0_56 = arith.constant 0 : index
    %34 = vector.load %arg11[%c2_54, %c2_55, %c0_56] : memref<18x18x4xf32, #tpu.memory_space<vmem>>, vector<16x16x4xf32>
    %c0_57 = arith.constant 0 : index
    %c0_58 = arith.constant 0 : index
    %c32 = arith.constant 32 : index
    %35 = vector.load %arg14[%c0_57, %c0_58, %c32] : memref<16x16x36xf32, #tpu.memory_space<vmem>>, vector<16x16x4xf32>
    tpu.vector_store %arg14[%c0_57, %c0_58, %c32], %34 {strides = array<i32>} : memref<16x16x36xf32, #tpu.memory_space<vmem>>, vector<16x16x4xf32>,
    %c0_59 = arith.constant 0 : index
    %c0_60 = arith.constant 0 : index
    %c0_61 = arith.constant 0 : index
    %36 = vector.load %arg14[%c0_59, %c0_60, %c0_61] : memref<16x16x36xf32, #tpu.memory_space<vmem>>, vector<16x16x36xf32>
    %37 = vector.shape_cast %36 : vector<16x16x36xf32> to vector<256x36xf32>
    %c0_62 = arith.constant 0 : index
    %c0_63 = arith.constant 0 : index
    %38 = vector.load %arg4[%c0_62, %c0_63] : memref<36x8xf32, #tpu.memory_space<vmem>>, vector<36x8xf32>
    %cst_64 = arith.constant dense<0.000000e+00> : vector<256x8xf32>
    %39 = tpu.matmul %37, %38, %cst_64 {dimension_numbers = #tpu.dot_dimension_numbers<[1], [0], [0], [1], [0, 0, 1, 1], [], []>} : vector<256x36xf32>, vector<36x8xf32>, vector<256x8xf32> -> vector<256x8xf32>
    %c0_65 = arith.constant 0 : index
    %c0_66 = arith.constant 0 : index
    %40 = vector.load %arg5[%c0_65, %c0_66] : memref<1x8xf32, #tpu.memory_space<vmem>>, vector<1x8xf32>
    %41 = vector.broadcast %40 : vector<1x8xf32> to vector<256x8xf32>
    %42 = arith.addf %39, %41 : vector<256x8xf32>
    %cst_67 = arith.constant 0.000000e+00 : f32
    %43 = vector.broadcast %cst_67 : f32 to vector<256x8xf32>
    %44 = arith.maximumf %42, %43 : vector<256x8xf32>
    %cst_68 = arith.constant 0.000000e+00 : f32
    %45 = vector.broadcast %cst_68 : f32 to vector<20x20x2xf32>
    %c0_69 = arith.constant 0 : index
    %c0_70 = arith.constant 0 : index
    %c0_71 = arith.constant 0 : index
    %46 = vector.load %arg12[%c0_69, %c0_70, %c0_71] : memref<20x20x2xf32, #tpu.memory_space<vmem>>, vector<20x20x2xf32>
    tpu.vector_store %arg12[%c0_69, %c0_70, %c0_71], %45 {strides = array<i32>} : memref<20x20x2xf32, #tpu.memory_space<vmem>>, vector<20x20x2xf32>,
    %c2_72 = arith.constant 2 : index
    %c2_73 = arith.constant 2 : index
    %c0_74 = arith.constant 0 : index
    %47 = vector.load %arg12[%c2_72, %c2_73, %c0_74] : memref<20x20x2xf32, #tpu.memory_space<vmem>>, vector<16x16x2xf32>
    tpu.vector_store %arg12[%c2_72, %c2_73, %c0_74], %14 {strides = array<i32>} : memref<20x20x2xf32, #tpu.memory_space<vmem>>, vector<16x16x2xf32>,
    %c0_75 = arith.constant 0 : index
    %c0_76 = arith.constant 0 : index
    %c0_77 = arith.constant 0 : index
    %48 = vector.load %arg12[%c0_75, %c0_76, %c0_77] : memref<20x20x2xf32, #tpu.memory_space<vmem>>, vector<16x16x2xf32>
    %c0_78 = arith.constant 0 : index
    %c0_79 = arith.constant 0 : index
    %c0_80 = arith.constant 0 : index
    %49 = vector.load %arg15[%c0_78, %c0_79, %c0_80] : memref<16x16x50xf32, #tpu.memory_space<vmem>>, vector<16x16x2xf32>
    tpu.vector_store %arg15[%c0_78, %c0_79, %c0_80], %48 {strides = array<i32>} : memref<16x16x50xf32, #tpu.memory_space<vmem>>, vector<16x16x2xf32>,
    %c0_81 = arith.constant 0 : index
    %c1_82 = arith.constant 1 : index
    %c0_83 = arith.constant 0 : index
    %50 = vector.load %arg12[%c0_81, %c1_82, %c0_83] : memref<20x20x2xf32, #tpu.memory_space<vmem>>, vector<16x16x2xf32>
    %c0_84 = arith.constant 0 : index
    %c0_85 = arith.constant 0 : index
    %c2_86 = arith.constant 2 : index
    %51 = vector.load %arg15[%c0_84, %c0_85, %c2_86] : memref<16x16x50xf32, #tpu.memory_space<vmem>>, vector<16x16x2xf32>
    tpu.vector_store %arg15[%c0_84, %c0_85, %c2_86], %50 {strides = array<i32>} : memref<16x16x50xf32, #tpu.memory_space<vmem>>, vector<16x16x2xf32>,
    %c0_87 = arith.constant 0 : index
    %c2_88 = arith.constant 2 : index
    %c0_89 = arith.constant 0 : index
    %52 = vector.load %arg12[%c0_87, %c2_88, %c0_89] : memref<20x20x2xf32, #tpu.memory_space<vmem>>, vector<16x16x2xf32>
    %c0_90 = arith.constant 0 : index
    %c0_91 = arith.constant 0 : index
    %c4_92 = arith.constant 4 : index
    %53 = vector.load %arg15[%c0_90, %c0_91, %c4_92] : memref<16x16x50xf32, #tpu.memory_space<vmem>>, vector<16x16x2xf32>
    tpu.vector_store %arg15[%c0_90, %c0_91, %c4_92], %52 {strides = array<i32>} : memref<16x16x50xf32, #tpu.memory_space<vmem>>, vector<16x16x2xf32>,
    %c0_93 = arith.constant 0 : index
    %c3 = arith.constant 3 : index
    %c0_94 = arith.constant 0 : index
    %54 = vector.load %arg12[%c0_93, %c3, %c0_94] : memref<20x20x2xf32, #tpu.memory_space<vmem>>, vector<16x16x2xf32>
    %c0_95 = arith.constant 0 : index
    %c0_96 = arith.constant 0 : index
    %c6 = arith.constant 6 : index
    %55 = vector.load %arg15[%c0_95, %c0_96, %c6] : memref<16x16x50xf32, #tpu.memory_space<vmem>>, vector<16x16x2xf32>
    tpu.vector_store %arg15[%c0_95, %c0_96, %c6], %54 {strides = array<i32>} : memref<16x16x50xf32, #tpu.memory_space<vmem>>, vector<16x16x2xf32>,
    %c0_97 = arith.constant 0 : index
    %c4_98 = arith.constant 4 : index
    %c0_99 = arith.constant 0 : index
    %56 = vector.load %arg12[%c0_97, %c4_98, %c0_99] : memref<20x20x2xf32, #tpu.memory_space<vmem>>, vector<16x16x2xf32>
    %c0_100 = arith.constant 0 : index
    %c0_101 = arith.constant 0 : index
    %c8_102 = arith.constant 8 : index
    %57 = vector.load %arg15[%c0_100, %c0_101, %c8_102] : memref<16x16x50xf32, #tpu.memory_space<vmem>>, vector<16x16x2xf32>
    tpu.vector_store %arg15[%c0_100, %c0_101, %c8_102], %56 {strides = array<i32>} : memref<16x16x50xf32, #tpu.memory_space<vmem>>, vector<16x16x2xf32>,
    %c1_103 = arith.constant 1 : index
    %c0_104 = arith.constant 0 : index
    %c0_105 = arith.constant 0 : index
    %58 = vector.load %arg12[%c1_103, %c0_104, %c0_105] : memref<20x20x2xf32, #tpu.memory_space<vmem>>, vector<16x16x2xf32>
    %c0_106 = arith.constant 0 : index
    %c0_107 = arith.constant 0 : index
    %c10 = arith.constant 10 : index
    %59 = vector.load %arg15[%c0_106, %c0_107, %c10] : memref<16x16x50xf32, #tpu.memory_space<vmem>>, vector<16x16x2xf32>
    tpu.vector_store %arg15[%c0_106, %c0_107, %c10], %58 {strides = array<i32>} : memref<16x16x50xf32, #tpu.memory_space<vmem>>, vector<16x16x2xf32>,
    %c1_108 = arith.constant 1 : index
    %c1_109 = arith.constant 1 : index
    %c0_110 = arith.constant 0 : index
    %60 = vector.load %arg12[%c1_108, %c1_109, %c0_110] : memref<20x20x2xf32, #tpu.memory_space<vmem>>, vector<16x16x2xf32>
    %c0_111 = arith.constant 0 : index
    %c0_112 = arith.constant 0 : index
    %c12_113 = arith.constant 12 : index
    %61 = vector.load %arg15[%c0_111, %c0_112, %c12_113] : memref<16x16x50xf32, #tpu.memory_space<vmem>>, vector<16x16x2xf32>
    tpu.vector_store %arg15[%c0_111, %c0_112, %c12_113], %60 {strides = array<i32>} : memref<16x16x50xf32, #tpu.memory_space<vmem>>, vector<16x16x2xf32>,
    %c1_114 = arith.constant 1 : index
    %c2_115 = arith.constant 2 : index
    %c0_116 = arith.constant 0 : index
    %62 = vector.load %arg12[%c1_114, %c2_115, %c0_116] : memref<20x20x2xf32, #tpu.memory_space<vmem>>, vector<16x16x2xf32>
    %c0_117 = arith.constant 0 : index
    %c0_118 = arith.constant 0 : index
    %c14 = arith.constant 14 : index
    %63 = vector.load %arg15[%c0_117, %c0_118, %c14] : memref<16x16x50xf32, #tpu.memory_space<vmem>>, vector<16x16x2xf32>
    tpu.vector_store %arg15[%c0_117, %c0_118, %c14], %62 {strides = array<i32>} : memref<16x16x50xf32, #tpu.memory_space<vmem>>, vector<16x16x2xf32>,
    %c1_119 = arith.constant 1 : index
    %c3_120 = arith.constant 3 : index
    %c0_121 = arith.constant 0 : index
    %64 = vector.load %arg12[%c1_119, %c3_120, %c0_121] : memref<20x20x2xf32, #tpu.memory_space<vmem>>, vector<16x16x2xf32>
    %c0_122 = arith.constant 0 : index
    %c0_123 = arith.constant 0 : index
    %c16_124 = arith.constant 16 : index
    %65 = vector.load %arg15[%c0_122, %c0_123, %c16_124] : memref<16x16x50xf32, #tpu.memory_space<vmem>>, vector<16x16x2xf32>
    tpu.vector_store %arg15[%c0_122, %c0_123, %c16_124], %64 {strides = array<i32>} : memref<16x16x50xf32, #tpu.memory_space<vmem>>, vector<16x16x2xf32>,
    %c1_125 = arith.constant 1 : index
    %c4_126 = arith.constant 4 : index
    %c0_127 = arith.constant 0 : index
    %66 = vector.load %arg12[%c1_125, %c4_126, %c0_127] : memref<20x20x2xf32, #tpu.memory_space<vmem>>, vector<16x16x2xf32>
    %c0_128 = arith.constant 0 : index
    %c0_129 = arith.constant 0 : index
    %c18 = arith.constant 18 : index
    %67 = vector.load %arg15[%c0_128, %c0_129, %c18] : memref<16x16x50xf32, #tpu.memory_space<vmem>>, vector<16x16x2xf32>
    tpu.vector_store %arg15[%c0_128, %c0_129, %c18], %66 {strides = array<i32>} : memref<16x16x50xf32, #tpu.memory_space<vmem>>, vector<16x16x2xf32>,
    %c2_130 = arith.constant 2 : index
    %c0_131 = arith.constant 0 : index
    %c0_132 = arith.constant 0 : index
    %68 = vector.load %arg12[%c2_130, %c0_131, %c0_132] : memref<20x20x2xf32, #tpu.memory_space<vmem>>, vector<16x16x2xf32>
    %c0_133 = arith.constant 0 : index
    %c0_134 = arith.constant 0 : index
    %c20_135 = arith.constant 20 : index
    %69 = vector.load %arg15[%c0_133, %c0_134, %c20_135] : memref<16x16x50xf32, #tpu.memory_space<vmem>>, vector<16x16x2xf32>
    tpu.vector_store %arg15[%c0_133, %c0_134, %c20_135], %68 {strides = array<i32>} : memref<16x16x50xf32, #tpu.memory_space<vmem>>, vector<16x16x2xf32>,
    %c2_136 = arith.constant 2 : index
    %c1_137 = arith.constant 1 : index
    %c0_138 = arith.constant 0 : index
    %70 = vector.load %arg12[%c2_136, %c1_137, %c0_138] : memref<20x20x2xf32, #tpu.memory_space<vmem>>, vector<16x16x2xf32>
    %c0_139 = arith.constant 0 : index
    %c0_140 = arith.constant 0 : index
    %c22 = arith.constant 22 : index
    %71 = vector.load %arg15[%c0_139, %c0_140, %c22] : memref<16x16x50xf32, #tpu.memory_space<vmem>>, vector<16x16x2xf32>
    tpu.vector_store %arg15[%c0_139, %c0_140, %c22], %70 {strides = array<i32>} : memref<16x16x50xf32, #tpu.memory_space<vmem>>, vector<16x16x2xf32>,
    %c2_141 = arith.constant 2 : index
    %c2_142 = arith.constant 2 : index
    %c0_143 = arith.constant 0 : index
    %72 = vector.load %arg12[%c2_141, %c2_142, %c0_143] : memref<20x20x2xf32, #tpu.memory_space<vmem>>, vector<16x16x2xf32>
    %c0_144 = arith.constant 0 : index
    %c0_145 = arith.constant 0 : index
    %c24_146 = arith.constant 24 : index
    %73 = vector.load %arg15[%c0_144, %c0_145, %c24_146] : memref<16x16x50xf32, #tpu.memory_space<vmem>>, vector<16x16x2xf32>
    tpu.vector_store %arg15[%c0_144, %c0_145, %c24_146], %72 {strides = array<i32>} : memref<16x16x50xf32, #tpu.memory_space<vmem>>, vector<16x16x2xf32>,
    %c2_147 = arith.constant 2 : index
    %c3_148 = arith.constant 3 : index
    %c0_149 = arith.constant 0 : index
    %74 = vector.load %arg12[%c2_147, %c3_148, %c0_149] : memref<20x20x2xf32, #tpu.memory_space<vmem>>, vector<16x16x2xf32>
    %c0_150 = arith.constant 0 : index
    %c0_151 = arith.constant 0 : index
    %c26 = arith.constant 26 : index
    %75 = vector.load %arg15[%c0_150, %c0_151, %c26] : memref<16x16x50xf32, #tpu.memory_space<vmem>>, vector<16x16x2xf32>
    tpu.vector_store %arg15[%c0_150, %c0_151, %c26], %74 {strides = array<i32>} : memref<16x16x50xf32, #tpu.memory_space<vmem>>, vector<16x16x2xf32>,
    %c2_152 = arith.constant 2 : index
    %c4_153 = arith.constant 4 : index
    %c0_154 = arith.constant 0 : index
    %76 = vector.load %arg12[%c2_152, %c4_153, %c0_154] : memref<20x20x2xf32, #tpu.memory_space<vmem>>, vector<16x16x2xf32>
    %c0_155 = arith.constant 0 : index
    %c0_156 = arith.constant 0 : index
    %c28_157 = arith.constant 28 : index
    %77 = vector.load %arg15[%c0_155, %c0_156, %c28_157] : memref<16x16x50xf32, #tpu.memory_space<vmem>>, vector<16x16x2xf32>
    tpu.vector_store %arg15[%c0_155, %c0_156, %c28_157], %76 {strides = array<i32>} : memref<16x16x50xf32, #tpu.memory_space<vmem>>, vector<16x16x2xf32>,
    %c3_158 = arith.constant 3 : index
    %c0_159 = arith.constant 0 : index
    %c0_160 = arith.constant 0 : index
    %78 = vector.load %arg12[%c3_158, %c0_159, %c0_160] : memref<20x20x2xf32, #tpu.memory_space<vmem>>, vector<16x16x2xf32>
    %c0_161 = arith.constant 0 : index
    %c0_162 = arith.constant 0 : index
    %c30 = arith.constant 30 : index
    %79 = vector.load %arg15[%c0_161, %c0_162, %c30] : memref<16x16x50xf32, #tpu.memory_space<vmem>>, vector<16x16x2xf32>
    tpu.vector_store %arg15[%c0_161, %c0_162, %c30], %78 {strides = array<i32>} : memref<16x16x50xf32, #tpu.memory_space<vmem>>, vector<16x16x2xf32>,
    %c3_163 = arith.constant 3 : index
    %c1_164 = arith.constant 1 : index
    %c0_165 = arith.constant 0 : index
    %80 = vector.load %arg12[%c3_163, %c1_164, %c0_165] : memref<20x20x2xf32, #tpu.memory_space<vmem>>, vector<16x16x2xf32>
    %c0_166 = arith.constant 0 : index
    %c0_167 = arith.constant 0 : index
    %c32_168 = arith.constant 32 : index
    %81 = vector.load %arg15[%c0_166, %c0_167, %c32_168] : memref<16x16x50xf32, #tpu.memory_space<vmem>>, vector<16x16x2xf32>
    tpu.vector_store %arg15[%c0_166, %c0_167, %c32_168], %80 {strides = array<i32>} : memref<16x16x50xf32, #tpu.memory_space<vmem>>, vector<16x16x2xf32>,
    %c3_169 = arith.constant 3 : index
    %c2_170 = arith.constant 2 : index
    %c0_171 = arith.constant 0 : index
    %82 = vector.load %arg12[%c3_169, %c2_170, %c0_171] : memref<20x20x2xf32, #tpu.memory_space<vmem>>, vector<16x16x2xf32>
    %c0_172 = arith.constant 0 : index
    %c0_173 = arith.constant 0 : index
    %c34 = arith.constant 34 : index
    %83 = vector.load %arg15[%c0_172, %c0_173, %c34] : memref<16x16x50xf32, #tpu.memory_space<vmem>>, vector<16x16x2xf32>
    tpu.vector_store %arg15[%c0_172, %c0_173, %c34], %82 {strides = array<i32>} : memref<16x16x50xf32, #tpu.memory_space<vmem>>, vector<16x16x2xf32>,
    %c3_174 = arith.constant 3 : index
    %c3_175 = arith.constant 3 : index
    %c0_176 = arith.constant 0 : index
    %84 = vector.load %arg12[%c3_174, %c3_175, %c0_176] : memref<20x20x2xf32, #tpu.memory_space<vmem>>, vector<16x16x2xf32>
    %c0_177 = arith.constant 0 : index
    %c0_178 = arith.constant 0 : index
    %c36 = arith.constant 36 : index
    %85 = vector.load %arg15[%c0_177, %c0_178, %c36] : memref<16x16x50xf32, #tpu.memory_space<vmem>>, vector<16x16x2xf32>
    tpu.vector_store %arg15[%c0_177, %c0_178, %c36], %84 {strides = array<i32>} : memref<16x16x50xf32, #tpu.memory_space<vmem>>, vector<16x16x2xf32>,
    %c3_179 = arith.constant 3 : index
    %c4_180 = arith.constant 4 : index
    %c0_181 = arith.constant 0 : index
    %86 = vector.load %arg12[%c3_179, %c4_180, %c0_181] : memref<20x20x2xf32, #tpu.memory_space<vmem>>, vector<16x16x2xf32>
    %c0_182 = arith.constant 0 : index
    %c0_183 = arith.constant 0 : index
    %c38 = arith.constant 38 : index
    %87 = vector.load %arg15[%c0_182, %c0_183, %c38] : memref<16x16x50xf32, #tpu.memory_space<vmem>>, vector<16x16x2xf32>
    tpu.vector_store %arg15[%c0_182, %c0_183, %c38], %86 {strides = array<i32>} : memref<16x16x50xf32, #tpu.memory_space<vmem>>, vector<16x16x2xf32>,
    %c4_184 = arith.constant 4 : index
    %c0_185 = arith.constant 0 : index
    %c0_186 = arith.constant 0 : index
    %88 = vector.load %arg12[%c4_184, %c0_185, %c0_186] : memref<20x20x2xf32, #tpu.memory_space<vmem>>, vector<16x16x2xf32>
    %c0_187 = arith.constant 0 : index
    %c0_188 = arith.constant 0 : index
    %c40 = arith.constant 40 : index
    %89 = vector.load %arg15[%c0_187, %c0_188, %c40] : memref<16x16x50xf32, #tpu.memory_space<vmem>>, vector<16x16x2xf32>
    tpu.vector_store %arg15[%c0_187, %c0_188, %c40], %88 {strides = array<i32>} : memref<16x16x50xf32, #tpu.memory_space<vmem>>, vector<16x16x2xf32>,
    %c4_189 = arith.constant 4 : index
    %c1_190 = arith.constant 1 : index
    %c0_191 = arith.constant 0 : index
    %90 = vector.load %arg12[%c4_189, %c1_190, %c0_191] : memref<20x20x2xf32, #tpu.memory_space<vmem>>, vector<16x16x2xf32>
    %c0_192 = arith.constant 0 : index
    %c0_193 = arith.constant 0 : index
    %c42 = arith.constant 42 : index
    %91 = vector.load %arg15[%c0_192, %c0_193, %c42] : memref<16x16x50xf32, #tpu.memory_space<vmem>>, vector<16x16x2xf32>
    tpu.vector_store %arg15[%c0_192, %c0_193, %c42], %90 {strides = array<i32>} : memref<16x16x50xf32, #tpu.memory_space<vmem>>, vector<16x16x2xf32>,
    %c4_194 = arith.constant 4 : index
    %c2_195 = arith.constant 2 : index
    %c0_196 = arith.constant 0 : index
    %92 = vector.load %arg12[%c4_194, %c2_195, %c0_196] : memref<20x20x2xf32, #tpu.memory_space<vmem>>, vector<16x16x2xf32>
    %c0_197 = arith.constant 0 : index
    %c0_198 = arith.constant 0 : index
    %c44 = arith.constant 44 : index
    %93 = vector.load %arg15[%c0_197, %c0_198, %c44] : memref<16x16x50xf32, #tpu.memory_space<vmem>>, vector<16x16x2xf32>
    tpu.vector_store %arg15[%c0_197, %c0_198, %c44], %92 {strides = array<i32>} : memref<16x16x50xf32, #tpu.memory_space<vmem>>, vector<16x16x2xf32>,
    %c4_199 = arith.constant 4 : index
    %c3_200 = arith.constant 3 : index
    %c0_201 = arith.constant 0 : index
    %94 = vector.load %arg12[%c4_199, %c3_200, %c0_201] : memref<20x20x2xf32, #tpu.memory_space<vmem>>, vector<16x16x2xf32>
    %c0_202 = arith.constant 0 : index
    %c0_203 = arith.constant 0 : index
    %c46 = arith.constant 46 : index
    %95 = vector.load %arg15[%c0_202, %c0_203, %c46] : memref<16x16x50xf32, #tpu.memory_space<vmem>>, vector<16x16x2xf32>
    tpu.vector_store %arg15[%c0_202, %c0_203, %c46], %94 {strides = array<i32>} : memref<16x16x50xf32, #tpu.memory_space<vmem>>, vector<16x16x2xf32>,
    %c4_204 = arith.constant 4 : index
    %c4_205 = arith.constant 4 : index
    %c0_206 = arith.constant 0 : index
    %96 = vector.load %arg12[%c4_204, %c4_205, %c0_206] : memref<20x20x2xf32, #tpu.memory_space<vmem>>, vector<16x16x2xf32>
    %c0_207 = arith.constant 0 : index
    %c0_208 = arith.constant 0 : index
    %c48 = arith.constant 48 : index
    %97 = vector.load %arg15[%c0_207, %c0_208, %c48] : memref<16x16x50xf32, #tpu.memory_space<vmem>>, vector<16x16x2xf32>
    tpu.vector_store %arg15[%c0_207, %c0_208, %c48], %96 {strides = array<i32>} : memref<16x16x50xf32, #tpu.memory_space<vmem>>, vector<16x16x2xf32>,
    %c0_209 = arith.constant 0 : index
    %c0_210 = arith.constant 0 : index
    %c0_211 = arith.constant 0 : index
    %98 = vector.load %arg15[%c0_209, %c0_210, %c0_211] : memref<16x16x50xf32, #tpu.memory_space<vmem>>, vector<16x16x50xf32>
    %99 = vector.shape_cast %98 : vector<16x16x50xf32> to vector<256x50xf32>
    %c0_212 = arith.constant 0 : index
    %c0_213 = arith.constant 0 : index
    %100 = vector.load %arg6[%c0_212, %c0_213] : memref<50x4xf32, #tpu.memory_space<vmem>>, vector<50x4xf32>
    %cst_214 = arith.constant dense<0.000000e+00> : vector<256x4xf32>
    %101 = tpu.matmul %99, %100, %cst_214 {dimension_numbers = #tpu.dot_dimension_numbers<[1], [0], [0], [1], [0, 0, 1, 1], [], []>} : vector<256x50xf32>, vector<50x4xf32>, vector<256x4xf32> -> vector<256x4xf32>
    %c0_215 = arith.constant 0 : index
    %c0_216 = arith.constant 0 : index
    %102 = vector.load %arg7[%c0_215, %c0_216] : memref<1x4xf32, #tpu.memory_space<vmem>>, vector<1x4xf32>
    %103 = vector.broadcast %102 : vector<1x4xf32> to vector<256x4xf32>
    %104 = arith.addf %101, %103 : vector<256x4xf32>
    %cst_217 = arith.constant 0.000000e+00 : f32
    %105 = vector.broadcast %cst_217 : f32 to vector<256x4xf32>
    %106 = arith.maximumf %104, %105 : vector<256x4xf32>
    %cst_218 = arith.constant 0xFF800000 : f32
    %107 = vector.broadcast %cst_218 : f32 to vector<18x18x4xf32>
    %c0_219 = arith.constant 0 : index
    %c0_220 = arith.constant 0 : index
    %c0_221 = arith.constant 0 : index
    %108 = vector.load %arg13[%c0_219, %c0_220, %c0_221] : memref<18x18x4xf32, #tpu.memory_space<vmem>>, vector<18x18x4xf32>
    tpu.vector_store %arg13[%c0_219, %c0_220, %c0_221], %107 {strides = array<i32>} : memref<18x18x4xf32, #tpu.memory_space<vmem>>, vector<18x18x4xf32>,
    %c1_222 = arith.constant 1 : index
    %c1_223 = arith.constant 1 : index
    %c0_224 = arith.constant 0 : index
    %109 = vector.load %arg13[%c1_222, %c1_223, %c0_224] : memref<18x18x4xf32, #tpu.memory_space<vmem>>, vector<16x16x4xf32>
    tpu.vector_store %arg13[%c1_222, %c1_223, %c0_224], %1 {strides = array<i32>} : memref<18x18x4xf32, #tpu.memory_space<vmem>>, vector<16x16x4xf32>,
    %c0_225 = arith.constant 0 : index
    %c0_226 = arith.constant 0 : index
    %c0_227 = arith.constant 0 : index
    %110 = vector.load %arg13[%c0_225, %c0_226, %c0_227] : memref<18x18x4xf32, #tpu.memory_space<vmem>>, vector<16x16x4xf32>
    %c0_228 = arith.constant 0 : index
    %c1_229 = arith.constant 1 : index
    %c0_230 = arith.constant 0 : index
    %111 = vector.load %arg13[%c0_228, %c1_229, %c0_230] : memref<18x18x4xf32, #tpu.memory_space<vmem>>, vector<16x16x4xf32>
    %112 = arith.maximumf %110, %111 : vector<16x16x4xf32>
    %c0_231 = arith.constant 0 : index
    %c2_232 = arith.constant 2 : index
    %c0_233 = arith.constant 0 : index
    %113 = vector.load %arg13[%c0_231, %c2_232, %c0_233] : memref<18x18x4xf32, #tpu.memory_space<vmem>>, vector<16x16x4xf32>
    %114 = arith.maximumf %112, %113 : vector<16x16x4xf32>
    %c1_234 = arith.constant 1 : index
    %c0_235 = arith.constant 0 : index
    %c0_236 = arith.constant 0 : index
    %115 = vector.load %arg13[%c1_234, %c0_235, %c0_236] : memref<18x18x4xf32, #tpu.memory_space<vmem>>, vector<16x16x4xf32>
    %116 = arith.maximumf %114, %115 : vector<16x16x4xf32>
    %c1_237 = arith.constant 1 : index
    %c1_238 = arith.constant 1 : index
    %c0_239 = arith.constant 0 : index
    %117 = vector.load %arg13[%c1_237, %c1_238, %c0_239] : memref<18x18x4xf32, #tpu.memory_space<vmem>>, vector<16x16x4xf32>
    %118 = arith.maximumf %116, %117 : vector<16x16x4xf32>
    %c1_240 = arith.constant 1 : index
    %c2_241 = arith.constant 2 : index
    %c0_242 = arith.constant 0 : index
    %119 = vector.load %arg13[%c1_240, %c2_241, %c0_242] : memref<18x18x4xf32, #tpu.memory_space<vmem>>, vector<16x16x4xf32>
    %120 = arith.maximumf %118, %119 : vector<16x16x4xf32>
    %c2_243 = arith.constant 2 : index
    %c0_244 = arith.constant 0 : index
    %c0_245 = arith.constant 0 : index
    %121 = vector.load %arg13[%c2_243, %c0_244, %c0_245] : memref<18x18x4xf32, #tpu.memory_space<vmem>>, vector<16x16x4xf32>
    %122 = arith.maximumf %120, %121 : vector<16x16x4xf32>
    %c2_246 = arith.constant 2 : index
    %c1_247 = arith.constant 1 : index
    %c0_248 = arith.constant 0 : index
    %123 = vector.load %arg13[%c2_246, %c1_247, %c0_248] : memref<18x18x4xf32, #tpu.memory_space<vmem>>, vector<16x16x4xf32>
    %124 = arith.maximumf %122, %123 : vector<16x16x4xf32>
    %c2_249 = arith.constant 2 : index
    %c2_250 = arith.constant 2 : index
    %c0_251 = arith.constant 0 : index
    %125 = vector.load %arg13[%c2_249, %c2_250, %c0_251] : memref<18x18x4xf32, #tpu.memory_space<vmem>>, vector<16x16x4xf32>
    %126 = arith.maximumf %124, %125 : vector<16x16x4xf32>
    %127 = vector.shape_cast %126 : vector<16x16x4xf32> to vector<256x4xf32>
    %c0_252 = arith.constant 0 : index
    %c0_253 = arith.constant 0 : index
    %128 = vector.load %arg8[%c0_252, %c0_253] : memref<4x4xf32, #tpu.memory_space<vmem>>, vector<4x4xf32>
    %cst_254 = arith.constant dense<0.000000e+00> : vector<256x4xf32>
    %129 = tpu.matmul %127, %128, %cst_254 {dimension_numbers = #tpu.dot_dimension_numbers<[1], [0], [0], [1], [0, 0, 1, 1], [], []>} : vector<256x4xf32>, vector<4x4xf32>, vector<256x4xf32> -> vector<256x4xf32>
    %c0_255 = arith.constant 0 : index
    %c0_256 = arith.constant 0 : index
    %130 = vector.load %arg9[%c0_255, %c0_256] : memref<1x4xf32, #tpu.memory_space<vmem>>, vector<1x4xf32>
    %131 = vector.broadcast %130 : vector<1x4xf32> to vector<256x4xf32>
    %132 = arith.addf %129, %131 : vector<256x4xf32>
    %cst_257 = arith.constant 0.000000e+00 : f32
    %133 = vector.broadcast %cst_257 : f32 to vector<256x4xf32>
    %134 = arith.maximumf %132, %133 : vector<256x4xf32>
    %c0_258 = arith.constant 0 : index
    %c0_259 = arith.constant 0 : index
    %c0_260 = arith.constant 0 : index
    %135 = vector.load %arg10[%c0_258, %c0_259, %c0_260] : memref<1x256x20xf32, #tpu.memory_space<vmem>>, vector<1x256x4xf32>
    %136 = vector.shape_cast %135 : vector<1x256x4xf32> to vector<256x4xf32>
    %137 = vector.shape_cast %10 : vector<256x4xf32> to vector<1x256x4xf32>
    tpu.vector_store %arg10[%c0_258, %c0_259, %c0_260], %137 {strides = array<i32>} : memref<1x256x20xf32, #tpu.memory_space<vmem>>, vector<1x256x4xf32>,
    %c0_261 = arith.constant 0 : index
    %c0_262 = arith.constant 0 : index
    %c4_263 = arith.constant 4 : index
    %138 = vector.load %arg10[%c0_261, %c0_262, %c4_263] : memref<1x256x20xf32, #tpu.memory_space<vmem>>, vector<1x256x8xf32>
    %139 = vector.shape_cast %138 : vector<1x256x8xf32> to vector<256x8xf32>
    %140 = vector.shape_cast %44 : vector<256x8xf32> to vector<1x256x8xf32>
    tpu.vector_store %arg10[%c0_261, %c0_262, %c4_263], %140 {strides = array<i32>} : memref<1x256x20xf32, #tpu.memory_space<vmem>>, vector<1x256x8xf32>,
    %c0_264 = arith.constant 0 : index
    %c0_265 = arith.constant 0 : index
    %c12_266 = arith.constant 12 : index
    %141 = vector.load %arg10[%c0_264, %c0_265, %c12_266] : memref<1x256x20xf32, #tpu.memory_space<vmem>>, vector<1x256x4xf32>
    %142 = vector.shape_cast %141 : vector<1x256x4xf32> to vector<256x4xf32>
    %143 = vector.shape_cast %106 : vector<256x4xf32> to vector<1x256x4xf32>
    tpu.vector_store %arg10[%c0_264, %c0_265, %c12_266], %143 {strides = array<i32>} : memref<1x256x20xf32, #tpu.memory_space<vmem>>, vector<1x256x4xf32>,
    %c0_267 = arith.constant 0 : index
    %c0_268 = arith.constant 0 : index
    %c16_269 = arith.constant 16 : index
    %144 = vector.load %arg10[%c0_267, %c0_268, %c16_269] : memref<1x256x20xf32, #tpu.memory_space<vmem>>, vector<1x256x4xf32>
    %145 = vector.shape_cast %144 : vector<1x256x4xf32> to vector<256x4xf32>
    %146 = vector.shape_cast %134 : vector<256x4xf32> to vector<1x256x4xf32>
    tpu.vector_store %arg10[%c0_267, %c0_268, %c16_269], %146 {strides = array<i32>} : memref<1x256x20xf32, #tpu.memory_space<vmem>>, vector<1x256x4xf32>,
    return
  }
  func.func @transform_0(%arg0: i32) -> (i32, i32, i32, i32) {
    %c0_i32 = arith.constant 0 : i32
    %c0_i32_0 = arith.constant 0 : i32
    %c0_i32_1 = arith.constant 0 : i32
    %c0_i32_2 = arith.constant 0 : i32
    return %arg0, %c0_i32, %c0_i32_0, %c0_i32_1 : i32, i32, i32, i32
  }
  func.func @transform_1(%arg0: i32) -> (i32, i32) {
    %c0_i32 = arith.constant 0 : i32
    %c0_i32_0 = arith.constant 0 : i32
    %c0_i32_1 = arith.constant 0 : i32
    return %c0_i32, %c0_i32_0 : i32, i32
  }
  func.func @transform_2(%arg0: i32) -> (i32, i32) {
    %c0_i32 = arith.constant 0 : i32
    %c0_i32_0 = arith.constant 0 : i32
    %c0_i32_1 = arith.constant 0 : i32
    return %c0_i32, %c0_i32_0 : i32, i32
  }
  func.func @transform_3(%arg0: i32) -> (i32, i32) {
    %c0_i32 = arith.constant 0 : i32
    %c0_i32_0 = arith.constant 0 : i32
    %c0_i32_1 = arith.constant 0 : i32
    return %c0_i32, %c0_i32_0 : i32, i32
  }
  func.func @transform_4(%arg0: i32) -> (i32, i32) {
    %c0_i32 = arith.constant 0 : i32
    %c0_i32_0 = arith.constant 0 : i32
    %c0_i32_1 = arith.constant 0 : i32
    return %c0_i32, %c0_i32_0 : i32, i32
  }
  func.func @transform_5(%arg0: i32) -> (i32, i32) {
    %c0_i32 = arith.constant 0 : i32
    %c0_i32_0 = arith.constant 0 : i32
    %c0_i32_1 = arith.constant 0 : i32
    return %c0_i32, %c0_i32_0 : i32, i32
  }
  func.func @transform_6(%arg0: i32) -> (i32, i32) {
    %c0_i32 = arith.constant 0 : i32
    %c0_i32_0 = arith.constant 0 : i32
    %c0_i32_1 = arith.constant 0 : i32
    return %c0_i32, %c0_i32_0 : i32, i32
  }
  func.func @transform_7(%arg0: i32) -> (i32, i32) {
    %c0_i32 = arith.constant 0 : i32
    %c0_i32_0 = arith.constant 0 : i32
    %c0_i32_1 = arith.constant 0 : i32
    return %c0_i32, %c0_i32_0 : i32, i32
  }
  func.func @transform_8(%arg0: i32) -> (i32, i32) {
    %c0_i32 = arith.constant 0 : i32
    %c0_i32_0 = arith.constant 0 : i32
    %c0_i32_1 = arith.constant 0 : i32
    return %c0_i32, %c0_i32_0 : i32, i32
  }
  func.func @transform_9(%arg0: i32) -> (i32, i32, i32) {
    %c0_i32 = arith.constant 0 : i32
    %c0_i32_0 = arith.constant 0 : i32
    %c0_i32_1 = arith.constant 0 : i32
    return %arg0, %c0_i32, %c0_i32_0 : i32, i32, i32
  }
}

</mosaic_0001>

<bundles_post_ra>
// kernel: inception_forward.1
= control target key start
LH: loop header
LB: loop body
LE: loop exit
PB: predicated region body
PF: predicated region fallthrough
CT: control target
= control target key end

     0   :  { %14 = vsyncpa [#allocation8], 0  ;;  %s14921_s0 = inlined_call_operand.vmem [shape: f32[2,16,16,4], index: 0, kind: input, shape index: {}]   ;;  %s14922_s1 = inlined_call_operand.vmem [shape: f32[4,10], index: 1, kind: input, shape index: {}]   ;;  %s14923_s2 = inlined_call_operand.vmem [shape: f32[1,10], index: 2, kind: input, shape index: {}]   ;;  %s14924_s3 = inlined_call_operand.vmem [shape: f32[36,8], index: 3, kind: input, shape index: {}]   ;;  %s14925_s4 = inlined_call_operand.vmem [shape: f32[1,8], index: 4, kind: input, shape index: {}]   ;;  %s14926_s5 = inlined_call_operand.vmem [shape: f32[50,4], index: 5, kind: input, shape index: {}]   ;;  %s14927_s6 = inlined_call_operand.vmem [shape: f32[1,4], index: 6, kind: input, shape index: {}]   ;;  %s14928_s7 = inlined_call_operand.vmem [shape: f32[4,4], index: 7, kind: input, shape index: {}]   ;;  %s14929_s8 = inlined_call_operand.vmem [shape: f32[1,4], index: 8, kind: input, shape index: {}]   ;;  %s14930_s9 = inlined_call_operand.hbm [shape: f32[2,256,20], index: 9, kind: output, shape index: {}]  }
   0x1   :  { %16 = vsyncpa [#allocation8 + $0x1], 0  ;;  %s10561_s30 = smov 0   ;;  %s10563_s10 = smov 0  }
   0x2   :  { %s10565_s11 = smov 0   ;;  %s10567_s12 = smov 0  }
   0x3 LB: > { %s10582_s13 = sadd.s32 4294967295, %s10479_s12   ;;  %s9834_s14 = sadd.s32 4294967294, %s10479_s12   ;;  %s10479_s12 = sphi %s10567_s12, %s15014_s12   ;;  %s10475_s11 = sphi %s10565_s11, %s15013_s11   ;;  %s10471_s10 = sphi %s10563_s10, %s15012_s10   ;;  %s10467_s30 = sphi %s10561_s30, %s15011_s30  }
   0x4   : > { %s10586_s15 = sadd.s32 1, %s10479_s12   ;;  %s223_s16 = sadd.s32 1, %s10475_s11 }
   0x5   : > { %s220_s17 = ssub.s32 %s10479_s12, %s10586_s15  ;;  %p233_p0 = scmp.ne.s32.totalorder %s10475_s11, %s10471_s10 }
   0x6   : > { %p221_p1 = scmp.eq.s32.totalorder %s220_s17, 0  ;;  %p234_p2 = scmp.eq.s32.totalorder %s10582_s13, 1 }
   0x7   : > { %p239_p3 = scmp.ne.s32.totalorder %s10471_s10, %s10467_s30  ;;  %p240_p4 = scmp.eq.s32.totalorder %s9834_s14, 1 }
   0x8   : > { %s10597_s18 = scalar_select %p221_p1, %s10475_s11, %s223_s16  }
   0x9   : > { %p10599_p5 = por %p234_p2, %p233_p0  ;;  %p10603_p6 = por %p240_p4, %p239_p3 }
   0xa   : > { %p9837_p7 = scmp.ge.s32.totalorder %s10479_s12, 1  ;;  %p290_p8 = scmp.lt.s32.totalorder %s10479_s12, 3 }
   0xc   : > { %p291_p9 = pnand %p9837_p7, %p290_p8 }
   0xe   : > { %294 = sbr.rel (%p291_p9) target bundleno = 3019 (0xbcb), region = 56 }
  0x13   : > { %v363_v0 = vld [vmem:[%s14922_s1] sm:$0xf]  ;;  %vm468_vm0 = vcmask 1043456   ;;  %p326_p10 = scmp.lt.s32.totalorder %s10582_s13, 1  ;;  %vm371_vm1 = vcmask 31744   ;;  %v10481_v1 = vmov -inf  }
  0x14   : > { %10126 = vmatprep.subr.msk.mxu0 %vm468_vm0, %v363_v0  ;;  %8252 = vst.msk [vmem:[#allocation4 + $0x18] sm:$0xff] %vm371_vm1, %v10481_v1  ;;  %8253 = vst.msk [vmem:[#allocation4 + $0x20] sm:$0xff] %vm371_vm1, %v10481_v1  ;;  %vm731_vm2 = vcmask 25600   ;;  %v14931_v2 = vmov 0.0   ;;  %s10483_s28 = smov 4   ;;  %s14955_s29 = smov 8  }
  0x15   : > { %8249 = vst.msk [vmem:[#allocation4] sm:$0xff] %vm371_vm1, %v10481_v1  ;;  %8250 = vst.msk [vmem:[#allocation4 + $0x8] sm:$0xff] %vm371_vm1, %v10481_v1  ;;  %10127 = vmatpush3.msk.msra.mxu0 %vm468_vm0, %v363_v0  ;;  %s10654_s23 = scalar_select %p326_p10, %s10582_s13, 1  ;;  %vm1169_vm3 = vcmask 64544   ;;  %vm1362_vm4 = vcmask 97344   ;;  %vm1555_vm5 = vcmask 130144  }
  0x16   : > { %8255 = vst.msk [vmem:[#allocation4 + $0x30] sm:$0xff] %vm371_vm1, %v10481_v1  ;;  %8256 = vst.msk [vmem:[#allocation4 + $0x38] sm:$0xff] %vm371_vm1, %v10481_v1  ;;  %s14954_s14 = sand.u32 1, %s10471_s10   ;;  %v10896_v44 = vld [vmem:[%s14923_s2] ss:$0 sm:$0xff]  ;;  %s10487_s25 = smov 20  }
  0x17   : > { %8258 = vst.msk [vmem:[#allocation4 + $0x48] sm:$0xff] %vm371_vm1, %v10481_v1  ;;  %8259 = vst.msk [vmem:[#allocation4 + $0x50] sm:$0xff] %vm371_vm1, %v10481_v1  ;;  %s9982_s24 = sshll.u32 %s10654_s23, 8  ;;  %s9838_s21 = sshll.u32 %s14954_s14, 8  ;;  %vm1748_vm6 = vcmask 162944   ;;  %vm1941_vm7 = vcmask 195744  }
  0x18   : > { %8261 = vst.msk [vmem:[#allocation4 + $0x60] sm:$0xff] %vm371_vm1, %v10481_v1  ;;  %8262 = vst.msk [vmem:[#allocation4 + $0x68] sm:$0xff] %vm371_vm1, %v10481_v1  ;;  %s10786_s27 = scalar_lea.vmem %s14921_s0, %s9982_s24  ;;  %s10906_s22 = scalar_lea.vmem [#allocation7], %s9838_s21  ;;  %vm2135_vm8 = vcmask 228544   ;;  %vm2955_vm9 = vcmask 15360   ;;  %vm2958_vm10 = vcmask 11264  }
  0x19   : > { %8264 = vst.msk [vmem:[#allocation4 + $0x78] sm:$0xff] %vm371_vm1, %v10481_v1  ;;  %8265 = vst.msk [vmem:[#allocation4 + $0x80] sm:$0xff] %vm371_vm1, %v10481_v1  ;;  %v331_v3 = vld [vmem:[%s10786_s27] sm:$0xff]  ;;  %v332_v4 = vld [vmem:[%s10786_s27 + $0x8] sm:$0xff]  ;;  %s10485_s23 = smov 124   ;;  %s10486_s24 = smov 16  }
  0x1a   : > { %8267 = vst.msk [vmem:[#allocation4 + $0x90] sm:$0xff] %vm371_vm1, %v10481_v1  ;;  %8268 = vst.msk [vmem:[#allocation4 + $0x98] sm:$0xff] %vm371_vm1, %v10481_v1  ;;  %v333_v5 = vld [vmem:[%s10786_s27 + $0x10] sm:$0xff]  ;;  %10128 = vmatprep.mubr.msk.f32.mxu0 %vm371_vm1, %v331_v3  ;;  %v334_v6 = vld [vmem:[%s10786_s27 + $0x18] sm:$0xff]  ;;  %s10488_s26 = smov 12   ;;  %s10490_s16 = smov 28  }
  0x1b   : > { %8270 = vst.msk [vmem:[#allocation4 + $0xa8] sm:$0xff] %vm371_vm1, %v10481_v1  ;;  %8271 = vst.msk [vmem:[#allocation4 + $0xb0] sm:$0xff] %vm371_vm1, %v10481_v1  ;;  %v335_v7 = vld [vmem:[%s10786_s27 + $0x20] sm:$0xff]  ;;  %v336_v8 = vld [vmem:[%s10786_s27 + $0x28] sm:$0xff]  ;;  %10129 = vmatmul.mubr.msk.f32.vlgmr.msra.gmra.mxu0 %vm371_vm1, %v332_v4  ;;  %s10491_s14 = smov 32   ;;  %vm2328_vm11 = vcmask 261344  }
  0x1c   : > { %8273 = vst.msk [vmem:[#allocation4 + $0xc0] sm:$0xff] %vm371_vm1, %v10481_v1  ;;  %8274 = vst.msk [vmem:[#allocation4 + $0xc8] sm:$0xff] %vm371_vm1, %v10481_v1  ;;  %v337_v9 = vld [vmem:[%s10786_s27 + $0x30] sm:$0xff]  ;;  %v338_v10 = vld [vmem:[%s10786_s27 + $0x38] sm:$0xff]  ;;  %10131 = vmatprep.mubr.msk.f32.mxu0 %vm371_vm1, %v333_v5  ;;  %vm2521_vm12 = vcmask 294144   ;;  %vm2598_vm13 = vcmask 293888  }
  0x1d   : > { %8276 = vst.msk [vmem:[#allocation4 + $0xd8] sm:$0xff] %vm371_vm1, %v10481_v1  ;;  %8277 = vst.msk [vmem:[#allocation4 + $0xe0] sm:$0xff] %vm371_vm1, %v10481_v1  ;;  %v339_v11 = vld [vmem:[%s10786_s27 + $0x40] sm:$0xff]  ;;  %v340_v12 = vld [vmem:[%s10786_s27 + $0x48] sm:$0xff]  ;;  %s10493_s17 = smov 2   ;;  %vm3370_vm14 = vcmask 31760  }
  0x1e   : > { %8279 = vst.msk [vmem:[#allocation4 + $0xf0] sm:$0xff] %vm371_vm1, %v10481_v1  ;;  %8280 = vst.msk [vmem:[#allocation4 + $0xf8] sm:$0xff] %vm371_vm1, %v10481_v1  ;;  %v341_v13 = vld [vmem:[%s10786_s27 + $0x50] sm:$0xff]  ;;  %v342_v14 = vld [vmem:[%s10786_s27 + $0x58] sm:$0xff]  ;;  %s10494_s21 = smov 6   ;;  %vm3563_vm15 = vcmask 48160  }
  0x1f   : > { %8282 = vst.msk [vmem:[#allocation4 + $0x108] sm:$0xff] %vm371_vm1, %v10481_v1  ;;  %8283 = vst.msk [vmem:[#allocation4 + $0x110] sm:$0xff] %vm371_vm1, %v10481_v1  ;;  %v343_v15 = vld [vmem:[%s10786_s27 + $0x60] sm:$0xff]  ;;  %v344_v16 = vld [vmem:[%s10786_s27 + $0x68] sm:$0xff]  ;;  %10132 = vmatmul.mubr.msk.f32.gmra.mxu0 %vm371_vm1, %v334_v6 }
  0x20   : > { %8285 = vst.msk [vmem:[#allocation4 + $0x120] sm:$0xff] %vm371_vm1, %v10481_v1  ;;  %8286 = vst.msk [vmem:[#allocation4 + $0x128] sm:$0xff] %vm371_vm1, %v10481_v1  ;;  %v345_v17 = vld [vmem:[%s10786_s27 + $0x70] sm:$0xff]  ;;  %v346_v18 = vld [vmem:[%s10786_s27 + $0x78] sm:$0xff]  ;;  %10134 = vmatprep.mubr.msk.f32.mxu0 %vm371_vm1, %v335_v7 }
  0x21   : > { %8288 = vst.msk [vmem:[#allocation4 + $0x138] sm:$0xff] %vm371_vm1, %v10481_v1  ;;  %8289 = vst.msk [vmem:[#allocation4 + $0x140] sm:$0xff] %vm371_vm1, %v10481_v1  ;;  %v347_v19 = vld [vmem:[%s10786_s27 + $0x80] sm:$0xff]  ;;  %v348_v20 = vld [vmem:[%s10786_s27 + $0x88] sm:$0xff] }
  0x22   : > { %8291 = vst.msk [vmem:[#allocation4 + $0x150] sm:$0xff] %vm371_vm1, %v10481_v1  ;;  %8292 = vst.msk [vmem:[#allocation4 + $0x158] sm:$0xff] %vm371_vm1, %v10481_v1  ;;  %v349_v21 = vld [vmem:[%s10786_s27 + $0x90] sm:$0xff]  ;;  %v350_v22 = vld [vmem:[%s10786_s27 + $0x98] sm:$0xff] }
  0x23   : > { %8294 = vst.msk [vmem:[#allocation4 + $0x168] sm:$0xff] %vm371_vm1, %v10481_v1  ;;  %8295 = vst.msk [vmem:[#allocation4 + $0x170] sm:$0xff] %vm371_vm1, %v10481_v1  ;;  %v351_v23 = vld [vmem:[%s10786_s27 + $0xa0] sm:$0xff]  ;;  %v352_v24 = vld [vmem:[%s10786_s27 + $0xa8] sm:$0xff]  ;;  %10135 = vmatmul.mubr.msk.f32.gmra.mxu0 %vm371_vm1, %v336_v8 }
  0x24   : > { %8297 = vst.msk [vmem:[#allocation4 + $0x180] sm:$0xff] %vm371_vm1, %v10481_v1  ;;  %8298 = vst.msk [vmem:[#allocation4 + $0x188] sm:$0xff] %vm371_vm1, %v10481_v1  ;;  %v353_v25 = vld [vmem:[%s10786_s27 + $0xb0] sm:$0xff]  ;;  %v354_v26 = vld [vmem:[%s10786_s27 + $0xb8] sm:$0xff]  ;;  %10137 = vmatprep.mubr.msk.f32.mxu0 %vm371_vm1, %v337_v9 }
  0x25   : > { %8300 = vst.msk [vmem:[#allocation4 + $0x198] sm:$0xff] %vm371_vm1, %v10481_v1  ;;  %8301 = vst.msk [vmem:[#allocation4 + $0x1a0] sm:$0xff] %vm371_vm1, %v10481_v1  ;;  %v355_v27 = vld [vmem:[%s10786_s27 + $0xc0] sm:$0xff]  ;;  %v356_v28 = vld [vmem:[%s10786_s27 + $0xc8] sm:$0xff] }
  0x26   : > { %8254 = vst.msk [vmem:[#allocation4 + $0x28] sm:$0x3] %vm731_vm2, %v10481_v1  ;;  %8251 = vst.msk [vmem:[#allocation4 + $0x10] sm:$0x3] %vm731_vm2, %v10481_v1  ;;  %v357_v29 = vld [vmem:[%s10786_s27 + $0xd0] sm:$0xff]  ;;  %v358_v30 = vld [vmem:[%s10786_s27 + $0xd8] sm:$0xff] }
  0x27   : > { %8257 = vst.msk [vmem:[#allocation4 + $0x40] sm:$0x3] %vm731_vm2, %v10481_v1  ;;  %8260 = vst.msk [vmem:[#allocation4 + $0x58] sm:$0x3] %vm731_vm2, %v10481_v1  ;;  %v359_v31 = vld [vmem:[%s10786_s27 + $0xe0] sm:$0xff]  ;;  %v360_v32 = vld [vmem:[%s10786_s27 + $0xe8] sm:$0xff]  ;;  %10138 = vmatmul.mubr.msk.f32.gmra.mxu0 %vm371_vm1, %v338_v10 }
  0x28   : > { %8263 = vst.msk [vmem:[#allocation4 + $0x70] sm:$0x3] %vm731_vm2, %v10481_v1  ;;  %8266 = vst.msk [vmem:[#allocation4 + $0x88] sm:$0x3] %vm731_vm2, %v10481_v1  ;;  %v361_v33 = vld [vmem:[%s10786_s27 + $0xf0] sm:$0xff]  ;;  %v362_v34 = vld [vmem:[%s10786_s27 + $0xf8] sm:$0xff]  ;;  %10140 = vmatprep.mubr.msk.f32.mxu0 %vm371_vm1, %v339_v11 }
  0x29   : > { %8269 = vst.msk [vmem:[#allocation4 + $0xa0] sm:$0x3] %vm731_vm2, %v10481_v1  ;;  %8272 = vst.msk [vmem:[#allocation4 + $0xb8] sm:$0x3] %vm731_vm2, %v10481_v1  ;;  %s10489_s27 = smov 24  }
  0x2a   : > { %8275 = vst.msk [vmem:[#allocation4 + $0xd0] sm:$0x3] %vm731_vm2, %v10481_v1  ;;  %8278 = vst.msk [vmem:[#allocation4 + $0xe8] sm:$0x3] %vm731_vm2, %v10481_v1 }
  0x2b   : > { %8281 = vst.msk [vmem:[#allocation4 + $0x100] sm:$0x3] %vm731_vm2, %v10481_v1  ;;  %8284 = vst.msk [vmem:[#allocation4 + $0x118] sm:$0x3] %vm731_vm2, %v10481_v1  ;;  %10141 = vmatmul.mubr.msk.f32.gmra.mxu0 %vm371_vm1, %v340_v12 }
  0x2c   : > { %8287 = vst.msk [vmem:[#allocation4 + $0x130] sm:$0x3] %vm731_vm2, %v10481_v1  ;;  %8290 = vst.msk [vmem:[#allocation4 + $0x148] sm:$0x3] %vm731_vm2, %v10481_v1  ;;  %10143 = vmatprep.mubr.msk.f32.mxu0 %vm371_vm1, %v341_v13 }
  0x2d   : > { %8293 = vst.msk [vmem:[#allocation4 + $0x160] sm:$0x3] %vm731_vm2, %v10481_v1  ;;  %8296 = vst.msk [vmem:[#allocation4 + $0x178] sm:$0x3] %vm731_vm2, %v10481_v1 }
  0x2e   : > { %8299 = vst.msk [vmem:[#allocation4 + $0x190] sm:$0x3] %vm731_vm2, %v10481_v1  ;;  %8302 = vst.msk [vmem:[#allocation4 + $0x1a8] sm:$0x3] %vm731_vm2, %v10481_v1 }
  0x2f   : > { %729 = vst.msk [vmem:[#allocation2] sm:$0xff] %vm371_vm1, %v14931_v2  ;;  %730 = vst.msk [vmem:[#allocation2 + $0x8] sm:$0xff] %vm371_vm1, %v14931_v2  ;;  %10144 = vmatmul.mubr.msk.f32.gmra.mxu0 %vm371_vm1, %v342_v14 }
  0x30   : > { %732 = vst.msk [vmem:[#allocation2 + $0x10] sm:$0x3] %vm731_vm2, %v14931_v2  ;;  %735 = vst.msk [vmem:[#allocation2 + $0x28] sm:$0x3] %vm731_vm2, %v14931_v2  ;;  %10146 = vmatprep.mubr.msk.f32.mxu0 %vm371_vm1, %v343_v15 }
  0x31   : > { %733 = vst.msk [vmem:[#allocation2 + $0x18] sm:$0xff] %vm371_vm1, %v14931_v2  ;;  %734 = vst.msk [vmem:[#allocation2 + $0x20] sm:$0xff] %vm371_vm1, %v14931_v2 }
  0x32   : > { %736 = vst.msk [vmem:[#allocation2 + $0x30] sm:$0xff] %vm371_vm1, %v14931_v2  ;;  %737 = vst.msk [vmem:[#allocation2 + $0x38] sm:$0xff] %vm371_vm1, %v14931_v2 }
  0x33   : > { %738 = vst.msk [vmem:[#allocation2 + $0x40] sm:$0x3] %vm731_vm2, %v14931_v2  ;;  %741 = vst.msk [vmem:[#allocation2 + $0x58] sm:$0x3] %vm731_vm2, %v14931_v2  ;;  %10147 = vmatmul.mubr.msk.f32.gmra.mxu0 %vm371_vm1, %v344_v16 }
  0x34   : > { %739 = vst.msk [vmem:[#allocation2 + $0x48] sm:$0xff] %vm371_vm1, %v14931_v2  ;;  %740 = vst.msk [vmem:[#allocation2 + $0x50] sm:$0xff] %vm371_vm1, %v14931_v2  ;;  %10149 = vmatprep.mubr.msk.f32.mxu0 %vm371_vm1, %v345_v17 }
  0x35   : > { %742 = vst.msk [vmem:[#allocation2 + $0x60] sm:$0xff] %vm371_vm1, %v14931_v2  ;;  %743 = vst.msk [vmem:[#allocation2 + $0x68] sm:$0xff] %vm371_vm1, %v14931_v2 }
  0x36   : > { %744 = vst.msk [vmem:[#allocation2 + $0x70] sm:$0x3] %vm731_vm2, %v14931_v2  ;;  %747 = vst.msk [vmem:[#allocation2 + $0x88] sm:$0x3] %vm731_vm2, %v14931_v2  ;;  %v1009_v35 = vld [vmem:[#allocation2 + $0x1] sm:$0xff] }
  0x37   : > { %745 = vst.msk [vmem:[#allocation2 + $0x78] sm:$0xff] %vm371_vm1, %v14931_v2  ;;  %746 = vst.msk [vmem:[#allocation2 + $0x80] sm:$0xff] %vm371_vm1, %v14931_v2  ;;  %1073 = vrot.lane.b32.xlu0 %v1009_v35, %s10483_s28  ;;  %10150 = vmatmul.mubr.msk.f32.gmra.mxu0 %vm371_vm1, %v346_v18  ;;  %v1202_v36 = vld [vmem:[#allocation2 + $0x2] sm:$0xff]  ;;  %v1203_v38 = vld [vmem:[#allocation2 + $0xa] sm:$0xff] }
  0x38   : > { %748 = vst.msk [vmem:[#allocation2 + $0x90] sm:$0xff] %vm371_vm1, %v14931_v2  ;;  %749 = vst.msk [vmem:[#allocation2 + $0x98] sm:$0xff] %vm371_vm1, %v14931_v2  ;;  %10152 = vmatprep.mubr.msk.f32.mxu0 %vm371_vm1, %v347_v19  ;;  %v1010_v37 = vld [vmem:[#allocation2 + $0x9] sm:$0xff]  ;;  %v945_v39 = vld [vmem:[#allocation2] sm:$0xff] }
  0x39   : > { %750 = vst.msk [vmem:[#allocation2 + $0xa0] sm:$0x3] %vm731_vm2, %v14931_v2  ;;  %753 = vst.msk [vmem:[#allocation2 + $0xb8] sm:$0x3] %vm731_vm2, %v14931_v2  ;;  %1075 = vrot.lane.b32.xlu1 %v1010_v37, %s10483_s28  ;;  %v946_v43 = vld [vmem:[#allocation2 + $0x8] sm:$0xff] }
  0x3a   : > { %751 = vst.msk [vmem:[#allocation2 + $0xa8] sm:$0xff] %vm371_vm1, %v14931_v2  ;;  %752 = vst.msk [vmem:[#allocation2 + $0xb0] sm:$0xff] %vm371_vm1, %v14931_v2 }
  0x3b   : > { %754 = vst.msk [vmem:[#allocation2 + $0xc0] sm:$0xff] %vm371_vm1, %v14931_v2  ;;  %755 = vst.msk [vmem:[#allocation2 + $0xc8] sm:$0xff] %vm371_vm1, %v14931_v2  ;;  %10153 = vmatmul.mubr.msk.f32.gmra.mxu0 %vm371_vm1, %v348_v20  ;;  %1266 = vrot.lane.b32.xlu0 %v1202_v36, %s14955_s29 }
  0x3c   : > { %756 = vst.msk [vmem:[#allocation2 + $0xd0] sm:$0x3] %vm731_vm2, %v14931_v2  ;;  %759 = vst.msk [vmem:[#allocation2 + $0xe8] sm:$0x3] %vm731_vm2, %v14931_v2  ;;  %10155 = vmatprep.mubr.msk.f32.mxu0 %vm371_vm1, %v349_v21 }
  0x3d   : > { %757 = vst.msk [vmem:[#allocation2 + $0xd8] sm:$0xff] %vm371_vm1, %v14931_v2  ;;  %758 = vst.msk [vmem:[#allocation2 + $0xe0] sm:$0xff] %vm371_vm1, %v14931_v2  ;;  %1268 = vrot.lane.b32.xlu1 %v1203_v38, %s14955_s29 }
  0x3e   : > { %760 = vst.msk [vmem:[#allocation2 + $0xf0] sm:$0xff] %vm371_vm1, %v14931_v2  ;;  %761 = vst.msk [vmem:[#allocation2 + $0xf8] sm:$0xff] %vm371_vm1, %v14931_v2 }
  0x3f   : > { %762 = vst.msk [vmem:[#allocation2 + $0x100] sm:$0x3] %vm731_vm2, %v14931_v2  ;;  %765 = vst.msk [vmem:[#allocation2 + $0x118] sm:$0x3] %vm731_vm2, %v14931_v2  ;;  %10156 = vmatmul.mubr.msk.f32.gmra.mxu0 %vm371_vm1, %v350_v22 }
  0x40   : > { %763 = vst.msk [vmem:[#allocation2 + $0x108] sm:$0xff] %vm371_vm1, %v14931_v2  ;;  %764 = vst.msk [vmem:[#allocation2 + $0x110] sm:$0xff] %vm371_vm1, %v14931_v2  ;;  %10158 = vmatprep.mubr.msk.f32.mxu0 %vm371_vm1, %v351_v23 }
  0x41   : > { %766 = vst.msk [vmem:[#allocation2 + $0x120] sm:$0xff] %vm371_vm1, %v14931_v2  ;;  %767 = vst.msk [vmem:[#allocation2 + $0x128] sm:$0xff] %vm371_vm1, %v14931_v2 }
  0x42   : > { %768 = vst.msk [vmem:[#allocation2 + $0x130] sm:$0x3] %vm731_vm2, %v14931_v2  ;;  %771 = vst.msk [vmem:[#allocation2 + $0x148] sm:$0x3] %vm731_vm2, %v14931_v2 }
  0x43   : > { %769 = vst.msk [vmem:[#allocation2 + $0x138] sm:$0xff] %vm371_vm1, %v14931_v2  ;;  %770 = vst.msk [vmem:[#allocation2 + $0x140] sm:$0xff] %vm371_vm1, %v14931_v2  ;;  %10159 = vmatmul.mubr.msk.f32.gmra.mxu0 %vm371_vm1, %v352_v24 }
  0x44   : > { %772 = vst.msk [vmem:[#allocation2 + $0x150] sm:$0xff] %vm371_vm1, %v14931_v2  ;;  %773 = vst.msk [vmem:[#allocation2 + $0x158] sm:$0xff] %vm371_vm1, %v14931_v2  ;;  %10161 = vmatprep.mubr.msk.f32.mxu0 %vm371_vm1, %v353_v25 }
  0x45   : > { %774 = vst.msk [vmem:[#allocation2 + $0x160] sm:$0x3] %vm731_vm2, %v14931_v2  ;;  %777 = vst.msk [vmem:[#allocation2 + $0x178] sm:$0x3] %vm731_vm2, %v14931_v2 }
  0x46   : > { %775 = vst.msk [vmem:[#allocation2 + $0x168] sm:$0xff] %vm371_vm1, %v14931_v2  ;;  %776 = vst.msk [vmem:[#allocation2 + $0x170] sm:$0xff] %vm371_vm1, %v14931_v2 }
  0x47   : > { %778 = vst.msk [vmem:[#allocation2 + $0x180] sm:$0xff] %vm371_vm1, %v14931_v2  ;;  %779 = vst.msk [vmem:[#allocation2 + $0x188] sm:$0xff] %vm371_vm1, %v14931_v2  ;;  %10162 = vmatmul.mubr.msk.f32.gmra.mxu0 %vm371_vm1, %v354_v26 }
  0x48   : > { %780 = vst.msk [vmem:[#allocation2 + $0x190] sm:$0x3] %vm731_vm2, %v14931_v2  ;;  %783 = vst.msk [vmem:[#allocation2 + $0x1a8] sm:$0x3] %vm731_vm2, %v14931_v2  ;;  %10164 = vmatprep.mubr.msk.f32.mxu0 %vm371_vm1, %v355_v27  ;;  %vm3756_vm2 = vcmask 64560  }
  0x49   : > { %781 = vst.msk [vmem:[#allocation2 + $0x198] sm:$0xff] %vm371_vm1, %v14931_v2  ;;  %782 = vst.msk [vmem:[#allocation2 + $0x1a0] sm:$0xff] %vm371_vm1, %v14931_v2 }
  0x4a   : > { %8304 = vst.msk [vmem:[#allocation4 + $0x19] sm:$0xff] %vm371_vm1, %v331_v3  ;;  %8305 = vst.msk [vmem:[#allocation4 + $0x21] sm:$0xff] %vm371_vm1, %v332_v4 }
  0x4b   : > { %8306 = vst.msk [vmem:[#allocation4 + $0x31] sm:$0xff] %vm371_vm1, %v333_v5  ;;  %8307 = vst.msk [vmem:[#allocation4 + $0x39] sm:$0xff] %vm371_vm1, %v334_v6  ;;  %10165 = vmatmul.mubr.msk.f32.gmra.mxu0 %vm371_vm1, %v356_v28 }
  0x4c   : > { %8308 = vst.msk [vmem:[#allocation4 + $0x49] sm:$0xff] %vm371_vm1, %v335_v7  ;;  %8309 = vst.msk [vmem:[#allocation4 + $0x51] sm:$0xff] %vm371_vm1, %v336_v8  ;;  %10167 = vmatprep.mubr.msk.f32.mxu0 %vm371_vm1, %v357_v29 }
  0x4d   : > { %8310 = vst.msk [vmem:[#allocation4 + $0x61] sm:$0xff] %vm371_vm1, %v337_v9  ;;  %8311 = vst.msk [vmem:[#allocation4 + $0x69] sm:$0xff] %vm371_vm1, %v338_v10 }
  0x4e   : > { %8312 = vst.msk [vmem:[#allocation4 + $0x79] sm:$0xff] %vm371_vm1, %v339_v11  ;;  %8313 = vst.msk [vmem:[#allocation4 + $0x81] sm:$0xff] %vm371_vm1, %v340_v12 }
  0x4f   : > { %8314 = vst.msk [vmem:[#allocation4 + $0x91] sm:$0xff] %vm371_vm1, %v341_v13  ;;  %8315 = vst.msk [vmem:[#allocation4 + $0x99] sm:$0xff] %vm371_vm1, %v342_v14  ;;  %10168 = vmatmul.mubr.msk.f32.gmra.mxu0 %vm371_vm1, %v358_v30 }
  0x50   : > { %8316 = vst.msk [vmem:[#allocation4 + $0xa9] sm:$0xff] %vm371_vm1, %v343_v15  ;;  %8317 = vst.msk [vmem:[#allocation4 + $0xb1] sm:$0xff] %vm371_vm1, %v344_v16  ;;  %10170 = vmatprep.mubr.msk.f32.mxu0 %vm371_vm1, %v359_v31 }
  0x51   : > { %8318 = vst.msk [vmem:[#allocation4 + $0xc1] sm:$0xff] %vm371_vm1, %v345_v17  ;;  %8319 = vst.msk [vmem:[#allocation4 + $0xc9] sm:$0xff] %vm371_vm1, %v346_v18 }
  0x52   : > { %8320 = vst.msk [vmem:[#allocation4 + $0xd9] sm:$0xff] %vm371_vm1, %v347_v19  ;;  %8321 = vst.msk [vmem:[#allocation4 + $0xe1] sm:$0xff] %vm371_vm1, %v348_v20 }
  0x53   : > { %8322 = vst.msk [vmem:[#allocation4 + $0xf1] sm:$0xff] %vm371_vm1, %v349_v21  ;;  %8323 = vst.msk [vmem:[#allocation4 + $0xf9] sm:$0xff] %vm371_vm1, %v350_v22  ;;  %10171 = vmatmul.mubr.msk.f32.gmra.mxu0 %vm371_vm1, %v360_v32 }
  0x54   : > { %8324 = vst.msk [vmem:[#allocation4 + $0x109] sm:$0xff] %vm371_vm1, %v351_v23  ;;  %8325 = vst.msk [vmem:[#allocation4 + $0x111] sm:$0xff] %vm371_vm1, %v352_v24  ;;  %10173 = vmatprep.mubr.msk.f32.mxu0 %vm371_vm1, %v361_v33 }
  0x55   : > { %8326 = vst.msk [vmem:[#allocation4 + $0x121] sm:$0xff] %vm371_vm1, %v353_v25  ;;  %8327 = vst.msk [vmem:[#allocation4 + $0x129] sm:$0xff] %vm371_vm1, %v354_v26 }
  0x56   : > { %8328 = vst.msk [vmem:[#allocation4 + $0x139] sm:$0xff] %vm371_vm1, %v355_v27  ;;  %8329 = vst.msk [vmem:[#allocation4 + $0x141] sm:$0xff] %vm371_vm1, %v356_v28 }
  0x57   : > { %8330 = vst.msk [vmem:[#allocation4 + $0x151] sm:$0xff] %vm371_vm1, %v357_v29  ;;  %8331 = vst.msk [vmem:[#allocation4 + $0x159] sm:$0xff] %vm371_vm1, %v358_v30  ;;  %10174 = vmatmul.mubr.msk.f32.gmra.mxu0 %vm371_vm1, %v362_v34 }
  0x58   : > { %8332 = vst.msk [vmem:[#allocation4 + $0x169] sm:$0xff] %vm371_vm1, %v359_v31  ;;  %8333 = vst.msk [vmem:[#allocation4 + $0x171] sm:$0xff] %vm371_vm1, %v360_v32 }
  0x59   : > { %8334 = vst.msk [vmem:[#allocation4 + $0x181] sm:$0xff] %vm371_vm1, %v361_v33  ;;  %8335 = vst.msk [vmem:[#allocation4 + $0x189] sm:$0xff] %vm371_vm1, %v362_v34 }
  0x5a   : > { %977 = vst.msk [vmem:[#allocation5] sm:$0xff] %vm371_vm1, %v945_v39  ;;  %978 = vst.msk [vmem:[#allocation5 + $0x8] sm:$0xff] %vm371_vm1, %v946_v43 }
  0xa9   : > { %v1074_v40 = vpop.permute.xlu0 %1073 }
  0xaa   : > { %1170 = vst.msk [vmem:[#allocation5] sm:$0xff] %vm1169_vm3, %v1074_v40 }
  0xab   : > { %v1076_v42 = vpop.permute.xlu1 %1075 }
  0xac   : > { %1171 = vst.msk [vmem:[#allocation5 + $0x8] sm:$0xff] %vm1169_vm3, %v1076_v42 }
  0xad   : > { %v1267_v41 = vpop.permute.xlu0 %1266 }
  0xae   : > { %1363 = vst.msk [vmem:[#allocation5] sm:$0xff] %vm1362_vm4, %v1267_v41 }
  0xaf   : > { %v1269_v46 = vpop.permute.xlu1 %1268 }
  0xb0   : > { %1364 = vst.msk [vmem:[#allocation5 + $0x8] sm:$0xff] %vm1362_vm4, %v1269_v46 }
  0xdb   : > { %v10130_v45 = vpop.f32.mrf.mxu0 }
  0xdc   : > { %v544_v47 = vadd.f32 %v10130_v45, %v10896_v44 }
  0xdd   : > { %v538_v48 = vpop.f32.mrf.mxu0 }
  0xde   : > { %v10903_v49 = vmax.f32 %v544_v47, 0.0  ;;  %v539_v50 = vadd.f32 %v10896_v44, %v538_v48 }
  0xdf   : > { %v10133_v51 = vpop.f32.mrf.mxu0 }
  0xe0   : > { %9246 = vst.msk [vmem:[%s10906_s22 + $0x8] sm:$0xff] %vm371_vm1, %v10903_v49  ;;  %v10911_v52 = vmax.f32 %v539_v50, 0.0  ;;  %818 = vrot.lane.b32.xlu0 %v10903_v49, %s10485_s23  ;;  %v554_v53 = vadd.f32 %v10133_v51, %v10896_v44 }
  0xe1   : > { %v548_v54 = vpop.f32.mrf.mxu0 }
  0xe2   : > { %9245 = vst.msk [vmem:[%s10906_s22] sm:$0xff] %vm371_vm1, %v10911_v52  ;;  %v10919_v55 = vmax.f32 %v554_v53, 0.0  ;;  %v549_v56 = vadd.f32 %v10896_v44, %v548_v54 }
  0xe3   : > { %v10136_v57 = vpop.f32.mrf.mxu0 }
  0xe4   : > { %816 = vrot.lane.b32.xlu0 %v10911_v52, %s10485_s23  ;;  %9248 = vst.msk [vmem:[%s10906_s22 + $0x18] sm:$0xff] %vm371_vm1, %v10919_v55  ;;  %v10927_v58 = vmax.f32 %v549_v56, 0.0  ;;  %822 = vrot.lane.b32.xlu1 %v10919_v55, %s10485_s23  ;;  %v564_v59 = vadd.f32 %v10136_v57, %v10896_v44 }
  0xe5   : > { %v558_v60 = vpop.f32.mrf.mxu0 }
  0xe6   : > { %9247 = vst.msk [vmem:[%s10906_s22 + $0x10] sm:$0xff] %vm371_vm1, %v10927_v58  ;;  %v10935_v61 = vmax.f32 %v564_v59, 0.0  ;;  %v559_v62 = vadd.f32 %v10896_v44, %v558_v60 }
  0xe7   : > { %v10139_v63 = vpop.f32.mrf.mxu0 }
  0xe8   : > { %820 = vrot.lane.b32.xlu1 %v10927_v58, %s10485_s23  ;;  %9250 = vst.msk [vmem:[%s10906_s22 + $0x28] sm:$0xff] %vm371_vm1, %v10935_v61  ;;  %v10943_v0 = vmax.f32 %v559_v62, 0.0  ;;  %v574_v1 = vadd.f32 %v10139_v63, %v10896_v44 }
  0xe9   : > { %v568_v3 = vpop.f32.mrf.mxu0 }
  0xea   : > { %9249 = vst.msk [vmem:[%s10906_s22 + $0x20] sm:$0xff] %vm371_vm1, %v10943_v0  ;;  %824 = vrot.lane.b32.xlu0 %v10943_v0, %s10485_s23  ;;  %v10951_v4 = vmax.f32 %v574_v1, 0.0  ;;  %v569_v5 = vadd.f32 %v10896_v44, %v568_v3 }
  0xeb   : > { %v10142_v6 = vpop.f32.mrf.mxu0 }
  0xec   : > { %826 = vrot.lane.b32.xlu1 %v10935_v61, %s10485_s23  ;;  %9252 = vst.msk [vmem:[%s10906_s22 + $0x38] sm:$0xff] %vm371_vm1, %v10951_v4  ;;  %v10959_v7 = vmax.f32 %v569_v5, 0.0  ;;  %v584_v8 = vadd.f32 %v10142_v6, %v10896_v44 }
  0xed   : > { %v578_v9 = vpop.f32.mrf.mxu0 }
  0xee   : > { %9251 = vst.msk [vmem:[%s10906_s22 + $0x30] sm:$0xff] %vm371_vm1, %v10959_v7  ;;  %v10965_v10 = vmax.f32 %v584_v8, 0.0  ;;  %828 = vrot.lane.b32.xlu0 %v10959_v7, %s10485_s23  ;;  %v579_v11 = vadd.f32 %v10896_v44, %v578_v9 }
  0xef   : > { %v10145_v12 = vpop.f32.mrf.mxu0 }
  0xf0   : > { %830 = vrot.lane.b32.xlu1 %v10951_v4, %s10485_s23  ;;  %9254 = vst.msk [vmem:[%s10906_s22 + $0x48] sm:$0xff] %vm371_vm1, %v10965_v10  ;;  %v10975_v13 = vmax.f32 %v579_v11, 0.0  ;;  %v594_v14 = vadd.f32 %v10145_v12, %v10896_v44 }
  0xf1   : > { %v588_v15 = vpop.f32.mrf.mxu0 }
  0xf2   : > { %9253 = vst.msk [vmem:[%s10906_s22 + $0x40] sm:$0xff] %vm371_vm1, %v10975_v13  ;;  %v10981_v16 = vmax.f32 %v594_v14, 0.0  ;;  %v589_v17 = vadd.f32 %v10896_v44, %v588_v15  ;;  %832 = vrot.lane.b32.xlu0 %v10975_v13, %s10485_s23 }
  0xf3   : > { %v10148_v18 = vpop.f32.mrf.mxu0 }
  0xf4   : > { %9256 = vst.msk [vmem:[%s10906_s22 + $0x58] sm:$0xff] %vm371_vm1, %v10981_v16  ;;  %834 = vrot.lane.b32.xlu1 %v10965_v10, %s10485_s23  ;;  %v10991_v19 = vmax.f32 %v589_v17, 0.0  ;;  %v604_v20 = vadd.f32 %v10148_v18, %v10896_v44 }
  0xf5   : > { %v598_v21 = vpop.f32.mrf.mxu0 }
  0xf6   : > { %14958 = vst [vmem:[#allocation10_spill] sm:$0xff] %v10991_v19  ;;  %9255 = vst.msk [vmem:[%s10906_s22 + $0x50] sm:$0xff] %vm371_vm1, %v10991_v19  ;;  %v10997_v22 = vmax.f32 %v604_v20, 0.0  ;;  %v599_v23 = vadd.f32 %v10896_v44, %v598_v21  ;;  %836 = vrot.lane.b32.xlu0 %v10991_v19, %s10485_s23 }
  0xf7   : > { %v10151_v24 = vpop.f32.mrf.mxu0 }
  0xf8   : > { %14959 = vst [vmem:[#allocation11_spill] sm:$0xff] %v10997_v22  ;;  %9258 = vst.msk [vmem:[%s10906_s22 + $0x68] sm:$0xff] %vm371_vm1, %v10997_v22  ;;  %838 = vrot.lane.b32.xlu1 %v10981_v16, %s10485_s23  ;;  %v11007_v25 = vmax.f32 %v599_v23, 0.0  ;;  %v614_v26 = vadd.f32 %v10151_v24, %v10896_v44 }
  0xf9   : > { %v608_v27 = vpop.f32.mrf.mxu0 }
  0xfa   : > { %14960 = vst [vmem:[#allocation12_spill] sm:$0xff] %v11007_v25  ;;  %9257 = vst.msk [vmem:[%s10906_s22 + $0x60] sm:$0xff] %vm371_vm1, %v11007_v25  ;;  %v11013_v28 = vmax.f32 %v614_v26, 0.0  ;;  %v609_v29 = vadd.f32 %v10896_v44, %v608_v27  ;;  %840 = vrot.lane.b32.xlu0 %v11007_v25, %s10485_s23 }
  0xfb   : > { %v10154_v30 = vpop.f32.mrf.mxu0 }
  0xfc   : > { %14961 = vst [vmem:[#allocation13_spill] sm:$0xff] %v11013_v28  ;;  %9260 = vst.msk [vmem:[%s10906_s22 + $0x78] sm:$0xff] %vm371_vm1, %v11013_v28  ;;  %842 = vrot.lane.b32.xlu1 %v10997_v22, %s10485_s23  ;;  %v11023_v31 = vmax.f32 %v609_v29, 0.0  ;;  %v624_v32 = vadd.f32 %v10154_v30, %v10896_v44 }
  0xfd   : > { %v618_v33 = vpop.f32.mrf.mxu0 }
  0xfe   : > { %14962 = vst [vmem:[#allocation14_spill] sm:$0xff] %v11023_v31  ;;  %9259 = vst.msk [vmem:[%s10906_s22 + $0x70] sm:$0xff] %vm371_vm1, %v11023_v31  ;;  %v11029_v34 = vmax.f32 %v624_v32, 0.0  ;;  %v619_v35 = vadd.f32 %v10896_v44, %v618_v33  ;;  %844 = vrot.lane.b32.xlu0 %v11023_v31, %s10485_s23 }
  0xff   : > { %v10157_v36 = vpop.f32.mrf.mxu0 }
 0x100   : > { %14963 = vst [vmem:[#allocation15_spill] sm:$0xff] %v11029_v34  ;;  %9262 = vst.msk [vmem:[%s10906_s22 + $0x88] sm:$0xff] %vm371_vm1, %v11029_v34  ;;  %846 = vrot.lane.b32.xlu1 %v11013_v28, %s10485_s23  ;;  %v11039_v37 = vmax.f32 %v619_v35, 0.0  ;;  %v634_v38 = vadd.f32 %v10157_v36, %v10896_v44 }
 0x101   : > { %v628_v39 = vpop.f32.mrf.mxu0 }
 0x102   : > { %14964 = vst [vmem:[#allocation16_spill] sm:$0xff] %v11039_v37  ;;  %9261 = vst.msk [vmem:[%s10906_s22 + $0x80] sm:$0xff] %vm371_vm1, %v11039_v37  ;;  %v11045_v40 = vmax.f32 %v634_v38, 0.0  ;;  %v629_v41 = vadd.f32 %v10896_v44, %v628_v39  ;;  %848 = vrot.lane.b32.xlu0 %v11039_v37, %s10485_s23 }
 0x103   : > { %v10160_v42 = vpop.f32.mrf.mxu0 }
 0x104   : > { %14965 = vst [vmem:[#allocation17_spill] sm:$0xff] %v11045_v40  ;;  %9264 = vst.msk [vmem:[%s10906_s22 + $0x98] sm:$0xff] %vm371_vm1, %v11045_v40  ;;  %850 = vrot.lane.b32.xlu1 %v11029_v34, %s10485_s23  ;;  %v11055_v43 = vmax.f32 %v629_v41, 0.0  ;;  %v644_v45 = vadd.f32 %v10160_v42, %v10896_v44 }
 0x105   : > { %v638_v46 = vpop.f32.mrf.mxu0 }
 0x106   : > { %14966 = vst [vmem:[#allocation18_spill] sm:$0xff] %v11055_v43  ;;  %9263 = vst.msk [vmem:[%s10906_s22 + $0x90] sm:$0xff] %vm371_vm1, %v11055_v43  ;;  %v11061_v47 = vmax.f32 %v644_v45, 0.0  ;;  %v639_v48 = vadd.f32 %v10896_v44, %v638_v46  ;;  %852 = vrot.lane.b32.xlu0 %v11055_v43, %s10485_s23 }
 0x107   : > { %v10163_v50 = vpop.f32.mrf.mxu0 }
 0x108   : > { %14967 = vst [vmem:[#allocation19_spill] sm:$0xff] %v11061_v47  ;;  %9266 = vst.msk [vmem:[%s10906_s22 + $0xa8] sm:$0xff] %vm371_vm1, %v11061_v47  ;;  %854 = vrot.lane.b32.xlu1 %v11045_v40, %s10485_s23  ;;  %v11071_v51 = vmax.f32 %v639_v48, 0.0  ;;  %v654_v53 = vadd.f32 %v10163_v50, %v10896_v44 }
 0x109   : > { %v648_v54 = vpop.f32.mrf.mxu0 }
 0x10a   : > { %14968 = vst [vmem:[#allocation20_spill] sm:$0xff] %v11071_v51  ;;  %9265 = vst.msk [vmem:[%s10906_s22 + $0xa0] sm:$0xff] %vm371_vm1, %v11071_v51  ;;  %v11077_v56 = vmax.f32 %v654_v53, 0.0  ;;  %v649_v57 = vadd.f32 %v10896_v44, %v648_v54  ;;  %856 = vrot.lane.b32.xlu0 %v11071_v51, %s10485_s23 }
 0x10b   : > { %v10166_v59 = vpop.f32.mrf.mxu0 }
 0x10c   : > { %14969 = vst [vmem:[#allocation21_spill] sm:$0xff] %v11077_v56  ;;  %9268 = vst.msk [vmem:[%s10906_s22 + $0xb8] sm:$0xff] %vm371_vm1, %v11077_v56  ;;  %858 = vrot.lane.b32.xlu1 %v11061_v47, %s10485_s23  ;;  %v11087_v60 = vmax.f32 %v649_v57, 0.0  ;;  %v664_v62 = vadd.f32 %v10166_v59, %v10896_v44 }
 0x10d   : > { %v658_v63 = vpop.f32.mrf.mxu0 }
 0x10e   : > { %14970 = vst [vmem:[#allocation22_spill] sm:$0xff] %v11087_v60  ;;  %9267 = vst.msk [vmem:[%s10906_s22 + $0xb0] sm:$0xff] %vm371_vm1, %v11087_v60  ;;  %v11093_v1 = vmax.f32 %v664_v62, 0.0  ;;  %v659_v3 = vadd.f32 %v10896_v44, %v658_v63  ;;  %860 = vrot.lane.b32.xlu0 %v11087_v60, %s10485_s23 }
 0x10f   : > { %v10169_v5 = vpop.f32.mrf.mxu0 }
 0x110   : > { %14971 = vst [vmem:[#allocation23_spill] sm:$0xff] %v11093_v1  ;;  %9270 = vst.msk [vmem:[%s10906_s22 + $0xc8] sm:$0xff] %vm371_vm1, %v11093_v1  ;;  %862 = vrot.lane.b32.xlu1 %v11077_v56, %s10485_s23  ;;  %v11103_v6 = vmax.f32 %v659_v3, 0.0  ;;  %v674_v8 = vadd.f32 %v10169_v5, %v10896_v44 }
 0x111   : > { %v668_v9 = vpop.f32.mrf.mxu0 }
 0x112   : > { %14972 = vst [vmem:[#allocation24_spill] sm:$0xff] %v11103_v6  ;;  %9269 = vst.msk [vmem:[%s10906_s22 + $0xc0] sm:$0xff] %vm371_vm1, %v11103_v6  ;;  %v11109_v11 = vmax.f32 %v674_v8, 0.0  ;;  %v669_v12 = vadd.f32 %v10896_v44, %v668_v9  ;;  %864 = vrot.lane.b32.xlu0 %v11103_v6, %s10485_s23 }
 0x113   : > { %v10172_v14 = vpop.f32.mrf.mxu0 }
 0x114   : > { %14973 = vst [vmem:[#allocation25_spill] sm:$0xff] %v11109_v11  ;;  %9272 = vst.msk [vmem:[%s10906_s22 + $0xd8] sm:$0xff] %vm371_vm1, %v11109_v11  ;;  %866 = vrot.lane.b32.xlu1 %v11093_v1, %s10485_s23  ;;  %v11119_v15 = vmax.f32 %v669_v12, 0.0  ;;  %v684_v17 = vadd.f32 %v10172_v14, %v10896_v44 }
 0x115   : > { %v678_v18 = vpop.f32.mrf.mxu0 }
 0x116   : > { %14974 = vst [vmem:[#allocation26_spill] sm:$0xff] %v11119_v15  ;;  %9271 = vst.msk [vmem:[%s10906_s22 + $0xd0] sm:$0xff] %vm371_vm1, %v11119_v15  ;;  %v11125_v20 = vmax.f32 %v684_v17, 0.0  ;;  %v679_v21 = vadd.f32 %v10896_v44, %v678_v18  ;;  %868 = vrot.lane.b32.xlu0 %v11119_v15, %s10485_s23 }
 0x117   : > { %v10175_v23 = vpop.f32.mrf.mxu0 }
 0x118   : > { %14975 = vst [vmem:[#allocation27_spill] sm:$0xff] %v11125_v20  ;;  %9274 = vst.msk [vmem:[%s10906_s22 + $0xe8] sm:$0xff] %vm371_vm1, %v11125_v20  ;;  %870 = vrot.lane.b32.xlu1 %v11109_v11, %s10485_s23  ;;  %v11135_v24 = vmax.f32 %v679_v21, 0.0  ;;  %v694_v26 = vadd.f32 %v10175_v23, %v10896_v44 }
 0x119   : > { %v688_v27 = vpop.f32.mrf.mxu0 }
 0x11a   : > { %14976 = vst [vmem:[#allocation28_spill] sm:$0xff] %v11135_v24  ;;  %9273 = vst.msk [vmem:[%s10906_s22 + $0xe0] sm:$0xff] %vm371_vm1, %v11135_v24  ;;  %v11141_v29 = vmax.f32 %v694_v26, 0.0  ;;  %v689_v30 = vadd.f32 %v10896_v44, %v688_v27  ;;  %872 = vrot.lane.b32.xlu0 %v11135_v24, %s10485_s23 }
 0x11c   : > { %14977 = vst [vmem:[#allocation29_spill] sm:$0xff] %v11141_v29  ;;  %9276 = vst.msk [vmem:[%s10906_s22 + $0xf8] sm:$0xff] %vm371_vm1, %v11141_v29  ;;  %874 = vrot.lane.b32.xlu1 %v11125_v20, %s10485_s23  ;;  %v11151_v32 = vmax.f32 %v689_v30, 0.0 }
 0x11e   : > { %14978 = vst [vmem:[#allocation30_spill] sm:$0xff] %v11151_v32  ;;  %9275 = vst.msk [vmem:[%s10906_s22 + $0xf0] sm:$0xff] %vm371_vm1, %v11151_v32  ;;  %876 = vrot.lane.b32.xlu0 %v11151_v32, %s10485_s23 }
 0x120   : > { %878 = vrot.lane.b32.xlu1 %v11141_v29, %s10485_s23  ;;  %s10492_s23 = smov 120  }
 0x152   : > { %v819_v44 = vpop.permute.xlu0 %818 }
 0x153   : > { %914 = vst.msk [vmem:[#allocation2 + $0x21] sm:$0xff] %vm371_vm1, %v819_v44 }
 0x156   : > { %v817_v33 = vpop.permute.xlu0 %816  ;;  %v823_v35 = vpop.permute.xlu1 %822 }
 0x157   : > { %913 = vst.msk [vmem:[#allocation2 + $0x19] sm:$0xff] %vm371_vm1, %v817_v33  ;;  %916 = vst.msk [vmem:[#allocation2 + $0x39] sm:$0xff] %vm371_vm1, %v823_v35 }
 0x15a   : > { %v1012_v36 = vld [vmem:[#allocation2 + $0x21] sm:$0xff]  ;;  %v821_v38 = vpop.permute.xlu1 %820 }
 0x15b   : > { %1079 = vrot.lane.b32.xlu1 %v1012_v36, %s10483_s28  ;;  %915 = vst.msk [vmem:[#allocation2 + $0x31] sm:$0xff] %vm371_vm1, %v821_v38  ;;  %v1205_v41 = vld [vmem:[#allocation2 + $0x22] sm:$0xff] }
 0x15c   : > { %v825_v39 = vpop.permute.xlu0 %824 }
 0x15d   : > { %917 = vst.msk [vmem:[#allocation2 + $0x49] sm:$0xff] %vm371_vm1, %v825_v39 }
 0x15e   : > { %v1011_v42 = vld [vmem:[#allocation2 + $0x19] sm:$0xff]  ;;  %v827_v46 = vpop.permute.xlu1 %826 }
 0x15f   : > { %v1395_v45 = vld [vmem:[#allocation2 + $0x18] sm:$0xff]  ;;  %1272 = vrot.lane.b32.xlu1 %v1205_v41, %s14955_s29  ;;  %1077 = vrot.lane.b32.xlu0 %v1011_v42, %s10483_s28  ;;  %v1396_v48 = vld [vmem:[#allocation2 + $0x20] sm:$0xff]  ;;  %918 = vst.msk [vmem:[#allocation2 + $0x51] sm:$0xff] %vm371_vm1, %v827_v46 }
 0x160   : > { %979 = vst.msk [vmem:[#allocation5 + $0x10] sm:$0xff] %vm371_vm1, %v1395_v45  ;;  %v829_v50 = vpop.permute.xlu0 %828  ;;  %980 = vst.msk [vmem:[#allocation5 + $0x18] sm:$0xff] %vm371_vm1, %v1396_v48  ;;  %v1204_v53 = vld [vmem:[#allocation2 + $0x1a] sm:$0xff] }
 0x161   : > { %919 = vst.msk [vmem:[#allocation2 + $0x61] sm:$0xff] %vm371_vm1, %v829_v50  ;;  %v1014_v17 = vld [vmem:[#allocation2 + $0x39] sm:$0xff] }
 0x162   : > { %v11172_v54 = vld [vmem:[#allocation2 + $0x30] sm:$0xff]  ;;  %v831_v57 = vpop.permute.xlu1 %830  ;;  %v11176_v59 = vld [vmem:[#allocation2 + $0x38] sm:$0xff] }
 0x163   : > { %1654 = vrot.lane.b32.xlu1 %v1012_v36, %s10486_s24  ;;  %1270 = vrot.lane.b32.xlu0 %v1204_v53, %s14955_s29  ;;  %920 = vst.msk [vmem:[#allocation2 + $0x69] sm:$0xff] %vm371_vm1, %v831_v57  ;;  %981 = vst.msk [vmem:[#allocation5 + $0x20] sm:$0xff] %vm371_vm1, %v11172_v54  ;;  %v1207_v44 = vld [vmem:[#allocation2 + $0x3a] sm:$0xff]  ;;  %v1013_v33 = vld [vmem:[#allocation2 + $0x31] sm:$0xff] }
 0x164   : > { %v11181_v62 = vld [vmem:[#allocation2 + $0x48] sm:$0xff]  ;;  %v833_v63 = vpop.permute.xlu0 %832  ;;  %982 = vst.msk [vmem:[#allocation5 + $0x28] sm:$0xff] %vm371_vm1, %v11176_v59 }
 0x165   : > { %921 = vst.msk [vmem:[#allocation2 + $0x79] sm:$0xff] %vm371_vm1, %v833_v63  ;;  %983 = vst.msk [vmem:[#allocation5 + $0x30] sm:$0xff] %vm371_vm1, %v11181_v62 }
 0x166   : > { %v835_v3 = vpop.permute.xlu1 %834  ;;  %v11190_v5 = vld [vmem:[#allocation2 + $0x50] sm:$0xff] }
 0x167   : > { %1847 = vrot.lane.b32.xlu1 %v1205_v41, %s10487_s25  ;;  %1459 = vrot.lane.b32.xlu0 %v1395_v45, %s10488_s26  ;;  %922 = vst.msk [vmem:[#allocation2 + $0x81] sm:$0xff] %vm371_vm1, %v835_v3  ;;  %984 = vst.msk [vmem:[#allocation5 + $0x38] sm:$0xff] %vm371_vm1, %v11190_v5  ;;  %v1206_v41 = vld [vmem:[#allocation2 + $0x32] sm:$0xff] }
 0x168   : > { %v837_v8 = vpop.permute.xlu0 %836  ;;  %v11193_v9 = vld [vmem:[#allocation2 + $0x60] sm:$0xff] }
 0x169   : > { %923 = vst.msk [vmem:[#allocation2 + $0x91] sm:$0xff] %vm371_vm1, %v837_v8  ;;  %985 = vst.msk [vmem:[#allocation5 + $0x40] sm:$0xff] %vm371_vm1, %v11193_v9 }
 0x16a   : > { %v839_v12 = vpop.permute.xlu1 %838  ;;  %v11203_v14 = vld [vmem:[#allocation2 + $0x68] sm:$0xff] }
 0x16b   : > { %1461 = vrot.lane.b32.xlu1 %v1396_v48, %s10488_s26  ;;  %1652 = vrot.lane.b32.xlu0 %v1011_v42, %s10486_s24  ;;  %924 = vst.msk [vmem:[#allocation2 + $0x99] sm:$0xff] %vm371_vm1, %v839_v12  ;;  %986 = vst.msk [vmem:[#allocation5 + $0x48] sm:$0xff] %vm371_vm1, %v11203_v14  ;;  %v1980_v28 = vld [vmem:[#allocation2 + $0x68] sm:$0xff] }
 0x16c   : > { %v841_v18 = vpop.permute.xlu0 %840  ;;  %v11205_v21 = vld [vmem:[#allocation2 + $0x78] sm:$0xff] }
 0x16d   : > { %925 = vst.msk [vmem:[#allocation2 + $0xa9] sm:$0xff] %vm371_vm1, %v841_v18  ;;  %987 = vst.msk [vmem:[#allocation5 + $0x50] sm:$0xff] %vm371_vm1, %v11205_v21 }
 0x16e   : > { %v843_v23 = vpop.permute.xlu1 %842  ;;  %v11215_v26 = vld [vmem:[#allocation2 + $0x80] sm:$0xff] }
 0x16f   : > { %1083 = vrot.lane.b32.xlu1 %v1014_v17, %s10483_s28  ;;  %1845 = vrot.lane.b32.xlu0 %v1204_v53, %s10487_s25  ;;  %926 = vst.msk [vmem:[#allocation2 + $0xb1] sm:$0xff] %vm371_vm1, %v843_v23  ;;  %988 = vst.msk [vmem:[#allocation5 + $0x58] sm:$0xff] %vm371_vm1, %v11215_v26 }
 0x170   : > { %v845_v27 = vpop.permute.xlu0 %844  ;;  %v11217_v30 = vld [vmem:[#allocation2 + $0x90] sm:$0xff] }
 0x171   : > { %927 = vst.msk [vmem:[#allocation2 + $0xc1] sm:$0xff] %vm371_vm1, %v845_v27  ;;  %989 = vst.msk [vmem:[#allocation5 + $0x60] sm:$0xff] %vm371_vm1, %v11217_v30  ;;  %v1016_v27 = vld [vmem:[#allocation2 + $0x51] sm:$0xff] }
 0x172   : > { %v847_v35 = vpop.permute.xlu1 %846  ;;  %v11227_v36 = vld [vmem:[#allocation2 + $0x98] sm:$0xff] }
 0x173   : > { %1276 = vrot.lane.b32.xlu1 %v1207_v44, %s14955_s29  ;;  %1081 = vrot.lane.b32.xlu0 %v1013_v33, %s10483_s28  ;;  %928 = vst.msk [vmem:[#allocation2 + $0xc9] sm:$0xff] %vm371_vm1, %v847_v35  ;;  %990 = vst.msk [vmem:[#allocation5 + $0x68] sm:$0xff] %vm371_vm1, %v11227_v36 }
 0x174   : > { %v849_v38 = vpop.permute.xlu0 %848  ;;  %v11229_v39 = vld [vmem:[#allocation2 + $0xa8] sm:$0xff] }
 0x175   : > { %929 = vst.msk [vmem:[#allocation2 + $0xd9] sm:$0xff] %vm371_vm1, %v849_v38  ;;  %991 = vst.msk [vmem:[#allocation5 + $0x70] sm:$0xff] %vm371_vm1, %v11229_v39 }
 0x176   : > { %v851_v42 = vpop.permute.xlu1 %850  ;;  %v11239_v45 = vld [vmem:[#allocation2 + $0xb0] sm:$0xff] }
 0x177   : > { %1658 = vrot.lane.b32.xlu1 %v1014_v17, %s10486_s24  ;;  %1274 = vrot.lane.b32.xlu0 %v1206_v41, %s14955_s29  ;;  %930 = vst.msk [vmem:[#allocation2 + $0xe1] sm:$0xff] %vm371_vm1, %v851_v42  ;;  %992 = vst.msk [vmem:[#allocation5 + $0x78] sm:$0xff] %vm371_vm1, %v11239_v45  ;;  %v1209_v42 = vld [vmem:[#allocation2 + $0x52] sm:$0xff]  ;;  %v1216_v2 = vld [vmem:[#allocation2 + $0xaa] sm:$0xff] }
 0x178   : > { %v853_v46 = vpop.permute.xlu0 %852  ;;  %v11241_v48 = vld [vmem:[#allocation2 + $0xc0] sm:$0xff] }
 0x179   : > { %931 = vst.msk [vmem:[#allocation2 + $0xf1] sm:$0xff] %vm371_vm1, %v853_v46  ;;  %993 = vst.msk [vmem:[#allocation5 + $0x80] sm:$0xff] %vm371_vm1, %v11241_v48  ;;  %v1015_v46 = vld [vmem:[#allocation2 + $0x49] sm:$0xff] }
 0x17a   : > { %v855_v50 = vpop.permute.xlu1 %854  ;;  %v11252_v53 = vld [vmem:[#allocation2 + $0xc8] sm:$0xff] }
 0x17b   : > { %1851 = vrot.lane.b32.xlu1 %v1207_v44, %s10487_s25  ;;  %1463 = vrot.lane.b32.xlu0 %v11172_v54, %s10488_s26  ;;  %932 = vst.msk [vmem:[#allocation2 + $0xf9] sm:$0xff] %vm371_vm1, %v855_v50  ;;  %994 = vst.msk [vmem:[#allocation5 + $0x88] sm:$0xff] %vm371_vm1, %v11252_v53 }
 0x17c   : > { %v857_v57 = vpop.permute.xlu0 %856  ;;  %v11254_v63 = vld [vmem:[#allocation2 + $0xd8] sm:$0xff] }
 0x17d   : > { %933 = vst.msk [vmem:[#allocation2 + $0x109] sm:$0xff] %vm371_vm1, %v857_v57  ;;  %995 = vst.msk [vmem:[#allocation5 + $0x90] sm:$0xff] %vm371_vm1, %v11254_v63 }
 0x17e   : > { %v859_v3 = vpop.permute.xlu1 %858  ;;  %v11265_v8 = vld [vmem:[#allocation2 + $0xe0] sm:$0xff] }
 0x17f   : > { %1465 = vrot.lane.b32.xlu1 %v11176_v59, %s10488_s26  ;;  %1656 = vrot.lane.b32.xlu0 %v1013_v33, %s10486_s24  ;;  %934 = vst.msk [vmem:[#allocation2 + $0x111] sm:$0xff] %vm371_vm1, %v859_v3  ;;  %996 = vst.msk [vmem:[#allocation5 + $0x98] sm:$0xff] %vm371_vm1, %v11265_v8 }
 0x180   : > { %v861_v12 = vpop.permute.xlu0 %860  ;;  %v11267_v17 = vld [vmem:[#allocation2 + $0xf0] sm:$0xff] }
 0x181   : > { %935 = vst.msk [vmem:[#allocation2 + $0x121] sm:$0xff] %vm371_vm1, %v861_v12  ;;  %997 = vst.msk [vmem:[#allocation5 + $0xa0] sm:$0xff] %vm371_vm1, %v11267_v17  ;;  %v1208_v12 = vld [vmem:[#allocation2 + $0x4a] sm:$0xff] }
 0x182   : > { %v863_v18 = vpop.permute.xlu1 %862  ;;  %v11278_v23 = vld [vmem:[#allocation2 + $0xf8] sm:$0xff] }
 0x183   : > { %2041 = vrot.lane.b32.xlu1 %v11176_v59, %s10489_s27  ;;  %1849 = vrot.lane.b32.xlu0 %v1206_v41, %s10487_s25  ;;  %936 = vst.msk [vmem:[#allocation2 + $0x129] sm:$0xff] %vm371_vm1, %v863_v18  ;;  %998 = vst.msk [vmem:[#allocation5 + $0xa8] sm:$0xff] %vm371_vm1, %v11278_v23 }
 0x184   : > { %v865_v44 = vpop.permute.xlu0 %864  ;;  %v11280_v33 = vld [vmem:[#allocation2 + $0x108] sm:$0xff] }
 0x185   : > { %937 = vst.msk [vmem:[#allocation2 + $0x139] sm:$0xff] %vm371_vm1, %v865_v44  ;;  %999 = vst.msk [vmem:[#allocation5 + $0xb0] sm:$0xff] %vm371_vm1, %v11280_v33 }
 0x186   : > { %v867_v35 = vpop.permute.xlu1 %866  ;;  %v11291_v59 = vld [vmem:[#allocation2 + $0x110] sm:$0xff] }
 0x187   : > { %1087 = vrot.lane.b32.xlu1 %v1016_v27, %s10483_s28  ;;  %2039 = vrot.lane.b32.xlu0 %v11172_v54, %s10489_s27  ;;  %938 = vst.msk [vmem:[#allocation2 + $0x141] sm:$0xff] %vm371_vm1, %v867_v35  ;;  %1000 = vst.msk [vmem:[#allocation5 + $0xb8] sm:$0xff] %vm371_vm1, %v11291_v59  ;;  %v1224_v32 = vld [vmem:[#allocation2 + $0x10a] sm:$0xff] }
 0x188   : > { %v869_v38 = vpop.permute.xlu0 %868  ;;  %v11293_v41 = vld [vmem:[#allocation2 + $0x120] sm:$0xff] }
 0x189   : > { %939 = vst.msk [vmem:[#allocation2 + $0x151] sm:$0xff] %vm371_vm1, %v869_v38  ;;  %1001 = vst.msk [vmem:[#allocation5 + $0xc0] sm:$0xff] %vm371_vm1, %v11293_v41 }
 0x18a   : > { %v871_v50 = vpop.permute.xlu1 %870  ;;  %v11303_v54 = vld [vmem:[#allocation2 + $0x128] sm:$0xff] }
 0x18b   : > { %1280 = vrot.lane.b32.xlu1 %v1209_v42, %s14955_s29  ;;  %1085 = vrot.lane.b32.xlu0 %v1015_v46, %s10483_s28  ;;  %940 = vst.msk [vmem:[#allocation2 + $0x159] sm:$0xff] %vm371_vm1, %v871_v50  ;;  %1002 = vst.msk [vmem:[#allocation5 + $0xc8] sm:$0xff] %vm371_vm1, %v11303_v54  ;;  %v1226_v29 = vld [vmem:[#allocation2 + $0x122] sm:$0xff] }
 0x18c   : > { %v873_v57 = vpop.permute.xlu0 %872  ;;  %v11305_v3 = vld [vmem:[#allocation2 + $0x138] sm:$0xff] }
 0x18d   : > { %941 = vst.msk [vmem:[#allocation2 + $0x169] sm:$0xff] %vm371_vm1, %v873_v57  ;;  %1003 = vst.msk [vmem:[#allocation5 + $0xd0] sm:$0xff] %vm371_vm1, %v11305_v3 }
 0x18e   : > { %v875_v18 = vpop.permute.xlu1 %874  ;;  %v11315_v44 = vld [vmem:[#allocation2 + $0x140] sm:$0xff] }
 0x18f   : > { %1662 = vrot.lane.b32.xlu1 %v1016_v27, %s10486_s24  ;;  %1278 = vrot.lane.b32.xlu0 %v1208_v12, %s14955_s29  ;;  %942 = vst.msk [vmem:[#allocation2 + $0x171] sm:$0xff] %vm371_vm1, %v875_v18  ;;  %1004 = vst.msk [vmem:[#allocation5 + $0xd8] sm:$0xff] %vm371_vm1, %v11315_v44  ;;  %v1018_v18 = vld [vmem:[#allocation2 + $0x69] sm:$0xff]  ;;  %v11561_v20 = vld [vmem:[#allocation2 + $0x13a] sm:$0xff] }
 0x190   : > { %v877_v35 = vpop.permute.xlu0 %876  ;;  %v11317_v38 = vld [vmem:[#allocation2 + $0x150] sm:$0xff] }
 0x191   : > { %943 = vst.msk [vmem:[#allocation2 + $0x181] sm:$0xff] %vm371_vm1, %v877_v35  ;;  %1005 = vst.msk [vmem:[#allocation5 + $0xe0] sm:$0xff] %vm371_vm1, %v11317_v38  ;;  %v1211_v35 = vld [vmem:[#allocation2 + $0x6a] sm:$0xff] }
 0x192   : > { %v879_v50 = vpop.permute.xlu1 %878  ;;  %v11328_v27 = vld [vmem:[#allocation2 + $0x158] sm:$0xff] }
 0x193   : > { %1855 = vrot.lane.b32.xlu1 %v1209_v42, %s10487_s25  ;;  %1467 = vrot.lane.b32.xlu0 %v11181_v62, %s10488_s26  ;;  %944 = vst.msk [vmem:[#allocation2 + $0x189] sm:$0xff] %vm371_vm1, %v879_v50  ;;  %1006 = vst.msk [vmem:[#allocation5 + $0xe8] sm:$0xff] %vm371_vm1, %v11328_v27  ;;  %v1017_v50 = vld [vmem:[#allocation2 + $0x61] sm:$0xff]  ;;  %v11592_v11 = vld [vmem:[#allocation2 + $0x151] sm:$0xff] }
 0x194   : > { %v11330_v57 = vld [vmem:[#allocation2 + $0x168] sm:$0xff]  ;;  %v11599_v60 = vld [vmem:[#allocation2 + $0x152] sm:$0xff] }
 0x195   : > { %1007 = vst.msk [vmem:[#allocation5 + $0xf0] sm:$0xff] %vm371_vm1, %v11330_v57  ;;  %v11630_v56 = vld [vmem:[#allocation2 + $0x169] sm:$0xff] }
 0x196   : > { %v11339_v42 = vld [vmem:[#allocation2 + $0x170] sm:$0xff] }
 0x197   : > { %1469 = vrot.lane.b32.xlu1 %v11190_v5, %s10488_s26  ;;  %1660 = vrot.lane.b32.xlu0 %v1015_v46, %s10486_s24  ;;  %1008 = vst.msk [vmem:[#allocation5 + $0xf8] sm:$0xff] %vm371_vm1, %v11339_v42  ;;  %v1210_v46 = vld [vmem:[#allocation2 + $0x62] sm:$0xff]  ;;  %v11637_v43 = vld [vmem:[#allocation2 + $0x16a] sm:$0xff] }
 0x198   : > { %v11668_v40 = vld [vmem:[#allocation2 + $0x180] sm:$0xff] }
 0x199   : > { %v11677_v34 = vld [vmem:[#allocation2 + $0x181] sm:$0xff] }
 0x19a   : > { %v11675_v31 = vld [vmem:[#allocation2 + $0x188] sm:$0xff] }
 0x19b   : > { %2045 = vrot.lane.b32.xlu1 %v11190_v5, %s10489_s27  ;;  %1853 = vrot.lane.b32.xlu0 %v1208_v12, %s10487_s25  ;;  %v1213_v5 = vld [vmem:[#allocation2 + $0x82] sm:$0xff]  ;;  %v1019_v12 = vld [vmem:[#allocation2 + $0x79] sm:$0xff] }
 0x19c   : > { %v11685_v19 = vld [vmem:[#allocation2 + $0x182] sm:$0xff] }
 0x19f   : > { %1091 = vrot.lane.b32.xlu1 %v1018_v18, %s10483_s28  ;;  %2043 = vrot.lane.b32.xlu0 %v11181_v62, %s10489_s27  ;;  %v1020_v62 = vld [vmem:[#allocation2 + $0x81] sm:$0xff] }
 0x1a3   : > { %1284 = vrot.lane.b32.xlu1 %v1211_v35, %s14955_s29  ;;  %1089 = vrot.lane.b32.xlu0 %v1017_v50, %s10483_s28 }
 0x1a7   : > { %1666 = vrot.lane.b32.xlu1 %v1018_v18, %s10486_s24  ;;  %1282 = vrot.lane.b32.xlu0 %v1210_v46, %s14955_s29  ;;  %v1212_v18 = vld [vmem:[#allocation2 + $0x7a] sm:$0xff] }
 0x1ab   : > { %1859 = vrot.lane.b32.xlu1 %v1211_v35, %s10487_s25  ;;  %1471 = vrot.lane.b32.xlu0 %v11193_v9, %s10488_s26  ;;  %v1022_v9 = vld [vmem:[#allocation2 + $0x99] sm:$0xff]  ;;  %v1021_v35 = vld [vmem:[#allocation2 + $0x91] sm:$0xff] }
 0x1af   : > { %1473 = vrot.lane.b32.xlu1 %v11203_v14, %s10488_s26  ;;  %1664 = vrot.lane.b32.xlu0 %v1017_v50, %s10486_s24  ;;  %v1215_v14 = vld [vmem:[#allocation2 + $0x9a] sm:$0xff] }
 0x1b3   : > { %1095 = vrot.lane.b32.xlu1 %v1020_v62, %s10483_s28  ;;  %1857 = vrot.lane.b32.xlu0 %v1210_v46, %s10487_s25  ;;  %v1214_v46 = vld [vmem:[#allocation2 + $0x92] sm:$0xff] }
 0x1b7   : > { %1288 = vrot.lane.b32.xlu1 %v1213_v5, %s14955_s29  ;;  %1093 = vrot.lane.b32.xlu0 %v1019_v12, %s10483_s28 }
 0x1bb   : > { %1670 = vrot.lane.b32.xlu1 %v1020_v62, %s10486_s24  ;;  %1286 = vrot.lane.b32.xlu0 %v1212_v18, %s14955_s29 }
 0x1bf   : > { %1863 = vrot.lane.b32.xlu1 %v1213_v5, %s10487_s25  ;;  %1475 = vrot.lane.b32.xlu0 %v11205_v21, %s10488_s26 }
 0x1c3   : > { %1477 = vrot.lane.b32.xlu1 %v11215_v26, %s10488_s26  ;;  %1668 = vrot.lane.b32.xlu0 %v1019_v12, %s10486_s24 }
 0x1c7   : > { %1099 = vrot.lane.b32.xlu1 %v1022_v9, %s10483_s28  ;;  %1861 = vrot.lane.b32.xlu0 %v1212_v18, %s10487_s25 }
 0x1cb   : > { %1292 = vrot.lane.b32.xlu1 %v1215_v14, %s14955_s29  ;;  %1097 = vrot.lane.b32.xlu0 %v1021_v35, %s10483_s28 }
 0x1cd   : > { %v1080_v50 = vpop.permute.xlu1 %1079 }
 0x1ce   : > { %1173 = vst.msk [vmem:[#allocation5 + $0x18] sm:$0xff] %vm1169_vm3, %v1080_v50 }
 0x1cf   : > { %1674 = vrot.lane.b32.xlu1 %v1022_v9, %s10486_s24  ;;  %1290 = vrot.lane.b32.xlu0 %v1214_v46, %s14955_s29 }
 0x1d1   : > { %v1273_v62 = vpop.permute.xlu1 %1272  ;;  %v1078_v5 = vpop.permute.xlu0 %1077 }
 0x1d2   : > { %1366 = vst.msk [vmem:[#allocation5 + $0x18] sm:$0xff] %vm1362_vm4, %v1273_v62  ;;  %v1024_v62 = vld [vmem:[#allocation2 + $0xb1] sm:$0xff] }
 0x1d3   : > { %1172 = vst.msk [vmem:[#allocation5 + $0x10] sm:$0xff] %vm1169_vm3, %v1078_v5  ;;  %1867 = vrot.lane.b32.xlu1 %v1215_v14, %s10487_s25  ;;  %1479 = vrot.lane.b32.xlu0 %v11217_v30, %s10488_s26 }
 0x1d5   : > { %v1655_v12 = vpop.permute.xlu1 %1654  ;;  %v1271_v18 = vpop.permute.xlu0 %1270 }
 0x1d6   : > { %1365 = vst.msk [vmem:[#allocation5 + $0x10] sm:$0xff] %vm1362_vm4, %v1271_v18  ;;  %v1217_v18 = vld [vmem:[#allocation2 + $0xb2] sm:$0xff] }
 0x1d7   : > { %1481 = vrot.lane.b32.xlu1 %v11227_v36, %s10488_s26  ;;  %1672 = vrot.lane.b32.xlu0 %v1021_v35, %s10486_s24  ;;  %v1023_v35 = vld [vmem:[#allocation2 + $0xa9] sm:$0xff] }
 0x1d9   : > { %v1848_v9 = vpop.permute.xlu1 %1847  ;;  %v1460_v50 = vpop.permute.xlu0 %1459 }
 0x1da   : > { %1556 = vst.msk [vmem:[#allocation5] sm:$0xff] %vm1555_vm5, %v1460_v50 }
 0x1db   : > { %1103 = vrot.lane.b32.xlu1 %v1024_v62, %s10483_s28  ;;  %1865 = vrot.lane.b32.xlu0 %v1214_v46, %s10487_s25 }
 0x1dd   : > { %v1462_v14 = vpop.permute.xlu1 %1461  ;;  %v1653_v5 = vpop.permute.xlu0 %1652 }
 0x1de   : > { %1557 = vst.msk [vmem:[#allocation5 + $0x8] sm:$0xff] %vm1555_vm5, %v1462_v14 }
 0x1df   : > { %1749 = vst.msk [vmem:[#allocation5] sm:$0xff] %vm1748_vm6, %v1653_v5  ;;  %1750 = vst.msk [vmem:[#allocation5 + $0x8] sm:$0xff] %vm1748_vm6, %v1655_v12  ;;  %1296 = vrot.lane.b32.xlu1 %v1217_v18, %s14955_s29  ;;  %1101 = vrot.lane.b32.xlu0 %v1023_v35, %s10483_s28 }
 0x1e0   : > { %1943 = vst.msk [vmem:[#allocation5 + $0x8] sm:$0xff] %vm1941_vm7, %v1848_v9 }
 0x1e1   : > { %v1084_v50 = vpop.permute.xlu1 %1083  ;;  %v1846_v46 = vpop.permute.xlu0 %1845 }
 0x1e2   : > { %1175 = vst.msk [vmem:[#allocation5 + $0x28] sm:$0xff] %vm1169_vm3, %v1084_v50 }
 0x1e3   : > { %1942 = vst.msk [vmem:[#allocation5] sm:$0xff] %vm1941_vm7, %v1846_v46  ;;  %1678 = vrot.lane.b32.xlu1 %v1024_v62, %s10486_s24  ;;  %1294 = vrot.lane.b32.xlu0 %v1216_v2, %s14955_s29  ;;  %v1026_v46 = vld [vmem:[#allocation2 + $0xc9] sm:$0xff] }
 0x1e5   : > { %v1277_v14 = vpop.permute.xlu1 %1276  ;;  %v1082_v5 = vpop.permute.xlu0 %1081 }
 0x1e6   : > { %1368 = vst.msk [vmem:[#allocation5 + $0x28] sm:$0xff] %vm1362_vm4, %v1277_v14 }
 0x1e7   : > { %1174 = vst.msk [vmem:[#allocation5 + $0x20] sm:$0xff] %vm1169_vm3, %v1082_v5  ;;  %1871 = vrot.lane.b32.xlu1 %v1217_v18, %s10487_s25  ;;  %1483 = vrot.lane.b32.xlu0 %v11229_v39, %s10488_s26  ;;  %v1219_v5 = vld [vmem:[#allocation2 + $0xca] sm:$0xff] }
 0x1e9   : > { %v1659_v12 = vpop.permute.xlu1 %1658  ;;  %v1275_v9 = vpop.permute.xlu0 %1274 }
 0x1ea   : > { %1367 = vst.msk [vmem:[#allocation5 + $0x20] sm:$0xff] %vm1362_vm4, %v1275_v9  ;;  %v1025_v9 = vld [vmem:[#allocation2 + $0xc1] sm:$0xff] }
 0x1eb   : > { %1485 = vrot.lane.b32.xlu1 %v11239_v45, %s10488_s26  ;;  %1676 = vrot.lane.b32.xlu0 %v1023_v35, %s10486_s24 }
 0x1ed   : > { %v1852_v62 = vpop.permute.xlu1 %1851  ;;  %v1464_v50 = vpop.permute.xlu0 %1463 }
 0x1ee   : > { %1558 = vst.msk [vmem:[#allocation5 + $0x10] sm:$0xff] %vm1555_vm5, %v1464_v50 }
 0x1ef   : > { %1107 = vrot.lane.b32.xlu1 %v1026_v46, %s10483_s28  ;;  %1869 = vrot.lane.b32.xlu0 %v1216_v2, %s10487_s25  ;;  %v1218_v2 = vld [vmem:[#allocation2 + $0xc2] sm:$0xff] }
 0x1f1   : > { %v1466_v18 = vpop.permute.xlu1 %1465  ;;  %v1657_v14 = vpop.permute.xlu0 %1656 }
 0x1f2   : > { %1559 = vst.msk [vmem:[#allocation5 + $0x18] sm:$0xff] %vm1555_vm5, %v1466_v18 }
 0x1f3   : > { %1751 = vst.msk [vmem:[#allocation5 + $0x10] sm:$0xff] %vm1748_vm6, %v1657_v14  ;;  %1752 = vst.msk [vmem:[#allocation5 + $0x18] sm:$0xff] %vm1748_vm6, %v1659_v12  ;;  %1300 = vrot.lane.b32.xlu1 %v1219_v5, %s14955_s29  ;;  %1105 = vrot.lane.b32.xlu0 %v1025_v9, %s10483_s28 }
 0x1f4   : > { %1945 = vst.msk [vmem:[#allocation5 + $0x18] sm:$0xff] %vm1941_vm7, %v1852_v62 }
 0x1f5   : > { %v2042_v35 = vpop.permute.xlu1 %2041  ;;  %v1850_v50 = vpop.permute.xlu0 %1849 }
 0x1f6   : > { %2137 = vst.msk [vmem:[#allocation5 + $0x8] sm:$0xff] %vm2135_vm8, %v2042_v35 }
 0x1f7   : > { %1944 = vst.msk [vmem:[#allocation5 + $0x10] sm:$0xff] %vm1941_vm7, %v1850_v50  ;;  %1682 = vrot.lane.b32.xlu1 %v1026_v46, %s10486_s24  ;;  %1298 = vrot.lane.b32.xlu0 %v1218_v2, %s14955_s29  ;;  %v1028_v50 = vld [vmem:[#allocation2 + $0xe1] sm:$0xff] }
 0x1f9   : > { %v1088_v18 = vpop.permute.xlu1 %1087  ;;  %v2040_v12 = vpop.permute.xlu0 %2039 }
 0x1fa   : > { %1177 = vst.msk [vmem:[#allocation5 + $0x38] sm:$0xff] %vm1169_vm3, %v1088_v18 }
 0x1fb   : > { %2136 = vst.msk [vmem:[#allocation5] sm:$0xff] %vm2135_vm8, %v2040_v12  ;;  %1875 = vrot.lane.b32.xlu1 %v1219_v5, %s10487_s25  ;;  %1487 = vrot.lane.b32.xlu0 %v11241_v48, %s10488_s26  ;;  %v1221_v12 = vld [vmem:[#allocation2 + $0xe2] sm:$0xff] }
 0x1fd   : > { %v1281_v62 = vpop.permute.xlu1 %1280  ;;  %v1086_v14 = vpop.permute.xlu0 %1085 }
 0x1fe   : > { %1370 = vst.msk [vmem:[#allocation5 + $0x38] sm:$0xff] %vm1362_vm4, %v1281_v62  ;;  %v1027_v62 = vld [vmem:[#allocation2 + $0xd9] sm:$0xff] }
 0x1ff   : > { %1176 = vst.msk [vmem:[#allocation5 + $0x30] sm:$0xff] %vm1169_vm3, %v1086_v14  ;;  %1489 = vrot.lane.b32.xlu1 %v11252_v53, %s10488_s26  ;;  %1680 = vrot.lane.b32.xlu0 %v1025_v9, %s10486_s24 }
 0x201   : > { %v1663_v46 = vpop.permute.xlu1 %1662  ;;  %v1279_v35 = vpop.permute.xlu0 %1278 }
 0x202   : > { %1369 = vst.msk [vmem:[#allocation5 + $0x30] sm:$0xff] %vm1362_vm4, %v1279_v35  ;;  %v1220_v35 = vld [vmem:[#allocation2 + $0xda] sm:$0xff] }
 0x203   : > { %1111 = vrot.lane.b32.xlu1 %v1028_v50, %s10483_s28  ;;  %1873 = vrot.lane.b32.xlu0 %v1218_v2, %s10487_s25 }
 0x205   : > { %v1856_v5 = vpop.permute.xlu1 %1855  ;;  %v1468_v18 = vpop.permute.xlu0 %1467 }
 0x206   : > { %1560 = vst.msk [vmem:[#allocation5 + $0x20] sm:$0xff] %vm1555_vm5, %v1468_v18 }
 0x207   : > { %1304 = vrot.lane.b32.xlu1 %v1221_v12, %s14955_s29  ;;  %1109 = vrot.lane.b32.xlu0 %v1027_v62, %s10483_s28 }
 0x209   : > { %v1470_v9 = vpop.permute.xlu1 %1469  ;;  %v1661_v14 = vpop.permute.xlu0 %1660 }
 0x20a   : > { %1561 = vst.msk [vmem:[#allocation5 + $0x28] sm:$0xff] %vm1555_vm5, %v1470_v9 }
 0x20b   : > { %1753 = vst.msk [vmem:[#allocation5 + $0x20] sm:$0xff] %vm1748_vm6, %v1661_v14  ;;  %1754 = vst.msk [vmem:[#allocation5 + $0x28] sm:$0xff] %vm1748_vm6, %v1663_v46  ;;  %1686 = vrot.lane.b32.xlu1 %v1028_v50, %s10486_s24  ;;  %1302 = vrot.lane.b32.xlu0 %v1220_v35, %s14955_s29 }
 0x20c   : > { %1947 = vst.msk [vmem:[#allocation5 + $0x28] sm:$0xff] %vm1941_vm7, %v1856_v5  ;;  %v11456_v5 = vld [vmem:[#allocation2 + $0xf9] sm:$0xff] }
 0x20d   : > { %v2046_v2 = vpop.permute.xlu1 %2045  ;;  %v1854_v18 = vpop.permute.xlu0 %1853 }
 0x20e   : > { %2139 = vst.msk [vmem:[#allocation5 + $0x18] sm:$0xff] %vm2135_vm8, %v2046_v2 }
 0x20f   : > { %1946 = vst.msk [vmem:[#allocation5 + $0x20] sm:$0xff] %vm1941_vm7, %v1854_v18  ;;  %1879 = vrot.lane.b32.xlu1 %v1221_v12, %s10487_s25  ;;  %1491 = vrot.lane.b32.xlu0 %v11254_v63, %s10488_s26  ;;  %v1223_v18 = vld [vmem:[#allocation2 + $0xfa] sm:$0xff] }
 0x211   : > { %v1092_v9 = vpop.permute.xlu1 %1091  ;;  %v2044_v14 = vpop.permute.xlu0 %2043 }
 0x212   : > { %1179 = vst.msk [vmem:[#allocation5 + $0x48] sm:$0xff] %vm1169_vm3, %v1092_v9  ;;  %v11462_v9 = vld [vmem:[#allocation2 + $0xf1] sm:$0xff] }
 0x213   : > { %2138 = vst.msk [vmem:[#allocation5 + $0x10] sm:$0xff] %vm2135_vm8, %v2044_v14  ;;  %1493 = vrot.lane.b32.xlu1 %v11265_v8, %s10488_s26  ;;  %1684 = vrot.lane.b32.xlu0 %v1027_v62, %s10486_s24 }
 0x215   : > { %v1285_v46 = vpop.permute.xlu1 %1284  ;;  %v1090_v50 = vpop.permute.xlu0 %1089 }
 0x216   : > { %1372 = vst.msk [vmem:[#allocation5 + $0x48] sm:$0xff] %vm1362_vm4, %v1285_v46  ;;  %v1222_v46 = vld [vmem:[#allocation2 + $0xf2] sm:$0xff] }
 0x217   : > { %1178 = vst.msk [vmem:[#allocation5 + $0x40] sm:$0xff] %vm1169_vm3, %v1090_v50  ;;  %1115 = vrot.lane.b32.xlu1 %v11456_v5, %s10483_s28  ;;  %1877 = vrot.lane.b32.xlu0 %v1220_v35, %s10487_s25 }
 0x219   : > { %v1667_v12 = vpop.permute.xlu1 %1666  ;;  %v1283_v2 = vpop.permute.xlu0 %1282 }
 0x21a   : > { %1371 = vst.msk [vmem:[#allocation5 + $0x40] sm:$0xff] %vm1362_vm4, %v1283_v2 }
 0x21b   : > { %1308 = vrot.lane.b32.xlu1 %v1223_v18, %s14955_s29  ;;  %1113 = vrot.lane.b32.xlu0 %v11462_v9, %s10483_s28 }
 0x21d   : > { %v1860_v62 = vpop.permute.xlu1 %1859  ;;  %v1472_v14 = vpop.permute.xlu0 %1471 }
 0x21e   : > { %1562 = vst.msk [vmem:[#allocation5 + $0x30] sm:$0xff] %vm1555_vm5, %v1472_v14 }
 0x21f   : > { %1690 = vrot.lane.b32.xlu1 %v11456_v5, %s10486_s24  ;;  %1306 = vrot.lane.b32.xlu0 %v1222_v46, %s14955_s29 }
 0x221   : > { %v1474_v35 = vpop.permute.xlu1 %1473  ;;  %v1665_v50 = vpop.permute.xlu0 %1664 }
 0x222   : > { %1563 = vst.msk [vmem:[#allocation5 + $0x38] sm:$0xff] %vm1555_vm5, %v1474_v35 }
 0x223   : > { %1755 = vst.msk [vmem:[#allocation5 + $0x30] sm:$0xff] %vm1748_vm6, %v1665_v50  ;;  %1756 = vst.msk [vmem:[#allocation5 + $0x38] sm:$0xff] %vm1748_vm6, %v1667_v12  ;;  %1883 = vrot.lane.b32.xlu1 %v1223_v18, %s10487_s25  ;;  %1495 = vrot.lane.b32.xlu0 %v11267_v17, %s10488_s26  ;;  %v11486_v18 = vld [vmem:[#allocation2 + $0x111] sm:$0xff] }
 0x224   : > { %1949 = vst.msk [vmem:[#allocation5 + $0x38] sm:$0xff] %vm1941_vm7, %v1860_v62 }
 0x225   : > { %v1096_v2 = vpop.permute.xlu1 %1095  ;;  %v1858_v14 = vpop.permute.xlu0 %1857 }
 0x226   : > { %1181 = vst.msk [vmem:[#allocation5 + $0x58] sm:$0xff] %vm1169_vm3, %v1096_v2  ;;  %v1225_v2 = vld [vmem:[#allocation2 + $0x112] sm:$0xff] }
 0x227   : > { %1948 = vst.msk [vmem:[#allocation5 + $0x30] sm:$0xff] %vm1941_vm7, %v1858_v14  ;;  %1497 = vrot.lane.b32.xlu1 %v11278_v23, %s10488_s26  ;;  %1688 = vrot.lane.b32.xlu0 %v11462_v9, %s10486_s24  ;;  %v11492_v14 = vld [vmem:[#allocation2 + $0x109] sm:$0xff] }
 0x229   : > { %v1289_v12 = vpop.permute.xlu1 %1288  ;;  %v1094_v35 = vpop.permute.xlu0 %1093 }
 0x22a   : > { %1374 = vst.msk [vmem:[#allocation5 + $0x58] sm:$0xff] %vm1362_vm4, %v1289_v12 }
 0x22b   : > { %1180 = vst.msk [vmem:[#allocation5 + $0x50] sm:$0xff] %vm1169_vm3, %v1094_v35  ;;  %1119 = vrot.lane.b32.xlu1 %v11486_v18, %s10483_s28  ;;  %1881 = vrot.lane.b32.xlu0 %v1222_v46, %s10487_s25 }
 0x22d   : > { %v1671_v62 = vpop.permute.xlu1 %1670  ;;  %v1287_v50 = vpop.permute.xlu0 %1286 }
 0x22e   : > { %1373 = vst.msk [vmem:[#allocation5 + $0x50] sm:$0xff] %vm1362_vm4, %v1287_v50 }
 0x22f   : > { %1312 = vrot.lane.b32.xlu1 %v1225_v2, %s14955_s29  ;;  %1117 = vrot.lane.b32.xlu0 %v11492_v14, %s10483_s28 }
 0x231   : > { %v1864_v12 = vpop.permute.xlu1 %1863  ;;  %v1476_v35 = vpop.permute.xlu0 %1475 }
 0x232   : > { %1564 = vst.msk [vmem:[#allocation5 + $0x40] sm:$0xff] %vm1555_vm5, %v1476_v35 }
 0x233   : > { %1694 = vrot.lane.b32.xlu1 %v11486_v18, %s10486_s24  ;;  %1310 = vrot.lane.b32.xlu0 %v1224_v32, %s14955_s29 }
 0x235   : > { %v1478_v46 = vpop.permute.xlu1 %1477  ;;  %v1669_v50 = vpop.permute.xlu0 %1668 }
 0x236   : > { %1565 = vst.msk [vmem:[#allocation5 + $0x48] sm:$0xff] %vm1555_vm5, %v1478_v46 }
 0x237   : > { %1757 = vst.msk [vmem:[#allocation5 + $0x40] sm:$0xff] %vm1748_vm6, %v1669_v50  ;;  %1758 = vst.msk [vmem:[#allocation5 + $0x48] sm:$0xff] %vm1748_vm6, %v1671_v62  ;;  %1887 = vrot.lane.b32.xlu1 %v1225_v2, %s10487_s25  ;;  %1499 = vrot.lane.b32.xlu0 %v11280_v33, %s10488_s26  ;;  %v11516_v2 = vld [vmem:[#allocation2 + $0x129] sm:$0xff] }
 0x238   : > { %1951 = vst.msk [vmem:[#allocation5 + $0x48] sm:$0xff] %vm1941_vm7, %v1864_v12  ;;  %v1227_v50 = vld [vmem:[#allocation2 + $0x12a] sm:$0xff] }
 0x239   : > { %v1100_v35 = vpop.permute.xlu1 %1099  ;;  %v1862_v24 = vpop.permute.xlu0 %1861 }
 0x23a   : > { %1183 = vst.msk [vmem:[#allocation5 + $0x68] sm:$0xff] %vm1169_vm3, %v1100_v35  ;;  %v11522_v35 = vld [vmem:[#allocation2 + $0x121] sm:$0xff] }
 0x23b   : > { %1950 = vst.msk [vmem:[#allocation5 + $0x40] sm:$0xff] %vm1941_vm7, %v1862_v24  ;;  %1501 = vrot.lane.b32.xlu1 %v11291_v59, %s10488_s26  ;;  %1692 = vrot.lane.b32.xlu0 %v11492_v14, %s10486_s24 }
 0x23d   : > { %v1293_v62 = vpop.permute.xlu1 %1292  ;;  %v1098_v46 = vpop.permute.xlu0 %1097 }
 0x23e   : > { %1376 = vst.msk [vmem:[#allocation5 + $0x68] sm:$0xff] %vm1362_vm4, %v1293_v62 }
 0x23f   : > { %1182 = vst.msk [vmem:[#allocation5 + $0x60] sm:$0xff] %vm1169_vm3, %v1098_v46  ;;  %1123 = vrot.lane.b32.xlu1 %v11516_v2, %s10483_s28  ;;  %1885 = vrot.lane.b32.xlu0 %v1224_v32, %s10487_s25 }
 0x241   : > { %v1675_v24 = vpop.permute.xlu1 %1674  ;;  %v1291_v12 = vpop.permute.xlu0 %1290 }
 0x242   : > { %1375 = vst.msk [vmem:[#allocation5 + $0x60] sm:$0xff] %vm1362_vm4, %v1291_v12 }
 0x243   : > { %1316 = vrot.lane.b32.xlu1 %v1227_v50, %s14955_s29  ;;  %1121 = vrot.lane.b32.xlu0 %v11522_v35, %s10483_s28 }
 0x245   : > { %v1868_v62 = vpop.permute.xlu1 %1867  ;;  %v1480_v46 = vpop.permute.xlu0 %1479 }
 0x246   : > { %1566 = vst.msk [vmem:[#allocation5 + $0x50] sm:$0xff] %vm1555_vm5, %v1480_v46 }
 0x247   : > { %1698 = vrot.lane.b32.xlu1 %v11516_v2, %s10486_s24  ;;  %1314 = vrot.lane.b32.xlu0 %v1226_v29, %s14955_s29 }
 0x249   : > { %v1482_v32 = vpop.permute.xlu1 %1481  ;;  %v1673_v12 = vpop.permute.xlu0 %1672 }
 0x24a   : > { %1567 = vst.msk [vmem:[#allocation5 + $0x58] sm:$0xff] %vm1555_vm5, %v1482_v32 }
 0x24b   : > { %1759 = vst.msk [vmem:[#allocation5 + $0x50] sm:$0xff] %vm1748_vm6, %v1673_v12  ;;  %1760 = vst.msk [vmem:[#allocation5 + $0x58] sm:$0xff] %vm1748_vm6, %v1675_v24  ;;  %1891 = vrot.lane.b32.xlu1 %v1227_v50, %s10487_s25  ;;  %1503 = vrot.lane.b32.xlu0 %v11293_v41, %s10488_s26  ;;  %v11546_v50 = vld [vmem:[#allocation2 + $0x141] sm:$0xff] }
 0x24c   : > { %1953 = vst.msk [vmem:[#allocation5 + $0x58] sm:$0xff] %vm1941_vm7, %v1868_v62  ;;  %v11552_v12 = vld [vmem:[#allocation2 + $0x142] sm:$0xff] }
 0x24d   : > { %v1104_v46 = vpop.permute.xlu1 %1103  ;;  %v1866_v15 = vpop.permute.xlu0 %1865 }
 0x24e   : > { %1185 = vst.msk [vmem:[#allocation5 + $0x78] sm:$0xff] %vm1169_vm3, %v1104_v46  ;;  %v11554_v46 = vld [vmem:[#allocation2 + $0x139] sm:$0xff] }
 0x24f   : > { %1952 = vst.msk [vmem:[#allocation5 + $0x50] sm:$0xff] %vm1941_vm7, %v1866_v15  ;;  %1505 = vrot.lane.b32.xlu1 %v11303_v54, %s10488_s26  ;;  %1696 = vrot.lane.b32.xlu0 %v11522_v35, %s10486_s24 }
 0x251   : > { %v1297_v24 = vpop.permute.xlu1 %1296  ;;  %v1102_v32 = vpop.permute.xlu0 %1101 }
 0x252   : > { %1378 = vst.msk [vmem:[#allocation5 + $0x78] sm:$0xff] %vm1362_vm4, %v1297_v24 }
 0x253   : > { %1184 = vst.msk [vmem:[#allocation5 + $0x70] sm:$0xff] %vm1169_vm3, %v1102_v32  ;;  %1127 = vrot.lane.b32.xlu1 %v11546_v50, %s10483_s28  ;;  %1889 = vrot.lane.b32.xlu0 %v1226_v29, %s10487_s25 }
 0x255   : > { %v1679_v15 = vpop.permute.xlu1 %1678  ;;  %v1295_v62 = vpop.permute.xlu0 %1294 }
 0x256   : > { %1377 = vst.msk [vmem:[#allocation5 + $0x70] sm:$0xff] %vm1362_vm4, %v1295_v62 }
 0x257   : > { %1320 = vrot.lane.b32.xlu1 %v11552_v12, %s14955_s29  ;;  %1125 = vrot.lane.b32.xlu0 %v11554_v46, %s10483_s28 }
 0x259   : > { %v1872_v24 = vpop.permute.xlu1 %1871  ;;  %v1484_v32 = vpop.permute.xlu0 %1483 }
 0x25a   : > { %1568 = vst.msk [vmem:[#allocation5 + $0x60] sm:$0xff] %vm1555_vm5, %v1484_v32 }
 0x25b   : > { %1702 = vrot.lane.b32.xlu1 %v11546_v50, %s10486_s24  ;;  %1318 = vrot.lane.b32.xlu0 %v11561_v20, %s14955_s29 }
 0x25d   : > { %v1486_v29 = vpop.permute.xlu1 %1485  ;;  %v1677_v62 = vpop.permute.xlu0 %1676 }
 0x25e   : > { %1569 = vst.msk [vmem:[#allocation5 + $0x68] sm:$0xff] %vm1555_vm5, %v1486_v29 }
 0x25f   : > { %1761 = vst.msk [vmem:[#allocation5 + $0x60] sm:$0xff] %vm1748_vm6, %v1677_v62  ;;  %1762 = vst.msk [vmem:[#allocation5 + $0x68] sm:$0xff] %vm1748_vm6, %v1679_v15  ;;  %1895 = vrot.lane.b32.xlu1 %v11552_v12, %s10487_s25  ;;  %1507 = vrot.lane.b32.xlu0 %v11305_v3, %s10488_s26  ;;  %v11583_v62 = vld [vmem:[#allocation2 + $0x159] sm:$0xff] }
 0x260   : > { %1955 = vst.msk [vmem:[#allocation5 + $0x68] sm:$0xff] %vm1941_vm7, %v1872_v24 }
 0x261   : > { %v1108_v32 = vpop.permute.xlu1 %1107  ;;  %v1870_v6 = vpop.permute.xlu0 %1869 }
 0x262   : > { %1187 = vst.msk [vmem:[#allocation5 + $0x88] sm:$0xff] %vm1169_vm3, %v1108_v32  ;;  %v11590_v32 = vld [vmem:[#allocation2 + $0x15a] sm:$0xff] }
 0x263   : > { %1954 = vst.msk [vmem:[#allocation5 + $0x60] sm:$0xff] %vm1941_vm7, %v1870_v6  ;;  %1509 = vrot.lane.b32.xlu1 %v11315_v44, %s10488_s26  ;;  %1700 = vrot.lane.b32.xlu0 %v11554_v46, %s10486_s24 }
 0x265   : > { %v1301_v15 = vpop.permute.xlu1 %1300  ;;  %v1106_v29 = vpop.permute.xlu0 %1105 }
 0x266   : > { %1380 = vst.msk [vmem:[#allocation5 + $0x88] sm:$0xff] %vm1362_vm4, %v1301_v15 }
 0x267   : > { %1186 = vst.msk [vmem:[#allocation5 + $0x80] sm:$0xff] %vm1169_vm3, %v1106_v29  ;;  %1131 = vrot.lane.b32.xlu1 %v11583_v62, %s10483_s28  ;;  %1893 = vrot.lane.b32.xlu0 %v11561_v20, %s10487_s25 }
 0x269   : > { %v1683_v6 = vpop.permute.xlu1 %1682  ;;  %v1299_v24 = vpop.permute.xlu0 %1298 }
 0x26a   : > { %1379 = vst.msk [vmem:[#allocation5 + $0x80] sm:$0xff] %vm1362_vm4, %v1299_v24 }
 0x26b   : > { %1324 = vrot.lane.b32.xlu1 %v11590_v32, %s14955_s29  ;;  %1129 = vrot.lane.b32.xlu0 %v11592_v11, %s10483_s28 }
 0x26d   : > { %v1876_v15 = vpop.permute.xlu1 %1875  ;;  %v1488_v29 = vpop.permute.xlu0 %1487 }
 0x26e   : > { %1570 = vst.msk [vmem:[#allocation5 + $0x70] sm:$0xff] %vm1555_vm5, %v1488_v29 }
 0x26f   : > { %1706 = vrot.lane.b32.xlu1 %v11583_v62, %s10486_s24  ;;  %1322 = vrot.lane.b32.xlu0 %v11599_v60, %s14955_s29 }
 0x271   : > { %v1490_v24 = vpop.permute.xlu1 %1489  ;;  %v1681_v1 = vpop.permute.xlu0 %1680 }
 0x272   : > { %1571 = vst.msk [vmem:[#allocation5 + $0x78] sm:$0xff] %vm1555_vm5, %v1490_v24  ;;  %v11621_v24 = vld [vmem:[#allocation2 + $0x171] sm:$0xff] }
 0x273   : > { %1763 = vst.msk [vmem:[#allocation5 + $0x70] sm:$0xff] %vm1748_vm6, %v1681_v1  ;;  %1764 = vst.msk [vmem:[#allocation5 + $0x78] sm:$0xff] %vm1748_vm6, %v1683_v6  ;;  %1899 = vrot.lane.b32.xlu1 %v11590_v32, %s10487_s25  ;;  %1511 = vrot.lane.b32.xlu0 %v11317_v38, %s10488_s26 }
 0x274   : > { %1957 = vst.msk [vmem:[#allocation5 + $0x78] sm:$0xff] %vm1941_vm7, %v1876_v15 }
 0x275   : > { %v1112_v29 = vpop.permute.xlu1 %1111  ;;  %v1874_v51 = vpop.permute.xlu0 %1873 }
 0x276   : > { %1189 = vst.msk [vmem:[#allocation5 + $0x98] sm:$0xff] %vm1169_vm3, %v1112_v29  ;;  %v11628_v29 = vld [vmem:[#allocation2 + $0x172] sm:$0xff] }
 0x277   : > { %1956 = vst.msk [vmem:[#allocation5 + $0x70] sm:$0xff] %vm1941_vm7, %v1874_v51  ;;  %1513 = vrot.lane.b32.xlu1 %v11328_v27, %s10488_s26  ;;  %1704 = vrot.lane.b32.xlu0 %v11592_v11, %s10486_s24 }
 0x279   : > { %v1305_v1 = vpop.permute.xlu1 %1304  ;;  %v1110_v6 = vpop.permute.xlu0 %1109 }
 0x27a   : > { %1382 = vst.msk [vmem:[#allocation5 + $0x98] sm:$0xff] %vm1362_vm4, %v1305_v1 }
 0x27b   : > { %1188 = vst.msk [vmem:[#allocation5 + $0x90] sm:$0xff] %vm1169_vm3, %v1110_v6  ;;  %1135 = vrot.lane.b32.xlu1 %v11621_v24, %s10483_s28  ;;  %1897 = vrot.lane.b32.xlu0 %v11599_v60, %s10487_s25 }
 0x27d   : > { %v1687_v51 = vpop.permute.xlu1 %1686  ;;  %v1303_v15 = vpop.permute.xlu0 %1302 }
 0x27e   : > { %1381 = vst.msk [vmem:[#allocation5 + $0x90] sm:$0xff] %vm1362_vm4, %v1303_v15 }
 0x27f   : > { %1328 = vrot.lane.b32.xlu1 %v11628_v29, %s14955_s29  ;;  %1133 = vrot.lane.b32.xlu0 %v11630_v56, %s10483_s28 }
 0x281   : > { %v1880_v1 = vpop.permute.xlu1 %1879  ;;  %v1492_v6 = vpop.permute.xlu0 %1491 }
 0x282   : > { %1572 = vst.msk [vmem:[#allocation5 + $0x80] sm:$0xff] %vm1555_vm5, %v1492_v6 }
 0x283   : > { %1710 = vrot.lane.b32.xlu1 %v11621_v24, %s10486_s24  ;;  %1326 = vrot.lane.b32.xlu0 %v11637_v43, %s14955_s29 }
 0x285   : > { %v1494_v15 = vpop.permute.xlu1 %1493  ;;  %v1685_v47 = vpop.permute.xlu0 %1684 }
 0x286   : > { %1573 = vst.msk [vmem:[#allocation5 + $0x88] sm:$0xff] %vm1555_vm5, %v1494_v15  ;;  %v11659_v15 = vld [vmem:[#allocation2 + $0x189] sm:$0xff] }
 0x287   : > { %1765 = vst.msk [vmem:[#allocation5 + $0x80] sm:$0xff] %vm1748_vm6, %v1685_v47  ;;  %1766 = vst.msk [vmem:[#allocation5 + $0x88] sm:$0xff] %vm1748_vm6, %v1687_v51  ;;  %1903 = vrot.lane.b32.xlu1 %v11628_v29, %s10487_s25  ;;  %1515 = vrot.lane.b32.xlu0 %v11330_v57, %s10488_s26 }
 0x288   : > { %1959 = vst.msk [vmem:[#allocation5 + $0x88] sm:$0xff] %vm1941_vm7, %v1880_v1 }
 0x289   : > { %v1116_v6 = vpop.permute.xlu1 %1115  ;;  %v1878_v37 = vpop.permute.xlu0 %1877 }
 0x28a   : > { %1191 = vst.msk [vmem:[#allocation5 + $0xa8] sm:$0xff] %vm1169_vm3, %v1116_v6  ;;  %v11666_v6 = vld [vmem:[#allocation2 + $0x18a] sm:$0xff] }
 0x28b   : > { %1958 = vst.msk [vmem:[#allocation5 + $0x80] sm:$0xff] %vm1941_vm7, %v1878_v37  ;;  %1517 = vrot.lane.b32.xlu1 %v11339_v42, %s10488_s26  ;;  %1708 = vrot.lane.b32.xlu0 %v11630_v56, %s10486_s24 }
 0x28d   : > { %v1309_v47 = vpop.permute.xlu1 %1308  ;;  %v1114_v51 = vpop.permute.xlu0 %1113 }
 0x28e   : > { %1384 = vst.msk [vmem:[#allocation5 + $0xa8] sm:$0xff] %vm1362_vm4, %v1309_v47 }
 0x28f   : > { %1190 = vst.msk [vmem:[#allocation5 + $0xa0] sm:$0xff] %vm1169_vm3, %v1114_v51  ;;  %1714 = vrot.lane.b32.xlu1 %v11659_v15, %s10486_s24  ;;  %1901 = vrot.lane.b32.xlu0 %v11637_v43, %s10487_s25 }
 0x291   : > { %v1691_v37 = vpop.permute.xlu1 %1690  ;;  %v1307_v1 = vpop.permute.xlu0 %1306 }
 0x292   : > { %1383 = vst.msk [vmem:[#allocation5 + $0xa0] sm:$0xff] %vm1362_vm4, %v1307_v1 }
 0x293   : > { %1907 = vrot.lane.b32.xlu1 %v11666_v6, %s10487_s25  ;;  %1519 = vrot.lane.b32.xlu0 %v11668_v40, %s10488_s26 }
 0x295   : > { %v1884_v47 = vpop.permute.xlu1 %1883  ;;  %v1496_v51 = vpop.permute.xlu0 %1495 }
 0x296   : > { %1574 = vst.msk [vmem:[#allocation5 + $0x90] sm:$0xff] %vm1555_vm5, %v1496_v51 }
 0x297   : > { %1521 = vrot.lane.b32.xlu1 %v11675_v31, %s10488_s26  ;;  %1712 = vrot.lane.b32.xlu0 %v11677_v34, %s10486_s24 }
 0x299   : > { %v1498_v1 = vpop.permute.xlu1 %1497  ;;  %v1689_v25 = vpop.permute.xlu0 %1688 }
 0x29a   : > { %1575 = vst.msk [vmem:[#allocation5 + $0x98] sm:$0xff] %vm1555_vm5, %v1498_v1  ;;  %v1979_v1 = vld [vmem:[#allocation2 + $0x60] sm:$0xff] }
 0x29b   : > { %1767 = vst.msk [vmem:[#allocation5 + $0x90] sm:$0xff] %vm1748_vm6, %v1689_v25  ;;  %1768 = vst.msk [vmem:[#allocation5 + $0x98] sm:$0xff] %vm1748_vm6, %v1691_v37  ;;  %2049 = vrot.lane.b32.xlu1 %v1980_v28, %s10489_s27  ;;  %1905 = vrot.lane.b32.xlu0 %v11685_v19, %s10487_s25 }
 0x29c   : > { %1961 = vst.msk [vmem:[#allocation5 + $0x98] sm:$0xff] %vm1941_vm7, %v1884_v47 }
 0x29d   : > { %v1120_v51 = vpop.permute.xlu1 %1119  ;;  %v1882_v22 = vpop.permute.xlu0 %1881 }
 0x29e   : > { %1193 = vst.msk [vmem:[#allocation5 + $0xb8] sm:$0xff] %vm1169_vm3, %v1120_v51 }
 0x29f   : > { %1960 = vst.msk [vmem:[#allocation5 + $0x90] sm:$0xff] %vm1941_vm7, %v1882_v22  ;;  %2053 = vrot.lane.b32.xlu1 %v11215_v26, %s10489_s27  ;;  %2047 = vrot.lane.b32.xlu0 %v1979_v1, %s10489_s27 }
 0x2a1   : > { %v1313_v25 = vpop.permute.xlu1 %1312  ;;  %v1118_v37 = vpop.permute.xlu0 %1117 }
 0x2a2   : > { %1386 = vst.msk [vmem:[#allocation5 + $0xb8] sm:$0xff] %vm1362_vm4, %v1313_v25  ;;  %v2169_v25 = vld [vmem:[#allocation2 + $0x39] sm:$0xff] }
 0x2a3   : > { %1192 = vst.msk [vmem:[#allocation5 + $0xb0] sm:$0xff] %vm1169_vm3, %v1118_v37  ;;  %2057 = vrot.lane.b32.xlu1 %v11227_v36, %s10489_s27  ;;  %2051 = vrot.lane.b32.xlu0 %v11205_v21, %s10489_s27  ;;  %v2171_v37 = vld [vmem:[#allocation2 + $0x51] sm:$0xff] }
 0x2a5   : > { %v1695_v28 = vpop.permute.xlu1 %1694  ;;  %v1311_v22 = vpop.permute.xlu0 %1310 }
 0x2a6   : > { %1385 = vst.msk [vmem:[#allocation5 + $0xb0] sm:$0xff] %vm1362_vm4, %v1311_v22 }
 0x2a7   : > { %2061 = vrot.lane.b32.xlu1 %v11239_v45, %s10489_s27  ;;  %2055 = vrot.lane.b32.xlu0 %v11217_v30, %s10489_s27 }
 0x2a9   : > { %v1888_v26 = vpop.permute.xlu1 %1887  ;;  %v1500_v47 = vpop.permute.xlu0 %1499 }
 0x2aa   : > { %1576 = vst.msk [vmem:[#allocation5 + $0xa0] sm:$0xff] %vm1555_vm5, %v1500_v47  ;;  %v2170_v47 = vld [vmem:[#allocation2 + $0x49] sm:$0xff] }
 0x2ab   : > { %2065 = vrot.lane.b32.xlu1 %v11252_v53, %s10489_s27  ;;  %2059 = vrot.lane.b32.xlu0 %v11229_v39, %s10489_s27 }
 0x2ad   : > { %v1502_v21 = vpop.permute.xlu1 %1501  ;;  %v1693_v36 = vpop.permute.xlu0 %1692 }
 0x2ae   : > { %1577 = vst.msk [vmem:[#allocation5 + $0xa8] sm:$0xff] %vm1555_vm5, %v1502_v21 }
 0x2af   : > { %1769 = vst.msk [vmem:[#allocation5 + $0xa0] sm:$0xff] %vm1748_vm6, %v1693_v36  ;;  %1770 = vst.msk [vmem:[#allocation5 + $0xa8] sm:$0xff] %vm1748_vm6, %v1695_v28  ;;  %2069 = vrot.lane.b32.xlu1 %v11265_v8, %s10489_s27  ;;  %2063 = vrot.lane.b32.xlu0 %v11241_v48, %s10489_s27  ;;  %v2168_v28 = vld [vmem:[#allocation2 + $0x31] sm:$0xff] }
 0x2b0   : > { %1963 = vst.msk [vmem:[#allocation5 + $0xa8] sm:$0xff] %vm1941_vm7, %v1888_v26  ;;  %v2173_v26 = vld [vmem:[#allocation2 + $0x69] sm:$0xff] }
 0x2b1   : > { %v1124_v30 = vpop.permute.xlu1 %1123  ;;  %v1886_v45 = vpop.permute.xlu0 %1885 }
 0x2b2   : > { %1195 = vst.msk [vmem:[#allocation5 + $0xc8] sm:$0xff] %vm1169_vm3, %v1124_v30  ;;  %v2175_v30 = vld [vmem:[#allocation2 + $0x81] sm:$0xff] }
 0x2b3   : > { %1962 = vst.msk [vmem:[#allocation5 + $0xa0] sm:$0xff] %vm1941_vm7, %v1886_v45  ;;  %2073 = vrot.lane.b32.xlu1 %v11278_v23, %s10489_s27  ;;  %2067 = vrot.lane.b32.xlu0 %v11254_v63, %s10489_s27  ;;  %v2172_v45 = vld [vmem:[#allocation2 + $0x61] sm:$0xff] }
 0x2b5   : > { %v1317_v39 = vpop.permute.xlu1 %1316  ;;  %v1122_v53 = vpop.permute.xlu0 %1121 }
 0x2b6   : > { %1388 = vst.msk [vmem:[#allocation5 + $0xc8] sm:$0xff] %vm1362_vm4, %v1317_v39 }
 0x2b7   : > { %1194 = vst.msk [vmem:[#allocation5 + $0xc0] sm:$0xff] %vm1169_vm3, %v1122_v53  ;;  %2077 = vrot.lane.b32.xlu1 %v11291_v59, %s10489_s27  ;;  %2071 = vrot.lane.b32.xlu0 %v11267_v17, %s10489_s27 }
 0x2b9   : > { %v1699_v48 = vpop.permute.xlu1 %1698  ;;  %v1315_v8 = vpop.permute.xlu0 %1314 }
 0x2ba   : > { %1387 = vst.msk [vmem:[#allocation5 + $0xc0] sm:$0xff] %vm1362_vm4, %v1315_v8  ;;  %v2174_v8 = vld [vmem:[#allocation2 + $0x79] sm:$0xff] }
 0x2bb   : > { %2081 = vrot.lane.b32.xlu1 %v11303_v54, %s10489_s27  ;;  %2075 = vrot.lane.b32.xlu0 %v11280_v33, %s10489_s27 }
 0x2bd   : > { %v1892_v63 = vpop.permute.xlu1 %1891  ;;  %v1504_v23 = vpop.permute.xlu0 %1503 }
 0x2be   : > { %1578 = vst.msk [vmem:[#allocation5 + $0xb0] sm:$0xff] %vm1555_vm5, %v1504_v23 }
 0x2bf   : > { %2085 = vrot.lane.b32.xlu1 %v11315_v44, %s10489_s27  ;;  %2079 = vrot.lane.b32.xlu0 %v11293_v41, %s10489_s27 }
 0x2c1   : > { %v1506_v17 = vpop.permute.xlu1 %1505  ;;  %v1697_v59 = vpop.permute.xlu0 %1696 }
 0x2c2   : > { %1579 = vst.msk [vmem:[#allocation5 + $0xb8] sm:$0xff] %vm1555_vm5, %v1506_v17  ;;  %v2179_v17 = vld [vmem:[#allocation2 + $0xb1] sm:$0xff] }
 0x2c3   : > { %1771 = vst.msk [vmem:[#allocation5 + $0xb0] sm:$0xff] %vm1748_vm6, %v1697_v59  ;;  %1772 = vst.msk [vmem:[#allocation5 + $0xb8] sm:$0xff] %vm1748_vm6, %v1699_v48  ;;  %2089 = vrot.lane.b32.xlu1 %v11328_v27, %s10489_s27  ;;  %2083 = vrot.lane.b32.xlu0 %v11305_v3, %s10489_s27  ;;  %v2006_v3 = vld [vmem:[#allocation2 + $0x1a0] sm:$0xff]  ;;  %v2176_v59 = vld [vmem:[#allocation2 + $0x91] sm:$0xff] }
 0x2c4   : > { %1965 = vst.msk [vmem:[#allocation5 + $0xb8] sm:$0xff] %vm1941_vm7, %v1892_v63  ;;  %v2177_v48 = vld [vmem:[#allocation2 + $0x99] sm:$0xff] }
 0x2c5   : > { %v1128_v33 = vpop.permute.xlu1 %1127  ;;  %v1890_v54 = vpop.permute.xlu0 %1889 }
 0x2c6   : > { %1197 = vst.msk [vmem:[#allocation5 + $0xd8] sm:$0xff] %vm1169_vm3, %v1128_v33 }
 0x2c7   : > { %1964 = vst.msk [vmem:[#allocation5 + $0xb0] sm:$0xff] %vm1941_vm7, %v1890_v54  ;;  %2093 = vrot.lane.b32.xlu1 %v11339_v42, %s10489_s27  ;;  %2087 = vrot.lane.b32.xlu0 %v11317_v38, %s10489_s27  ;;  %v2005_v38 = vld [vmem:[#allocation2 + $0x198] sm:$0xff] }
 0x2c9   : > { %v1321_v41 = vpop.permute.xlu1 %1320  ;;  %v1126_v44 = vpop.permute.xlu0 %1125 }
 0x2ca   : > { %1390 = vst.msk [vmem:[#allocation5 + $0xd8] sm:$0xff] %vm1362_vm4, %v1321_v41  ;;  %v2181_v41 = vld [vmem:[#allocation2 + $0xc9] sm:$0xff] }
 0x2cb   : > { %1196 = vst.msk [vmem:[#allocation5 + $0xd0] sm:$0xff] %vm1169_vm3, %v1126_v44  ;;  %2097 = vrot.lane.b32.xlu1 %v11675_v31, %s10489_s27  ;;  %2091 = vrot.lane.b32.xlu0 %v11330_v57, %s10489_s27  ;;  %v2178_v44 = vld [vmem:[#allocation2 + $0xa9] sm:$0xff] }
 0x2cd   : > { %v1703_v27 = vpop.permute.xlu1 %1702  ;;  %v1319_v51 = vpop.permute.xlu0 %1318 }
 0x2ce   : > { %1389 = vst.msk [vmem:[#allocation5 + $0xd0] sm:$0xff] %vm1362_vm4, %v1319_v51  ;;  %v2183_v51 = vld [vmem:[#allocation2 + $0xe1] sm:$0xff] }
 0x2cf   : > { %2101 = vrot.lane.b32.xlu1 %v2006_v3, %s10489_s27  ;;  %2095 = vrot.lane.b32.xlu0 %v11668_v40, %s10489_s27 }
 0x2d1   : > { %v1896_v42 = vpop.permute.xlu1 %1895  ;;  %v1508_v1 = vpop.permute.xlu0 %1507 }
 0x2d2   : > { %1580 = vst.msk [vmem:[#allocation5 + $0xc0] sm:$0xff] %vm1555_vm5, %v1508_v1 }
 0x2d3   : > { %2234 = vrot.lane.b32.xlu1 %v2169_v25, %s10490_s16  ;;  %2099 = vrot.lane.b32.xlu0 %v2005_v38, %s10489_s27  ;;  %v2180_v38 = vld [vmem:[#allocation2 + $0xc1] sm:$0xff]  ;;  %v2182_v25 = vld [vmem:[#allocation2 + $0xd9] sm:$0xff] }
 0x2d5   : > { %v1510_v31 = vpop.permute.xlu1 %1509  ;;  %v1701_v57 = vpop.permute.xlu0 %1700 }
 0x2d6   : > { %1581 = vst.msk [vmem:[#allocation5 + $0xc8] sm:$0xff] %vm1555_vm5, %v1510_v31 }
 0x2d7   : > { %1773 = vst.msk [vmem:[#allocation5 + $0xc0] sm:$0xff] %vm1748_vm6, %v1701_v57  ;;  %1774 = vst.msk [vmem:[#allocation5 + $0xc8] sm:$0xff] %vm1748_vm6, %v1703_v27  ;;  %2238 = vrot.lane.b32.xlu1 %v2171_v37, %s10490_s16  ;;  %2232 = vrot.lane.b32.xlu0 %v2168_v28, %s10490_s16 }
 0x2d8   : > { %1967 = vst.msk [vmem:[#allocation5 + $0xc8] sm:$0xff] %vm1941_vm7, %v1896_v42 }
 0x2d9   : > { %v1132_v40 = vpop.permute.xlu1 %1131  ;;  %v1894_v22 = vpop.permute.xlu0 %1893 }
 0x2da   : > { %1199 = vst.msk [vmem:[#allocation5 + $0xe8] sm:$0xff] %vm1169_vm3, %v1132_v40 }
 0x2db   : > { %1966 = vst.msk [vmem:[#allocation5 + $0xc0] sm:$0xff] %vm1941_vm7, %v1894_v22  ;;  %2242 = vrot.lane.b32.xlu1 %v2173_v26, %s10490_s16  ;;  %2236 = vrot.lane.b32.xlu0 %v2170_v47, %s10490_s16 }
 0x2dd   : > { %v1325_v21 = vpop.permute.xlu1 %1324  ;;  %v1130_v36 = vpop.permute.xlu0 %1129 }
 0x2de   : > { %1392 = vst.msk [vmem:[#allocation5 + $0xe8] sm:$0xff] %vm1362_vm4, %v1325_v21 }
 0x2df   : > { %1198 = vst.msk [vmem:[#allocation5 + $0xe0] sm:$0xff] %vm1169_vm3, %v1130_v36  ;;  %2246 = vrot.lane.b32.xlu1 %v2175_v30, %s10490_s16  ;;  %2240 = vrot.lane.b32.xlu0 %v2172_v45, %s10490_s16  ;;  %v2586_v36 = vld [vmem:[%s14924_s3] sm:$0xff] }
 0x2e0   : > { %v2362_v30 = vld [vmem:[#allocation2 + $0x3a] sm:$0xff] }
 0x2e1   : > { %v1707_v39 = vpop.permute.xlu1 %1706  ;;  %v1323_v53 = vpop.permute.xlu0 %1322 }
 0x2e2   : > { %1391 = vst.msk [vmem:[#allocation5 + $0xe0] sm:$0xff] %vm1362_vm4, %v1323_v53  ;;  %v2361_v53 = vld [vmem:[#allocation2 + $0x32] sm:$0xff] }
 0x2e3   : > { %2250 = vrot.lane.b32.xlu1 %v2177_v48, %s10490_s16  ;;  %2244 = vrot.lane.b32.xlu0 %v2174_v8, %s10490_s16 }
 0x2e5   : > { %v1900_v63 = vpop.permute.xlu1 %1899  ;;  %v1512_v23 = vpop.permute.xlu0 %1511 }
 0x2e6   : > { %1582 = vst.msk [vmem:[#allocation5 + $0xd0] sm:$0xff] %vm1555_vm5, %v1512_v23  ;;  %v2363_v23 = vld [vmem:[#allocation2 + $0x4a] sm:$0xff] }
 0x2e7   : > { %2254 = vrot.lane.b32.xlu1 %v2179_v17, %s10490_s16  ;;  %2248 = vrot.lane.b32.xlu0 %v2176_v59, %s10490_s16 }
 0x2e9   : > { %v1514_v33 = vpop.permute.xlu1 %1513  ;;  %v1705_v54 = vpop.permute.xlu0 %1704 }
 0x2ea   : > { %1583 = vst.msk [vmem:[#allocation5 + $0xd8] sm:$0xff] %vm1555_vm5, %v1514_v33  ;;  %v2368_v33 = vld [vmem:[#allocation2 + $0x82] sm:$0xff] }
 0x2eb   : > { %1775 = vst.msk [vmem:[#allocation5 + $0xd0] sm:$0xff] %vm1748_vm6, %v1705_v54  ;;  %1776 = vst.msk [vmem:[#allocation5 + $0xd8] sm:$0xff] %vm1748_vm6, %v1707_v39  ;;  %2258 = vrot.lane.b32.xlu1 %v2181_v41, %s10490_s16  ;;  %2252 = vrot.lane.b32.xlu0 %v2178_v44, %s10490_s16  ;;  %v2364_v39 = vld [vmem:[#allocation2 + $0x52] sm:$0xff]  ;;  %v2365_v54 = vld [vmem:[#allocation2 + $0x62] sm:$0xff] }
 0x2ec   : > { %1969 = vst.msk [vmem:[#allocation5 + $0xd8] sm:$0xff] %vm1941_vm7, %v1900_v63  ;;  %v2366_v63 = vld [vmem:[#allocation2 + $0x6a] sm:$0xff] }
 0x2ed   : > { %v1136_v3 = vpop.permute.xlu1 %1135  ;;  %v1898_v27 = vpop.permute.xlu0 %1897 }
 0x2ee   : > { %1201 = vst.msk [vmem:[#allocation5 + $0xf8] sm:$0xff] %vm1169_vm3, %v1136_v3  ;;  %v2370_v3 = vld [vmem:[#allocation2 + $0x9a] sm:$0xff] }
 0x2ef   : > { %1968 = vst.msk [vmem:[#allocation5 + $0xd0] sm:$0xff] %vm1941_vm7, %v1898_v27  ;;  %2262 = vrot.lane.b32.xlu1 %v2183_v51, %s10490_s16  ;;  %2256 = vrot.lane.b32.xlu0 %v2180_v38, %s10490_s16  ;;  %v2367_v27 = vld [vmem:[#allocation2 + $0x7a] sm:$0xff] }
 0x2f1   : > { %v1329_v42 = vpop.permute.xlu1 %1328  ;;  %v1134_v1 = vpop.permute.xlu0 %1133 }
 0x2f2   : > { %1394 = vst.msk [vmem:[#allocation5 + $0xf8] sm:$0xff] %vm1362_vm4, %v1329_v42  ;;  %v2372_v42 = vld [vmem:[#allocation2 + $0xb2] sm:$0xff] }
 0x2f3   : > { %1200 = vst.msk [vmem:[#allocation5 + $0xf0] sm:$0xff] %vm1169_vm3, %v1134_v1  ;;  %2266 = vrot.lane.b32.xlu1 %v11456_v5, %s10490_s16  ;;  %2260 = vrot.lane.b32.xlu0 %v2182_v25, %s10490_s16  ;;  %v2369_v1 = vld [vmem:[#allocation2 + $0x92] sm:$0xff]  ;;  %vm3949_vm3 = vcmask 80960  }
 0x2f5   : > { %v1711_v31 = vpop.permute.xlu1 %1710  ;;  %v1327_v57 = vpop.permute.xlu0 %1326 }
 0x2f6   : > { %1393 = vst.msk [vmem:[#allocation5 + $0xf0] sm:$0xff] %vm1362_vm4, %v1327_v57  ;;  %v2374_v57 = vld [vmem:[#allocation2 + $0xca] sm:$0xff]  ;;  %vm4143_vm4 = vcmask 97360  }
 0x2f7   : > { %2270 = vrot.lane.b32.xlu1 %v11486_v18, %s10490_s16  ;;  %2264 = vrot.lane.b32.xlu0 %v11462_v9, %s10490_s16 }
 0x2f9   : > { %v1904_v37 = vpop.permute.xlu1 %1903  ;;  %v1516_v28 = vpop.permute.xlu0 %1515 }
 0x2fa   : > { %1584 = vst.msk [vmem:[#allocation5 + $0xe0] sm:$0xff] %vm1555_vm5, %v1516_v28 }
 0x2fb   : > { %2274 = vrot.lane.b32.xlu1 %v11516_v2, %s10490_s16  ;;  %2268 = vrot.lane.b32.xlu0 %v11492_v14, %s10490_s16 }
 0x2fd   : > { %v1518_v5 = vpop.permute.xlu1 %1517  ;;  %v1709_v40 = vpop.permute.xlu0 %1708 }
 0x2fe   : > { %1585 = vst.msk [vmem:[#allocation5 + $0xe8] sm:$0xff] %vm1555_vm5, %v1518_v5 }
 0x2ff   : > { %1777 = vst.msk [vmem:[#allocation5 + $0xe0] sm:$0xff] %vm1748_vm6, %v1709_v40  ;;  %1778 = vst.msk [vmem:[#allocation5 + $0xe8] sm:$0xff] %vm1748_vm6, %v1711_v31  ;;  %2278 = vrot.lane.b32.xlu1 %v11546_v50, %s10490_s16  ;;  %2272 = vrot.lane.b32.xlu0 %v11522_v35, %s10490_s16  ;;  %v2590_v35 = vld [vmem:[%s14924_s3 + $0x20] sm:$0xf] }
 0x300   : > { %1971 = vst.msk [vmem:[#allocation5 + $0xe8] sm:$0xff] %vm1941_vm7, %v1904_v37  ;;  %10176 = vmatprep.subr.msk.mxu1 %vm468_vm0, %v2590_v35  ;;  %v2371_v37 = vld [vmem:[#allocation2 + $0xaa] sm:$0xff]  ;;  %v2376_v40 = vld [vmem:[#allocation2 + $0xe2] sm:$0xff] }
 0x301   : > { %v1715_v9 = vpop.permute.xlu1 %1714  ;;  %v1902_v18 = vpop.permute.xlu0 %1901  ;;  %10177 = vmatpush3.msk.msra.mxu1 %vm468_vm0, %v2590_v35  ;;  %v2375_v35 = vld [vmem:[#allocation2 + $0xda] sm:$0xff] }
 0x302   : > { %1970 = vst.msk [vmem:[#allocation5 + $0xe0] sm:$0xff] %vm1941_vm7, %v1902_v18 }
 0x303   : > { %2282 = vrot.lane.b32.xlu1 %v11583_v62, %s10490_s16  ;;  %2276 = vrot.lane.b32.xlu0 %v11554_v46, %s10490_s16  ;;  %v2589_v46 = vld [vmem:[%s14924_s3 + $0x18] sm:$0xff] }
 0x304   : > { %10178 = vmatprep.subr.mxu1 %v2589_v46 }
 0x305   : > { %v1908_v14 = vpop.permute.xlu1 %1907  ;;  %v1520_v2 = vpop.permute.xlu0 %1519  ;;  %10179 = vmatpush3.msra.mxu1 %v2589_v46  ;;  %v2380_v46 = vld [vmem:[#allocation2 + $0x112] sm:$0xff] }
 0x306   : > { %1586 = vst.msk [vmem:[#allocation5 + $0xf0] sm:$0xff] %vm1555_vm5, %v1520_v2  ;;  %v2378_v2 = vld [vmem:[#allocation2 + $0xfa] sm:$0xff] }
 0x307   : > { %2286 = vrot.lane.b32.xlu1 %v11621_v24, %s10490_s16  ;;  %2280 = vrot.lane.b32.xlu0 %v11592_v11, %s10490_s16  ;;  %v2588_v11 = vld [vmem:[%s14924_s3 + $0x10] sm:$0xff]  ;;  %v2199_v24 = vld [vmem:[#allocation2 + $0x1a1] sm:$0xff] }
 0x308   : > { %10180 = vmatprep.subr.mxu1 %v2588_v11 }
 0x309   : > { %v1522_v50 = vpop.permute.xlu1 %1521  ;;  %v1713_v62 = vpop.permute.xlu0 %1712  ;;  %10181 = vmatpush3.msra.mxu1 %v2588_v11  ;;  %v2377_v11 = vld [vmem:[#allocation2 + $0xf2] sm:$0xff] }
 0x30a   : > { %1587 = vst.msk [vmem:[#allocation5 + $0xf8] sm:$0xff] %vm1555_vm5, %v1522_v50 }
 0x30b   : > { %1779 = vst.msk [vmem:[#allocation5 + $0xf0] sm:$0xff] %vm1748_vm6, %v1713_v62  ;;  %1780 = vst.msk [vmem:[#allocation5 + $0xf8] sm:$0xff] %vm1748_vm6, %v1715_v9  ;;  %2290 = vrot.lane.b32.xlu1 %v11659_v15, %s10490_s16  ;;  %2284 = vrot.lane.b32.xlu0 %v11630_v56, %s10490_s16  ;;  %v2587_v56 = vld [vmem:[%s14924_s3 + $0x8] sm:$0xff]  ;;  %v2198_v15 = vld [vmem:[#allocation2 + $0x199] sm:$0xff] }
 0x30c   : > { %1973 = vst.msk [vmem:[#allocation5 + $0xf8] sm:$0xff] %vm1941_vm7, %v1908_v14  ;;  %10182 = vmatprep.subr.mxu1 %v2587_v56  ;;  %v2373_v9 = vld [vmem:[#allocation2 + $0xc2] sm:$0xff] }
 0x30d   : > { %v2050_v22 = vpop.permute.xlu1 %2049  ;;  %v1906_v26 = vpop.permute.xlu0 %1905  ;;  %10183 = vmatpush3.msra.mxu1 %v2587_v56  ;;  %v2379_v56 = vld [vmem:[#allocation2 + $0x10a] sm:$0xff] }
 0x30e   : > { %2141 = vst.msk [vmem:[#allocation5 + $0x28] sm:$0xff] %vm2135_vm8, %v2050_v22  ;;  %10184 = vmatprep.subr.mxu1 %v2586_v36 }
 0x30f   : > { %1972 = vst.msk [vmem:[#allocation5 + $0xf0] sm:$0xff] %vm1941_vm7, %v1906_v26  ;;  %2294 = vrot.lane.b32.xlu1 %v2199_v24, %s10490_s16  ;;  %2288 = vrot.lane.b32.xlu0 %v11677_v34, %s10490_s16  ;;  %v2382_v26 = vld [vmem:[#allocation2 + $0x12a] sm:$0xff]  ;;  %vm4336_vm7 = vcmask 113760  }
 0x310   : > { %10185 = vmatpush3.msra.mxu1 %v2586_v36 }
 0x311   : > { %v2054_v47 = vpop.permute.xlu1 %2053  ;;  %v2048_v21 = vpop.permute.xlu0 %2047 }
 0x312   : > { %2143 = vst.msk [vmem:[#allocation5 + $0x38] sm:$0xff] %vm2135_vm8, %v2054_v47  ;;  %2140 = vst.msk [vmem:[#allocation5 + $0x20] sm:$0xff] %vm2135_vm8, %v2048_v21  ;;  %v2381_v21 = vld [vmem:[#allocation2 + $0x122] sm:$0xff] }
 0x313   : > { %2427 = vrot.lane.b32.xlu1 %v2362_v30, %s10491_s14  ;;  %2292 = vrot.lane.b32.xlu0 %v2198_v15, %s10490_s16 }
 0x315   : > { %v2058_v34 = vpop.permute.xlu1 %2057  ;;  %v2052_v45 = vpop.permute.xlu0 %2051 }
 0x316   : > { %2145 = vst.msk [vmem:[#allocation5 + $0x48] sm:$0xff] %vm2135_vm8, %v2058_v34  ;;  %2142 = vst.msk [vmem:[#allocation5 + $0x30] sm:$0xff] %vm2135_vm8, %v2052_v45  ;;  %v14979_v34 = vmov 0.0  }
 0x317   : > { %2431 = vrot.lane.b32.xlu1 %v2364_v39, %s10491_s14  ;;  %2425 = vrot.lane.b32.xlu0 %v2361_v53, %s10491_s14  ;;  %2964 = vst.msk [vmem:[#allocation3 + $0x38] sm:$0xff] %vm2955_vm9, %v14979_v34  ;;  %2956 = vst.msk [vmem:[#allocation3] sm:$0xff] %vm2955_vm9, %v14979_v34  ;;  %v2392_v39 = vld [vmem:[#allocation2 + $0x1a2] sm:$0xff] }
 0x318   : > { %2965 = vst.msk [vmem:[#allocation3 + $0x40] sm:$0xf] %vm2958_vm10, %v14979_v34  ;;  %2959 = vst.msk [vmem:[#allocation3 + $0x10] sm:$0xf] %vm2958_vm10, %v14979_v34 }
 0x319   : > { %v2062_v48 = vpop.permute.xlu1 %2061  ;;  %v2056_v8 = vpop.permute.xlu0 %2055  ;;  %2957 = vst.msk [vmem:[#allocation3 + $0x8] sm:$0xff] %vm2955_vm9, %v14979_v34  ;;  %2960 = vst.msk [vmem:[#allocation3 + $0x18] sm:$0xff] %vm2955_vm9, %v14979_v34 }
 0x31a   : > { %2147 = vst.msk [vmem:[#allocation5 + $0x58] sm:$0xff] %vm2135_vm8, %v2062_v48  ;;  %2144 = vst.msk [vmem:[#allocation5 + $0x40] sm:$0xff] %vm2135_vm8, %v2056_v8 }
 0x31b   : > { %2435 = vrot.lane.b32.xlu1 %v2366_v63, %s10491_s14  ;;  %2429 = vrot.lane.b32.xlu0 %v2363_v23, %s10491_s14  ;;  %2961 = vst.msk [vmem:[#allocation3 + $0x20] sm:$0xff] %vm2955_vm9, %v14979_v34  ;;  %2963 = vst.msk [vmem:[#allocation3 + $0x30] sm:$0xff] %vm2955_vm9, %v14979_v34 }
 0x31c   : > { %2962 = vst.msk [vmem:[#allocation3 + $0x28] sm:$0xf] %vm2958_vm10, %v14979_v34  ;;  %2968 = vst.msk [vmem:[#allocation3 + $0x58] sm:$0xf] %vm2958_vm10, %v14979_v34 }
 0x31d   : > { %v2066_v17 = vpop.permute.xlu1 %2065  ;;  %v2060_v59 = vpop.permute.xlu0 %2059  ;;  %2966 = vst.msk [vmem:[#allocation3 + $0x48] sm:$0xff] %vm2955_vm9, %v14979_v34  ;;  %2967 = vst.msk [vmem:[#allocation3 + $0x50] sm:$0xff] %vm2955_vm9, %v14979_v34 }
 0x31e   : > { %2149 = vst.msk [vmem:[#allocation5 + $0x68] sm:$0xff] %vm2135_vm8, %v2066_v17  ;;  %2146 = vst.msk [vmem:[#allocation5 + $0x50] sm:$0xff] %vm2135_vm8, %v2060_v59 }
 0x31f   : > { %2439 = vrot.lane.b32.xlu1 %v2368_v33, %s10491_s14  ;;  %2433 = vrot.lane.b32.xlu0 %v2365_v54, %s10491_s14  ;;  %2969 = vst.msk [vmem:[#allocation3 + $0x60] sm:$0xff] %vm2955_vm9, %v14979_v34  ;;  %2970 = vst.msk [vmem:[#allocation3 + $0x68] sm:$0xff] %vm2955_vm9, %v14979_v34 }
 0x320   : > { %2971 = vst.msk [vmem:[#allocation3 + $0x70] sm:$0xf] %vm2958_vm10, %v14979_v34  ;;  %2974 = vst.msk [vmem:[#allocation3 + $0x88] sm:$0xf] %vm2958_vm10, %v14979_v34 }
 0x321   : > { %v2070_v41 = vpop.permute.xlu1 %2069  ;;  %v2064_v44 = vpop.permute.xlu0 %2063  ;;  %2972 = vst.msk [vmem:[#allocation3 + $0x78] sm:$0xff] %vm2955_vm9, %v14979_v34  ;;  %2973 = vst.msk [vmem:[#allocation3 + $0x80] sm:$0xff] %vm2955_vm9, %v14979_v34 }
 0x322   : > { %2151 = vst.msk [vmem:[#allocation5 + $0x78] sm:$0xff] %vm2135_vm8, %v2070_v41  ;;  %2148 = vst.msk [vmem:[#allocation5 + $0x60] sm:$0xff] %vm2135_vm8, %v2064_v44  ;;  %v14984_v41 = vld [vmem:[#allocation15_spill] sm:$0xff]  ;;  %v14985_v44 = vld [vmem:[#allocation14_spill] sm:$0xff] }
 0x323   : > { %2443 = vrot.lane.b32.xlu1 %v2370_v3, %s10491_s14  ;;  %2437 = vrot.lane.b32.xlu0 %v2367_v27, %s10491_s14  ;;  %2975 = vst.msk [vmem:[#allocation3 + $0x90] sm:$0xff] %vm2955_vm9, %v14979_v34  ;;  %2976 = vst.msk [vmem:[#allocation3 + $0x98] sm:$0xff] %vm2955_vm9, %v14979_v34 }
 0x324   : > { %2977 = vst.msk [vmem:[#allocation3 + $0xa0] sm:$0xf] %vm2958_vm10, %v14979_v34  ;;  %2980 = vst.msk [vmem:[#allocation3 + $0xb8] sm:$0xf] %vm2958_vm10, %v14979_v34 }
 0x325   : > { %v2074_v51 = vpop.permute.xlu1 %2073  ;;  %v2068_v38 = vpop.permute.xlu0 %2067  ;;  %2978 = vst.msk [vmem:[#allocation3 + $0xa8] sm:$0xff] %vm2955_vm9, %v14979_v34  ;;  %2979 = vst.msk [vmem:[#allocation3 + $0xb0] sm:$0xff] %vm2955_vm9, %v14979_v34 }
 0x326   : > { %2153 = vst.msk [vmem:[#allocation5 + $0x88] sm:$0xff] %vm2135_vm8, %v2074_v51  ;;  %2150 = vst.msk [vmem:[#allocation5 + $0x70] sm:$0xff] %vm2135_vm8, %v2068_v38  ;;  %v14986_v51 = vld [vmem:[#allocation17_spill] sm:$0xff]  ;;  %v14987_v38 = vld [vmem:[#allocation16_spill] sm:$0xff] }
 0x327   : > { %2447 = vrot.lane.b32.xlu1 %v2372_v42, %s10491_s14  ;;  %2441 = vrot.lane.b32.xlu0 %v2369_v1, %s10491_s14  ;;  %2981 = vst.msk [vmem:[#allocation3 + $0xc0] sm:$0xff] %vm2955_vm9, %v14979_v34  ;;  %2982 = vst.msk [vmem:[#allocation3 + $0xc8] sm:$0xff] %vm2955_vm9, %v14979_v34 }
 0x328   : > { %2983 = vst.msk [vmem:[#allocation3 + $0xd0] sm:$0xf] %vm2958_vm10, %v14979_v34  ;;  %2986 = vst.msk [vmem:[#allocation3 + $0xe8] sm:$0xf] %vm2958_vm10, %v14979_v34 }
 0x329   : > { %v2078_v25 = vpop.permute.xlu1 %2077  ;;  %v2072_v31 = vpop.permute.xlu0 %2071  ;;  %2984 = vst.msk [vmem:[#allocation3 + $0xd8] sm:$0xff] %vm2955_vm9, %v14979_v34  ;;  %2985 = vst.msk [vmem:[#allocation3 + $0xe0] sm:$0xff] %vm2955_vm9, %v14979_v34 }
 0x32a   : > { %2155 = vst.msk [vmem:[#allocation5 + $0x98] sm:$0xff] %vm2135_vm8, %v2078_v25  ;;  %2152 = vst.msk [vmem:[#allocation5 + $0x80] sm:$0xff] %vm2135_vm8, %v2072_v31  ;;  %v14988_v25 = vld [vmem:[#allocation19_spill] sm:$0xff]  ;;  %v14989_v31 = vld [vmem:[#allocation18_spill] sm:$0xff] }
 0x32b   : > { %2451 = vrot.lane.b32.xlu1 %v2374_v57, %s10491_s14  ;;  %2445 = vrot.lane.b32.xlu0 %v2371_v37, %s10491_s14  ;;  %2987 = vst.msk [vmem:[#allocation3 + $0xf0] sm:$0xff] %vm2955_vm9, %v14979_v34  ;;  %2988 = vst.msk [vmem:[#allocation3 + $0xf8] sm:$0xff] %vm2955_vm9, %v14979_v34 }
 0x32c   : > { %2989 = vst.msk [vmem:[#allocation3 + $0x100] sm:$0xf] %vm2958_vm10, %v14979_v34  ;;  %2992 = vst.msk [vmem:[#allocation3 + $0x118] sm:$0xf] %vm2958_vm10, %v14979_v34 }
 0x32d   : > { %v2082_v28 = vpop.permute.xlu1 %2081  ;;  %v2076_v5 = vpop.permute.xlu0 %2075  ;;  %2990 = vst.msk [vmem:[#allocation3 + $0x108] sm:$0xff] %vm2955_vm9, %v14979_v34  ;;  %2991 = vst.msk [vmem:[#allocation3 + $0x110] sm:$0xff] %vm2955_vm9, %v14979_v34 }
 0x32e   : > { %2157 = vst.msk [vmem:[#allocation5 + $0xa8] sm:$0xff] %vm2135_vm8, %v2082_v28  ;;  %2154 = vst.msk [vmem:[#allocation5 + $0x90] sm:$0xff] %vm2135_vm8, %v2076_v5  ;;  %v14990_v28 = vld [vmem:[#allocation21_spill] sm:$0xff]  ;;  %v14991_v5 = vld [vmem:[#allocation20_spill] sm:$0xff] }
 0x32f   : > { %2455 = vrot.lane.b32.xlu1 %v2376_v40, %s10491_s14  ;;  %2449 = vrot.lane.b32.xlu0 %v2373_v9, %s10491_s14  ;;  %2993 = vst.msk [vmem:[#allocation3 + $0x120] sm:$0xff] %vm2955_vm9, %v14979_v34  ;;  %2994 = vst.msk [vmem:[#allocation3 + $0x128] sm:$0xff] %vm2955_vm9, %v14979_v34 }
 0x330   : > { %2995 = vst.msk [vmem:[#allocation3 + $0x130] sm:$0xf] %vm2958_vm10, %v14979_v34  ;;  %2998 = vst.msk [vmem:[#allocation3 + $0x148] sm:$0xf] %vm2958_vm10, %v14979_v34 }
 0x331   : > { %v2086_v18 = vpop.permute.xlu1 %2085  ;;  %v2080_v14 = vpop.permute.xlu0 %2079  ;;  %2996 = vst.msk [vmem:[#allocation3 + $0x138] sm:$0xff] %vm2955_vm9, %v14979_v34  ;;  %2997 = vst.msk [vmem:[#allocation3 + $0x140] sm:$0xff] %vm2955_vm9, %v14979_v34 }
 0x332   : > { %2159 = vst.msk [vmem:[#allocation5 + $0xb8] sm:$0xff] %vm2135_vm8, %v2086_v18  ;;  %2156 = vst.msk [vmem:[#allocation5 + $0xa0] sm:$0xff] %vm2135_vm8, %v2080_v14  ;;  %v14992_v18 = vld [vmem:[#allocation23_spill] sm:$0xff]  ;;  %v14993_v14 = vld [vmem:[#allocation22_spill] sm:$0xff] }
 0x333   : > { %2459 = vrot.lane.b32.xlu1 %v2378_v2, %s10491_s14  ;;  %2453 = vrot.lane.b32.xlu0 %v2375_v35, %s10491_s14  ;;  %2999 = vst.msk [vmem:[#allocation3 + $0x150] sm:$0xff] %vm2955_vm9, %v14979_v34  ;;  %3000 = vst.msk [vmem:[#allocation3 + $0x158] sm:$0xff] %vm2955_vm9, %v14979_v34 }
 0x334   : > { %3001 = vst.msk [vmem:[#allocation3 + $0x160] sm:$0xf] %vm2958_vm10, %v14979_v34  ;;  %3004 = vst.msk [vmem:[#allocation3 + $0x178] sm:$0xf] %vm2958_vm10, %v14979_v34 }
 0x335   : > { %v2090_v50 = vpop.permute.xlu1 %2089  ;;  %v2084_v62 = vpop.permute.xlu0 %2083  ;;  %3002 = vst.msk [vmem:[#allocation3 + $0x168] sm:$0xff] %vm2955_vm9, %v14979_v34  ;;  %3003 = vst.msk [vmem:[#allocation3 + $0x170] sm:$0xff] %vm2955_vm9, %v14979_v34 }
 0x336   : > { %2161 = vst.msk [vmem:[#allocation5 + $0xc8] sm:$0xff] %vm2135_vm8, %v2090_v50  ;;  %2158 = vst.msk [vmem:[#allocation5 + $0xb0] sm:$0xff] %vm2135_vm8, %v2084_v62  ;;  %v14994_v50 = vld [vmem:[#allocation25_spill] sm:$0xff]  ;;  %v14995_v62 = vld [vmem:[#allocation24_spill] sm:$0xff] }
 0x337   : > { %2463 = vrot.lane.b32.xlu1 %v2380_v46, %s10491_s14  ;;  %2457 = vrot.lane.b32.xlu0 %v2377_v11, %s10491_s14  ;;  %3005 = vst.msk [vmem:[#allocation3 + $0x180] sm:$0xff] %vm2955_vm9, %v14979_v34  ;;  %3006 = vst.msk [vmem:[#allocation3 + $0x188] sm:$0xff] %vm2955_vm9, %v14979_v34 }
 0x338   : > { %3007 = vst.msk [vmem:[#allocation3 + $0x190] sm:$0xf] %vm2958_vm10, %v14979_v34  ;;  %3010 = vst.msk [vmem:[#allocation3 + $0x1a8] sm:$0xf] %vm2958_vm10, %v14979_v34 }
 0x339   : > { %v2094_v24 = vpop.permute.xlu1 %2093  ;;  %v2088_v22 = vpop.permute.xlu0 %2087  ;;  %3008 = vst.msk [vmem:[#allocation3 + $0x198] sm:$0xff] %vm2955_vm9, %v14979_v34  ;;  %3009 = vst.msk [vmem:[#allocation3 + $0x1a0] sm:$0xff] %vm2955_vm9, %v14979_v34 }
 0x33a   : > { %2163 = vst.msk [vmem:[#allocation5 + $0xd8] sm:$0xff] %vm2135_vm8, %v2094_v24  ;;  %2160 = vst.msk [vmem:[#allocation5 + $0xc0] sm:$0xff] %vm2135_vm8, %v2088_v22  ;;  %v14996_v24 = vld [vmem:[#allocation27_spill] sm:$0xff]  ;;  %v14997_v22 = vld [vmem:[#allocation26_spill] sm:$0xff] }
 0x33b   : > { %2467 = vrot.lane.b32.xlu1 %v2382_v26, %s10491_s14  ;;  %2461 = vrot.lane.b32.xlu0 %v2379_v56, %s10491_s14  ;;  %3011 = vst.msk [vmem:[#allocation3 + $0x1b0] sm:$0xff] %vm2955_vm9, %v14979_v34  ;;  %3012 = vst.msk [vmem:[#allocation3 + $0x1b8] sm:$0xff] %vm2955_vm9, %v14979_v34 }
 0x33c   : > { %3013 = vst.msk [vmem:[#allocation3 + $0x1c0] sm:$0xf] %vm2958_vm10, %v14979_v34  ;;  %3016 = vst.msk [vmem:[#allocation3 + $0x1d8] sm:$0xf] %vm2958_vm10, %v14979_v34  ;;  %vm4915_vm10 = vcmask 162960  }
 0x33d   : > { %v2098_v15 = vpop.permute.xlu1 %2097  ;;  %v2092_v47 = vpop.permute.xlu0 %2091  ;;  %3014 = vst.msk [vmem:[#allocation3 + $0x1c8] sm:$0xff] %vm2955_vm9, %v14979_v34  ;;  %3015 = vst.msk [vmem:[#allocation3 + $0x1d0] sm:$0xff] %vm2955_vm9, %v14979_v34  ;;  %v3211_v34 = vld [vmem:[#allocation3 + $0x9] sm:$0xff] }
 0x33e   : > { %2165 = vst.msk [vmem:[#allocation5 + $0xe8] sm:$0xff] %vm2135_vm8, %v2098_v15  ;;  %2162 = vst.msk [vmem:[#allocation5 + $0xd0] sm:$0xff] %vm2135_vm8, %v2092_v47  ;;  %v14998_v15 = vld [vmem:[#allocation29_spill] sm:$0xff]  ;;  %v14999_v47 = vld [vmem:[#allocation28_spill] sm:$0xff] }
 0x33f   : > { %2471 = vrot.lane.b32.xlu1 %v11552_v12, %s10491_s14  ;;  %2465 = vrot.lane.b32.xlu0 %v2381_v21, %s10491_s14 }
 0x341   : > { %v2102_v36 = vpop.permute.xlu1 %2101  ;;  %v2096_v30 = vpop.permute.xlu0 %2095 }
 0x342   : > { %2167 = vst.msk [vmem:[#allocation5 + $0xf8] sm:$0xff] %vm2135_vm8, %v2102_v36  ;;  %2164 = vst.msk [vmem:[#allocation5 + $0xe0] sm:$0xff] %vm2135_vm8, %v2096_v30 }
 0x343   : > { %2475 = vrot.lane.b32.xlu1 %v11590_v32, %s10491_s14  ;;  %2469 = vrot.lane.b32.xlu0 %v11561_v20, %s10491_s14 }
 0x345   : > { %v2235_v20 = vpop.permute.xlu1 %2234  ;;  %v2100_v12 = vpop.permute.xlu0 %2099 }
 0x346   : > { %2330 = vst.msk [vmem:[#allocation5 + $0x8] sm:$0xff] %vm2328_vm11, %v2235_v20 }
 0x347   : > { %2166 = vst.msk [vmem:[#allocation5 + $0xf0] sm:$0xff] %vm2135_vm8, %v2100_v12  ;;  %2479 = vrot.lane.b32.xlu1 %v11628_v29, %s10491_s14  ;;  %2473 = vrot.lane.b32.xlu0 %v11599_v60, %s10491_s14  ;;  %v2391_v60 = vld [vmem:[#allocation2 + $0x19a] sm:$0xff]  ;;  %vm4529_vm8 = vcmask 130160  }
 0x348   : > { %v15000_v12 = vld [vmem:[#allocation30_spill] sm:$0xff] }
 0x349   : > { %v2239_v32 = vpop.permute.xlu1 %2238  ;;  %v2233_v45 = vpop.permute.xlu0 %2232 }
 0x34a   : > { %2332 = vst.msk [vmem:[#allocation5 + $0x18] sm:$0xff] %vm2328_vm11, %v2239_v32  ;;  %2329 = vst.msk [vmem:[#allocation5] sm:$0xff] %vm2328_vm11, %v2233_v45  ;;  %v3210_v32 = vld [vmem:[#allocation3 + $0x1] sm:$0xff] }
 0x34b   : > { %2483 = vrot.lane.b32.xlu1 %v11666_v6, %s10491_s14  ;;  %2477 = vrot.lane.b32.xlu0 %v11637_v43, %s10491_s14 }
 0x34d   : > { %v2243_v53 = vpop.permute.xlu1 %2242  ;;  %v2237_v48 = vpop.permute.xlu0 %2236 }
 0x34e   : > { %2334 = vst.msk [vmem:[#allocation5 + $0x28] sm:$0xff] %vm2328_vm11, %v2243_v53  ;;  %2331 = vst.msk [vmem:[#allocation5 + $0x10] sm:$0xff] %vm2328_vm11, %v2237_v48  ;;  %v3213_v48 = vld [vmem:[#allocation3 + $0x21] sm:$0xff] }
 0x34f   : > { %2487 = vrot.lane.b32.xlu1 %v2392_v39, %s10491_s14  ;;  %2481 = vrot.lane.b32.xlu0 %v11685_v19, %s10491_s14 }
 0x351   : > { %v2247_v29 = vpop.permute.xlu1 %2246  ;;  %v2241_v8 = vpop.permute.xlu0 %2240 }
 0x352   : > { %2336 = vst.msk [vmem:[#allocation5 + $0x38] sm:$0xff] %vm2328_vm11, %v2247_v29  ;;  %2333 = vst.msk [vmem:[#allocation5 + $0x20] sm:$0xff] %vm2328_vm11, %v2241_v8  ;;  %v3212_v29 = vld [vmem:[#allocation3 + $0x19] sm:$0xff] }
 0x353   : > { %3019 = vrot.lane.b32.xlu1 %v10903_v49, %s10492_s23  ;;  %2485 = vrot.lane.b32.xlu0 %v2391_v60, %s10491_s14 }
 0x355   : > { %v2251_v43 = vpop.permute.xlu1 %2250  ;;  %v2245_v6 = vpop.permute.xlu0 %2244 }
 0x356   : > { %2338 = vst.msk [vmem:[#allocation5 + $0x48] sm:$0xff] %vm2328_vm11, %v2251_v43  ;;  %2335 = vst.msk [vmem:[#allocation5 + $0x30] sm:$0xff] %vm2328_vm11, %v2245_v6 }
 0x357   : > { %3023 = vrot.lane.b32.xlu1 %v10919_v55, %s10492_s23  ;;  %3017 = vrot.lane.b32.xlu0 %v10911_v52, %s10492_s23 }
 0x359   : > { %v2255_v19 = vpop.permute.xlu1 %2254  ;;  %v2249_v63 = vpop.permute.xlu0 %2248 }
 0x35a   : > { %2340 = vst.msk [vmem:[#allocation5 + $0x58] sm:$0xff] %vm2328_vm11, %v2255_v19  ;;  %2337 = vst.msk [vmem:[#allocation5 + $0x40] sm:$0xff] %vm2328_vm11, %v2249_v63 }
 0x35b   : > { %3027 = vrot.lane.b32.xlu1 %v10935_v61, %s10492_s23  ;;  %3021 = vrot.lane.b32.xlu0 %v10927_v58, %s10492_s23 }
 0x35d   : > { %v2259_v49 = vpop.permute.xlu1 %2258  ;;  %v2253_v23 = vpop.permute.xlu0 %2252 }
 0x35e   : > { %2342 = vst.msk [vmem:[#allocation5 + $0x68] sm:$0xff] %vm2328_vm11, %v2259_v49  ;;  %2339 = vst.msk [vmem:[#allocation5 + $0x50] sm:$0xff] %vm2328_vm11, %v2253_v23 }
 0x35f   : > { %3031 = vrot.lane.b32.xlu1 %v10951_v4, %s10492_s23  ;;  %3025 = vrot.lane.b32.xlu0 %v10943_v0, %s10492_s23 }
 0x361   : > { %v2263_v52 = vpop.permute.xlu1 %2262  ;;  %v2257_v55 = vpop.permute.xlu0 %2256 }
 0x362   : > { %2344 = vst.msk [vmem:[#allocation5 + $0x78] sm:$0xff] %vm2328_vm11, %v2263_v52  ;;  %2341 = vst.msk [vmem:[#allocation5 + $0x60] sm:$0xff] %vm2328_vm11, %v2257_v55 }
 0x363   : > { %3035 = vrot.lane.b32.xlu1 %v10965_v10, %s10492_s23  ;;  %3029 = vrot.lane.b32.xlu0 %v10959_v7, %s10492_s23  ;;  %v14980_v7 = vld [vmem:[#allocation11_spill] sm:$0xff]  ;;  %v14981_v10 = vld [vmem:[#allocation10_spill] sm:$0xff] }
 0x365   : > { %v2267_v58 = vpop.permute.xlu1 %2266  ;;  %v2261_v61 = vpop.permute.xlu0 %2260 }
 0x366   : > { %2346 = vst.msk [vmem:[#allocation5 + $0x88] sm:$0xff] %vm2328_vm11, %v2267_v58  ;;  %2343 = vst.msk [vmem:[#allocation5 + $0x70] sm:$0xff] %vm2328_vm11, %v2261_v61 }
 0x367   : > { %3039 = vrot.lane.b32.xlu1 %v10981_v16, %s10492_s23  ;;  %3033 = vrot.lane.b32.xlu0 %v10975_v13, %s10492_s23  ;;  %v14982_v13 = vld [vmem:[#allocation13_spill] sm:$0xff]  ;;  %v14983_v16 = vld [vmem:[#allocation12_spill] sm:$0xff] }
 0x369   : > { %v2271_v0 = vpop.permute.xlu1 %2270  ;;  %v2265_v4 = vpop.permute.xlu0 %2264 }
 0x36a   : > { %2348 = vst.msk [vmem:[#allocation5 + $0x98] sm:$0xff] %vm2328_vm11, %v2271_v0  ;;  %2345 = vst.msk [vmem:[#allocation5 + $0x80] sm:$0xff] %vm2328_vm11, %v2265_v4 }
 0x36b   : > { %3043 = vrot.lane.b32.xlu1 %v14980_v7, %s10492_s23  ;;  %3037 = vrot.lane.b32.xlu0 %v14981_v10, %s10492_s23 }
 0x36d   : > { %v2275_v17 = vpop.permute.xlu1 %2274  ;;  %v2269_v59 = vpop.permute.xlu0 %2268 }
 0x36e   : > { %2350 = vst.msk [vmem:[#allocation5 + $0xa8] sm:$0xff] %vm2328_vm11, %v2275_v17  ;;  %2347 = vst.msk [vmem:[#allocation5 + $0x90] sm:$0xff] %vm2328_vm11, %v2269_v59 }
 0x36f   : > { %3047 = vrot.lane.b32.xlu1 %v14982_v13, %s10492_s23  ;;  %3041 = vrot.lane.b32.xlu0 %v14983_v16, %s10492_s23 }
 0x371   : > { %v2279_v33 = vpop.permute.xlu1 %2278  ;;  %v2273_v54 = vpop.permute.xlu0 %2272 }
 0x372   : > { %2352 = vst.msk [vmem:[#allocation5 + $0xb8] sm:$0xff] %vm2328_vm11, %v2279_v33  ;;  %2349 = vst.msk [vmem:[#allocation5 + $0xa0] sm:$0xff] %vm2328_vm11, %v2273_v54 }
 0x373   : > { %3051 = vrot.lane.b32.xlu1 %v14984_v41, %s10492_s23  ;;  %3045 = vrot.lane.b32.xlu0 %v14985_v44, %s10492_s23 }
 0x375   : > { %v2283_v3 = vpop.permute.xlu1 %2282  ;;  %v2277_v27 = vpop.permute.xlu0 %2276 }
 0x376   : > { %2354 = vst.msk [vmem:[#allocation5 + $0xc8] sm:$0xff] %vm2328_vm11, %v2283_v3  ;;  %2351 = vst.msk [vmem:[#allocation5 + $0xb0] sm:$0xff] %vm2328_vm11, %v2277_v27 }
 0x377   : > { %3055 = vrot.lane.b32.xlu1 %v14986_v51, %s10492_s23  ;;  %3049 = vrot.lane.b32.xlu0 %v14987_v38, %s10492_s23 }
 0x379   : > { %v2287_v42 = vpop.permute.xlu1 %2286  ;;  %v2281_v1 = vpop.permute.xlu0 %2280 }
 0x37a   : > { %2356 = vst.msk [vmem:[#allocation5 + $0xd8] sm:$0xff] %vm2328_vm11, %v2287_v42  ;;  %2353 = vst.msk [vmem:[#allocation5 + $0xc0] sm:$0xff] %vm2328_vm11, %v2281_v1 }
 0x37b   : > { %3059 = vrot.lane.b32.xlu1 %v14988_v25, %s10492_s23  ;;  %3053 = vrot.lane.b32.xlu0 %v14989_v31, %s10492_s23 }
 0x37d   : > { %v2291_v57 = vpop.permute.xlu1 %2290  ;;  %v2285_v37 = vpop.permute.xlu0 %2284 }
 0x37e   : > { %2358 = vst.msk [vmem:[#allocation5 + $0xe8] sm:$0xff] %vm2328_vm11, %v2291_v57  ;;  %2355 = vst.msk [vmem:[#allocation5 + $0xd0] sm:$0xff] %vm2328_vm11, %v2285_v37 }
 0x37f   : > { %3063 = vrot.lane.b32.xlu1 %v14990_v28, %s10492_s23  ;;  %3057 = vrot.lane.b32.xlu0 %v14991_v5, %s10492_s23 }
 0x381   : > { %v2295_v40 = vpop.permute.xlu1 %2294  ;;  %v2289_v9 = vpop.permute.xlu0 %2288 }
 0x382   : > { %2360 = vst.msk [vmem:[#allocation5 + $0xf8] sm:$0xff] %vm2328_vm11, %v2295_v40  ;;  %2357 = vst.msk [vmem:[#allocation5 + $0xe0] sm:$0xff] %vm2328_vm11, %v2289_v9  ;;  %v3147_v9 = vld [vmem:[#allocation3 + $0x8] sm:$0xff] }
 0x383   : > { %3067 = vrot.lane.b32.xlu1 %v14992_v18, %s10492_s23  ;;  %3061 = vrot.lane.b32.xlu0 %v14993_v14, %s10492_s23  ;;  %v3146_v18 = vld [vmem:[#allocation3] sm:$0xff]  ;;  %3179 = vst.msk [vmem:[#allocation6 + $0x8] sm:$0xff] %vm2955_vm9, %v3147_v9 }
 0x384   : > { %3178 = vst.msk [vmem:[#allocation6] sm:$0xff] %vm2955_vm9, %v3146_v18 }
 0x385   : > { %v2428_v2 = vpop.permute.xlu1 %2427  ;;  %v2293_v35 = vpop.permute.xlu0 %2292 }
 0x386   : > { %2523 = vst.msk [vmem:[#allocation5 + $0x8] sm:$0xff] %vm2521_vm12, %v2428_v2 }
 0x387   : > { %2359 = vst.msk [vmem:[#allocation5 + $0xf0] sm:$0xff] %vm2328_vm11, %v2293_v35  ;;  %3071 = vrot.lane.b32.xlu1 %v14994_v50, %s10492_s23  ;;  %3065 = vrot.lane.b32.xlu0 %v14995_v62, %s10492_s23  ;;  %v12205_v62 = vld [vmem:[#allocation3 + $0x20] sm:$0xff]  ;;  %vm5108_vm11 = vcmask 179360  }
 0x388   : > { %3181 = vst.msk [vmem:[#allocation6 + $0x18] sm:$0xff] %vm2955_vm9, %v12205_v62 }
 0x389   : > { %v2432_v46 = vpop.permute.xlu1 %2431  ;;  %v2426_v11 = vpop.permute.xlu0 %2425 }
 0x38a   : > { %2525 = vst.msk [vmem:[#allocation5 + $0x18] sm:$0xff] %vm2521_vm12, %v2432_v46  ;;  %2522 = vst.msk [vmem:[#allocation5] sm:$0xff] %vm2521_vm12, %v2426_v11  ;;  %v12207_v46 = vld [vmem:[#allocation3 + $0x18] sm:$0xff] }
 0x38b   : > { %3075 = vrot.lane.b32.xlu1 %v14996_v24, %s10492_s23  ;;  %3069 = vrot.lane.b32.xlu0 %v14997_v22, %s10492_s23  ;;  %3180 = vst.msk [vmem:[#allocation6 + $0x10] sm:$0xff] %vm2955_vm9, %v12207_v46 }
 0x38d   : > { %v2436_v26 = vpop.permute.xlu1 %2435  ;;  %v2430_v56 = vpop.permute.xlu0 %2429  ;;  %v2555_v20 = vld [vmem:[#allocation5 + $0x8] sm:$0xff] }
 0x38e   : > { %2527 = vst.msk [vmem:[#allocation5 + $0x28] sm:$0xff] %vm2521_vm12, %v2436_v26  ;;  %2524 = vst.msk [vmem:[#allocation5 + $0x10] sm:$0xff] %vm2521_vm12, %v2430_v56 }
 0x38f   : > { %3079 = vrot.lane.b32.xlu1 %v14998_v15, %s10492_s23  ;;  %3073 = vrot.lane.b32.xlu0 %v14999_v47, %s10492_s23 }
 0x391   : > { %v2440_v21 = vpop.permute.xlu1 %2439  ;;  %v2434_v36 = vpop.permute.xlu0 %2433  ;;  %v2554_v30 = vld [vmem:[#allocation5] sm:$0xff]  ;;  %v2557_v60 = vld [vmem:[#allocation5 + $0x18] sm:$0xff] }
 0x392   : > { %2529 = vst.msk [vmem:[#allocation5 + $0x38] sm:$0xff] %vm2521_vm12, %v2440_v21  ;;  %2526 = vst.msk [vmem:[#allocation5 + $0x20] sm:$0xff] %vm2521_vm12, %v2434_v36  ;;  %10186 = vmatprep.mubr.msk.f32.mxu1 %vm2598_vm13, %v2554_v30 }
 0x393   : > { %3077 = vrot.lane.b32.xlu0 %v15000_v12, %s10492_s23  ;;  %10187 = vmatmul.mubr.msk.f32.vlgmr.msra.gmra.mxu1 %vm2598_vm13, %v2555_v20  ;;  %s10495_s23 = smov 10  }
 0x394   : > { %3276 = vrot.lane.b32.xlu1 %v3211_v34, %s10493_s17 }
 0x395   : > { %v2444_v45 = vpop.permute.xlu1 %2443  ;;  %v2438_v39 = vpop.permute.xlu0 %2437  ;;  %v2556_v53 = vld [vmem:[#allocation5 + $0x10] sm:$0xff]  ;;  %v2559_v19 = vld [vmem:[#allocation5 + $0x28] sm:$0xff] }
 0x396   : > { %2531 = vst.msk [vmem:[#allocation5 + $0x48] sm:$0xff] %vm2521_vm12, %v2444_v45  ;;  %2528 = vst.msk [vmem:[#allocation5 + $0x30] sm:$0xff] %vm2521_vm12, %v2438_v39  ;;  %10189 = vmatprep.mubr.msk.f32.mxu1 %vm2598_vm13, %v2556_v53 }
 0x397   : > { %10190 = vmatmul.mubr.msk.f32.gmra.mxu1 %vm2598_vm13, %v2557_v60  ;;  %3274 = vrot.lane.b32.xlu0 %v3210_v32, %s10493_s17 }
 0x398   : > { %3280 = vrot.lane.b32.xlu1 %v3213_v48, %s10493_s17 }
 0x399   : > { %v2448_v8 = vpop.permute.xlu1 %2447  ;;  %v2442_v43 = vpop.permute.xlu0 %2441  ;;  %v2558_v6 = vld [vmem:[#allocation5 + $0x20] sm:$0xff]  ;;  %v2561_v52 = vld [vmem:[#allocation5 + $0x38] sm:$0xff] }
 0x39a   : > { %2533 = vst.msk [vmem:[#allocation5 + $0x58] sm:$0xff] %vm2521_vm12, %v2448_v8  ;;  %2530 = vst.msk [vmem:[#allocation5 + $0x40] sm:$0xff] %vm2521_vm12, %v2442_v43  ;;  %10192 = vmatprep.mubr.msk.f32.mxu1 %vm2598_vm13, %v2558_v6 }
 0x39b   : > { %10193 = vmatmul.mubr.msk.f32.gmra.mxu1 %vm2598_vm13, %v2559_v19  ;;  %3278 = vrot.lane.b32.xlu0 %v3212_v29, %s10493_s17 }
 0x39d   : > { %v2452_v63 = vpop.permute.xlu1 %2451  ;;  %v2446_v49 = vpop.permute.xlu0 %2445  ;;  %v2560_v23 = vld [vmem:[#allocation5 + $0x30] sm:$0xff]  ;;  %v2563_v0 = vld [vmem:[#allocation5 + $0x48] sm:$0xff] }
 0x39e   : > { %2535 = vst.msk [vmem:[#allocation5 + $0x68] sm:$0xff] %vm2521_vm12, %v2452_v63  ;;  %2532 = vst.msk [vmem:[#allocation5 + $0x50] sm:$0xff] %vm2521_vm12, %v2446_v49  ;;  %10195 = vmatprep.mubr.msk.f32.mxu1 %vm2598_vm13, %v2560_v23 }
 0x39f   : > { %10196 = vmatmul.mubr.msk.f32.gmra.mxu1 %vm2598_vm13, %v2561_v52 }
 0x3a1   : > { %v2456_v55 = vpop.permute.xlu1 %2455  ;;  %v2450_v58 = vpop.permute.xlu0 %2449  ;;  %v2562_v61 = vld [vmem:[#allocation5 + $0x40] sm:$0xff]  ;;  %v2565_v17 = vld [vmem:[#allocation5 + $0x58] sm:$0xff] }
 0x3a2   : > { %2537 = vst.msk [vmem:[#allocation5 + $0x78] sm:$0xff] %vm2521_vm12, %v2456_v55  ;;  %2534 = vst.msk [vmem:[#allocation5 + $0x60] sm:$0xff] %vm2521_vm12, %v2450_v58  ;;  %10198 = vmatprep.mubr.msk.f32.mxu1 %vm2598_vm13, %v2562_v61 }
 0x3a3   : > { %10199 = vmatmul.mubr.msk.f32.gmra.mxu1 %vm2598_vm13, %v2563_v0 }
 0x3a5   : > { %v2460_v4 = vpop.permute.xlu1 %2459  ;;  %v2454_v7 = vpop.permute.xlu0 %2453  ;;  %v2564_v10 = vld [vmem:[#allocation5 + $0x50] sm:$0xff]  ;;  %v2567_v33 = vld [vmem:[#allocation5 + $0x68] sm:$0xff] }
 0x3a6   : > { %2539 = vst.msk [vmem:[#allocation5 + $0x88] sm:$0xff] %vm2521_vm12, %v2460_v4  ;;  %2536 = vst.msk [vmem:[#allocation5 + $0x70] sm:$0xff] %vm2521_vm12, %v2454_v7  ;;  %10201 = vmatprep.mubr.msk.f32.mxu1 %vm2598_vm13, %v2564_v10 }
 0x3a7   : > { %10202 = vmatmul.mubr.msk.f32.gmra.mxu1 %vm2598_vm13, %v2565_v17 }
 0x3a9   : > { %v2464_v59 = vpop.permute.xlu1 %2463  ;;  %v2458_v13 = vpop.permute.xlu0 %2457  ;;  %v2566_v16 = vld [vmem:[#allocation5 + $0x60] sm:$0xff]  ;;  %v2569_v3 = vld [vmem:[#allocation5 + $0x78] sm:$0xff] }
 0x3aa   : > { %2541 = vst.msk [vmem:[#allocation5 + $0x98] sm:$0xff] %vm2521_vm12, %v2464_v59  ;;  %2538 = vst.msk [vmem:[#allocation5 + $0x80] sm:$0xff] %vm2521_vm12, %v2458_v13  ;;  %10204 = vmatprep.mubr.msk.f32.mxu1 %vm2598_vm13, %v2566_v16 }
 0x3ab   : > { %10205 = vmatmul.mubr.msk.f32.gmra.mxu1 %vm2598_vm13, %v2567_v33 }
 0x3ad   : > { %v2468_v54 = vpop.permute.xlu1 %2467  ;;  %v2462_v41 = vpop.permute.xlu0 %2461  ;;  %v2568_v44 = vld [vmem:[#allocation5 + $0x70] sm:$0xff]  ;;  %v2571_v42 = vld [vmem:[#allocation5 + $0x88] sm:$0xff] }
 0x3ae   : > { %2543 = vst.msk [vmem:[#allocation5 + $0xa8] sm:$0xff] %vm2521_vm12, %v2468_v54  ;;  %2540 = vst.msk [vmem:[#allocation5 + $0x90] sm:$0xff] %vm2521_vm12, %v2462_v41  ;;  %10207 = vmatprep.mubr.msk.f32.mxu1 %vm2598_vm13, %v2568_v44 }
 0x3af   : > { %10208 = vmatmul.mubr.msk.f32.gmra.mxu1 %vm2598_vm13, %v2569_v3 }
 0x3b1   : > { %v2472_v27 = vpop.permute.xlu1 %2471  ;;  %v2466_v51 = vpop.permute.xlu0 %2465  ;;  %v2570_v38 = vld [vmem:[#allocation5 + $0x80] sm:$0xff]  ;;  %v2573_v57 = vld [vmem:[#allocation5 + $0x98] sm:$0xff] }
 0x3b2   : > { %2545 = vst.msk [vmem:[#allocation5 + $0xb8] sm:$0xff] %vm2521_vm12, %v2472_v27  ;;  %2542 = vst.msk [vmem:[#allocation5 + $0xa0] sm:$0xff] %vm2521_vm12, %v2466_v51  ;;  %10210 = vmatprep.mubr.msk.f32.mxu1 %vm2598_vm13, %v2570_v38 }
 0x3b3   : > { %10211 = vmatmul.mubr.msk.f32.gmra.mxu1 %vm2598_vm13, %v2571_v42 }
 0x3b5   : > { %v2476_v1 = vpop.permute.xlu1 %2475  ;;  %v2470_v25 = vpop.permute.xlu0 %2469  ;;  %v2572_v31 = vld [vmem:[#allocation5 + $0x90] sm:$0xff]  ;;  %v2575_v40 = vld [vmem:[#allocation5 + $0xa8] sm:$0xff] }
 0x3b6   : > { %2547 = vst.msk [vmem:[#allocation5 + $0xc8] sm:$0xff] %vm2521_vm12, %v2476_v1  ;;  %2544 = vst.msk [vmem:[#allocation5 + $0xb0] sm:$0xff] %vm2521_vm12, %v2470_v25  ;;  %10213 = vmatprep.mubr.msk.f32.mxu1 %vm2598_vm13, %v2572_v31 }
 0x3b7   : > { %10214 = vmatmul.mubr.msk.f32.gmra.mxu1 %vm2598_vm13, %v2573_v57 }
 0x3b9   : > { %v2480_v37 = vpop.permute.xlu1 %2479  ;;  %v2474_v28 = vpop.permute.xlu0 %2473  ;;  %v2574_v5 = vld [vmem:[#allocation5 + $0xa0] sm:$0xff]  ;;  %v2577_v50 = vld [vmem:[#allocation5 + $0xb8] sm:$0xff] }
 0x3ba   : > { %2549 = vst.msk [vmem:[#allocation5 + $0xd8] sm:$0xff] %vm2521_vm12, %v2480_v37  ;;  %2546 = vst.msk [vmem:[#allocation5 + $0xc0] sm:$0xff] %vm2521_vm12, %v2474_v28  ;;  %10216 = vmatprep.mubr.msk.f32.mxu1 %vm2598_vm13, %v2574_v5 }
 0x3bb   : > { %10217 = vmatmul.mubr.msk.f32.gmra.mxu1 %vm2598_vm13, %v2575_v40 }
 0x3bd   : > { %v2484_v14 = vpop.permute.xlu1 %2483  ;;  %v2478_v2 = vpop.permute.xlu0 %2477  ;;  %v2576_v35 = vld [vmem:[#allocation5 + $0xb0] sm:$0xff]  ;;  %v2579_v26 = vld [vmem:[#allocation5 + $0xc8] sm:$0xff] }
 0x3be   : > { %2551 = vst.msk [vmem:[#allocation5 + $0xe8] sm:$0xff] %vm2521_vm12, %v2484_v14  ;;  %2548 = vst.msk [vmem:[#allocation5 + $0xd0] sm:$0xff] %vm2521_vm12, %v2478_v2  ;;  %10219 = vmatprep.mubr.msk.f32.mxu1 %vm2598_vm13, %v2576_v35 }
 0x3bf   : > { %10220 = vmatmul.mubr.msk.f32.gmra.mxu1 %vm2598_vm13, %v2577_v50 }
 0x3c1   : > { %v2488_v11 = vpop.permute.xlu1 %2487  ;;  %v2482_v24 = vpop.permute.xlu0 %2481  ;;  %v2578_v22 = vld [vmem:[#allocation5 + $0xc0] sm:$0xff]  ;;  %v2581_v21 = vld [vmem:[#allocation5 + $0xd8] sm:$0xff] }
 0x3c2   : > { %2553 = vst.msk [vmem:[#allocation5 + $0xf8] sm:$0xff] %vm2521_vm12, %v2488_v11  ;;  %2550 = vst.msk [vmem:[#allocation5 + $0xe0] sm:$0xff] %vm2521_vm12, %v2482_v24  ;;  %10222 = vmatprep.mubr.msk.f32.mxu1 %vm2598_vm13, %v2578_v22 }
 0x3c3   : > { %10223 = vmatmul.mubr.msk.f32.gmra.mxu1 %vm2598_vm13, %v2579_v26 }
 0x3c5   : > { %v3020_v56 = vpop.permute.xlu1 %3019  ;;  %v2486_v15 = vpop.permute.xlu0 %2485  ;;  %v2580_v47 = vld [vmem:[#allocation5 + $0xd0] sm:$0xff]  ;;  %v2583_v20 = vld [vmem:[#allocation5 + $0xe8] sm:$0xff] }
 0x3c6   : > { %3115 = vst.msk [vmem:[#allocation3 + $0x3a] sm:$0xff] %vm2955_vm9, %v3020_v56  ;;  %10225 = vmatprep.mubr.msk.f32.mxu1 %vm2598_vm13, %v2580_v47 }
 0x3c7   : > { %2552 = vst.msk [vmem:[#allocation5 + $0xf0] sm:$0xff] %vm2521_vm12, %v2486_v15  ;;  %10226 = vmatmul.mubr.msk.f32.gmra.mxu1 %vm2598_vm13, %v2581_v21  ;;  %vm5301_vm12 = vcmask 195760  }
 0x3c9   : > { %v3024_v36 = vpop.permute.xlu1 %3023  ;;  %v3018_v30 = vpop.permute.xlu0 %3017  ;;  %v2582_v34 = vld [vmem:[#allocation5 + $0xe0] sm:$0xff]  ;;  %v2585_v12 = vld [vmem:[#allocation5 + $0xf8] sm:$0xff] }
 0x3ca   : > { %3117 = vst.msk [vmem:[#allocation3 + $0x52] sm:$0xff] %vm2955_vm9, %v3024_v36  ;;  %3114 = vst.msk [vmem:[#allocation3 + $0x32] sm:$0xff] %vm2955_vm9, %v3018_v30  ;;  %10228 = vmatprep.mubr.msk.f32.mxu1 %vm2598_vm13, %v2582_v34 }
 0x3cb   : > { %10229 = vmatmul.mubr.msk.f32.gmra.mxu1 %vm2598_vm13, %v2583_v20 }
 0x3cd   : > { %v3028_v32 = vpop.permute.xlu1 %3027  ;;  %v3022_v45 = vpop.permute.xlu0 %3021 }
 0x3ce   : > { %v2584_v39 = vld [vmem:[#allocation5 + $0xf0] sm:$0xff]  ;;  %3119 = vst.msk [vmem:[#allocation3 + $0x6a] sm:$0xff] %vm2955_vm9, %v3028_v32  ;;  %3116 = vst.msk [vmem:[#allocation3 + $0x4a] sm:$0xff] %vm2955_vm9, %v3022_v45 }
 0x3cf   : > { %10231 = vmatprep.mubr.msk.f32.mxu1 %vm2598_vm13, %v2584_v39 }
 0x3d0   : > { %10232 = vmatmul.mubr.msk.f32.gmra.mxu1 %vm2598_vm13, %v2585_v12  ;;  %vm5494_vm13 = vcmask 212160  }
 0x3d1   : > { %v3032_v53 = vpop.permute.xlu1 %3031  ;;  %v3026_v48 = vpop.permute.xlu0 %3025  ;;  %v3215_v60 = vld [vmem:[#allocation3 + $0x39] sm:$0xff]  ;;  %v3214_v29 = vld [vmem:[#allocation3 + $0x31] sm:$0xff] }
 0x3d2   : > { %3121 = vst.msk [vmem:[#allocation3 + $0x82] sm:$0xff] %vm2955_vm9, %v3032_v53  ;;  %3118 = vst.msk [vmem:[#allocation3 + $0x62] sm:$0xff] %vm2955_vm9, %v3026_v48  ;;  %3284 = vrot.lane.b32.xlu1 %v3215_v60, %s10493_s17  ;;  %3282 = vrot.lane.b32.xlu0 %v3214_v29, %s10493_s17  ;;  %v12234_v8 = vld [vmem:[#allocation3 + $0x38] sm:$0xff]  ;;  %v12236_v43 = vld [vmem:[#allocation3 + $0x30] sm:$0xff] }
 0x3d3   : > { %3183 = vst.msk [vmem:[#allocation6 + $0x28] sm:$0xff] %vm2955_vm9, %v12234_v8  ;;  %3182 = vst.msk [vmem:[#allocation6 + $0x20] sm:$0xff] %vm2955_vm9, %v12236_v43 }
 0x3d5   : > { %v3036_v6 = vpop.permute.xlu1 %3035  ;;  %v3030_v19 = vpop.permute.xlu0 %3029  ;;  %v3217_v63 = vld [vmem:[#allocation3 + $0x51] sm:$0xff]  ;;  %v3216_v49 = vld [vmem:[#allocation3 + $0x49] sm:$0xff] }
 0x3d6   : > { %3123 = vst.msk [vmem:[#allocation3 + $0x9a] sm:$0xff] %vm2955_vm9, %v3036_v6  ;;  %3120 = vst.msk [vmem:[#allocation3 + $0x7a] sm:$0xff] %vm2955_vm9, %v3030_v19  ;;  %3288 = vrot.lane.b32.xlu1 %v3217_v63, %s10493_s17  ;;  %3286 = vrot.lane.b32.xlu0 %v3216_v49, %s10493_s17  ;;  %v12246_v23 = vld [vmem:[#allocation3 + $0x50] sm:$0xff]  ;;  %v12248_v52 = vld [vmem:[#allocation3 + $0x48] sm:$0xff] }
 0x3d7   : > { %3185 = vst.msk [vmem:[#allocation6 + $0x38] sm:$0xff] %vm2955_vm9, %v12246_v23  ;;  %3184 = vst.msk [vmem:[#allocation6 + $0x30] sm:$0xff] %vm2955_vm9, %v12248_v52 }
 0x3d9   : > { %v3040_v55 = vpop.permute.xlu1 %3039  ;;  %v3034_v58 = vpop.permute.xlu0 %3033  ;;  %v3219_v61 = vld [vmem:[#allocation3 + $0x69] sm:$0xff]  ;;  %v3218_v0 = vld [vmem:[#allocation3 + $0x61] sm:$0xff] }
 0x3da   : > { %3125 = vst.msk [vmem:[#allocation3 + $0xb2] sm:$0xff] %vm2955_vm9, %v3040_v55  ;;  %3122 = vst.msk [vmem:[#allocation3 + $0x92] sm:$0xff] %vm2955_vm9, %v3034_v58  ;;  %3292 = vrot.lane.b32.xlu1 %v3219_v61, %s10493_s17  ;;  %3290 = vrot.lane.b32.xlu0 %v3218_v0, %s10493_s17  ;;  %v12258_v4 = vld [vmem:[#allocation3 + $0x68] sm:$0xff]  ;;  %v12260_v7 = vld [vmem:[#allocation3 + $0x60] sm:$0xff] }
 0x3db   : > { %3187 = vst.msk [vmem:[#allocation6 + $0x48] sm:$0xff] %vm2955_vm9, %v12258_v4  ;;  %3186 = vst.msk [vmem:[#allocation6 + $0x40] sm:$0xff] %vm2955_vm9, %v12260_v7 }
 0x3dd   : > { %v3044_v10 = vpop.permute.xlu1 %3043  ;;  %v3038_v17 = vpop.permute.xlu0 %3037  ;;  %v3221_v59 = vld [vmem:[#allocation3 + $0x81] sm:$0xff]  ;;  %v3220_v13 = vld [vmem:[#allocation3 + $0x79] sm:$0xff] }
 0x3de   : > { %3127 = vst.msk [vmem:[#allocation3 + $0xca] sm:$0xff] %vm2955_vm9, %v3044_v10  ;;  %3124 = vst.msk [vmem:[#allocation3 + $0xaa] sm:$0xff] %vm2955_vm9, %v3038_v17  ;;  %3296 = vrot.lane.b32.xlu1 %v3221_v59, %s10493_s17  ;;  %3294 = vrot.lane.b32.xlu0 %v3220_v13, %s10493_s17  ;;  %v12270_v16 = vld [vmem:[#allocation3 + $0x80] sm:$0xff]  ;;  %v12272_v33 = vld [vmem:[#allocation3 + $0x78] sm:$0xff] }
 0x3df   : > { %3189 = vst.msk [vmem:[#allocation6 + $0x58] sm:$0xff] %vm2955_vm9, %v12270_v16  ;;  %3188 = vst.msk [vmem:[#allocation6 + $0x50] sm:$0xff] %vm2955_vm9, %v12272_v33 }
 0x3e1   : > { %v3048_v54 = vpop.permute.xlu1 %3047  ;;  %v3042_v41 = vpop.permute.xlu0 %3041  ;;  %v3223_v44 = vld [vmem:[#allocation3 + $0x99] sm:$0xff]  ;;  %v3222_v3 = vld [vmem:[#allocation3 + $0x91] sm:$0xff] }
 0x3e2   : > { %3129 = vst.msk [vmem:[#allocation3 + $0xe2] sm:$0xff] %vm2955_vm9, %v3048_v54  ;;  %3126 = vst.msk [vmem:[#allocation3 + $0xc2] sm:$0xff] %vm2955_vm9, %v3042_v41  ;;  %3300 = vrot.lane.b32.xlu1 %v3223_v44, %s10493_s17  ;;  %3298 = vrot.lane.b32.xlu0 %v3222_v3, %s10493_s17  ;;  %v12282_v27 = vld [vmem:[#allocation3 + $0x98] sm:$0xff]  ;;  %v12284_v51 = vld [vmem:[#allocation3 + $0x90] sm:$0xff] }
 0x3e3   : > { %3191 = vst.msk [vmem:[#allocation6 + $0x68] sm:$0xff] %vm2955_vm9, %v12282_v27  ;;  %3190 = vst.msk [vmem:[#allocation6 + $0x60] sm:$0xff] %vm2955_vm9, %v12284_v51 }
 0x3e5   : > { %v3052_v38 = vpop.permute.xlu1 %3051  ;;  %v3046_v42 = vpop.permute.xlu0 %3045  ;;  %v3225_v1 = vld [vmem:[#allocation3 + $0xb1] sm:$0xff]  ;;  %v3224_v25 = vld [vmem:[#allocation3 + $0xa9] sm:$0xff] }
 0x3e6   : > { %3131 = vst.msk [vmem:[#allocation3 + $0xfa] sm:$0xff] %vm2955_vm9, %v3052_v38  ;;  %3128 = vst.msk [vmem:[#allocation3 + $0xda] sm:$0xff] %vm2955_vm9, %v3046_v42  ;;  %3304 = vrot.lane.b32.xlu1 %v3225_v1, %s10493_s17  ;;  %3302 = vrot.lane.b32.xlu0 %v3224_v25, %s10493_s17  ;;  %v12294_v31 = vld [vmem:[#allocation3 + $0xb0] sm:$0xff]  ;;  %v12296_v57 = vld [vmem:[#allocation3 + $0xa8] sm:$0xff] }
 0x3e7   : > { %3193 = vst.msk [vmem:[#allocation6 + $0x78] sm:$0xff] %vm2955_vm9, %v12294_v31  ;;  %3192 = vst.msk [vmem:[#allocation6 + $0x70] sm:$0xff] %vm2955_vm9, %v12296_v57  ;;  %v3404_v1 = vld [vmem:[#allocation3 + $0xa] sm:$0xff]  ;;  %v3403_v25 = vld [vmem:[#allocation3 + $0x2] sm:$0xff] }
 0x3e9   : > { %v3056_v37 = vpop.permute.xlu1 %3055  ;;  %v3050_v28 = vpop.permute.xlu0 %3049  ;;  %v3227_v5 = vld [vmem:[#allocation3 + $0xc9] sm:$0xff]  ;;  %v3226_v40 = vld [vmem:[#allocation3 + $0xc1] sm:$0xff] }
 0x3ea   : > { %3133 = vst.msk [vmem:[#allocation3 + $0x112] sm:$0xff] %vm2955_vm9, %v3056_v37  ;;  %3130 = vst.msk [vmem:[#allocation3 + $0xf2] sm:$0xff] %vm2955_vm9, %v3050_v28  ;;  %3308 = vrot.lane.b32.xlu1 %v3227_v5, %s10493_s17  ;;  %3306 = vrot.lane.b32.xlu0 %v3226_v40, %s10493_s17  ;;  %v12306_v9 = vld [vmem:[#allocation3 + $0xc8] sm:$0xff]  ;;  %v12308_v18 = vld [vmem:[#allocation3 + $0xc0] sm:$0xff] }
 0x3eb   : > { %3195 = vst.msk [vmem:[#allocation6 + $0x88] sm:$0xff] %vm2955_vm9, %v12306_v9  ;;  %3194 = vst.msk [vmem:[#allocation6 + $0x80] sm:$0xff] %vm2955_vm9, %v12308_v18  ;;  %v3406_v5 = vld [vmem:[#allocation3 + $0x22] sm:$0xff]  ;;  %v3405_v40 = vld [vmem:[#allocation3 + $0x1a] sm:$0xff] }
 0x3ed   : > { %v3060_v14 = vpop.permute.xlu1 %3059  ;;  %v3054_v2 = vpop.permute.xlu0 %3053  ;;  %v3229_v35 = vld [vmem:[#allocation3 + $0xe1] sm:$0xff]  ;;  %v3228_v50 = vld [vmem:[#allocation3 + $0xd9] sm:$0xff] }
 0x3ee   : > { %3135 = vst.msk [vmem:[#allocation3 + $0x12a] sm:$0xff] %vm2955_vm9, %v3060_v14  ;;  %3132 = vst.msk [vmem:[#allocation3 + $0x10a] sm:$0xff] %vm2955_vm9, %v3054_v2  ;;  %3312 = vrot.lane.b32.xlu1 %v3229_v35, %s10493_s17  ;;  %3310 = vrot.lane.b32.xlu0 %v3228_v50, %s10493_s17  ;;  %v12318_v11 = vld [vmem:[#allocation3 + $0xe0] sm:$0xff]  ;;  %v12320_v24 = vld [vmem:[#allocation3 + $0xd8] sm:$0xff] }
 0x3ef   : > { %3197 = vst.msk [vmem:[#allocation6 + $0x98] sm:$0xff] %vm2955_vm9, %v12318_v11  ;;  %3196 = vst.msk [vmem:[#allocation6 + $0x90] sm:$0xff] %vm2955_vm9, %v12320_v24  ;;  %v3408_v2 = vld [vmem:[#allocation3 + $0x3a] sm:$0xff]  ;;  %v3407_v35 = vld [vmem:[#allocation3 + $0x32] sm:$0xff] }
 0x3f0   : > { %v3410_v50 = vld [vmem:[#allocation3 + $0x52] sm:$0xff] }
 0x3f1   : > { %v3064_v22 = vpop.permute.xlu1 %3063  ;;  %v3058_v26 = vpop.permute.xlu0 %3057  ;;  %v3231_v56 = vld [vmem:[#allocation3 + $0xf9] sm:$0xff]  ;;  %v3230_v15 = vld [vmem:[#allocation3 + $0xf1] sm:$0xff] }
 0x3f2   : > { %3137 = vst.msk [vmem:[#allocation3 + $0x142] sm:$0xff] %vm2955_vm9, %v3064_v22  ;;  %3134 = vst.msk [vmem:[#allocation3 + $0x122] sm:$0xff] %vm2955_vm9, %v3058_v26  ;;  %3316 = vrot.lane.b32.xlu1 %v3231_v56, %s10493_s17  ;;  %3314 = vrot.lane.b32.xlu0 %v3230_v15, %s10493_s17  ;;  %v12330_v47 = vld [vmem:[#allocation3 + $0xf8] sm:$0xff]  ;;  %v12332_v21 = vld [vmem:[#allocation3 + $0xf0] sm:$0xff] }
 0x3f3   : > { %3199 = vst.msk [vmem:[#allocation6 + $0xa8] sm:$0xff] %vm2955_vm9, %v12330_v47  ;;  %3198 = vst.msk [vmem:[#allocation6 + $0xa0] sm:$0xff] %vm2955_vm9, %v12332_v21  ;;  %v3409_v22 = vld [vmem:[#allocation3 + $0x4a] sm:$0xff]  ;;  %v3411_v56 = vld [vmem:[#allocation3 + $0x62] sm:$0xff] }
 0x3f4   : > { %v3412_v26 = vld [vmem:[#allocation3 + $0x6a] sm:$0xff]  ;;  %v3414_v15 = vld [vmem:[#allocation3 + $0x82] sm:$0xff] }
 0x3f5   : > { %v3068_v36 = vpop.permute.xlu1 %3067  ;;  %v3062_v30 = vpop.permute.xlu0 %3061  ;;  %v3233_v34 = vld [vmem:[#allocation3 + $0x111] sm:$0xff]  ;;  %v3232_v20 = vld [vmem:[#allocation3 + $0x109] sm:$0xff] }
 0x3f6   : > { %3139 = vst.msk [vmem:[#allocation3 + $0x15a] sm:$0xff] %vm2955_vm9, %v3068_v36  ;;  %3136 = vst.msk [vmem:[#allocation3 + $0x13a] sm:$0xff] %vm2955_vm9, %v3062_v30  ;;  %3320 = vrot.lane.b32.xlu1 %v3233_v34, %s10493_s17  ;;  %3318 = vrot.lane.b32.xlu0 %v3232_v20, %s10493_s17  ;;  %v12342_v12 = vld [vmem:[#allocation3 + $0x110] sm:$0xff]  ;;  %v12344_v32 = vld [vmem:[#allocation3 + $0x108] sm:$0xff] }
 0x3f7   : > { %3201 = vst.msk [vmem:[#allocation6 + $0xb8] sm:$0xff] %vm2955_vm9, %v12342_v12  ;;  %3200 = vst.msk [vmem:[#allocation6 + $0xb0] sm:$0xff] %vm2955_vm9, %v12344_v32  ;;  %v3413_v36 = vld [vmem:[#allocation3 + $0x7a] sm:$0xff]  ;;  %v3415_v34 = vld [vmem:[#allocation3 + $0x92] sm:$0xff] }
 0x3f8   : > { %v3416_v30 = vld [vmem:[#allocation3 + $0x9a] sm:$0xff]  ;;  %v3418_v20 = vld [vmem:[#allocation3 + $0xb2] sm:$0xff] }
 0x3f9   : > { %v3072_v45 = vpop.permute.xlu1 %3071  ;;  %v3066_v39 = vpop.permute.xlu0 %3065  ;;  %v3235_v53 = vld [vmem:[#allocation3 + $0x129] sm:$0xff]  ;;  %v3234_v48 = vld [vmem:[#allocation3 + $0x121] sm:$0xff] }
 0x3fa   : > { %3141 = vst.msk [vmem:[#allocation3 + $0x172] sm:$0xff] %vm2955_vm9, %v3072_v45  ;;  %3138 = vst.msk [vmem:[#allocation3 + $0x152] sm:$0xff] %vm2955_vm9, %v3066_v39  ;;  %3324 = vrot.lane.b32.xlu1 %v3235_v53, %s10493_s17  ;;  %3322 = vrot.lane.b32.xlu0 %v3234_v48, %s10493_s17  ;;  %v12354_v60 = vld [vmem:[#allocation3 + $0x128] sm:$0xff]  ;;  %v12356_v29 = vld [vmem:[#allocation3 + $0x120] sm:$0xff] }
 0x3fb   : > { %3203 = vst.msk [vmem:[#allocation6 + $0xc8] sm:$0xff] %vm2955_vm9, %v12354_v60  ;;  %3202 = vst.msk [vmem:[#allocation6 + $0xc0] sm:$0xff] %vm2955_vm9, %v12356_v29  ;;  %v3417_v45 = vld [vmem:[#allocation3 + $0xaa] sm:$0xff]  ;;  %v3419_v53 = vld [vmem:[#allocation3 + $0xc2] sm:$0xff] }
 0x3fc   : > { %v3420_v39 = vld [vmem:[#allocation3 + $0xca] sm:$0xff]  ;;  %v3422_v48 = vld [vmem:[#allocation3 + $0xe2] sm:$0xff] }
 0x3fd   : > { %v3076_v6 = vpop.permute.xlu1 %3075  ;;  %v3070_v19 = vpop.permute.xlu0 %3069  ;;  %v3237_v63 = vld [vmem:[#allocation3 + $0x141] sm:$0xff]  ;;  %v3236_v49 = vld [vmem:[#allocation3 + $0x139] sm:$0xff] }
 0x3fe   : > { %3143 = vst.msk [vmem:[#allocation3 + $0x18a] sm:$0xff] %vm2955_vm9, %v3076_v6  ;;  %3140 = vst.msk [vmem:[#allocation3 + $0x16a] sm:$0xff] %vm2955_vm9, %v3070_v19  ;;  %3328 = vrot.lane.b32.xlu1 %v3237_v63, %s10493_s17  ;;  %3326 = vrot.lane.b32.xlu0 %v3236_v49, %s10493_s17  ;;  %v12366_v55 = vld [vmem:[#allocation3 + $0x140] sm:$0xff]  ;;  %v12368_v58 = vld [vmem:[#allocation3 + $0x138] sm:$0xff] }
 0x3ff   : > { %3205 = vst.msk [vmem:[#allocation6 + $0xd8] sm:$0xff] %vm2955_vm9, %v12366_v55  ;;  %3204 = vst.msk [vmem:[#allocation6 + $0xd0] sm:$0xff] %vm2955_vm9, %v12368_v58  ;;  %v3421_v6 = vld [vmem:[#allocation3 + $0xda] sm:$0xff]  ;;  %v3423_v63 = vld [vmem:[#allocation3 + $0xf2] sm:$0xff] }
 0x400   : > { %v3424_v19 = vld [vmem:[#allocation3 + $0xfa] sm:$0xff]  ;;  %v3426_v49 = vld [vmem:[#allocation3 + $0x112] sm:$0xff] }
 0x401   : > { %v3080_v61 = vpop.permute.xlu1 %3079  ;;  %v3074_v0 = vpop.permute.xlu0 %3073  ;;  %v3239_v10 = vld [vmem:[#allocation3 + $0x159] sm:$0xff]  ;;  %v3238_v17 = vld [vmem:[#allocation3 + $0x151] sm:$0xff] }
 0x402   : > { %3145 = vst.msk [vmem:[#allocation3 + $0x1a2] sm:$0xff] %vm2955_vm9, %v3080_v61  ;;  %3142 = vst.msk [vmem:[#allocation3 + $0x182] sm:$0xff] %vm2955_vm9, %v3074_v0  ;;  %3332 = vrot.lane.b32.xlu1 %v3239_v10, %s10493_s17  ;;  %3330 = vrot.lane.b32.xlu0 %v3238_v17, %s10493_s17  ;;  %v12378_v59 = vld [vmem:[#allocation3 + $0x158] sm:$0xff]  ;;  %v12380_v13 = vld [vmem:[#allocation3 + $0x150] sm:$0xff] }
 0x403   : > { %3207 = vst.msk [vmem:[#allocation6 + $0xe8] sm:$0xff] %vm2955_vm9, %v12378_v59  ;;  %3206 = vst.msk [vmem:[#allocation6 + $0xe0] sm:$0xff] %vm2955_vm9, %v12380_v13  ;;  %v3425_v61 = vld [vmem:[#allocation3 + $0x10a] sm:$0xff]  ;;  %v3427_v10 = vld [vmem:[#allocation3 + $0x122] sm:$0xff] }
 0x404   : > { %v3428_v0 = vld [vmem:[#allocation3 + $0x12a] sm:$0xff]  ;;  %v3430_v17 = vld [vmem:[#allocation3 + $0x142] sm:$0xff] }
 0x405   : > { %v3078_v54 = vpop.permute.xlu0 %3077  ;;  %v3241_v41 = vld [vmem:[#allocation3 + $0x171] sm:$0xff]  ;;  %v3240_v44 = vld [vmem:[#allocation3 + $0x169] sm:$0xff] }
 0x406   : > { %3144 = vst.msk [vmem:[#allocation3 + $0x19a] sm:$0xff] %vm2955_vm9, %v3078_v54  ;;  %3336 = vrot.lane.b32.xlu1 %v3241_v41, %s10493_s17  ;;  %3334 = vrot.lane.b32.xlu0 %v3240_v44, %s10493_s17  ;;  %v3277_v3 = vpop.permute.xlu1 %3276  ;;  %v12389_v38 = vld [vmem:[#allocation3 + $0x170] sm:$0xff]  ;;  %v12391_v42 = vld [vmem:[#allocation3 + $0x168] sm:$0xff]  ;;  %v3429_v54 = vld [vmem:[#allocation3 + $0x13a] sm:$0xff]  ;;  %s10496_s17 = smov 14  }
 0x407   : > { %3372 = vst.msk [vmem:[#allocation6 + $0x8] sm:$0xff] %vm3370_vm14, %v3277_v3  ;;  %v3432_v41 = vld [vmem:[#allocation3 + $0x15a] sm:$0xff]  ;;  %v3431_v44 = vld [vmem:[#allocation3 + $0x152] sm:$0xff] }
 0x408   : > { %3209 = vst.msk [vmem:[#allocation6 + $0xf8] sm:$0xff] %vm2955_vm9, %v12389_v38  ;;  %3208 = vst.msk [vmem:[#allocation6 + $0xf0] sm:$0xff] %vm2955_vm9, %v12391_v42  ;;  %vm4722_vm9 = vcmask 146560  }
 0x409   : > { %v3275_v37 = vpop.permute.xlu0 %3274 }
 0x40a   : > { %3469 = vrot.lane.b32.xlu1 %v3404_v1, %s10483_s28  ;;  %3467 = vrot.lane.b32.xlu0 %v3403_v25, %s10483_s28  ;;  %3371 = vst.msk [vmem:[#allocation6] sm:$0xff] %vm3370_vm14, %v3275_v37  ;;  %v3281_v28 = vpop.permute.xlu1 %3280  ;;  %v3434_v25 = vld [vmem:[#allocation3 + $0x172] sm:$0xff]  ;;  %v3433_v37 = vld [vmem:[#allocation3 + $0x16a] sm:$0xff] }
 0x40b   : > { %3374 = vst.msk [vmem:[#allocation6 + $0x18] sm:$0xff] %vm3370_vm14, %v3281_v28  ;;  %v3597_v28 = vld [vmem:[#allocation3 + $0xb] sm:$0xff] }
 0x40d   : > { %v3279_v14 = vpop.permute.xlu0 %3278 }
 0x40e   : > { %3473 = vrot.lane.b32.xlu1 %v3406_v5, %s10483_s28  ;;  %3471 = vrot.lane.b32.xlu0 %v3405_v40, %s10483_s28  ;;  %3373 = vst.msk [vmem:[#allocation6 + $0x10] sm:$0xff] %vm3370_vm14, %v3279_v14  ;;  %v3596_v5 = vld [vmem:[#allocation3 + $0x3] sm:$0xff] }
 0x412   : > { %3477 = vrot.lane.b32.xlu1 %v3408_v2, %s10483_s28  ;;  %3475 = vrot.lane.b32.xlu0 %v3407_v35, %s10483_s28  ;;  %v3599_v2 = vld [vmem:[#allocation3 + $0x23] sm:$0xff]  ;;  %v3598_v35 = vld [vmem:[#allocation3 + $0x1b] sm:$0xff] }
 0x416   : > { %3481 = vrot.lane.b32.xlu1 %v3410_v50, %s10483_s28  ;;  %3479 = vrot.lane.b32.xlu0 %v3409_v22, %s10483_s28 }
 0x41a   : > { %3485 = vrot.lane.b32.xlu1 %v3412_v26, %s10483_s28  ;;  %3483 = vrot.lane.b32.xlu0 %v3411_v56, %s10483_s28 }
 0x41e   : > { %3489 = vrot.lane.b32.xlu1 %v3414_v15, %s10483_s28  ;;  %3487 = vrot.lane.b32.xlu0 %v3413_v36, %s10483_s28  ;;  %v3601_v15 = vld [vmem:[#allocation3 + $0x3b] sm:$0xff]  ;;  %v3600_v36 = vld [vmem:[#allocation3 + $0x33] sm:$0xff] }
 0x422   : > { %3493 = vrot.lane.b32.xlu1 %v3416_v30, %s10483_s28  ;;  %3491 = vrot.lane.b32.xlu0 %v3415_v34, %s10483_s28 }
 0x426   : > { %3497 = vrot.lane.b32.xlu1 %v3418_v20, %s10483_s28  ;;  %3495 = vrot.lane.b32.xlu0 %v3417_v45, %s10483_s28  ;;  %v3603_v20 = vld [vmem:[#allocation3 + $0x53] sm:$0xff]  ;;  %v3602_v45 = vld [vmem:[#allocation3 + $0x4b] sm:$0xff] }
 0x42a   : > { %3501 = vrot.lane.b32.xlu1 %v3420_v39, %s10483_s28  ;;  %3499 = vrot.lane.b32.xlu0 %v3419_v53, %s10483_s28 }
 0x42e   : > { %3505 = vrot.lane.b32.xlu1 %v3422_v48, %s10483_s28  ;;  %3503 = vrot.lane.b32.xlu0 %v3421_v6, %s10483_s28  ;;  %v3605_v48 = vld [vmem:[#allocation3 + $0x6b] sm:$0xff]  ;;  %v3604_v6 = vld [vmem:[#allocation3 + $0x63] sm:$0xff] }
 0x432   : > { %3509 = vrot.lane.b32.xlu1 %v3424_v19, %s10483_s28  ;;  %3507 = vrot.lane.b32.xlu0 %v3423_v63, %s10483_s28 }
 0x436   : > { %3513 = vrot.lane.b32.xlu1 %v3426_v49, %s10483_s28  ;;  %3511 = vrot.lane.b32.xlu0 %v3425_v61, %s10483_s28  ;;  %v3607_v49 = vld [vmem:[#allocation3 + $0x83] sm:$0xff]  ;;  %v3606_v61 = vld [vmem:[#allocation3 + $0x7b] sm:$0xff] }
 0x43a   : > { %3517 = vrot.lane.b32.xlu1 %v3428_v0, %s10483_s28  ;;  %3515 = vrot.lane.b32.xlu0 %v3427_v10, %s10483_s28 }
 0x43e   : > { %3521 = vrot.lane.b32.xlu1 %v3430_v17, %s10483_s28  ;;  %3519 = vrot.lane.b32.xlu0 %v3429_v54, %s10483_s28  ;;  %v3609_v17 = vld [vmem:[#allocation3 + $0x9b] sm:$0xff]  ;;  %v3608_v54 = vld [vmem:[#allocation3 + $0x93] sm:$0xff] }
 0x442   : > { %3525 = vrot.lane.b32.xlu1 %v3432_v41, %s10483_s28  ;;  %3523 = vrot.lane.b32.xlu0 %v3431_v44, %s10483_s28 }
 0x444   : > { %v3285_v3 = vpop.permute.xlu1 %3284  ;;  %v3283_v1 = vpop.permute.xlu0 %3282 }
 0x445   : > { %3376 = vst.msk [vmem:[#allocation6 + $0x28] sm:$0xff] %vm3370_vm14, %v3285_v3  ;;  %3375 = vst.msk [vmem:[#allocation6 + $0x20] sm:$0xff] %vm3370_vm14, %v3283_v1  ;;  %v3611_v3 = vld [vmem:[#allocation3 + $0xb3] sm:$0xff]  ;;  %v3610_v1 = vld [vmem:[#allocation3 + $0xab] sm:$0xff] }
 0x446   : > { %3529 = vrot.lane.b32.xlu1 %v3434_v25, %s10483_s28  ;;  %3527 = vrot.lane.b32.xlu0 %v3433_v37, %s10483_s28 }
 0x448   : > { %v3289_v40 = vpop.permute.xlu1 %3288  ;;  %v3287_v14 = vpop.permute.xlu0 %3286 }
 0x449   : > { %3378 = vst.msk [vmem:[#allocation6 + $0x38] sm:$0xff] %vm3370_vm14, %v3289_v40  ;;  %3377 = vst.msk [vmem:[#allocation6 + $0x30] sm:$0xff] %vm3370_vm14, %v3287_v14 }
 0x44a   : > { %3662 = vrot.lane.b32.xlu1 %v3597_v28, %s10494_s21  ;;  %3660 = vrot.lane.b32.xlu0 %v3596_v5, %s10494_s21  ;;  %v3613_v28 = vld [vmem:[#allocation3 + $0xcb] sm:$0xff]  ;;  %v3612_v5 = vld [vmem:[#allocation3 + $0xc3] sm:$0xff] }
 0x44c   : > { %v3293_v50 = vpop.permute.xlu1 %3292  ;;  %v3291_v22 = vpop.permute.xlu0 %3290 }
 0x44d   : > { %3380 = vst.msk [vmem:[#allocation6 + $0x48] sm:$0xff] %vm3370_vm14, %v3293_v50  ;;  %3379 = vst.msk [vmem:[#allocation6 + $0x40] sm:$0xff] %vm3370_vm14, %v3291_v22 }
 0x44e   : > { %3666 = vrot.lane.b32.xlu1 %v3599_v2, %s10494_s21  ;;  %3664 = vrot.lane.b32.xlu0 %v3598_v35, %s10494_s21  ;;  %v3615_v2 = vld [vmem:[#allocation3 + $0xe3] sm:$0xff]  ;;  %v3614_v35 = vld [vmem:[#allocation3 + $0xdb] sm:$0xff] }
 0x450   : > { %v3297_v26 = vpop.permute.xlu1 %3296  ;;  %v3295_v56 = vpop.permute.xlu0 %3294 }
 0x451   : > { %3382 = vst.msk [vmem:[#allocation6 + $0x58] sm:$0xff] %vm3370_vm14, %v3297_v26  ;;  %3381 = vst.msk [vmem:[#allocation6 + $0x50] sm:$0xff] %vm3370_vm14, %v3295_v56  ;;  %v3617_v26 = vld [vmem:[#allocation3 + $0xfb] sm:$0xff]  ;;  %v3616_v56 = vld [vmem:[#allocation3 + $0xf3] sm:$0xff] }
 0x452   : > { %3670 = vrot.lane.b32.xlu1 %v3601_v15, %s10494_s21  ;;  %3668 = vrot.lane.b32.xlu0 %v3600_v36, %s10494_s21 }
 0x454   : > { %v3301_v30 = vpop.permute.xlu1 %3300  ;;  %v3299_v34 = vpop.permute.xlu0 %3298 }
 0x455   : > { %3384 = vst.msk [vmem:[#allocation6 + $0x68] sm:$0xff] %vm3370_vm14, %v3301_v30  ;;  %3383 = vst.msk [vmem:[#allocation6 + $0x60] sm:$0xff] %vm3370_vm14, %v3299_v34  ;;  %v3619_v30 = vld [vmem:[#allocation3 + $0x113] sm:$0xff]  ;;  %v3618_v34 = vld [vmem:[#allocation3 + $0x10b] sm:$0xff] }
 0x456   : > { %3674 = vrot.lane.b32.xlu1 %v3603_v20, %s10494_s21  ;;  %3672 = vrot.lane.b32.xlu0 %v3602_v45, %s10494_s21 }
 0x458   : > { %v3305_v39 = vpop.permute.xlu1 %3304  ;;  %v3303_v53 = vpop.permute.xlu0 %3302 }
 0x459   : > { %3386 = vst.msk [vmem:[#allocation6 + $0x78] sm:$0xff] %vm3370_vm14, %v3305_v39  ;;  %3385 = vst.msk [vmem:[#allocation6 + $0x70] sm:$0xff] %vm3370_vm14, %v3303_v53  ;;  %v3621_v39 = vld [vmem:[#allocation3 + $0x12b] sm:$0xff]  ;;  %v3620_v53 = vld [vmem:[#allocation3 + $0x123] sm:$0xff] }
 0x45a   : > { %3678 = vrot.lane.b32.xlu1 %v3605_v48, %s10494_s21  ;;  %3676 = vrot.lane.b32.xlu0 %v3604_v6, %s10494_s21 }
 0x45c   : > { %v3309_v19 = vpop.permute.xlu1 %3308  ;;  %v3307_v63 = vpop.permute.xlu0 %3306 }
 0x45d   : > { %3388 = vst.msk [vmem:[#allocation6 + $0x88] sm:$0xff] %vm3370_vm14, %v3309_v19  ;;  %3387 = vst.msk [vmem:[#allocation6 + $0x80] sm:$0xff] %vm3370_vm14, %v3307_v63  ;;  %v3623_v19 = vld [vmem:[#allocation3 + $0x143] sm:$0xff]  ;;  %v3622_v63 = vld [vmem:[#allocation3 + $0x13b] sm:$0xff] }
 0x45e   : > { %3682 = vrot.lane.b32.xlu1 %v3607_v49, %s10494_s21  ;;  %3680 = vrot.lane.b32.xlu0 %v3606_v61, %s10494_s21 }
 0x460   : > { %v3313_v0 = vpop.permute.xlu1 %3312  ;;  %v3311_v10 = vpop.permute.xlu0 %3310 }
 0x461   : > { %3390 = vst.msk [vmem:[#allocation6 + $0x98] sm:$0xff] %vm3370_vm14, %v3313_v0  ;;  %3389 = vst.msk [vmem:[#allocation6 + $0x90] sm:$0xff] %vm3370_vm14, %v3311_v10  ;;  %v3625_v0 = vld [vmem:[#allocation3 + $0x15b] sm:$0xff]  ;;  %v3624_v10 = vld [vmem:[#allocation3 + $0x153] sm:$0xff] }
 0x462   : > { %3686 = vrot.lane.b32.xlu1 %v3609_v17, %s10494_s21  ;;  %3684 = vrot.lane.b32.xlu0 %v3608_v54, %s10494_s21 }
 0x464   : > { %v3317_v41 = vpop.permute.xlu1 %3316  ;;  %v3315_v44 = vpop.permute.xlu0 %3314 }
 0x465   : > { %3392 = vst.msk [vmem:[#allocation6 + $0xa8] sm:$0xff] %vm3370_vm14, %v3317_v41  ;;  %3391 = vst.msk [vmem:[#allocation6 + $0xa0] sm:$0xff] %vm3370_vm14, %v3315_v44  ;;  %v3627_v41 = vld [vmem:[#allocation3 + $0x173] sm:$0xff]  ;;  %v3626_v44 = vld [vmem:[#allocation3 + $0x16b] sm:$0xff] }
 0x466   : > { %3690 = vrot.lane.b32.xlu1 %v3611_v3, %s10494_s21  ;;  %3688 = vrot.lane.b32.xlu0 %v3610_v1, %s10494_s21  ;;  %v3790_v3 = vld [vmem:[#allocation3 + $0xc] sm:$0xff]  ;;  %v3789_v1 = vld [vmem:[#allocation3 + $0x4] sm:$0xff] }
 0x468   : > { %v3321_v25 = vpop.permute.xlu1 %3320  ;;  %v3319_v37 = vpop.permute.xlu0 %3318 }
 0x469   : > { %3394 = vst.msk [vmem:[#allocation6 + $0xb8] sm:$0xff] %vm3370_vm14, %v3321_v25  ;;  %3393 = vst.msk [vmem:[#allocation6 + $0xb0] sm:$0xff] %vm3370_vm14, %v3319_v37 }
 0x46a   : > { %3694 = vrot.lane.b32.xlu1 %v3613_v28, %s10494_s21  ;;  %3692 = vrot.lane.b32.xlu0 %v3612_v5, %s10494_s21  ;;  %v3792_v28 = vld [vmem:[#allocation3 + $0x24] sm:$0xff]  ;;  %v3791_v5 = vld [vmem:[#allocation3 + $0x1c] sm:$0xff] }
 0x46c   : > { %v3325_v40 = vpop.permute.xlu1 %3324  ;;  %v3323_v14 = vpop.permute.xlu0 %3322 }
 0x46d   : > { %3396 = vst.msk [vmem:[#allocation6 + $0xc8] sm:$0xff] %vm3370_vm14, %v3325_v40  ;;  %3395 = vst.msk [vmem:[#allocation6 + $0xc0] sm:$0xff] %vm3370_vm14, %v3323_v14 }
 0x46e   : > { %3698 = vrot.lane.b32.xlu1 %v3615_v2, %s10494_s21  ;;  %3696 = vrot.lane.b32.xlu0 %v3614_v35, %s10494_s21 }
 0x470   : > { %v3329_v50 = vpop.permute.xlu1 %3328  ;;  %v3327_v22 = vpop.permute.xlu0 %3326 }
 0x471   : > { %3398 = vst.msk [vmem:[#allocation6 + $0xd8] sm:$0xff] %vm3370_vm14, %v3329_v50  ;;  %3397 = vst.msk [vmem:[#allocation6 + $0xd0] sm:$0xff] %vm3370_vm14, %v3327_v22  ;;  %v3794_v50 = vld [vmem:[#allocation3 + $0x3c] sm:$0xff]  ;;  %v3793_v22 = vld [vmem:[#allocation3 + $0x34] sm:$0xff] }
 0x472   : > { %3702 = vrot.lane.b32.xlu1 %v3617_v26, %s10494_s21  ;;  %3700 = vrot.lane.b32.xlu0 %v3616_v56, %s10494_s21 }
 0x474   : > { %v3333_v15 = vpop.permute.xlu1 %3332  ;;  %v3331_v36 = vpop.permute.xlu0 %3330 }
 0x475   : > { %3400 = vst.msk [vmem:[#allocation6 + $0xe8] sm:$0xff] %vm3370_vm14, %v3333_v15  ;;  %3399 = vst.msk [vmem:[#allocation6 + $0xe0] sm:$0xff] %vm3370_vm14, %v3331_v36  ;;  %v3796_v15 = vld [vmem:[#allocation3 + $0x54] sm:$0xff]  ;;  %v3795_v36 = vld [vmem:[#allocation3 + $0x4c] sm:$0xff] }
 0x476   : > { %3706 = vrot.lane.b32.xlu1 %v3619_v30, %s10494_s21  ;;  %3704 = vrot.lane.b32.xlu0 %v3618_v34, %s10494_s21 }
 0x478   : > { %v3337_v20 = vpop.permute.xlu1 %3336  ;;  %v3335_v45 = vpop.permute.xlu0 %3334 }
 0x479   : > { %3402 = vst.msk [vmem:[#allocation6 + $0xf8] sm:$0xff] %vm3370_vm14, %v3337_v20  ;;  %3401 = vst.msk [vmem:[#allocation6 + $0xf0] sm:$0xff] %vm3370_vm14, %v3335_v45  ;;  %v3798_v20 = vld [vmem:[#allocation3 + $0x6c] sm:$0xff]  ;;  %v3797_v45 = vld [vmem:[#allocation3 + $0x64] sm:$0xff]  ;;  %vm5687_vm14 = vcmask 228560  }
 0x47a   : > { %3710 = vrot.lane.b32.xlu1 %v3621_v39, %s10494_s21  ;;  %3708 = vrot.lane.b32.xlu0 %v3620_v53, %s10494_s21 }
 0x47c   : > { %v3470_v48 = vpop.permute.xlu1 %3469  ;;  %v3468_v6 = vpop.permute.xlu0 %3467 }
 0x47d   : > { %3565 = vst.msk [vmem:[#allocation6 + $0x8] sm:$0xff] %vm3563_vm15, %v3470_v48  ;;  %3564 = vst.msk [vmem:[#allocation6] sm:$0xff] %vm3563_vm15, %v3468_v6  ;;  %v3800_v48 = vld [vmem:[#allocation3 + $0x84] sm:$0xff]  ;;  %v3799_v6 = vld [vmem:[#allocation3 + $0x7c] sm:$0xff] }
 0x47e   : > { %3714 = vrot.lane.b32.xlu1 %v3623_v19, %s10494_s21  ;;  %3712 = vrot.lane.b32.xlu0 %v3622_v63, %s10494_s21 }
 0x480   : > { %v3474_v49 = vpop.permute.xlu1 %3473  ;;  %v3472_v61 = vpop.permute.xlu0 %3471 }
 0x481   : > { %3567 = vst.msk [vmem:[#allocation6 + $0x18] sm:$0xff] %vm3563_vm15, %v3474_v49  ;;  %3566 = vst.msk [vmem:[#allocation6 + $0x10] sm:$0xff] %vm3563_vm15, %v3472_v61  ;;  %v3802_v49 = vld [vmem:[#allocation3 + $0x9c] sm:$0xff]  ;;  %v3801_v61 = vld [vmem:[#allocation3 + $0x94] sm:$0xff] }
 0x482   : > { %3718 = vrot.lane.b32.xlu1 %v3625_v0, %s10494_s21  ;;  %3716 = vrot.lane.b32.xlu0 %v3624_v10, %s10494_s21 }
 0x484   : > { %v3478_v17 = vpop.permute.xlu1 %3477  ;;  %v3476_v54 = vpop.permute.xlu0 %3475 }
 0x485   : > { %3569 = vst.msk [vmem:[#allocation6 + $0x28] sm:$0xff] %vm3563_vm15, %v3478_v17  ;;  %3568 = vst.msk [vmem:[#allocation6 + $0x20] sm:$0xff] %vm3563_vm15, %v3476_v54  ;;  %v3804_v17 = vld [vmem:[#allocation3 + $0xb4] sm:$0xff]  ;;  %v3803_v54 = vld [vmem:[#allocation3 + $0xac] sm:$0xff] }
 0x486   : > { %3722 = vrot.lane.b32.xlu1 %v3627_v41, %s10494_s21  ;;  %3720 = vrot.lane.b32.xlu0 %v3626_v44, %s10494_s21  ;;  %s10497_s21 = smov 18  }
 0x488   : > { %v3482_v25 = vpop.permute.xlu1 %3481  ;;  %v3480_v37 = vpop.permute.xlu0 %3479 }
 0x489   : > { %3571 = vst.msk [vmem:[#allocation6 + $0x38] sm:$0xff] %vm3563_vm15, %v3482_v25  ;;  %3570 = vst.msk [vmem:[#allocation6 + $0x30] sm:$0xff] %vm3563_vm15, %v3480_v37 }
 0x48a   : > { %3855 = vrot.lane.b32.xlu1 %v3790_v3, %s14955_s29  ;;  %3853 = vrot.lane.b32.xlu0 %v3789_v1, %s14955_s29  ;;  %v3806_v3 = vld [vmem:[#allocation3 + $0xcc] sm:$0xff]  ;;  %v3805_v1 = vld [vmem:[#allocation3 + $0xc4] sm:$0xff] }
 0x48c   : > { %v3486_v40 = vpop.permute.xlu1 %3485  ;;  %v3484_v14 = vpop.permute.xlu0 %3483 }
 0x48d   : > { %3573 = vst.msk [vmem:[#allocation6 + $0x48] sm:$0xff] %vm3563_vm15, %v3486_v40  ;;  %3572 = vst.msk [vmem:[#allocation6 + $0x40] sm:$0xff] %vm3563_vm15, %v3484_v14 }
 0x48e   : > { %3859 = vrot.lane.b32.xlu1 %v3792_v28, %s14955_s29  ;;  %3857 = vrot.lane.b32.xlu0 %v3791_v5, %s14955_s29  ;;  %v3808_v28 = vld [vmem:[#allocation3 + $0xe4] sm:$0xff]  ;;  %v3807_v5 = vld [vmem:[#allocation3 + $0xdc] sm:$0xff] }
 0x490   : > { %v3490_v2 = vpop.permute.xlu1 %3489  ;;  %v3488_v35 = vpop.permute.xlu0 %3487 }
 0x491   : > { %3575 = vst.msk [vmem:[#allocation6 + $0x58] sm:$0xff] %vm3563_vm15, %v3490_v2  ;;  %3574 = vst.msk [vmem:[#allocation6 + $0x50] sm:$0xff] %vm3563_vm15, %v3488_v35  ;;  %v3810_v2 = vld [vmem:[#allocation3 + $0xfc] sm:$0xff]  ;;  %v3809_v35 = vld [vmem:[#allocation3 + $0xf4] sm:$0xff] }
 0x492   : > { %3863 = vrot.lane.b32.xlu1 %v3794_v50, %s14955_s29  ;;  %3861 = vrot.lane.b32.xlu0 %v3793_v22, %s14955_s29 }
 0x494   : > { %v3494_v26 = vpop.permute.xlu1 %3493  ;;  %v3492_v56 = vpop.permute.xlu0 %3491 }
 0x495   : > { %3577 = vst.msk [vmem:[#allocation6 + $0x68] sm:$0xff] %vm3563_vm15, %v3494_v26  ;;  %3576 = vst.msk [vmem:[#allocation6 + $0x60] sm:$0xff] %vm3563_vm15, %v3492_v56  ;;  %v3812_v26 = vld [vmem:[#allocation3 + $0x114] sm:$0xff]  ;;  %v3811_v56 = vld [vmem:[#allocation3 + $0x10c] sm:$0xff] }
 0x496   : > { %3867 = vrot.lane.b32.xlu1 %v3796_v15, %s14955_s29  ;;  %3865 = vrot.lane.b32.xlu0 %v3795_v36, %s14955_s29 }
 0x498   : > { %v3498_v30 = vpop.permute.xlu1 %3497  ;;  %v3496_v34 = vpop.permute.xlu0 %3495 }
 0x499   : > { %3579 = vst.msk [vmem:[#allocation6 + $0x78] sm:$0xff] %vm3563_vm15, %v3498_v30  ;;  %3578 = vst.msk [vmem:[#allocation6 + $0x70] sm:$0xff] %vm3563_vm15, %v3496_v34  ;;  %v3814_v30 = vld [vmem:[#allocation3 + $0x12c] sm:$0xff]  ;;  %v3813_v34 = vld [vmem:[#allocation3 + $0x124] sm:$0xff] }
 0x49a   : > { %3871 = vrot.lane.b32.xlu1 %v3798_v20, %s14955_s29  ;;  %3869 = vrot.lane.b32.xlu0 %v3797_v45, %s14955_s29 }
 0x49c   : > { %v3502_v39 = vpop.permute.xlu1 %3501  ;;  %v3500_v53 = vpop.permute.xlu0 %3499 }
 0x49d   : > { %3581 = vst.msk [vmem:[#allocation6 + $0x88] sm:$0xff] %vm3563_vm15, %v3502_v39  ;;  %3580 = vst.msk [vmem:[#allocation6 + $0x80] sm:$0xff] %vm3563_vm15, %v3500_v53  ;;  %v3816_v39 = vld [vmem:[#allocation3 + $0x144] sm:$0xff]  ;;  %v3815_v53 = vld [vmem:[#allocation3 + $0x13c] sm:$0xff] }
 0x49e   : > { %3875 = vrot.lane.b32.xlu1 %v3800_v48, %s14955_s29  ;;  %3873 = vrot.lane.b32.xlu0 %v3799_v6, %s14955_s29 }
 0x4a0   : > { %v3506_v19 = vpop.permute.xlu1 %3505  ;;  %v3504_v63 = vpop.permute.xlu0 %3503 }
 0x4a1   : > { %3583 = vst.msk [vmem:[#allocation6 + $0x98] sm:$0xff] %vm3563_vm15, %v3506_v19  ;;  %3582 = vst.msk [vmem:[#allocation6 + $0x90] sm:$0xff] %vm3563_vm15, %v3504_v63  ;;  %v3818_v19 = vld [vmem:[#allocation3 + $0x15c] sm:$0xff]  ;;  %v3817_v63 = vld [vmem:[#allocation3 + $0x154] sm:$0xff] }
 0x4a2   : > { %3879 = vrot.lane.b32.xlu1 %v3802_v49, %s14955_s29  ;;  %3877 = vrot.lane.b32.xlu0 %v3801_v61, %s14955_s29 }
 0x4a4   : > { %v3510_v0 = vpop.permute.xlu1 %3509  ;;  %v3508_v10 = vpop.permute.xlu0 %3507 }
 0x4a5   : > { %3585 = vst.msk [vmem:[#allocation6 + $0xa8] sm:$0xff] %vm3563_vm15, %v3510_v0  ;;  %3584 = vst.msk [vmem:[#allocation6 + $0xa0] sm:$0xff] %vm3563_vm15, %v3508_v10  ;;  %v3820_v0 = vld [vmem:[#allocation3 + $0x174] sm:$0xff]  ;;  %v3819_v10 = vld [vmem:[#allocation3 + $0x16c] sm:$0xff] }
 0x4a6   : > { %3883 = vrot.lane.b32.xlu1 %v3804_v17, %s14955_s29  ;;  %3881 = vrot.lane.b32.xlu0 %v3803_v54, %s14955_s29 }
 0x4a8   : > { %v3514_v41 = vpop.permute.xlu1 %3513  ;;  %v3512_v44 = vpop.permute.xlu0 %3511 }
 0x4a9   : > { %3587 = vst.msk [vmem:[#allocation6 + $0xb8] sm:$0xff] %vm3563_vm15, %v3514_v41  ;;  %3586 = vst.msk [vmem:[#allocation6 + $0xb0] sm:$0xff] %vm3563_vm15, %v3512_v44 }
 0x4aa   : > { %3887 = vrot.lane.b32.xlu1 %v3806_v3, %s14955_s29  ;;  %3885 = vrot.lane.b32.xlu0 %v3805_v1, %s14955_s29 }
 0x4ac   : > { %v3518_v25 = vpop.permute.xlu1 %3517  ;;  %v3516_v37 = vpop.permute.xlu0 %3515 }
 0x4ad   : > { %3589 = vst.msk [vmem:[#allocation6 + $0xc8] sm:$0xff] %vm3563_vm15, %v3518_v25  ;;  %3588 = vst.msk [vmem:[#allocation6 + $0xc0] sm:$0xff] %vm3563_vm15, %v3516_v37  ;;  %v4177_v25 = vld [vmem:[#allocation3 + $0x21] sm:$0xff]  ;;  %v4176_v37 = vld [vmem:[#allocation3 + $0x19] sm:$0xff] }
 0x4ae   : > { %3891 = vrot.lane.b32.xlu1 %v3808_v28, %s14955_s29  ;;  %3889 = vrot.lane.b32.xlu0 %v3807_v5, %s14955_s29 }
 0x4b0   : > { %v3522_v40 = vpop.permute.xlu1 %3521  ;;  %v3520_v14 = vpop.permute.xlu0 %3519 }
 0x4b1   : > { %3591 = vst.msk [vmem:[#allocation6 + $0xd8] sm:$0xff] %vm3563_vm15, %v3522_v40  ;;  %3590 = vst.msk [vmem:[#allocation6 + $0xd0] sm:$0xff] %vm3563_vm15, %v3520_v14  ;;  %v4179_v40 = vld [vmem:[#allocation3 + $0x39] sm:$0xff]  ;;  %v4178_v14 = vld [vmem:[#allocation3 + $0x31] sm:$0xff] }
 0x4b2   : > { %3895 = vrot.lane.b32.xlu1 %v3810_v2, %s14955_s29  ;;  %3893 = vrot.lane.b32.xlu0 %v3809_v35, %s14955_s29 }
 0x4b4   : > { %v3526_v50 = vpop.permute.xlu1 %3525  ;;  %v3524_v22 = vpop.permute.xlu0 %3523 }
 0x4b5   : > { %3593 = vst.msk [vmem:[#allocation6 + $0xe8] sm:$0xff] %vm3563_vm15, %v3526_v50  ;;  %3592 = vst.msk [vmem:[#allocation6 + $0xe0] sm:$0xff] %vm3563_vm15, %v3524_v22  ;;  %v4181_v50 = vld [vmem:[#allocation3 + $0x51] sm:$0xff]  ;;  %v4180_v22 = vld [vmem:[#allocation3 + $0x49] sm:$0xff] }
 0x4b6   : > { %3899 = vrot.lane.b32.xlu1 %v3812_v26, %s14955_s29  ;;  %3897 = vrot.lane.b32.xlu0 %v3811_v56, %s14955_s29 }
 0x4b8   : > { %v3530_v15 = vpop.permute.xlu1 %3529  ;;  %v3528_v36 = vpop.permute.xlu0 %3527 }
 0x4b9   : > { %3595 = vst.msk [vmem:[#allocation6 + $0xf8] sm:$0xff] %vm3563_vm15, %v3530_v15  ;;  %3594 = vst.msk [vmem:[#allocation6 + $0xf0] sm:$0xff] %vm3563_vm15, %v3528_v36  ;;  %v4183_v15 = vld [vmem:[#allocation3 + $0x69] sm:$0xff]  ;;  %v4182_v36 = vld [vmem:[#allocation3 + $0x61] sm:$0xff]  ;;  %vm5880_vm15 = vcmask 244960  }
 0x4ba   : > { %3903 = vrot.lane.b32.xlu1 %v3814_v30, %s14955_s29  ;;  %3901 = vrot.lane.b32.xlu0 %v3813_v34, %s14955_s29 }
 0x4bc   : > { %v3663_v20 = vpop.permute.xlu1 %3662  ;;  %v3661_v45 = vpop.permute.xlu0 %3660 }
 0x4bd   : > { %3758 = vst.msk [vmem:[#allocation6 + $0x8] sm:$0xff] %vm3756_vm2, %v3663_v20  ;;  %3757 = vst.msk [vmem:[#allocation6] sm:$0xff] %vm3756_vm2, %v3661_v45  ;;  %v4185_v20 = vld [vmem:[#allocation3 + $0x81] sm:$0xff]  ;;  %v4184_v45 = vld [vmem:[#allocation3 + $0x79] sm:$0xff] }
 0x4be   : > { %3907 = vrot.lane.b32.xlu1 %v3816_v39, %s14955_s29  ;;  %3905 = vrot.lane.b32.xlu0 %v3815_v53, %s14955_s29 }
 0x4c0   : > { %v3667_v48 = vpop.permute.xlu1 %3666  ;;  %v3665_v6 = vpop.permute.xlu0 %3664 }
 0x4c1   : > { %3760 = vst.msk [vmem:[#allocation6 + $0x18] sm:$0xff] %vm3756_vm2, %v3667_v48  ;;  %3759 = vst.msk [vmem:[#allocation6 + $0x10] sm:$0xff] %vm3756_vm2, %v3665_v6  ;;  %v4187_v48 = vld [vmem:[#allocation3 + $0x99] sm:$0xff]  ;;  %v4186_v6 = vld [vmem:[#allocation3 + $0x91] sm:$0xff] }
 0x4c2   : > { %3911 = vrot.lane.b32.xlu1 %v3818_v19, %s14955_s29  ;;  %3909 = vrot.lane.b32.xlu0 %v3817_v63, %s14955_s29 }
 0x4c4   : > { %v3671_v49 = vpop.permute.xlu1 %3670  ;;  %v3669_v61 = vpop.permute.xlu0 %3668 }
 0x4c5   : > { %3762 = vst.msk [vmem:[#allocation6 + $0x28] sm:$0xff] %vm3756_vm2, %v3671_v49  ;;  %3761 = vst.msk [vmem:[#allocation6 + $0x20] sm:$0xff] %vm3756_vm2, %v3669_v61  ;;  %v4189_v49 = vld [vmem:[#allocation3 + $0xb1] sm:$0xff]  ;;  %v4188_v61 = vld [vmem:[#allocation3 + $0xa9] sm:$0xff] }
 0x4c6   : > { %3915 = vrot.lane.b32.xlu1 %v3820_v0, %s14955_s29  ;;  %3913 = vrot.lane.b32.xlu0 %v3819_v10, %s14955_s29  ;;  %s10508_s29 = smov 48  }
 0x4c8   : > { %v3675_v17 = vpop.permute.xlu1 %3674  ;;  %v3673_v54 = vpop.permute.xlu0 %3672 }
 0x4c9   : > { %3764 = vst.msk [vmem:[#allocation6 + $0x38] sm:$0xff] %vm3756_vm2, %v3675_v17  ;;  %3763 = vst.msk [vmem:[#allocation6 + $0x30] sm:$0xff] %vm3756_vm2, %v3673_v54  ;;  %v4191_v17 = vld [vmem:[#allocation3 + $0xc9] sm:$0xff]  ;;  %v4190_v54 = vld [vmem:[#allocation3 + $0xc1] sm:$0xff] }
 0x4ca   : > { %4049 = vrot.lane.b32.xlu1 %v12205_v62, %s10495_s23  ;;  %4047 = vrot.lane.b32.xlu0 %v12207_v46, %s10495_s23 }
 0x4cc   : > { %v3679_v41 = vpop.permute.xlu1 %3678  ;;  %v3677_v44 = vpop.permute.xlu0 %3676 }
 0x4cd   : > { %3766 = vst.msk [vmem:[#allocation6 + $0x48] sm:$0xff] %vm3756_vm2, %v3679_v41  ;;  %3765 = vst.msk [vmem:[#allocation6 + $0x40] sm:$0xff] %vm3756_vm2, %v3677_v44 }
 0x4ce   : > { %4053 = vrot.lane.b32.xlu1 %v12234_v8, %s10495_s23  ;;  %4051 = vrot.lane.b32.xlu0 %v12236_v43, %s10495_s23 }
 0x4d0   : > { %v3683_v3 = vpop.permute.xlu1 %3682  ;;  %v3681_v1 = vpop.permute.xlu0 %3680 }
 0x4d1   : > { %3768 = vst.msk [vmem:[#allocation6 + $0x58] sm:$0xff] %vm3756_vm2, %v3683_v3  ;;  %3767 = vst.msk [vmem:[#allocation6 + $0x50] sm:$0xff] %vm3756_vm2, %v3681_v1  ;;  %v4193_v3 = vld [vmem:[#allocation3 + $0xe1] sm:$0xff]  ;;  %v4192_v1 = vld [vmem:[#allocation3 + $0xd9] sm:$0xff] }
 0x4d2   : > { %4057 = vrot.lane.b32.xlu1 %v12246_v23, %s10495_s23  ;;  %4055 = vrot.lane.b32.xlu0 %v12248_v52, %s10495_s23 }
 0x4d4   : > { %v3687_v62 = vpop.permute.xlu1 %3686  ;;  %v3685_v46 = vpop.permute.xlu0 %3684 }
 0x4d5   : > { %3770 = vst.msk [vmem:[#allocation6 + $0x68] sm:$0xff] %vm3756_vm2, %v3687_v62  ;;  %3769 = vst.msk [vmem:[#allocation6 + $0x60] sm:$0xff] %vm3756_vm2, %v3685_v46 }
 0x4d6   : > { %4061 = vrot.lane.b32.xlu1 %v12258_v4, %s10495_s23  ;;  %4059 = vrot.lane.b32.xlu0 %v12260_v7, %s10495_s23 }
 0x4d8   : > { %v3691_v8 = vpop.permute.xlu1 %3690  ;;  %v3689_v43 = vpop.permute.xlu0 %3688 }
 0x4d9   : > { %3772 = vst.msk [vmem:[#allocation6 + $0x78] sm:$0xff] %vm3756_vm2, %v3691_v8  ;;  %3771 = vst.msk [vmem:[#allocation6 + $0x70] sm:$0xff] %vm3756_vm2, %v3689_v43  ;;  %v4195_v8 = vld [vmem:[#allocation3 + $0xf9] sm:$0xff]  ;;  %v4194_v43 = vld [vmem:[#allocation3 + $0xf1] sm:$0xff] }
 0x4da   : > { %4065 = vrot.lane.b32.xlu1 %v12270_v16, %s10495_s23  ;;  %4063 = vrot.lane.b32.xlu0 %v12272_v33, %s10495_s23 }
 0x4dc   : > { %v3695_v23 = vpop.permute.xlu1 %3694  ;;  %v3693_v52 = vpop.permute.xlu0 %3692 }
 0x4dd   : > { %3774 = vst.msk [vmem:[#allocation6 + $0x88] sm:$0xff] %vm3756_vm2, %v3695_v23  ;;  %3773 = vst.msk [vmem:[#allocation6 + $0x80] sm:$0xff] %vm3756_vm2, %v3693_v52 }
 0x4de   : > { %4069 = vrot.lane.b32.xlu1 %v12282_v27, %s10495_s23  ;;  %4067 = vrot.lane.b32.xlu0 %v12284_v51, %s10495_s23 }
 0x4e0   : > { %v3699_v4 = vpop.permute.xlu1 %3698  ;;  %v3697_v7 = vpop.permute.xlu0 %3696 }
 0x4e1   : > { %3776 = vst.msk [vmem:[#allocation6 + $0x98] sm:$0xff] %vm3756_vm2, %v3699_v4  ;;  %3775 = vst.msk [vmem:[#allocation6 + $0x90] sm:$0xff] %vm3756_vm2, %v3697_v7  ;;  %v4197_v4 = vld [vmem:[#allocation3 + $0x111] sm:$0xff]  ;;  %v4196_v7 = vld [vmem:[#allocation3 + $0x109] sm:$0xff] }
 0x4e2   : > { %4073 = vrot.lane.b32.xlu1 %v12294_v31, %s10495_s23  ;;  %4071 = vrot.lane.b32.xlu0 %v12296_v57, %s10495_s23 }
 0x4e4   : > { %v3703_v16 = vpop.permute.xlu1 %3702  ;;  %v3701_v33 = vpop.permute.xlu0 %3700 }
 0x4e5   : > { %3778 = vst.msk [vmem:[#allocation6 + $0xa8] sm:$0xff] %vm3756_vm2, %v3703_v16  ;;  %3777 = vst.msk [vmem:[#allocation6 + $0xa0] sm:$0xff] %vm3756_vm2, %v3701_v33 }
 0x4e6   : > { %4077 = vrot.lane.b32.xlu1 %v12306_v9, %s10495_s23  ;;  %4075 = vrot.lane.b32.xlu0 %v12308_v18, %s10495_s23 }
 0x4e8   : > { %v3707_v27 = vpop.permute.xlu1 %3706  ;;  %v3705_v51 = vpop.permute.xlu0 %3704 }
 0x4e9   : > { %3780 = vst.msk [vmem:[#allocation6 + $0xb8] sm:$0xff] %vm3756_vm2, %v3707_v27  ;;  %3779 = vst.msk [vmem:[#allocation6 + $0xb0] sm:$0xff] %vm3756_vm2, %v3705_v51  ;;  %v4199_v27 = vld [vmem:[#allocation3 + $0x129] sm:$0xff]  ;;  %v4198_v51 = vld [vmem:[#allocation3 + $0x121] sm:$0xff] }
 0x4ea   : > { %4081 = vrot.lane.b32.xlu1 %v12318_v11, %s10495_s23  ;;  %4079 = vrot.lane.b32.xlu0 %v12320_v24, %s10495_s23 }
 0x4ec   : > { %v3711_v31 = vpop.permute.xlu1 %3710  ;;  %v3709_v57 = vpop.permute.xlu0 %3708 }
 0x4ed   : > { %3782 = vst.msk [vmem:[#allocation6 + $0xc8] sm:$0xff] %vm3756_vm2, %v3711_v31  ;;  %3781 = vst.msk [vmem:[#allocation6 + $0xc0] sm:$0xff] %vm3756_vm2, %v3709_v57 }
 0x4ee   : > { %4085 = vrot.lane.b32.xlu1 %v12330_v47, %s10495_s23  ;;  %4083 = vrot.lane.b32.xlu0 %v12332_v21, %s10495_s23 }
 0x4f0   : > { %v3715_v9 = vpop.permute.xlu1 %3714  ;;  %v3713_v18 = vpop.permute.xlu0 %3712 }
 0x4f1   : > { %3784 = vst.msk [vmem:[#allocation6 + $0xd8] sm:$0xff] %vm3756_vm2, %v3715_v9  ;;  %3783 = vst.msk [vmem:[#allocation6 + $0xd0] sm:$0xff] %vm3756_vm2, %v3713_v18  ;;  %v4201_v9 = vld [vmem:[#allocation3 + $0x141] sm:$0xff]  ;;  %v4200_v18 = vld [vmem:[#allocation3 + $0x139] sm:$0xff] }
 0x4f2   : > { %4089 = vrot.lane.b32.xlu1 %v12342_v12, %s10495_s23  ;;  %4087 = vrot.lane.b32.xlu0 %v12344_v32, %s10495_s23 }
 0x4f4   : > { %v3719_v11 = vpop.permute.xlu1 %3718  ;;  %v3717_v24 = vpop.permute.xlu0 %3716 }
 0x4f5   : > { %3786 = vst.msk [vmem:[#allocation6 + $0xe8] sm:$0xff] %vm3756_vm2, %v3719_v11  ;;  %3785 = vst.msk [vmem:[#allocation6 + $0xe0] sm:$0xff] %vm3756_vm2, %v3717_v24 }
 0x4f6   : > { %4093 = vrot.lane.b32.xlu1 %v12354_v60, %s10495_s23  ;;  %4091 = vrot.lane.b32.xlu0 %v12356_v29, %s10495_s23 }
 0x4f8   : > { %v3723_v47 = vpop.permute.xlu1 %3722  ;;  %v3721_v21 = vpop.permute.xlu0 %3720 }
 0x4f9   : > { %3788 = vst.msk [vmem:[#allocation6 + $0xf8] sm:$0xff] %vm3756_vm2, %v3723_v47  ;;  %3787 = vst.msk [vmem:[#allocation6 + $0xf0] sm:$0xff] %vm3756_vm2, %v3721_v21  ;;  %v4203_v47 = vld [vmem:[#allocation3 + $0x159] sm:$0xff]  ;;  %v4202_v21 = vld [vmem:[#allocation3 + $0x151] sm:$0xff]  ;;  %vm6074_vm2 = vcmask 261360  }
 0x4fa   : > { %4097 = vrot.lane.b32.xlu1 %v12366_v55, %s10495_s23  ;;  %4095 = vrot.lane.b32.xlu0 %v12368_v58, %s10495_s23 }
 0x4fc   : > { %v3856_v12 = vpop.permute.xlu1 %3855  ;;  %v3854_v32 = vpop.permute.xlu0 %3853 }
 0x4fd   : > { %3951 = vst.msk [vmem:[#allocation6 + $0x8] sm:$0xff] %vm3949_vm3, %v3856_v12  ;;  %3950 = vst.msk [vmem:[#allocation6] sm:$0xff] %vm3949_vm3, %v3854_v32 }
 0x4fe   : > { %4101 = vrot.lane.b32.xlu1 %v12378_v59, %s10495_s23  ;;  %4099 = vrot.lane.b32.xlu0 %v12380_v13, %s10495_s23  ;;  %v4014_v59 = vld [vmem:[#allocation3 + $0x188] sm:$0xff]  ;;  %v4013_v13 = vld [vmem:[#allocation3 + $0x180] sm:$0xff] }
 0x500   : > { %v3860_v60 = vpop.permute.xlu1 %3859  ;;  %v3858_v29 = vpop.permute.xlu0 %3857 }
 0x501   : > { %3953 = vst.msk [vmem:[#allocation6 + $0x18] sm:$0xff] %vm3949_vm3, %v3860_v60  ;;  %3952 = vst.msk [vmem:[#allocation6 + $0x10] sm:$0xff] %vm3949_vm3, %v3858_v29  ;;  %v4205_v60 = vld [vmem:[#allocation3 + $0x171] sm:$0xff]  ;;  %v4204_v29 = vld [vmem:[#allocation3 + $0x169] sm:$0xff] }
 0x502   : > { %4105 = vrot.lane.b32.xlu1 %v12389_v38, %s10495_s23  ;;  %4103 = vrot.lane.b32.xlu0 %v12391_v42, %s10495_s23 }
 0x504   : > { %v3864_v55 = vpop.permute.xlu1 %3863  ;;  %v3862_v58 = vpop.permute.xlu0 %3861 }
 0x505   : > { %3955 = vst.msk [vmem:[#allocation6 + $0x28] sm:$0xff] %vm3949_vm3, %v3864_v55  ;;  %3954 = vst.msk [vmem:[#allocation6 + $0x20] sm:$0xff] %vm3949_vm3, %v3862_v58 }
 0x506   : > { %4109 = vrot.lane.b32.xlu1 %v4014_v59, %s10495_s23  ;;  %4107 = vrot.lane.b32.xlu0 %v4013_v13, %s10495_s23  ;;  %v4207_v59 = vld [vmem:[#allocation3 + $0x189] sm:$0xff]  ;;  %v4206_v13 = vld [vmem:[#allocation3 + $0x181] sm:$0xff]  ;;  %s10498_s23 = smov 22  }
 0x508   : > { %v3868_v28 = vpop.permute.xlu1 %3867  ;;  %v3866_v5 = vpop.permute.xlu0 %3865 }
 0x509   : > { %3957 = vst.msk [vmem:[#allocation6 + $0x38] sm:$0xff] %vm3949_vm3, %v3868_v28  ;;  %3956 = vst.msk [vmem:[#allocation6 + $0x30] sm:$0xff] %vm3949_vm3, %v3866_v5 }
 0x50a   : > { %4242 = vrot.lane.b32.xlu1 %v4177_v25, %s10488_s26  ;;  %4240 = vrot.lane.b32.xlu0 %v4176_v37, %s10488_s26  ;;  %v4370_v25 = vld [vmem:[#allocation3 + $0x22] sm:$0xff]  ;;  %v4369_v37 = vld [vmem:[#allocation3 + $0x1a] sm:$0xff] }
 0x50c   : > { %v3872_v38 = vpop.permute.xlu1 %3871  ;;  %v3870_v42 = vpop.permute.xlu0 %3869 }
 0x50d   : > { %3959 = vst.msk [vmem:[#allocation6 + $0x48] sm:$0xff] %vm3949_vm3, %v3872_v38  ;;  %3958 = vst.msk [vmem:[#allocation6 + $0x40] sm:$0xff] %vm3949_vm3, %v3870_v42 }
 0x50e   : > { %4246 = vrot.lane.b32.xlu1 %v4179_v40, %s10488_s26  ;;  %4244 = vrot.lane.b32.xlu0 %v4178_v14, %s10488_s26  ;;  %v4372_v40 = vld [vmem:[#allocation3 + $0x3a] sm:$0xff]  ;;  %v4371_v14 = vld [vmem:[#allocation3 + $0x32] sm:$0xff] }
 0x510   : > { %v3876_v2 = vpop.permute.xlu1 %3875  ;;  %v3874_v35 = vpop.permute.xlu0 %3873 }
 0x511   : > { %3961 = vst.msk [vmem:[#allocation6 + $0x58] sm:$0xff] %vm3949_vm3, %v3876_v2  ;;  %3960 = vst.msk [vmem:[#allocation6 + $0x50] sm:$0xff] %vm3949_vm3, %v3874_v35 }
 0x512   : > { %4250 = vrot.lane.b32.xlu1 %v4181_v50, %s10488_s26  ;;  %4248 = vrot.lane.b32.xlu0 %v4180_v22, %s10488_s26  ;;  %v4374_v50 = vld [vmem:[#allocation3 + $0x52] sm:$0xff]  ;;  %v4373_v22 = vld [vmem:[#allocation3 + $0x4a] sm:$0xff] }
 0x514   : > { %v3880_v26 = vpop.permute.xlu1 %3879  ;;  %v3878_v56 = vpop.permute.xlu0 %3877 }
 0x515   : > { %3963 = vst.msk [vmem:[#allocation6 + $0x68] sm:$0xff] %vm3949_vm3, %v3880_v26  ;;  %3962 = vst.msk [vmem:[#allocation6 + $0x60] sm:$0xff] %vm3949_vm3, %v3878_v56 }
 0x516   : > { %4254 = vrot.lane.b32.xlu1 %v4183_v15, %s10488_s26  ;;  %4252 = vrot.lane.b32.xlu0 %v4182_v36, %s10488_s26  ;;  %v4376_v15 = vld [vmem:[#allocation3 + $0x6a] sm:$0xff]  ;;  %v4375_v36 = vld [vmem:[#allocation3 + $0x62] sm:$0xff] }
 0x518   : > { %v3884_v30 = vpop.permute.xlu1 %3883  ;;  %v3882_v34 = vpop.permute.xlu0 %3881 }
 0x519   : > { %3965 = vst.msk [vmem:[#allocation6 + $0x78] sm:$0xff] %vm3949_vm3, %v3884_v30  ;;  %3964 = vst.msk [vmem:[#allocation6 + $0x70] sm:$0xff] %vm3949_vm3, %v3882_v34 }
 0x51a   : > { %4258 = vrot.lane.b32.xlu1 %v4185_v20, %s10488_s26  ;;  %4256 = vrot.lane.b32.xlu0 %v4184_v45, %s10488_s26  ;;  %v4378_v20 = vld [vmem:[#allocation3 + $0x82] sm:$0xff]  ;;  %v4377_v45 = vld [vmem:[#allocation3 + $0x7a] sm:$0xff] }
 0x51c   : > { %v3888_v39 = vpop.permute.xlu1 %3887  ;;  %v3886_v53 = vpop.permute.xlu0 %3885 }
 0x51d   : > { %3967 = vst.msk [vmem:[#allocation6 + $0x88] sm:$0xff] %vm3949_vm3, %v3888_v39  ;;  %3966 = vst.msk [vmem:[#allocation6 + $0x80] sm:$0xff] %vm3949_vm3, %v3886_v53 }
 0x51e   : > { %4262 = vrot.lane.b32.xlu1 %v4187_v48, %s10488_s26  ;;  %4260 = vrot.lane.b32.xlu0 %v4186_v6, %s10488_s26  ;;  %v4380_v48 = vld [vmem:[#allocation3 + $0x9a] sm:$0xff]  ;;  %v4379_v6 = vld [vmem:[#allocation3 + $0x92] sm:$0xff] }
 0x520   : > { %v3892_v19 = vpop.permute.xlu1 %3891  ;;  %v3890_v63 = vpop.permute.xlu0 %3889 }
 0x521   : > { %3969 = vst.msk [vmem:[#allocation6 + $0x98] sm:$0xff] %vm3949_vm3, %v3892_v19  ;;  %3968 = vst.msk [vmem:[#allocation6 + $0x90] sm:$0xff] %vm3949_vm3, %v3890_v63 }
 0x522   : > { %4266 = vrot.lane.b32.xlu1 %v4189_v49, %s10488_s26  ;;  %4264 = vrot.lane.b32.xlu0 %v4188_v61, %s10488_s26  ;;  %v4382_v49 = vld [vmem:[#allocation3 + $0xb2] sm:$0xff]  ;;  %v4381_v61 = vld [vmem:[#allocation3 + $0xaa] sm:$0xff] }
 0x524   : > { %v3896_v0 = vpop.permute.xlu1 %3895  ;;  %v3894_v10 = vpop.permute.xlu0 %3893 }
 0x525   : > { %3971 = vst.msk [vmem:[#allocation6 + $0xa8] sm:$0xff] %vm3949_vm3, %v3896_v0  ;;  %3970 = vst.msk [vmem:[#allocation6 + $0xa0] sm:$0xff] %vm3949_vm3, %v3894_v10 }
 0x526   : > { %4270 = vrot.lane.b32.xlu1 %v4191_v17, %s10488_s26  ;;  %4268 = vrot.lane.b32.xlu0 %v4190_v54, %s10488_s26  ;;  %v4384_v17 = vld [vmem:[#allocation3 + $0xca] sm:$0xff]  ;;  %v4383_v54 = vld [vmem:[#allocation3 + $0xc2] sm:$0xff] }
 0x528   : > { %v3900_v41 = vpop.permute.xlu1 %3899  ;;  %v3898_v44 = vpop.permute.xlu0 %3897 }
 0x529   : > { %3973 = vst.msk [vmem:[#allocation6 + $0xb8] sm:$0xff] %vm3949_vm3, %v3900_v41  ;;  %3972 = vst.msk [vmem:[#allocation6 + $0xb0] sm:$0xff] %vm3949_vm3, %v3898_v44 }
 0x52a   : > { %4274 = vrot.lane.b32.xlu1 %v4193_v3, %s10488_s26  ;;  %4272 = vrot.lane.b32.xlu0 %v4192_v1, %s10488_s26  ;;  %v4386_v3 = vld [vmem:[#allocation3 + $0xe2] sm:$0xff]  ;;  %v4385_v1 = vld [vmem:[#allocation3 + $0xda] sm:$0xff] }
 0x52c   : > { %v3904_v62 = vpop.permute.xlu1 %3903  ;;  %v3902_v46 = vpop.permute.xlu0 %3901 }
 0x52d   : > { %3975 = vst.msk [vmem:[#allocation6 + $0xc8] sm:$0xff] %vm3949_vm3, %v3904_v62  ;;  %3974 = vst.msk [vmem:[#allocation6 + $0xc0] sm:$0xff] %vm3949_vm3, %v3902_v46 }
 0x52e   : > { %4278 = vrot.lane.b32.xlu1 %v4195_v8, %s10488_s26  ;;  %4276 = vrot.lane.b32.xlu0 %v4194_v43, %s10488_s26  ;;  %v4388_v8 = vld [vmem:[#allocation3 + $0xfa] sm:$0xff]  ;;  %v4387_v43 = vld [vmem:[#allocation3 + $0xf2] sm:$0xff] }
 0x530   : > { %v3908_v23 = vpop.permute.xlu1 %3907  ;;  %v3906_v52 = vpop.permute.xlu0 %3905 }
 0x531   : > { %3977 = vst.msk [vmem:[#allocation6 + $0xd8] sm:$0xff] %vm3949_vm3, %v3908_v23  ;;  %3976 = vst.msk [vmem:[#allocation6 + $0xd0] sm:$0xff] %vm3949_vm3, %v3906_v52 }
 0x532   : > { %4282 = vrot.lane.b32.xlu1 %v4197_v4, %s10488_s26  ;;  %4280 = vrot.lane.b32.xlu0 %v4196_v7, %s10488_s26  ;;  %v4390_v4 = vld [vmem:[#allocation3 + $0x112] sm:$0xff]  ;;  %v4389_v7 = vld [vmem:[#allocation3 + $0x10a] sm:$0xff] }
 0x534   : > { %v3912_v16 = vpop.permute.xlu1 %3911  ;;  %v3910_v33 = vpop.permute.xlu0 %3909 }
 0x535   : > { %3979 = vst.msk [vmem:[#allocation6 + $0xe8] sm:$0xff] %vm3949_vm3, %v3912_v16  ;;  %3978 = vst.msk [vmem:[#allocation6 + $0xe0] sm:$0xff] %vm3949_vm3, %v3910_v33 }
 0x536   : > { %4286 = vrot.lane.b32.xlu1 %v4199_v27, %s10488_s26  ;;  %4284 = vrot.lane.b32.xlu0 %v4198_v51, %s10488_s26  ;;  %v4392_v27 = vld [vmem:[#allocation3 + $0x12a] sm:$0xff]  ;;  %v4391_v51 = vld [vmem:[#allocation3 + $0x122] sm:$0xff] }
 0x538   : > { %v3916_v31 = vpop.permute.xlu1 %3915  ;;  %v3914_v57 = vpop.permute.xlu0 %3913 }
 0x539   : > { %3981 = vst.msk [vmem:[#allocation6 + $0xf8] sm:$0xff] %vm3949_vm3, %v3916_v31  ;;  %3980 = vst.msk [vmem:[#allocation6 + $0xf0] sm:$0xff] %vm3949_vm3, %v3914_v57  ;;  %vm6267_vm3 = vcmask 277760  }
 0x53a   : > { %4290 = vrot.lane.b32.xlu1 %v4201_v9, %s10488_s26  ;;  %4288 = vrot.lane.b32.xlu0 %v4200_v18, %s10488_s26  ;;  %v4394_v9 = vld [vmem:[#allocation3 + $0x142] sm:$0xff]  ;;  %v4393_v18 = vld [vmem:[#allocation3 + $0x13a] sm:$0xff] }
 0x53c   : > { %v4050_v11 = vpop.permute.xlu1 %4049  ;;  %v4048_v24 = vpop.permute.xlu0 %4047 }
 0x53d   : > { %4145 = vst.msk [vmem:[#allocation6 + $0x8] sm:$0xff] %vm4143_vm4, %v4050_v11  ;;  %4144 = vst.msk [vmem:[#allocation6] sm:$0xff] %vm4143_vm4, %v4048_v24 }
 0x53e   : > { %4294 = vrot.lane.b32.xlu1 %v4203_v47, %s10488_s26  ;;  %4292 = vrot.lane.b32.xlu0 %v4202_v21, %s10488_s26  ;;  %v4396_v47 = vld [vmem:[#allocation3 + $0x15a] sm:$0xff]  ;;  %v4395_v21 = vld [vmem:[#allocation3 + $0x152] sm:$0xff] }
 0x540   : > { %v4054_v12 = vpop.permute.xlu1 %4053  ;;  %v4052_v32 = vpop.permute.xlu0 %4051 }
 0x541   : > { %4147 = vst.msk [vmem:[#allocation6 + $0x18] sm:$0xff] %vm4143_vm4, %v4054_v12  ;;  %4146 = vst.msk [vmem:[#allocation6 + $0x10] sm:$0xff] %vm4143_vm4, %v4052_v32 }
 0x542   : > { %4298 = vrot.lane.b32.xlu1 %v4205_v60, %s10488_s26  ;;  %4296 = vrot.lane.b32.xlu0 %v4204_v29, %s10488_s26  ;;  %v4398_v60 = vld [vmem:[#allocation3 + $0x172] sm:$0xff]  ;;  %v4397_v29 = vld [vmem:[#allocation3 + $0x16a] sm:$0xff] }
 0x544   : > { %v4058_v55 = vpop.permute.xlu1 %4057  ;;  %v4056_v58 = vpop.permute.xlu0 %4055 }
 0x545   : > { %4149 = vst.msk [vmem:[#allocation6 + $0x28] sm:$0xff] %vm4143_vm4, %v4058_v55  ;;  %4148 = vst.msk [vmem:[#allocation6 + $0x20] sm:$0xff] %vm4143_vm4, %v4056_v58 }
 0x546   : > { %4302 = vrot.lane.b32.xlu1 %v4207_v59, %s10488_s26  ;;  %4300 = vrot.lane.b32.xlu0 %v4206_v13, %s10488_s26  ;;  %v4400_v59 = vld [vmem:[#allocation3 + $0x18a] sm:$0xff]  ;;  %v4399_v13 = vld [vmem:[#allocation3 + $0x182] sm:$0xff] }
 0x548   : > { %v4062_v28 = vpop.permute.xlu1 %4061  ;;  %v4060_v5 = vpop.permute.xlu0 %4059 }
 0x549   : > { %4151 = vst.msk [vmem:[#allocation6 + $0x38] sm:$0xff] %vm4143_vm4, %v4062_v28  ;;  %4150 = vst.msk [vmem:[#allocation6 + $0x30] sm:$0xff] %vm4143_vm4, %v4060_v5 }
 0x54a   : > { %4435 = vrot.lane.b32.xlu1 %v4370_v25, %s10496_s17  ;;  %4433 = vrot.lane.b32.xlu0 %v4369_v37, %s10496_s17  ;;  %v4563_v25 = vld [vmem:[#allocation3 + $0x23] sm:$0xff]  ;;  %v4562_v37 = vld [vmem:[#allocation3 + $0x1b] sm:$0xff] }
 0x54c   : > { %v4066_v38 = vpop.permute.xlu1 %4065  ;;  %v4064_v42 = vpop.permute.xlu0 %4063 }
 0x54d   : > { %4153 = vst.msk [vmem:[#allocation6 + $0x48] sm:$0xff] %vm4143_vm4, %v4066_v38  ;;  %4152 = vst.msk [vmem:[#allocation6 + $0x40] sm:$0xff] %vm4143_vm4, %v4064_v42 }
 0x54e   : > { %4439 = vrot.lane.b32.xlu1 %v4372_v40, %s10496_s17  ;;  %4437 = vrot.lane.b32.xlu0 %v4371_v14, %s10496_s17  ;;  %v4565_v40 = vld [vmem:[#allocation3 + $0x3b] sm:$0xff]  ;;  %v4564_v14 = vld [vmem:[#allocation3 + $0x33] sm:$0xff] }
 0x550   : > { %v4070_v2 = vpop.permute.xlu1 %4069  ;;  %v4068_v35 = vpop.permute.xlu0 %4067 }
 0x551   : > { %4155 = vst.msk [vmem:[#allocation6 + $0x58] sm:$0xff] %vm4143_vm4, %v4070_v2  ;;  %4154 = vst.msk [vmem:[#allocation6 + $0x50] sm:$0xff] %vm4143_vm4, %v4068_v35 }
 0x552   : > { %4443 = vrot.lane.b32.xlu1 %v4374_v50, %s10496_s17  ;;  %4441 = vrot.lane.b32.xlu0 %v4373_v22, %s10496_s17  ;;  %v4567_v50 = vld [vmem:[#allocation3 + $0x53] sm:$0xff]  ;;  %v4566_v22 = vld [vmem:[#allocation3 + $0x4b] sm:$0xff] }
 0x554   : > { %v4074_v26 = vpop.permute.xlu1 %4073  ;;  %v4072_v56 = vpop.permute.xlu0 %4071 }
 0x555   : > { %4157 = vst.msk [vmem:[#allocation6 + $0x68] sm:$0xff] %vm4143_vm4, %v4074_v26  ;;  %4156 = vst.msk [vmem:[#allocation6 + $0x60] sm:$0xff] %vm4143_vm4, %v4072_v56 }
 0x556   : > { %4447 = vrot.lane.b32.xlu1 %v4376_v15, %s10496_s17  ;;  %4445 = vrot.lane.b32.xlu0 %v4375_v36, %s10496_s17  ;;  %v4569_v15 = vld [vmem:[#allocation3 + $0x6b] sm:$0xff]  ;;  %v4568_v36 = vld [vmem:[#allocation3 + $0x63] sm:$0xff] }
 0x558   : > { %v4078_v30 = vpop.permute.xlu1 %4077  ;;  %v4076_v34 = vpop.permute.xlu0 %4075 }
 0x559   : > { %4159 = vst.msk [vmem:[#allocation6 + $0x78] sm:$0xff] %vm4143_vm4, %v4078_v30  ;;  %4158 = vst.msk [vmem:[#allocation6 + $0x70] sm:$0xff] %vm4143_vm4, %v4076_v34 }
 0x55a   : > { %4451 = vrot.lane.b32.xlu1 %v4378_v20, %s10496_s17  ;;  %4449 = vrot.lane.b32.xlu0 %v4377_v45, %s10496_s17  ;;  %v4571_v20 = vld [vmem:[#allocation3 + $0x83] sm:$0xff]  ;;  %v4570_v45 = vld [vmem:[#allocation3 + $0x7b] sm:$0xff] }
 0x55c   : > { %v4082_v39 = vpop.permute.xlu1 %4081  ;;  %v4080_v53 = vpop.permute.xlu0 %4079 }
 0x55d   : > { %4161 = vst.msk [vmem:[#allocation6 + $0x88] sm:$0xff] %vm4143_vm4, %v4082_v39  ;;  %4160 = vst.msk [vmem:[#allocation6 + $0x80] sm:$0xff] %vm4143_vm4, %v4080_v53 }
 0x55e   : > { %4455 = vrot.lane.b32.xlu1 %v4380_v48, %s10496_s17  ;;  %4453 = vrot.lane.b32.xlu0 %v4379_v6, %s10496_s17  ;;  %v4573_v48 = vld [vmem:[#allocation3 + $0x9b] sm:$0xff]  ;;  %v4572_v6 = vld [vmem:[#allocation3 + $0x93] sm:$0xff] }
 0x560   : > { %v4086_v19 = vpop.permute.xlu1 %4085  ;;  %v4084_v63 = vpop.permute.xlu0 %4083 }
 0x561   : > { %4163 = vst.msk [vmem:[#allocation6 + $0x98] sm:$0xff] %vm4143_vm4, %v4086_v19  ;;  %4162 = vst.msk [vmem:[#allocation6 + $0x90] sm:$0xff] %vm4143_vm4, %v4084_v63 }
 0x562   : > { %4459 = vrot.lane.b32.xlu1 %v4382_v49, %s10496_s17  ;;  %4457 = vrot.lane.b32.xlu0 %v4381_v61, %s10496_s17  ;;  %v4575_v49 = vld [vmem:[#allocation3 + $0xb3] sm:$0xff]  ;;  %v4574_v61 = vld [vmem:[#allocation3 + $0xab] sm:$0xff] }
 0x564   : > { %v4090_v0 = vpop.permute.xlu1 %4089  ;;  %v4088_v10 = vpop.permute.xlu0 %4087 }
 0x565   : > { %4165 = vst.msk [vmem:[#allocation6 + $0xa8] sm:$0xff] %vm4143_vm4, %v4090_v0  ;;  %4164 = vst.msk [vmem:[#allocation6 + $0xa0] sm:$0xff] %vm4143_vm4, %v4088_v10 }
 0x566   : > { %4463 = vrot.lane.b32.xlu1 %v4384_v17, %s10496_s17  ;;  %4461 = vrot.lane.b32.xlu0 %v4383_v54, %s10496_s17  ;;  %v4577_v17 = vld [vmem:[#allocation3 + $0xcb] sm:$0xff]  ;;  %v4576_v54 = vld [vmem:[#allocation3 + $0xc3] sm:$0xff] }
 0x568   : > { %v4094_v41 = vpop.permute.xlu1 %4093  ;;  %v4092_v44 = vpop.permute.xlu0 %4091 }
 0x569   : > { %4167 = vst.msk [vmem:[#allocation6 + $0xb8] sm:$0xff] %vm4143_vm4, %v4094_v41  ;;  %4166 = vst.msk [vmem:[#allocation6 + $0xb0] sm:$0xff] %vm4143_vm4, %v4092_v44 }
 0x56a   : > { %4467 = vrot.lane.b32.xlu1 %v4386_v3, %s10496_s17  ;;  %4465 = vrot.lane.b32.xlu0 %v4385_v1, %s10496_s17  ;;  %v4579_v3 = vld [vmem:[#allocation3 + $0xe3] sm:$0xff]  ;;  %v4578_v1 = vld [vmem:[#allocation3 + $0xdb] sm:$0xff] }
 0x56c   : > { %v4098_v62 = vpop.permute.xlu1 %4097  ;;  %v4096_v46 = vpop.permute.xlu0 %4095 }
 0x56d   : > { %4169 = vst.msk [vmem:[#allocation6 + $0xc8] sm:$0xff] %vm4143_vm4, %v4098_v62  ;;  %4168 = vst.msk [vmem:[#allocation6 + $0xc0] sm:$0xff] %vm4143_vm4, %v4096_v46 }
 0x56e   : > { %4471 = vrot.lane.b32.xlu1 %v4388_v8, %s10496_s17  ;;  %4469 = vrot.lane.b32.xlu0 %v4387_v43, %s10496_s17  ;;  %v4581_v8 = vld [vmem:[#allocation3 + $0xfb] sm:$0xff]  ;;  %v4580_v43 = vld [vmem:[#allocation3 + $0xf3] sm:$0xff] }
 0x570   : > { %v4102_v23 = vpop.permute.xlu1 %4101  ;;  %v4100_v52 = vpop.permute.xlu0 %4099 }
 0x571   : > { %4171 = vst.msk [vmem:[#allocation6 + $0xd8] sm:$0xff] %vm4143_vm4, %v4102_v23  ;;  %4170 = vst.msk [vmem:[#allocation6 + $0xd0] sm:$0xff] %vm4143_vm4, %v4100_v52 }
 0x572   : > { %4475 = vrot.lane.b32.xlu1 %v4390_v4, %s10496_s17  ;;  %4473 = vrot.lane.b32.xlu0 %v4389_v7, %s10496_s17  ;;  %v4583_v4 = vld [vmem:[#allocation3 + $0x113] sm:$0xff]  ;;  %v4582_v7 = vld [vmem:[#allocation3 + $0x10b] sm:$0xff] }
 0x574   : > { %v4106_v16 = vpop.permute.xlu1 %4105  ;;  %v4104_v33 = vpop.permute.xlu0 %4103 }
 0x575   : > { %4173 = vst.msk [vmem:[#allocation6 + $0xe8] sm:$0xff] %vm4143_vm4, %v4106_v16  ;;  %4172 = vst.msk [vmem:[#allocation6 + $0xe0] sm:$0xff] %vm4143_vm4, %v4104_v33 }
 0x576   : > { %4479 = vrot.lane.b32.xlu1 %v4392_v27, %s10496_s17  ;;  %4477 = vrot.lane.b32.xlu0 %v4391_v51, %s10496_s17  ;;  %v4585_v27 = vld [vmem:[#allocation3 + $0x12b] sm:$0xff]  ;;  %v4584_v51 = vld [vmem:[#allocation3 + $0x123] sm:$0xff] }
 0x578   : > { %v4110_v31 = vpop.permute.xlu1 %4109  ;;  %v4108_v57 = vpop.permute.xlu0 %4107 }
 0x579   : > { %4175 = vst.msk [vmem:[#allocation6 + $0xf8] sm:$0xff] %vm4143_vm4, %v4110_v31  ;;  %4174 = vst.msk [vmem:[#allocation6 + $0xf0] sm:$0xff] %vm4143_vm4, %v4108_v57  ;;  %vm6460_vm4 = vcmask 294160  }
 0x57a   : > { %4483 = vrot.lane.b32.xlu1 %v4394_v9, %s10496_s17  ;;  %4481 = vrot.lane.b32.xlu0 %v4393_v18, %s10496_s17  ;;  %v4587_v9 = vld [vmem:[#allocation3 + $0x143] sm:$0xff]  ;;  %v4586_v18 = vld [vmem:[#allocation3 + $0x13b] sm:$0xff] }
 0x57c   : > { %v4243_v11 = vpop.permute.xlu1 %4242  ;;  %v4241_v24 = vpop.permute.xlu0 %4240 }
 0x57d   : > { %4338 = vst.msk [vmem:[#allocation6 + $0x8] sm:$0xff] %vm4336_vm7, %v4243_v11  ;;  %4337 = vst.msk [vmem:[#allocation6] sm:$0xff] %vm4336_vm7, %v4241_v24 }
 0x57e   : > { %4487 = vrot.lane.b32.xlu1 %v4396_v47, %s10496_s17  ;;  %4485 = vrot.lane.b32.xlu0 %v4395_v21, %s10496_s17  ;;  %v4589_v47 = vld [vmem:[#allocation3 + $0x15b] sm:$0xff]  ;;  %v4588_v21 = vld [vmem:[#allocation3 + $0x153] sm:$0xff] }
 0x580   : > { %v4247_v12 = vpop.permute.xlu1 %4246  ;;  %v4245_v32 = vpop.permute.xlu0 %4244 }
 0x581   : > { %4340 = vst.msk [vmem:[#allocation6 + $0x18] sm:$0xff] %vm4336_vm7, %v4247_v12  ;;  %4339 = vst.msk [vmem:[#allocation6 + $0x10] sm:$0xff] %vm4336_vm7, %v4245_v32 }
 0x582   : > { %4491 = vrot.lane.b32.xlu1 %v4398_v60, %s10496_s17  ;;  %4489 = vrot.lane.b32.xlu0 %v4397_v29, %s10496_s17  ;;  %v4591_v60 = vld [vmem:[#allocation3 + $0x173] sm:$0xff]  ;;  %v4590_v29 = vld [vmem:[#allocation3 + $0x16b] sm:$0xff] }
 0x584   : > { %v4251_v55 = vpop.permute.xlu1 %4250  ;;  %v4249_v58 = vpop.permute.xlu0 %4248 }
 0x585   : > { %4342 = vst.msk [vmem:[#allocation6 + $0x28] sm:$0xff] %vm4336_vm7, %v4251_v55  ;;  %4341 = vst.msk [vmem:[#allocation6 + $0x20] sm:$0xff] %vm4336_vm7, %v4249_v58 }
 0x586   : > { %4495 = vrot.lane.b32.xlu1 %v4400_v59, %s10496_s17  ;;  %4493 = vrot.lane.b32.xlu0 %v4399_v13, %s10496_s17  ;;  %v4593_v59 = vld [vmem:[#allocation3 + $0x18b] sm:$0xff]  ;;  %v4592_v13 = vld [vmem:[#allocation3 + $0x183] sm:$0xff]  ;;  %s10503_s17 = smov 38  }
 0x588   : > { %v4255_v28 = vpop.permute.xlu1 %4254  ;;  %v4253_v5 = vpop.permute.xlu0 %4252 }
 0x589   : > { %4344 = vst.msk [vmem:[#allocation6 + $0x38] sm:$0xff] %vm4336_vm7, %v4255_v28  ;;  %4343 = vst.msk [vmem:[#allocation6 + $0x30] sm:$0xff] %vm4336_vm7, %v4253_v5 }
 0x58a   : > { %4628 = vrot.lane.b32.xlu1 %v4563_v25, %s10486_s24  ;;  %4626 = vrot.lane.b32.xlu0 %v4562_v37, %s10486_s24  ;;  %v4756_v25 = vld [vmem:[#allocation3 + $0x24] sm:$0xff]  ;;  %v4755_v37 = vld [vmem:[#allocation3 + $0x1c] sm:$0xff] }
 0x58c   : > { %v4259_v38 = vpop.permute.xlu1 %4258  ;;  %v4257_v42 = vpop.permute.xlu0 %4256 }
 0x58d   : > { %4346 = vst.msk [vmem:[#allocation6 + $0x48] sm:$0xff] %vm4336_vm7, %v4259_v38  ;;  %4345 = vst.msk [vmem:[#allocation6 + $0x40] sm:$0xff] %vm4336_vm7, %v4257_v42 }
 0x58e   : > { %4632 = vrot.lane.b32.xlu1 %v4565_v40, %s10486_s24  ;;  %4630 = vrot.lane.b32.xlu0 %v4564_v14, %s10486_s24  ;;  %v4758_v40 = vld [vmem:[#allocation3 + $0x3c] sm:$0xff]  ;;  %v4757_v14 = vld [vmem:[#allocation3 + $0x34] sm:$0xff] }
 0x590   : > { %v4263_v2 = vpop.permute.xlu1 %4262  ;;  %v4261_v35 = vpop.permute.xlu0 %4260 }
 0x591   : > { %4348 = vst.msk [vmem:[#allocation6 + $0x58] sm:$0xff] %vm4336_vm7, %v4263_v2  ;;  %4347 = vst.msk [vmem:[#allocation6 + $0x50] sm:$0xff] %vm4336_vm7, %v4261_v35 }
 0x592   : > { %4636 = vrot.lane.b32.xlu1 %v4567_v50, %s10486_s24  ;;  %4634 = vrot.lane.b32.xlu0 %v4566_v22, %s10486_s24  ;;  %v4760_v50 = vld [vmem:[#allocation3 + $0x54] sm:$0xff]  ;;  %v4759_v22 = vld [vmem:[#allocation3 + $0x4c] sm:$0xff] }
 0x594   : > { %v4267_v26 = vpop.permute.xlu1 %4266  ;;  %v4265_v56 = vpop.permute.xlu0 %4264 }
 0x595   : > { %4350 = vst.msk [vmem:[#allocation6 + $0x68] sm:$0xff] %vm4336_vm7, %v4267_v26  ;;  %4349 = vst.msk [vmem:[#allocation6 + $0x60] sm:$0xff] %vm4336_vm7, %v4265_v56 }
 0x596   : > { %4640 = vrot.lane.b32.xlu1 %v4569_v15, %s10486_s24  ;;  %4638 = vrot.lane.b32.xlu0 %v4568_v36, %s10486_s24  ;;  %v4762_v15 = vld [vmem:[#allocation3 + $0x6c] sm:$0xff]  ;;  %v4761_v36 = vld [vmem:[#allocation3 + $0x64] sm:$0xff] }
 0x598   : > { %v4271_v30 = vpop.permute.xlu1 %4270  ;;  %v4269_v34 = vpop.permute.xlu0 %4268 }
 0x599   : > { %4352 = vst.msk [vmem:[#allocation6 + $0x78] sm:$0xff] %vm4336_vm7, %v4271_v30  ;;  %4351 = vst.msk [vmem:[#allocation6 + $0x70] sm:$0xff] %vm4336_vm7, %v4269_v34 }
 0x59a   : > { %4644 = vrot.lane.b32.xlu1 %v4571_v20, %s10486_s24  ;;  %4642 = vrot.lane.b32.xlu0 %v4570_v45, %s10486_s24  ;;  %v4764_v20 = vld [vmem:[#allocation3 + $0x84] sm:$0xff]  ;;  %v4763_v45 = vld [vmem:[#allocation3 + $0x7c] sm:$0xff] }
 0x59c   : > { %v4275_v39 = vpop.permute.xlu1 %4274  ;;  %v4273_v53 = vpop.permute.xlu0 %4272 }
 0x59d   : > { %4354 = vst.msk [vmem:[#allocation6 + $0x88] sm:$0xff] %vm4336_vm7, %v4275_v39  ;;  %4353 = vst.msk [vmem:[#allocation6 + $0x80] sm:$0xff] %vm4336_vm7, %v4273_v53 }
 0x59e   : > { %4648 = vrot.lane.b32.xlu1 %v4573_v48, %s10486_s24  ;;  %4646 = vrot.lane.b32.xlu0 %v4572_v6, %s10486_s24  ;;  %v4766_v48 = vld [vmem:[#allocation3 + $0x9c] sm:$0xff]  ;;  %v4765_v6 = vld [vmem:[#allocation3 + $0x94] sm:$0xff] }
 0x5a0   : > { %v4279_v19 = vpop.permute.xlu1 %4278  ;;  %v4277_v63 = vpop.permute.xlu0 %4276 }
 0x5a1   : > { %4356 = vst.msk [vmem:[#allocation6 + $0x98] sm:$0xff] %vm4336_vm7, %v4279_v19  ;;  %4355 = vst.msk [vmem:[#allocation6 + $0x90] sm:$0xff] %vm4336_vm7, %v4277_v63 }
 0x5a2   : > { %4652 = vrot.lane.b32.xlu1 %v4575_v49, %s10486_s24  ;;  %4650 = vrot.lane.b32.xlu0 %v4574_v61, %s10486_s24  ;;  %v4768_v49 = vld [vmem:[#allocation3 + $0xb4] sm:$0xff]  ;;  %v4767_v61 = vld [vmem:[#allocation3 + $0xac] sm:$0xff] }
 0x5a4   : > { %v4283_v0 = vpop.permute.xlu1 %4282  ;;  %v4281_v10 = vpop.permute.xlu0 %4280 }
 0x5a5   : > { %4358 = vst.msk [vmem:[#allocation6 + $0xa8] sm:$0xff] %vm4336_vm7, %v4283_v0  ;;  %4357 = vst.msk [vmem:[#allocation6 + $0xa0] sm:$0xff] %vm4336_vm7, %v4281_v10 }
 0x5a6   : > { %4656 = vrot.lane.b32.xlu1 %v4577_v17, %s10486_s24  ;;  %4654 = vrot.lane.b32.xlu0 %v4576_v54, %s10486_s24  ;;  %v4770_v17 = vld [vmem:[#allocation3 + $0xcc] sm:$0xff]  ;;  %v4769_v54 = vld [vmem:[#allocation3 + $0xc4] sm:$0xff] }
 0x5a8   : > { %v4287_v41 = vpop.permute.xlu1 %4286  ;;  %v4285_v44 = vpop.permute.xlu0 %4284 }
 0x5a9   : > { %4360 = vst.msk [vmem:[#allocation6 + $0xb8] sm:$0xff] %vm4336_vm7, %v4287_v41  ;;  %4359 = vst.msk [vmem:[#allocation6 + $0xb0] sm:$0xff] %vm4336_vm7, %v4285_v44 }
 0x5aa   : > { %4660 = vrot.lane.b32.xlu1 %v4579_v3, %s10486_s24  ;;  %4658 = vrot.lane.b32.xlu0 %v4578_v1, %s10486_s24  ;;  %v4772_v3 = vld [vmem:[#allocation3 + $0xe4] sm:$0xff]  ;;  %v4771_v1 = vld [vmem:[#allocation3 + $0xdc] sm:$0xff] }
 0x5ac   : > { %v4291_v62 = vpop.permute.xlu1 %4290  ;;  %v4289_v46 = vpop.permute.xlu0 %4288 }
 0x5ad   : > { %4362 = vst.msk [vmem:[#allocation6 + $0xc8] sm:$0xff] %vm4336_vm7, %v4291_v62  ;;  %4361 = vst.msk [vmem:[#allocation6 + $0xc0] sm:$0xff] %vm4336_vm7, %v4289_v46 }
 0x5ae   : > { %4664 = vrot.lane.b32.xlu1 %v4581_v8, %s10486_s24  ;;  %4662 = vrot.lane.b32.xlu0 %v4580_v43, %s10486_s24  ;;  %v4774_v8 = vld [vmem:[#allocation3 + $0xfc] sm:$0xff]  ;;  %v4773_v43 = vld [vmem:[#allocation3 + $0xf4] sm:$0xff] }
 0x5b0   : > { %v4295_v23 = vpop.permute.xlu1 %4294  ;;  %v4293_v52 = vpop.permute.xlu0 %4292 }
 0x5b1   : > { %4364 = vst.msk [vmem:[#allocation6 + $0xd8] sm:$0xff] %vm4336_vm7, %v4295_v23  ;;  %4363 = vst.msk [vmem:[#allocation6 + $0xd0] sm:$0xff] %vm4336_vm7, %v4293_v52 }
 0x5b2   : > { %4668 = vrot.lane.b32.xlu1 %v4583_v4, %s10486_s24  ;;  %4666 = vrot.lane.b32.xlu0 %v4582_v7, %s10486_s24  ;;  %v4776_v4 = vld [vmem:[#allocation3 + $0x114] sm:$0xff]  ;;  %v4775_v7 = vld [vmem:[#allocation3 + $0x10c] sm:$0xff] }
 0x5b4   : > { %v4299_v16 = vpop.permute.xlu1 %4298  ;;  %v4297_v33 = vpop.permute.xlu0 %4296 }
 0x5b5   : > { %4366 = vst.msk [vmem:[#allocation6 + $0xe8] sm:$0xff] %vm4336_vm7, %v4299_v16  ;;  %4365 = vst.msk [vmem:[#allocation6 + $0xe0] sm:$0xff] %vm4336_vm7, %v4297_v33 }
 0x5b6   : > { %4672 = vrot.lane.b32.xlu1 %v4585_v27, %s10486_s24  ;;  %4670 = vrot.lane.b32.xlu0 %v4584_v51, %s10486_s24  ;;  %v4778_v27 = vld [vmem:[#allocation3 + $0x12c] sm:$0xff]  ;;  %v4777_v51 = vld [vmem:[#allocation3 + $0x124] sm:$0xff] }
 0x5b8   : > { %v4303_v31 = vpop.permute.xlu1 %4302  ;;  %v4301_v57 = vpop.permute.xlu0 %4300 }
 0x5b9   : > { %4368 = vst.msk [vmem:[#allocation6 + $0xf8] sm:$0xff] %vm4336_vm7, %v4303_v31  ;;  %4367 = vst.msk [vmem:[#allocation6 + $0xf0] sm:$0xff] %vm4336_vm7, %v4301_v57  ;;  %vm6653_vm7 = vcmask 310560  }
 0x5ba   : > { %4676 = vrot.lane.b32.xlu1 %v4587_v9, %s10486_s24  ;;  %4674 = vrot.lane.b32.xlu0 %v4586_v18, %s10486_s24  ;;  %v4780_v9 = vld [vmem:[#allocation3 + $0x144] sm:$0xff]  ;;  %v4779_v18 = vld [vmem:[#allocation3 + $0x13c] sm:$0xff] }
 0x5bc   : > { %v4436_v11 = vpop.permute.xlu1 %4435  ;;  %v4434_v24 = vpop.permute.xlu0 %4433 }
 0x5bd   : > { %4531 = vst.msk [vmem:[#allocation6 + $0x8] sm:$0xff] %vm4529_vm8, %v4436_v11  ;;  %4530 = vst.msk [vmem:[#allocation6] sm:$0xff] %vm4529_vm8, %v4434_v24 }
 0x5be   : > { %4680 = vrot.lane.b32.xlu1 %v4589_v47, %s10486_s24  ;;  %4678 = vrot.lane.b32.xlu0 %v4588_v21, %s10486_s24  ;;  %v4782_v47 = vld [vmem:[#allocation3 + $0x15c] sm:$0xff]  ;;  %v4781_v21 = vld [vmem:[#allocation3 + $0x154] sm:$0xff] }
 0x5c0   : > { %v4440_v12 = vpop.permute.xlu1 %4439  ;;  %v4438_v32 = vpop.permute.xlu0 %4437 }
 0x5c1   : > { %4533 = vst.msk [vmem:[#allocation6 + $0x18] sm:$0xff] %vm4529_vm8, %v4440_v12  ;;  %4532 = vst.msk [vmem:[#allocation6 + $0x10] sm:$0xff] %vm4529_vm8, %v4438_v32 }
 0x5c2   : > { %4684 = vrot.lane.b32.xlu1 %v4591_v60, %s10486_s24  ;;  %4682 = vrot.lane.b32.xlu0 %v4590_v29, %s10486_s24  ;;  %v4784_v60 = vld [vmem:[#allocation3 + $0x174] sm:$0xff]  ;;  %v4783_v29 = vld [vmem:[#allocation3 + $0x16c] sm:$0xff] }
 0x5c4   : > { %v4444_v55 = vpop.permute.xlu1 %4443  ;;  %v4442_v58 = vpop.permute.xlu0 %4441 }
 0x5c5   : > { %4535 = vst.msk [vmem:[#allocation6 + $0x28] sm:$0xff] %vm4529_vm8, %v4444_v55  ;;  %4534 = vst.msk [vmem:[#allocation6 + $0x20] sm:$0xff] %vm4529_vm8, %v4442_v58 }
 0x5c6   : > { %4688 = vrot.lane.b32.xlu1 %v4593_v59, %s10486_s24  ;;  %4686 = vrot.lane.b32.xlu0 %v4592_v13, %s10486_s24  ;;  %v4786_v59 = vld [vmem:[#allocation3 + $0x18c] sm:$0xff]  ;;  %v4785_v13 = vld [vmem:[#allocation3 + $0x184] sm:$0xff] }
 0x5c8   : > { %v4448_v28 = vpop.permute.xlu1 %4447  ;;  %v4446_v5 = vpop.permute.xlu0 %4445 }
 0x5c9   : > { %4537 = vst.msk [vmem:[#allocation6 + $0x38] sm:$0xff] %vm4529_vm8, %v4448_v28  ;;  %4536 = vst.msk [vmem:[#allocation6 + $0x30] sm:$0xff] %vm4529_vm8, %v4446_v5  ;;  %v4949_v28 = vld [vmem:[#allocation3 + $0x38] sm:$0xff]  ;;  %v4948_v5 = vld [vmem:[#allocation3 + $0x30] sm:$0xff] }
 0x5ca   : > { %4821 = vrot.lane.b32.xlu1 %v4756_v25, %s10497_s21  ;;  %4819 = vrot.lane.b32.xlu0 %v4755_v37, %s10497_s21 }
 0x5cc   : > { %v4452_v38 = vpop.permute.xlu1 %4451  ;;  %v4450_v42 = vpop.permute.xlu0 %4449 }
 0x5cd   : > { %4539 = vst.msk [vmem:[#allocation6 + $0x48] sm:$0xff] %vm4529_vm8, %v4452_v38  ;;  %4538 = vst.msk [vmem:[#allocation6 + $0x40] sm:$0xff] %vm4529_vm8, %v4450_v42 }
 0x5ce   : > { %4825 = vrot.lane.b32.xlu1 %v4758_v40, %s10497_s21  ;;  %4823 = vrot.lane.b32.xlu0 %v4757_v14, %s10497_s21  ;;  %v4951_v40 = vld [vmem:[#allocation3 + $0x50] sm:$0xff]  ;;  %v4950_v14 = vld [vmem:[#allocation3 + $0x48] sm:$0xff] }
 0x5d0   : > { %v4456_v2 = vpop.permute.xlu1 %4455  ;;  %v4454_v35 = vpop.permute.xlu0 %4453 }
 0x5d1   : > { %4541 = vst.msk [vmem:[#allocation6 + $0x58] sm:$0xff] %vm4529_vm8, %v4456_v2  ;;  %4540 = vst.msk [vmem:[#allocation6 + $0x50] sm:$0xff] %vm4529_vm8, %v4454_v35 }
 0x5d2   : > { %4829 = vrot.lane.b32.xlu1 %v4760_v50, %s10497_s21  ;;  %4827 = vrot.lane.b32.xlu0 %v4759_v22, %s10497_s21  ;;  %v4953_v50 = vld [vmem:[#allocation3 + $0x68] sm:$0xff]  ;;  %v4952_v22 = vld [vmem:[#allocation3 + $0x60] sm:$0xff] }
 0x5d4   : > { %v4460_v26 = vpop.permute.xlu1 %4459  ;;  %v4458_v56 = vpop.permute.xlu0 %4457 }
 0x5d5   : > { %4543 = vst.msk [vmem:[#allocation6 + $0x68] sm:$0xff] %vm4529_vm8, %v4460_v26  ;;  %4542 = vst.msk [vmem:[#allocation6 + $0x60] sm:$0xff] %vm4529_vm8, %v4458_v56 }
 0x5d6   : > { %4833 = vrot.lane.b32.xlu1 %v4762_v15, %s10497_s21  ;;  %4831 = vrot.lane.b32.xlu0 %v4761_v36, %s10497_s21  ;;  %v4955_v15 = vld [vmem:[#allocation3 + $0x80] sm:$0xff]  ;;  %v4954_v36 = vld [vmem:[#allocation3 + $0x78] sm:$0xff] }
 0x5d8   : > { %v4464_v30 = vpop.permute.xlu1 %4463  ;;  %v4462_v34 = vpop.permute.xlu0 %4461 }
 0x5d9   : > { %4545 = vst.msk [vmem:[#allocation6 + $0x78] sm:$0xff] %vm4529_vm8, %v4464_v30  ;;  %4544 = vst.msk [vmem:[#allocation6 + $0x70] sm:$0xff] %vm4529_vm8, %v4462_v34 }
 0x5da   : > { %4837 = vrot.lane.b32.xlu1 %v4764_v20, %s10497_s21  ;;  %4835 = vrot.lane.b32.xlu0 %v4763_v45, %s10497_s21  ;;  %v4957_v20 = vld [vmem:[#allocation3 + $0x98] sm:$0xff]  ;;  %v4956_v45 = vld [vmem:[#allocation3 + $0x90] sm:$0xff] }
 0x5dc   : > { %v4468_v39 = vpop.permute.xlu1 %4467  ;;  %v4466_v53 = vpop.permute.xlu0 %4465 }
 0x5dd   : > { %4547 = vst.msk [vmem:[#allocation6 + $0x88] sm:$0xff] %vm4529_vm8, %v4468_v39  ;;  %4546 = vst.msk [vmem:[#allocation6 + $0x80] sm:$0xff] %vm4529_vm8, %v4466_v53 }
 0x5de   : > { %4841 = vrot.lane.b32.xlu1 %v4766_v48, %s10497_s21  ;;  %4839 = vrot.lane.b32.xlu0 %v4765_v6, %s10497_s21  ;;  %v4959_v48 = vld [vmem:[#allocation3 + $0xb0] sm:$0xff]  ;;  %v4958_v6 = vld [vmem:[#allocation3 + $0xa8] sm:$0xff] }
 0x5e0   : > { %v4472_v19 = vpop.permute.xlu1 %4471  ;;  %v4470_v63 = vpop.permute.xlu0 %4469 }
 0x5e1   : > { %4549 = vst.msk [vmem:[#allocation6 + $0x98] sm:$0xff] %vm4529_vm8, %v4472_v19  ;;  %4548 = vst.msk [vmem:[#allocation6 + $0x90] sm:$0xff] %vm4529_vm8, %v4470_v63 }
 0x5e2   : > { %4845 = vrot.lane.b32.xlu1 %v4768_v49, %s10497_s21  ;;  %4843 = vrot.lane.b32.xlu0 %v4767_v61, %s10497_s21  ;;  %v4961_v49 = vld [vmem:[#allocation3 + $0xc8] sm:$0xff]  ;;  %v4960_v61 = vld [vmem:[#allocation3 + $0xc0] sm:$0xff] }
 0x5e4   : > { %v4476_v0 = vpop.permute.xlu1 %4475  ;;  %v4474_v10 = vpop.permute.xlu0 %4473 }
 0x5e5   : > { %4551 = vst.msk [vmem:[#allocation6 + $0xa8] sm:$0xff] %vm4529_vm8, %v4476_v0  ;;  %4550 = vst.msk [vmem:[#allocation6 + $0xa0] sm:$0xff] %vm4529_vm8, %v4474_v10 }
 0x5e6   : > { %4849 = vrot.lane.b32.xlu1 %v4770_v17, %s10497_s21  ;;  %4847 = vrot.lane.b32.xlu0 %v4769_v54, %s10497_s21  ;;  %v4963_v17 = vld [vmem:[#allocation3 + $0xe0] sm:$0xff]  ;;  %v4962_v54 = vld [vmem:[#allocation3 + $0xd8] sm:$0xff] }
 0x5e8   : > { %v4480_v41 = vpop.permute.xlu1 %4479  ;;  %v4478_v44 = vpop.permute.xlu0 %4477 }
 0x5e9   : > { %4553 = vst.msk [vmem:[#allocation6 + $0xb8] sm:$0xff] %vm4529_vm8, %v4480_v41  ;;  %4552 = vst.msk [vmem:[#allocation6 + $0xb0] sm:$0xff] %vm4529_vm8, %v4478_v44 }
 0x5ea   : > { %4853 = vrot.lane.b32.xlu1 %v4772_v3, %s10497_s21  ;;  %4851 = vrot.lane.b32.xlu0 %v4771_v1, %s10497_s21  ;;  %v4965_v3 = vld [vmem:[#allocation3 + $0xf8] sm:$0xff]  ;;  %v4964_v1 = vld [vmem:[#allocation3 + $0xf0] sm:$0xff] }
 0x5ec   : > { %v4484_v62 = vpop.permute.xlu1 %4483  ;;  %v4482_v46 = vpop.permute.xlu0 %4481 }
 0x5ed   : > { %4555 = vst.msk [vmem:[#allocation6 + $0xc8] sm:$0xff] %vm4529_vm8, %v4484_v62  ;;  %4554 = vst.msk [vmem:[#allocation6 + $0xc0] sm:$0xff] %vm4529_vm8, %v4482_v46 }
 0x5ee   : > { %4857 = vrot.lane.b32.xlu1 %v4774_v8, %s10497_s21  ;;  %4855 = vrot.lane.b32.xlu0 %v4773_v43, %s10497_s21  ;;  %v4967_v8 = vld [vmem:[#allocation3 + $0x110] sm:$0xff]  ;;  %v4966_v43 = vld [vmem:[#allocation3 + $0x108] sm:$0xff] }
 0x5f0   : > { %v4488_v23 = vpop.permute.xlu1 %4487  ;;  %v4486_v52 = vpop.permute.xlu0 %4485 }
 0x5f1   : > { %4557 = vst.msk [vmem:[#allocation6 + $0xd8] sm:$0xff] %vm4529_vm8, %v4488_v23  ;;  %4556 = vst.msk [vmem:[#allocation6 + $0xd0] sm:$0xff] %vm4529_vm8, %v4486_v52 }
 0x5f2   : > { %4861 = vrot.lane.b32.xlu1 %v4776_v4, %s10497_s21  ;;  %4859 = vrot.lane.b32.xlu0 %v4775_v7, %s10497_s21  ;;  %v4969_v4 = vld [vmem:[#allocation3 + $0x128] sm:$0xff]  ;;  %v4968_v7 = vld [vmem:[#allocation3 + $0x120] sm:$0xff] }
 0x5f4   : > { %v4492_v16 = vpop.permute.xlu1 %4491  ;;  %v4490_v33 = vpop.permute.xlu0 %4489 }
 0x5f5   : > { %4559 = vst.msk [vmem:[#allocation6 + $0xe8] sm:$0xff] %vm4529_vm8, %v4492_v16  ;;  %4558 = vst.msk [vmem:[#allocation6 + $0xe0] sm:$0xff] %vm4529_vm8, %v4490_v33 }
 0x5f6   : > { %4865 = vrot.lane.b32.xlu1 %v4778_v27, %s10497_s21  ;;  %4863 = vrot.lane.b32.xlu0 %v4777_v51, %s10497_s21  ;;  %v4971_v27 = vld [vmem:[#allocation3 + $0x140] sm:$0xff]  ;;  %v4970_v51 = vld [vmem:[#allocation3 + $0x138] sm:$0xff] }
 0x5f8   : > { %v4496_v31 = vpop.permute.xlu1 %4495  ;;  %v4494_v57 = vpop.permute.xlu0 %4493 }
 0x5f9   : > { %4561 = vst.msk [vmem:[#allocation6 + $0xf8] sm:$0xff] %vm4529_vm8, %v4496_v31  ;;  %4560 = vst.msk [vmem:[#allocation6 + $0xf0] sm:$0xff] %vm4529_vm8, %v4494_v57  ;;  %vm6846_vm8 = vcmask 326960  }
 0x5fa   : > { %4869 = vrot.lane.b32.xlu1 %v4780_v9, %s10497_s21  ;;  %4867 = vrot.lane.b32.xlu0 %v4779_v18, %s10497_s21  ;;  %v4973_v9 = vld [vmem:[#allocation3 + $0x158] sm:$0xff]  ;;  %v4972_v18 = vld [vmem:[#allocation3 + $0x150] sm:$0xff] }
 0x5fc   : > { %v4629_v11 = vpop.permute.xlu1 %4628  ;;  %v4627_v24 = vpop.permute.xlu0 %4626 }
 0x5fd   : > { %4724 = vst.msk [vmem:[#allocation6 + $0x8] sm:$0xff] %vm4722_vm9, %v4629_v11  ;;  %4723 = vst.msk [vmem:[#allocation6] sm:$0xff] %vm4722_vm9, %v4627_v24 }
 0x5fe   : > { %4873 = vrot.lane.b32.xlu1 %v4782_v47, %s10497_s21  ;;  %4871 = vrot.lane.b32.xlu0 %v4781_v21, %s10497_s21  ;;  %v4975_v47 = vld [vmem:[#allocation3 + $0x170] sm:$0xff]  ;;  %v4974_v21 = vld [vmem:[#allocation3 + $0x168] sm:$0xff] }
 0x600   : > { %v4633_v12 = vpop.permute.xlu1 %4632  ;;  %v4631_v32 = vpop.permute.xlu0 %4630 }
 0x601   : > { %4726 = vst.msk [vmem:[#allocation6 + $0x18] sm:$0xff] %vm4722_vm9, %v4633_v12  ;;  %4725 = vst.msk [vmem:[#allocation6 + $0x10] sm:$0xff] %vm4722_vm9, %v4631_v32 }
 0x602   : > { %4877 = vrot.lane.b32.xlu1 %v4784_v60, %s10497_s21  ;;  %4875 = vrot.lane.b32.xlu0 %v4783_v29, %s10497_s21  ;;  %v4977_v60 = vld [vmem:[#allocation3 + $0x188] sm:$0xff]  ;;  %v4976_v29 = vld [vmem:[#allocation3 + $0x180] sm:$0xff] }
 0x604   : > { %v4637_v55 = vpop.permute.xlu1 %4636  ;;  %v4635_v58 = vpop.permute.xlu0 %4634 }
 0x605   : > { %4728 = vst.msk [vmem:[#allocation6 + $0x28] sm:$0xff] %vm4722_vm9, %v4637_v55  ;;  %4727 = vst.msk [vmem:[#allocation6 + $0x20] sm:$0xff] %vm4722_vm9, %v4635_v58 }
 0x606   : > { %4881 = vrot.lane.b32.xlu1 %v4786_v59, %s10497_s21  ;;  %4879 = vrot.lane.b32.xlu0 %v4785_v13, %s10497_s21  ;;  %v4979_v59 = vld [vmem:[#allocation3 + $0x1a0] sm:$0xff]  ;;  %v4978_v13 = vld [vmem:[#allocation3 + $0x198] sm:$0xff]  ;;  %s10504_s21 = smov 40  }
 0x608   : > { %v4641_v25 = vpop.permute.xlu1 %4640  ;;  %v4639_v37 = vpop.permute.xlu0 %4638 }
 0x609   : > { %4730 = vst.msk [vmem:[#allocation6 + $0x38] sm:$0xff] %vm4722_vm9, %v4641_v25  ;;  %4729 = vst.msk [vmem:[#allocation6 + $0x30] sm:$0xff] %vm4722_vm9, %v4639_v37 }
 0x60a   : > { %5014 = vrot.lane.b32.xlu1 %v4949_v28, %s10487_s25  ;;  %5012 = vrot.lane.b32.xlu0 %v4948_v5, %s10487_s25  ;;  %v5142_v28 = vld [vmem:[#allocation3 + $0x39] sm:$0xff]  ;;  %v5141_v5 = vld [vmem:[#allocation3 + $0x31] sm:$0xff] }
 0x60c   : > { %v4645_v38 = vpop.permute.xlu1 %4644  ;;  %v4643_v42 = vpop.permute.xlu0 %4642 }
 0x60d   : > { %4732 = vst.msk [vmem:[#allocation6 + $0x48] sm:$0xff] %vm4722_vm9, %v4645_v38  ;;  %4731 = vst.msk [vmem:[#allocation6 + $0x40] sm:$0xff] %vm4722_vm9, %v4643_v42 }
 0x60e   : > { %5018 = vrot.lane.b32.xlu1 %v4951_v40, %s10487_s25  ;;  %5016 = vrot.lane.b32.xlu0 %v4950_v14, %s10487_s25  ;;  %v5144_v40 = vld [vmem:[#allocation3 + $0x51] sm:$0xff]  ;;  %v5143_v14 = vld [vmem:[#allocation3 + $0x49] sm:$0xff] }
 0x610   : > { %v4649_v2 = vpop.permute.xlu1 %4648  ;;  %v4647_v35 = vpop.permute.xlu0 %4646 }
 0x611   : > { %4734 = vst.msk [vmem:[#allocation6 + $0x58] sm:$0xff] %vm4722_vm9, %v4649_v2  ;;  %4733 = vst.msk [vmem:[#allocation6 + $0x50] sm:$0xff] %vm4722_vm9, %v4647_v35 }
 0x612   : > { %5022 = vrot.lane.b32.xlu1 %v4953_v50, %s10487_s25  ;;  %5020 = vrot.lane.b32.xlu0 %v4952_v22, %s10487_s25  ;;  %v5146_v50 = vld [vmem:[#allocation3 + $0x69] sm:$0xff]  ;;  %v5145_v22 = vld [vmem:[#allocation3 + $0x61] sm:$0xff] }
 0x614   : > { %v4653_v26 = vpop.permute.xlu1 %4652  ;;  %v4651_v56 = vpop.permute.xlu0 %4650 }
 0x615   : > { %4736 = vst.msk [vmem:[#allocation6 + $0x68] sm:$0xff] %vm4722_vm9, %v4653_v26  ;;  %4735 = vst.msk [vmem:[#allocation6 + $0x60] sm:$0xff] %vm4722_vm9, %v4651_v56 }
 0x616   : > { %5026 = vrot.lane.b32.xlu1 %v4955_v15, %s10487_s25  ;;  %5024 = vrot.lane.b32.xlu0 %v4954_v36, %s10487_s25  ;;  %v5148_v15 = vld [vmem:[#allocation3 + $0x81] sm:$0xff]  ;;  %v5147_v36 = vld [vmem:[#allocation3 + $0x79] sm:$0xff] }
 0x618   : > { %v4657_v30 = vpop.permute.xlu1 %4656  ;;  %v4655_v34 = vpop.permute.xlu0 %4654 }
 0x619   : > { %4738 = vst.msk [vmem:[#allocation6 + $0x78] sm:$0xff] %vm4722_vm9, %v4657_v30  ;;  %4737 = vst.msk [vmem:[#allocation6 + $0x70] sm:$0xff] %vm4722_vm9, %v4655_v34 }
 0x61a   : > { %5030 = vrot.lane.b32.xlu1 %v4957_v20, %s10487_s25  ;;  %5028 = vrot.lane.b32.xlu0 %v4956_v45, %s10487_s25  ;;  %v5150_v20 = vld [vmem:[#allocation3 + $0x99] sm:$0xff]  ;;  %v5149_v45 = vld [vmem:[#allocation3 + $0x91] sm:$0xff] }
 0x61c   : > { %v4661_v39 = vpop.permute.xlu1 %4660  ;;  %v4659_v53 = vpop.permute.xlu0 %4658 }
 0x61d   : > { %4740 = vst.msk [vmem:[#allocation6 + $0x88] sm:$0xff] %vm4722_vm9, %v4661_v39  ;;  %4739 = vst.msk [vmem:[#allocation6 + $0x80] sm:$0xff] %vm4722_vm9, %v4659_v53 }
 0x61e   : > { %5034 = vrot.lane.b32.xlu1 %v4959_v48, %s10487_s25  ;;  %5032 = vrot.lane.b32.xlu0 %v4958_v6, %s10487_s25  ;;  %v5152_v48 = vld [vmem:[#allocation3 + $0xb1] sm:$0xff]  ;;  %v5151_v6 = vld [vmem:[#allocation3 + $0xa9] sm:$0xff] }
 0x620   : > { %v4665_v19 = vpop.permute.xlu1 %4664  ;;  %v4663_v63 = vpop.permute.xlu0 %4662 }
 0x621   : > { %4742 = vst.msk [vmem:[#allocation6 + $0x98] sm:$0xff] %vm4722_vm9, %v4665_v19  ;;  %4741 = vst.msk [vmem:[#allocation6 + $0x90] sm:$0xff] %vm4722_vm9, %v4663_v63 }
 0x622   : > { %5038 = vrot.lane.b32.xlu1 %v4961_v49, %s10487_s25  ;;  %5036 = vrot.lane.b32.xlu0 %v4960_v61, %s10487_s25  ;;  %v5154_v49 = vld [vmem:[#allocation3 + $0xc9] sm:$0xff]  ;;  %v5153_v61 = vld [vmem:[#allocation3 + $0xc1] sm:$0xff] }
 0x624   : > { %v4669_v0 = vpop.permute.xlu1 %4668  ;;  %v4667_v10 = vpop.permute.xlu0 %4666 }
 0x625   : > { %4744 = vst.msk [vmem:[#allocation6 + $0xa8] sm:$0xff] %vm4722_vm9, %v4669_v0  ;;  %4743 = vst.msk [vmem:[#allocation6 + $0xa0] sm:$0xff] %vm4722_vm9, %v4667_v10 }
 0x626   : > { %5042 = vrot.lane.b32.xlu1 %v4963_v17, %s10487_s25  ;;  %5040 = vrot.lane.b32.xlu0 %v4962_v54, %s10487_s25  ;;  %v5156_v17 = vld [vmem:[#allocation3 + $0xe1] sm:$0xff]  ;;  %v5155_v54 = vld [vmem:[#allocation3 + $0xd9] sm:$0xff] }
 0x628   : > { %v4673_v41 = vpop.permute.xlu1 %4672  ;;  %v4671_v44 = vpop.permute.xlu0 %4670 }
 0x629   : > { %4746 = vst.msk [vmem:[#allocation6 + $0xb8] sm:$0xff] %vm4722_vm9, %v4673_v41  ;;  %4745 = vst.msk [vmem:[#allocation6 + $0xb0] sm:$0xff] %vm4722_vm9, %v4671_v44 }
 0x62a   : > { %5046 = vrot.lane.b32.xlu1 %v4965_v3, %s10487_s25  ;;  %5044 = vrot.lane.b32.xlu0 %v4964_v1, %s10487_s25  ;;  %v5158_v3 = vld [vmem:[#allocation3 + $0xf9] sm:$0xff]  ;;  %v5157_v1 = vld [vmem:[#allocation3 + $0xf1] sm:$0xff] }
 0x62c   : > { %v4677_v62 = vpop.permute.xlu1 %4676  ;;  %v4675_v46 = vpop.permute.xlu0 %4674 }
 0x62d   : > { %4748 = vst.msk [vmem:[#allocation6 + $0xc8] sm:$0xff] %vm4722_vm9, %v4677_v62  ;;  %4747 = vst.msk [vmem:[#allocation6 + $0xc0] sm:$0xff] %vm4722_vm9, %v4675_v46 }
 0x62e   : > { %5050 = vrot.lane.b32.xlu1 %v4967_v8, %s10487_s25  ;;  %5048 = vrot.lane.b32.xlu0 %v4966_v43, %s10487_s25  ;;  %v5160_v8 = vld [vmem:[#allocation3 + $0x111] sm:$0xff]  ;;  %v5159_v43 = vld [vmem:[#allocation3 + $0x109] sm:$0xff] }
 0x630   : > { %v4681_v23 = vpop.permute.xlu1 %4680  ;;  %v4679_v52 = vpop.permute.xlu0 %4678 }
 0x631   : > { %4750 = vst.msk [vmem:[#allocation6 + $0xd8] sm:$0xff] %vm4722_vm9, %v4681_v23  ;;  %4749 = vst.msk [vmem:[#allocation6 + $0xd0] sm:$0xff] %vm4722_vm9, %v4679_v52 }
 0x632   : > { %5054 = vrot.lane.b32.xlu1 %v4969_v4, %s10487_s25  ;;  %5052 = vrot.lane.b32.xlu0 %v4968_v7, %s10487_s25  ;;  %v5162_v4 = vld [vmem:[#allocation3 + $0x129] sm:$0xff]  ;;  %v5161_v7 = vld [vmem:[#allocation3 + $0x121] sm:$0xff] }
 0x634   : > { %v4685_v16 = vpop.permute.xlu1 %4684  ;;  %v4683_v33 = vpop.permute.xlu0 %4682 }
 0x635   : > { %4752 = vst.msk [vmem:[#allocation6 + $0xe8] sm:$0xff] %vm4722_vm9, %v4685_v16  ;;  %4751 = vst.msk [vmem:[#allocation6 + $0xe0] sm:$0xff] %vm4722_vm9, %v4683_v33 }
 0x636   : > { %5058 = vrot.lane.b32.xlu1 %v4971_v27, %s10487_s25  ;;  %5056 = vrot.lane.b32.xlu0 %v4970_v51, %s10487_s25  ;;  %v5164_v27 = vld [vmem:[#allocation3 + $0x141] sm:$0xff]  ;;  %v5163_v51 = vld [vmem:[#allocation3 + $0x139] sm:$0xff] }
 0x638   : > { %v4689_v31 = vpop.permute.xlu1 %4688  ;;  %v4687_v57 = vpop.permute.xlu0 %4686 }
 0x639   : > { %4754 = vst.msk [vmem:[#allocation6 + $0xf8] sm:$0xff] %vm4722_vm9, %v4689_v31  ;;  %4753 = vst.msk [vmem:[#allocation6 + $0xf0] sm:$0xff] %vm4722_vm9, %v4687_v57  ;;  %vm7040_vm9 = vcmask 343360  }
 0x63a   : > { %5062 = vrot.lane.b32.xlu1 %v4973_v9, %s10487_s25  ;;  %5060 = vrot.lane.b32.xlu0 %v4972_v18, %s10487_s25  ;;  %v5166_v9 = vld [vmem:[#allocation3 + $0x159] sm:$0xff]  ;;  %v5165_v18 = vld [vmem:[#allocation3 + $0x151] sm:$0xff] }
 0x63c   : > { %v4822_v11 = vpop.permute.xlu1 %4821  ;;  %v4820_v24 = vpop.permute.xlu0 %4819 }
 0x63d   : > { %4917 = vst.msk [vmem:[#allocation6 + $0x8] sm:$0xff] %vm4915_vm10, %v4822_v11  ;;  %4916 = vst.msk [vmem:[#allocation6] sm:$0xff] %vm4915_vm10, %v4820_v24 }
 0x63e   : > { %5066 = vrot.lane.b32.xlu1 %v4975_v47, %s10487_s25  ;;  %5064 = vrot.lane.b32.xlu0 %v4974_v21, %s10487_s25  ;;  %v5168_v47 = vld [vmem:[#allocation3 + $0x171] sm:$0xff]  ;;  %v5167_v21 = vld [vmem:[#allocation3 + $0x169] sm:$0xff] }
 0x640   : > { %v4826_v12 = vpop.permute.xlu1 %4825  ;;  %v4824_v32 = vpop.permute.xlu0 %4823 }
 0x641   : > { %4919 = vst.msk [vmem:[#allocation6 + $0x18] sm:$0xff] %vm4915_vm10, %v4826_v12  ;;  %4918 = vst.msk [vmem:[#allocation6 + $0x10] sm:$0xff] %vm4915_vm10, %v4824_v32 }
 0x642   : > { %5070 = vrot.lane.b32.xlu1 %v4977_v60, %s10487_s25  ;;  %5068 = vrot.lane.b32.xlu0 %v4976_v29, %s10487_s25  ;;  %v5170_v60 = vld [vmem:[#allocation3 + $0x189] sm:$0xff]  ;;  %v5169_v29 = vld [vmem:[#allocation3 + $0x181] sm:$0xff] }
 0x644   : > { %v4830_v55 = vpop.permute.xlu1 %4829  ;;  %v4828_v58 = vpop.permute.xlu0 %4827 }
 0x645   : > { %4921 = vst.msk [vmem:[#allocation6 + $0x28] sm:$0xff] %vm4915_vm10, %v4830_v55  ;;  %4920 = vst.msk [vmem:[#allocation6 + $0x20] sm:$0xff] %vm4915_vm10, %v4828_v58 }
 0x646   : > { %5074 = vrot.lane.b32.xlu1 %v4979_v59, %s10487_s25  ;;  %5072 = vrot.lane.b32.xlu0 %v4978_v13, %s10487_s25  ;;  %v5172_v59 = vld [vmem:[#allocation3 + $0x1a1] sm:$0xff]  ;;  %v5171_v13 = vld [vmem:[#allocation3 + $0x199] sm:$0xff]  ;;  %s10499_s25 = smov 26  }
 0x648   : > { %v4834_v25 = vpop.permute.xlu1 %4833  ;;  %v4832_v37 = vpop.permute.xlu0 %4831 }
 0x649   : > { %4923 = vst.msk [vmem:[#allocation6 + $0x38] sm:$0xff] %vm4915_vm10, %v4834_v25  ;;  %4922 = vst.msk [vmem:[#allocation6 + $0x30] sm:$0xff] %vm4915_vm10, %v4832_v37 }
 0x64a   : > { %5207 = vrot.lane.b32.xlu1 %v5142_v28, %s10498_s23  ;;  %5205 = vrot.lane.b32.xlu0 %v5141_v5, %s10498_s23  ;;  %v5335_v28 = vld [vmem:[#allocation3 + $0x3a] sm:$0xff]  ;;  %v5334_v5 = vld [vmem:[#allocation3 + $0x32] sm:$0xff] }
 0x64c   : > { %v4838_v38 = vpop.permute.xlu1 %4837  ;;  %v4836_v42 = vpop.permute.xlu0 %4835 }
 0x64d   : > { %4925 = vst.msk [vmem:[#allocation6 + $0x48] sm:$0xff] %vm4915_vm10, %v4838_v38  ;;  %4924 = vst.msk [vmem:[#allocation6 + $0x40] sm:$0xff] %vm4915_vm10, %v4836_v42 }
 0x64e   : > { %5211 = vrot.lane.b32.xlu1 %v5144_v40, %s10498_s23  ;;  %5209 = vrot.lane.b32.xlu0 %v5143_v14, %s10498_s23  ;;  %v5337_v40 = vld [vmem:[#allocation3 + $0x52] sm:$0xff]  ;;  %v5336_v14 = vld [vmem:[#allocation3 + $0x4a] sm:$0xff] }
 0x650   : > { %v4842_v2 = vpop.permute.xlu1 %4841  ;;  %v4840_v35 = vpop.permute.xlu0 %4839 }
 0x651   : > { %4927 = vst.msk [vmem:[#allocation6 + $0x58] sm:$0xff] %vm4915_vm10, %v4842_v2  ;;  %4926 = vst.msk [vmem:[#allocation6 + $0x50] sm:$0xff] %vm4915_vm10, %v4840_v35 }
 0x652   : > { %5215 = vrot.lane.b32.xlu1 %v5146_v50, %s10498_s23  ;;  %5213 = vrot.lane.b32.xlu0 %v5145_v22, %s10498_s23  ;;  %v5339_v50 = vld [vmem:[#allocation3 + $0x6a] sm:$0xff]  ;;  %v5338_v22 = vld [vmem:[#allocation3 + $0x62] sm:$0xff] }
 0x654   : > { %v4846_v26 = vpop.permute.xlu1 %4845  ;;  %v4844_v56 = vpop.permute.xlu0 %4843 }
 0x655   : > { %4929 = vst.msk [vmem:[#allocation6 + $0x68] sm:$0xff] %vm4915_vm10, %v4846_v26  ;;  %4928 = vst.msk [vmem:[#allocation6 + $0x60] sm:$0xff] %vm4915_vm10, %v4844_v56 }
 0x656   : > { %5219 = vrot.lane.b32.xlu1 %v5148_v15, %s10498_s23  ;;  %5217 = vrot.lane.b32.xlu0 %v5147_v36, %s10498_s23  ;;  %v5341_v15 = vld [vmem:[#allocation3 + $0x82] sm:$0xff]  ;;  %v5340_v36 = vld [vmem:[#allocation3 + $0x7a] sm:$0xff] }
 0x658   : > { %v4850_v30 = vpop.permute.xlu1 %4849  ;;  %v4848_v34 = vpop.permute.xlu0 %4847 }
 0x659   : > { %4931 = vst.msk [vmem:[#allocation6 + $0x78] sm:$0xff] %vm4915_vm10, %v4850_v30  ;;  %4930 = vst.msk [vmem:[#allocation6 + $0x70] sm:$0xff] %vm4915_vm10, %v4848_v34 }
 0x65a   : > { %5223 = vrot.lane.b32.xlu1 %v5150_v20, %s10498_s23  ;;  %5221 = vrot.lane.b32.xlu0 %v5149_v45, %s10498_s23  ;;  %v5343_v20 = vld [vmem:[#allocation3 + $0x9a] sm:$0xff]  ;;  %v5342_v45 = vld [vmem:[#allocation3 + $0x92] sm:$0xff] }
 0x65c   : > { %v4854_v39 = vpop.permute.xlu1 %4853  ;;  %v4852_v53 = vpop.permute.xlu0 %4851 }
 0x65d   : > { %4933 = vst.msk [vmem:[#allocation6 + $0x88] sm:$0xff] %vm4915_vm10, %v4854_v39  ;;  %4932 = vst.msk [vmem:[#allocation6 + $0x80] sm:$0xff] %vm4915_vm10, %v4852_v53 }
 0x65e   : > { %5227 = vrot.lane.b32.xlu1 %v5152_v48, %s10498_s23  ;;  %5225 = vrot.lane.b32.xlu0 %v5151_v6, %s10498_s23  ;;  %v5345_v48 = vld [vmem:[#allocation3 + $0xb2] sm:$0xff]  ;;  %v5344_v6 = vld [vmem:[#allocation3 + $0xaa] sm:$0xff] }
 0x660   : > { %v4858_v19 = vpop.permute.xlu1 %4857  ;;  %v4856_v63 = vpop.permute.xlu0 %4855 }
 0x661   : > { %4935 = vst.msk [vmem:[#allocation6 + $0x98] sm:$0xff] %vm4915_vm10, %v4858_v19  ;;  %4934 = vst.msk [vmem:[#allocation6 + $0x90] sm:$0xff] %vm4915_vm10, %v4856_v63 }
 0x662   : > { %5231 = vrot.lane.b32.xlu1 %v5154_v49, %s10498_s23  ;;  %5229 = vrot.lane.b32.xlu0 %v5153_v61, %s10498_s23  ;;  %v5347_v49 = vld [vmem:[#allocation3 + $0xca] sm:$0xff]  ;;  %v5346_v61 = vld [vmem:[#allocation3 + $0xc2] sm:$0xff] }
 0x664   : > { %v4862_v0 = vpop.permute.xlu1 %4861  ;;  %v4860_v10 = vpop.permute.xlu0 %4859 }
 0x665   : > { %4937 = vst.msk [vmem:[#allocation6 + $0xa8] sm:$0xff] %vm4915_vm10, %v4862_v0  ;;  %4936 = vst.msk [vmem:[#allocation6 + $0xa0] sm:$0xff] %vm4915_vm10, %v4860_v10 }
 0x666   : > { %5235 = vrot.lane.b32.xlu1 %v5156_v17, %s10498_s23  ;;  %5233 = vrot.lane.b32.xlu0 %v5155_v54, %s10498_s23  ;;  %v5349_v17 = vld [vmem:[#allocation3 + $0xe2] sm:$0xff]  ;;  %v5348_v54 = vld [vmem:[#allocation3 + $0xda] sm:$0xff] }
 0x668   : > { %v4866_v41 = vpop.permute.xlu1 %4865  ;;  %v4864_v44 = vpop.permute.xlu0 %4863 }
 0x669   : > { %4939 = vst.msk [vmem:[#allocation6 + $0xb8] sm:$0xff] %vm4915_vm10, %v4866_v41  ;;  %4938 = vst.msk [vmem:[#allocation6 + $0xb0] sm:$0xff] %vm4915_vm10, %v4864_v44 }
 0x66a   : > { %5239 = vrot.lane.b32.xlu1 %v5158_v3, %s10498_s23  ;;  %5237 = vrot.lane.b32.xlu0 %v5157_v1, %s10498_s23  ;;  %v5351_v3 = vld [vmem:[#allocation3 + $0xfa] sm:$0xff]  ;;  %v5350_v1 = vld [vmem:[#allocation3 + $0xf2] sm:$0xff] }
 0x66c   : > { %v4870_v62 = vpop.permute.xlu1 %4869  ;;  %v4868_v46 = vpop.permute.xlu0 %4867 }
 0x66d   : > { %4941 = vst.msk [vmem:[#allocation6 + $0xc8] sm:$0xff] %vm4915_vm10, %v4870_v62  ;;  %4940 = vst.msk [vmem:[#allocation6 + $0xc0] sm:$0xff] %vm4915_vm10, %v4868_v46 }
 0x66e   : > { %5243 = vrot.lane.b32.xlu1 %v5160_v8, %s10498_s23  ;;  %5241 = vrot.lane.b32.xlu0 %v5159_v43, %s10498_s23  ;;  %v5353_v8 = vld [vmem:[#allocation3 + $0x112] sm:$0xff]  ;;  %v5352_v43 = vld [vmem:[#allocation3 + $0x10a] sm:$0xff] }
 0x670   : > { %v4874_v23 = vpop.permute.xlu1 %4873  ;;  %v4872_v52 = vpop.permute.xlu0 %4871 }
 0x671   : > { %4943 = vst.msk [vmem:[#allocation6 + $0xd8] sm:$0xff] %vm4915_vm10, %v4874_v23  ;;  %4942 = vst.msk [vmem:[#allocation6 + $0xd0] sm:$0xff] %vm4915_vm10, %v4872_v52 }
 0x672   : > { %5247 = vrot.lane.b32.xlu1 %v5162_v4, %s10498_s23  ;;  %5245 = vrot.lane.b32.xlu0 %v5161_v7, %s10498_s23  ;;  %v5355_v4 = vld [vmem:[#allocation3 + $0x12a] sm:$0xff]  ;;  %v5354_v7 = vld [vmem:[#allocation3 + $0x122] sm:$0xff] }
 0x674   : > { %v4878_v16 = vpop.permute.xlu1 %4877  ;;  %v4876_v33 = vpop.permute.xlu0 %4875 }
 0x675   : > { %4945 = vst.msk [vmem:[#allocation6 + $0xe8] sm:$0xff] %vm4915_vm10, %v4878_v16  ;;  %4944 = vst.msk [vmem:[#allocation6 + $0xe0] sm:$0xff] %vm4915_vm10, %v4876_v33 }
 0x676   : > { %5251 = vrot.lane.b32.xlu1 %v5164_v27, %s10498_s23  ;;  %5249 = vrot.lane.b32.xlu0 %v5163_v51, %s10498_s23  ;;  %v5357_v27 = vld [vmem:[#allocation3 + $0x142] sm:$0xff]  ;;  %v5356_v51 = vld [vmem:[#allocation3 + $0x13a] sm:$0xff] }
 0x678   : > { %v4882_v31 = vpop.permute.xlu1 %4881  ;;  %v4880_v57 = vpop.permute.xlu0 %4879 }
 0x679   : > { %4947 = vst.msk [vmem:[#allocation6 + $0xf8] sm:$0xff] %vm4915_vm10, %v4882_v31  ;;  %4946 = vst.msk [vmem:[#allocation6 + $0xf0] sm:$0xff] %vm4915_vm10, %v4880_v57  ;;  %vm7988_vm10 = vcmask 1041408  }
 0x67a   : > { %5255 = vrot.lane.b32.xlu1 %v5166_v9, %s10498_s23  ;;  %5253 = vrot.lane.b32.xlu0 %v5165_v18, %s10498_s23  ;;  %v5359_v9 = vld [vmem:[#allocation3 + $0x15a] sm:$0xff]  ;;  %v5358_v18 = vld [vmem:[#allocation3 + $0x152] sm:$0xff] }
 0x67c   : > { %v5015_v11 = vpop.permute.xlu1 %5014  ;;  %v5013_v24 = vpop.permute.xlu0 %5012 }
 0x67d   : > { %5110 = vst.msk [vmem:[#allocation6 + $0x8] sm:$0xff] %vm5108_vm11, %v5015_v11  ;;  %5109 = vst.msk [vmem:[#allocation6] sm:$0xff] %vm5108_vm11, %v5013_v24 }
 0x67e   : > { %5259 = vrot.lane.b32.xlu1 %v5168_v47, %s10498_s23  ;;  %5257 = vrot.lane.b32.xlu0 %v5167_v21, %s10498_s23  ;;  %v5361_v47 = vld [vmem:[#allocation3 + $0x172] sm:$0xff]  ;;  %v5360_v21 = vld [vmem:[#allocation3 + $0x16a] sm:$0xff] }
 0x680   : > { %v5019_v12 = vpop.permute.xlu1 %5018  ;;  %v5017_v32 = vpop.permute.xlu0 %5016 }
 0x681   : > { %5112 = vst.msk [vmem:[#allocation6 + $0x18] sm:$0xff] %vm5108_vm11, %v5019_v12  ;;  %5111 = vst.msk [vmem:[#allocation6 + $0x10] sm:$0xff] %vm5108_vm11, %v5017_v32 }
 0x682   : > { %5263 = vrot.lane.b32.xlu1 %v5170_v60, %s10498_s23  ;;  %5261 = vrot.lane.b32.xlu0 %v5169_v29, %s10498_s23  ;;  %v5363_v60 = vld [vmem:[#allocation3 + $0x18a] sm:$0xff]  ;;  %v5362_v29 = vld [vmem:[#allocation3 + $0x182] sm:$0xff] }
 0x684   : > { %v5023_v55 = vpop.permute.xlu1 %5022  ;;  %v5021_v58 = vpop.permute.xlu0 %5020 }
 0x685   : > { %5114 = vst.msk [vmem:[#allocation6 + $0x28] sm:$0xff] %vm5108_vm11, %v5023_v55  ;;  %5113 = vst.msk [vmem:[#allocation6 + $0x20] sm:$0xff] %vm5108_vm11, %v5021_v58 }
 0x686   : > { %5267 = vrot.lane.b32.xlu1 %v5172_v59, %s10498_s23  ;;  %5265 = vrot.lane.b32.xlu0 %v5171_v13, %s10498_s23  ;;  %v5365_v59 = vld [vmem:[#allocation3 + $0x1a2] sm:$0xff]  ;;  %v5364_v13 = vld [vmem:[#allocation3 + $0x19a] sm:$0xff]  ;;  %s10505_s23 = smov 42  }
 0x688   : > { %v5027_v25 = vpop.permute.xlu1 %5026  ;;  %v5025_v37 = vpop.permute.xlu0 %5024 }
 0x689   : > { %5116 = vst.msk [vmem:[#allocation6 + $0x38] sm:$0xff] %vm5108_vm11, %v5027_v25  ;;  %5115 = vst.msk [vmem:[#allocation6 + $0x30] sm:$0xff] %vm5108_vm11, %v5025_v37 }
 0x68a   : > { %5400 = vrot.lane.b32.xlu1 %v5335_v28, %s10489_s27  ;;  %5398 = vrot.lane.b32.xlu0 %v5334_v5, %s10489_s27  ;;  %v5528_v28 = vld [vmem:[#allocation3 + $0x3b] sm:$0xff]  ;;  %v5527_v5 = vld [vmem:[#allocation3 + $0x33] sm:$0xff] }
 0x68c   : > { %v5031_v38 = vpop.permute.xlu1 %5030  ;;  %v5029_v42 = vpop.permute.xlu0 %5028 }
 0x68d   : > { %5118 = vst.msk [vmem:[#allocation6 + $0x48] sm:$0xff] %vm5108_vm11, %v5031_v38  ;;  %5117 = vst.msk [vmem:[#allocation6 + $0x40] sm:$0xff] %vm5108_vm11, %v5029_v42 }
 0x68e   : > { %5404 = vrot.lane.b32.xlu1 %v5337_v40, %s10489_s27  ;;  %5402 = vrot.lane.b32.xlu0 %v5336_v14, %s10489_s27  ;;  %v5530_v40 = vld [vmem:[#allocation3 + $0x53] sm:$0xff]  ;;  %v5529_v14 = vld [vmem:[#allocation3 + $0x4b] sm:$0xff] }
 0x690   : > { %v5035_v2 = vpop.permute.xlu1 %5034  ;;  %v5033_v35 = vpop.permute.xlu0 %5032 }
 0x691   : > { %5120 = vst.msk [vmem:[#allocation6 + $0x58] sm:$0xff] %vm5108_vm11, %v5035_v2  ;;  %5119 = vst.msk [vmem:[#allocation6 + $0x50] sm:$0xff] %vm5108_vm11, %v5033_v35 }
 0x692   : > { %5408 = vrot.lane.b32.xlu1 %v5339_v50, %s10489_s27  ;;  %5406 = vrot.lane.b32.xlu0 %v5338_v22, %s10489_s27  ;;  %v5532_v50 = vld [vmem:[#allocation3 + $0x6b] sm:$0xff]  ;;  %v5531_v22 = vld [vmem:[#allocation3 + $0x63] sm:$0xff] }
 0x694   : > { %v5039_v26 = vpop.permute.xlu1 %5038  ;;  %v5037_v56 = vpop.permute.xlu0 %5036 }
 0x695   : > { %5122 = vst.msk [vmem:[#allocation6 + $0x68] sm:$0xff] %vm5108_vm11, %v5039_v26  ;;  %5121 = vst.msk [vmem:[#allocation6 + $0x60] sm:$0xff] %vm5108_vm11, %v5037_v56 }
 0x696   : > { %5412 = vrot.lane.b32.xlu1 %v5341_v15, %s10489_s27  ;;  %5410 = vrot.lane.b32.xlu0 %v5340_v36, %s10489_s27  ;;  %v5534_v15 = vld [vmem:[#allocation3 + $0x83] sm:$0xff]  ;;  %v5533_v36 = vld [vmem:[#allocation3 + $0x7b] sm:$0xff] }
 0x698   : > { %v5043_v30 = vpop.permute.xlu1 %5042  ;;  %v5041_v34 = vpop.permute.xlu0 %5040 }
 0x699   : > { %5124 = vst.msk [vmem:[#allocation6 + $0x78] sm:$0xff] %vm5108_vm11, %v5043_v30  ;;  %5123 = vst.msk [vmem:[#allocation6 + $0x70] sm:$0xff] %vm5108_vm11, %v5041_v34 }
 0x69a   : > { %5416 = vrot.lane.b32.xlu1 %v5343_v20, %s10489_s27  ;;  %5414 = vrot.lane.b32.xlu0 %v5342_v45, %s10489_s27  ;;  %v5536_v20 = vld [vmem:[#allocation3 + $0x9b] sm:$0xff]  ;;  %v5535_v45 = vld [vmem:[#allocation3 + $0x93] sm:$0xff] }
 0x69c   : > { %v5047_v39 = vpop.permute.xlu1 %5046  ;;  %v5045_v53 = vpop.permute.xlu0 %5044 }
 0x69d   : > { %5126 = vst.msk [vmem:[#allocation6 + $0x88] sm:$0xff] %vm5108_vm11, %v5047_v39  ;;  %5125 = vst.msk [vmem:[#allocation6 + $0x80] sm:$0xff] %vm5108_vm11, %v5045_v53 }
 0x69e   : > { %5420 = vrot.lane.b32.xlu1 %v5345_v48, %s10489_s27  ;;  %5418 = vrot.lane.b32.xlu0 %v5344_v6, %s10489_s27  ;;  %v5538_v48 = vld [vmem:[#allocation3 + $0xb3] sm:$0xff]  ;;  %v5537_v6 = vld [vmem:[#allocation3 + $0xab] sm:$0xff] }
 0x6a0   : > { %v5051_v19 = vpop.permute.xlu1 %5050  ;;  %v5049_v63 = vpop.permute.xlu0 %5048 }
 0x6a1   : > { %5128 = vst.msk [vmem:[#allocation6 + $0x98] sm:$0xff] %vm5108_vm11, %v5051_v19  ;;  %5127 = vst.msk [vmem:[#allocation6 + $0x90] sm:$0xff] %vm5108_vm11, %v5049_v63 }
 0x6a2   : > { %5424 = vrot.lane.b32.xlu1 %v5347_v49, %s10489_s27  ;;  %5422 = vrot.lane.b32.xlu0 %v5346_v61, %s10489_s27  ;;  %v5540_v49 = vld [vmem:[#allocation3 + $0xcb] sm:$0xff]  ;;  %v5539_v61 = vld [vmem:[#allocation3 + $0xc3] sm:$0xff] }
 0x6a4   : > { %v5055_v0 = vpop.permute.xlu1 %5054  ;;  %v5053_v10 = vpop.permute.xlu0 %5052 }
 0x6a5   : > { %5130 = vst.msk [vmem:[#allocation6 + $0xa8] sm:$0xff] %vm5108_vm11, %v5055_v0  ;;  %5129 = vst.msk [vmem:[#allocation6 + $0xa0] sm:$0xff] %vm5108_vm11, %v5053_v10 }
 0x6a6   : > { %5428 = vrot.lane.b32.xlu1 %v5349_v17, %s10489_s27  ;;  %5426 = vrot.lane.b32.xlu0 %v5348_v54, %s10489_s27  ;;  %v5542_v17 = vld [vmem:[#allocation3 + $0xe3] sm:$0xff]  ;;  %v5541_v54 = vld [vmem:[#allocation3 + $0xdb] sm:$0xff] }
 0x6a8   : > { %v5059_v41 = vpop.permute.xlu1 %5058  ;;  %v5057_v44 = vpop.permute.xlu0 %5056 }
 0x6a9   : > { %5132 = vst.msk [vmem:[#allocation6 + $0xb8] sm:$0xff] %vm5108_vm11, %v5059_v41  ;;  %5131 = vst.msk [vmem:[#allocation6 + $0xb0] sm:$0xff] %vm5108_vm11, %v5057_v44 }
 0x6aa   : > { %5432 = vrot.lane.b32.xlu1 %v5351_v3, %s10489_s27  ;;  %5430 = vrot.lane.b32.xlu0 %v5350_v1, %s10489_s27  ;;  %v5544_v3 = vld [vmem:[#allocation3 + $0xfb] sm:$0xff]  ;;  %v5543_v1 = vld [vmem:[#allocation3 + $0xf3] sm:$0xff] }
 0x6ac   : > { %v5063_v62 = vpop.permute.xlu1 %5062  ;;  %v5061_v46 = vpop.permute.xlu0 %5060 }
 0x6ad   : > { %5134 = vst.msk [vmem:[#allocation6 + $0xc8] sm:$0xff] %vm5108_vm11, %v5063_v62  ;;  %5133 = vst.msk [vmem:[#allocation6 + $0xc0] sm:$0xff] %vm5108_vm11, %v5061_v46 }
 0x6ae   : > { %5436 = vrot.lane.b32.xlu1 %v5353_v8, %s10489_s27  ;;  %5434 = vrot.lane.b32.xlu0 %v5352_v43, %s10489_s27  ;;  %v5546_v8 = vld [vmem:[#allocation3 + $0x113] sm:$0xff]  ;;  %v5545_v43 = vld [vmem:[#allocation3 + $0x10b] sm:$0xff] }
 0x6b0   : > { %v5067_v23 = vpop.permute.xlu1 %5066  ;;  %v5065_v52 = vpop.permute.xlu0 %5064 }
 0x6b1   : > { %5136 = vst.msk [vmem:[#allocation6 + $0xd8] sm:$0xff] %vm5108_vm11, %v5067_v23  ;;  %5135 = vst.msk [vmem:[#allocation6 + $0xd0] sm:$0xff] %vm5108_vm11, %v5065_v52 }
 0x6b2   : > { %5440 = vrot.lane.b32.xlu1 %v5355_v4, %s10489_s27  ;;  %5438 = vrot.lane.b32.xlu0 %v5354_v7, %s10489_s27  ;;  %v5548_v4 = vld [vmem:[#allocation3 + $0x12b] sm:$0xff]  ;;  %v5547_v7 = vld [vmem:[#allocation3 + $0x123] sm:$0xff] }
 0x6b4   : > { %v5071_v16 = vpop.permute.xlu1 %5070  ;;  %v5069_v33 = vpop.permute.xlu0 %5068 }
 0x6b5   : > { %5138 = vst.msk [vmem:[#allocation6 + $0xe8] sm:$0xff] %vm5108_vm11, %v5071_v16  ;;  %5137 = vst.msk [vmem:[#allocation6 + $0xe0] sm:$0xff] %vm5108_vm11, %v5069_v33 }
 0x6b6   : > { %5444 = vrot.lane.b32.xlu1 %v5357_v27, %s10489_s27  ;;  %5442 = vrot.lane.b32.xlu0 %v5356_v51, %s10489_s27  ;;  %v5550_v27 = vld [vmem:[#allocation3 + $0x143] sm:$0xff]  ;;  %v5549_v51 = vld [vmem:[#allocation3 + $0x13b] sm:$0xff] }
 0x6b8   : > { %v5075_v31 = vpop.permute.xlu1 %5074  ;;  %v5073_v57 = vpop.permute.xlu0 %5072 }
 0x6b9   : > { %5140 = vst.msk [vmem:[#allocation6 + $0xf8] sm:$0xff] %vm5108_vm11, %v5075_v31  ;;  %5139 = vst.msk [vmem:[#allocation6 + $0xf0] sm:$0xff] %vm5108_vm11, %v5073_v57  ;;  %vm7233_vm11 = vcmask 359760  }
 0x6ba   : > { %5448 = vrot.lane.b32.xlu1 %v5359_v9, %s10489_s27  ;;  %5446 = vrot.lane.b32.xlu0 %v5358_v18, %s10489_s27  ;;  %v5552_v9 = vld [vmem:[#allocation3 + $0x15b] sm:$0xff]  ;;  %v5551_v18 = vld [vmem:[#allocation3 + $0x153] sm:$0xff] }
 0x6bc   : > { %v5208_v11 = vpop.permute.xlu1 %5207  ;;  %v5206_v24 = vpop.permute.xlu0 %5205 }
 0x6bd   : > { %5303 = vst.msk [vmem:[#allocation6 + $0x8] sm:$0xff] %vm5301_vm12, %v5208_v11  ;;  %5302 = vst.msk [vmem:[#allocation6] sm:$0xff] %vm5301_vm12, %v5206_v24 }
 0x6be   : > { %5452 = vrot.lane.b32.xlu1 %v5361_v47, %s10489_s27  ;;  %5450 = vrot.lane.b32.xlu0 %v5360_v21, %s10489_s27  ;;  %v5554_v47 = vld [vmem:[#allocation3 + $0x173] sm:$0xff]  ;;  %v5553_v21 = vld [vmem:[#allocation3 + $0x16b] sm:$0xff] }
 0x6c0   : > { %v5212_v12 = vpop.permute.xlu1 %5211  ;;  %v5210_v32 = vpop.permute.xlu0 %5209 }
 0x6c1   : > { %5305 = vst.msk [vmem:[#allocation6 + $0x18] sm:$0xff] %vm5301_vm12, %v5212_v12  ;;  %5304 = vst.msk [vmem:[#allocation6 + $0x10] sm:$0xff] %vm5301_vm12, %v5210_v32 }
 0x6c2   : > { %5456 = vrot.lane.b32.xlu1 %v5363_v60, %s10489_s27  ;;  %5454 = vrot.lane.b32.xlu0 %v5362_v29, %s10489_s27  ;;  %v5556_v60 = vld [vmem:[#allocation3 + $0x18b] sm:$0xff]  ;;  %v5555_v29 = vld [vmem:[#allocation3 + $0x183] sm:$0xff] }
 0x6c4   : > { %v5216_v55 = vpop.permute.xlu1 %5215  ;;  %v5214_v58 = vpop.permute.xlu0 %5213 }
 0x6c5   : > { %5307 = vst.msk [vmem:[#allocation6 + $0x28] sm:$0xff] %vm5301_vm12, %v5216_v55  ;;  %5306 = vst.msk [vmem:[#allocation6 + $0x20] sm:$0xff] %vm5301_vm12, %v5214_v58 }
 0x6c6   : > { %5460 = vrot.lane.b32.xlu1 %v5365_v59, %s10489_s27  ;;  %5458 = vrot.lane.b32.xlu0 %v5364_v13, %s10489_s27  ;;  %v5558_v59 = vld [vmem:[#allocation3 + $0x1a3] sm:$0xff]  ;;  %v5557_v13 = vld [vmem:[#allocation3 + $0x19b] sm:$0xff]  ;;  %s10500_s27 = smov 30  }
 0x6c8   : > { %v5220_v25 = vpop.permute.xlu1 %5219  ;;  %v5218_v37 = vpop.permute.xlu0 %5217 }
 0x6c9   : > { %5309 = vst.msk [vmem:[#allocation6 + $0x38] sm:$0xff] %vm5301_vm12, %v5220_v25  ;;  %5308 = vst.msk [vmem:[#allocation6 + $0x30] sm:$0xff] %vm5301_vm12, %v5218_v37 }
 0x6ca   : > { %5593 = vrot.lane.b32.xlu1 %v5528_v28, %s10499_s25  ;;  %5591 = vrot.lane.b32.xlu0 %v5527_v5, %s10499_s25  ;;  %v5721_v28 = vld [vmem:[#allocation3 + $0x3c] sm:$0xff]  ;;  %v5720_v5 = vld [vmem:[#allocation3 + $0x34] sm:$0xff] }
 0x6cc   : > { %v5224_v38 = vpop.permute.xlu1 %5223  ;;  %v5222_v42 = vpop.permute.xlu0 %5221 }
 0x6cd   : > { %5311 = vst.msk [vmem:[#allocation6 + $0x48] sm:$0xff] %vm5301_vm12, %v5224_v38  ;;  %5310 = vst.msk [vmem:[#allocation6 + $0x40] sm:$0xff] %vm5301_vm12, %v5222_v42 }
 0x6ce   : > { %5597 = vrot.lane.b32.xlu1 %v5530_v40, %s10499_s25  ;;  %5595 = vrot.lane.b32.xlu0 %v5529_v14, %s10499_s25  ;;  %v5723_v40 = vld [vmem:[#allocation3 + $0x54] sm:$0xff]  ;;  %v5722_v14 = vld [vmem:[#allocation3 + $0x4c] sm:$0xff] }
 0x6d0   : > { %v5228_v2 = vpop.permute.xlu1 %5227  ;;  %v5226_v35 = vpop.permute.xlu0 %5225 }
 0x6d1   : > { %5313 = vst.msk [vmem:[#allocation6 + $0x58] sm:$0xff] %vm5301_vm12, %v5228_v2  ;;  %5312 = vst.msk [vmem:[#allocation6 + $0x50] sm:$0xff] %vm5301_vm12, %v5226_v35 }
 0x6d2   : > { %5601 = vrot.lane.b32.xlu1 %v5532_v50, %s10499_s25  ;;  %5599 = vrot.lane.b32.xlu0 %v5531_v22, %s10499_s25  ;;  %v5725_v50 = vld [vmem:[#allocation3 + $0x6c] sm:$0xff]  ;;  %v5724_v22 = vld [vmem:[#allocation3 + $0x64] sm:$0xff] }
 0x6d4   : > { %v5232_v26 = vpop.permute.xlu1 %5231  ;;  %v5230_v56 = vpop.permute.xlu0 %5229 }
 0x6d5   : > { %5315 = vst.msk [vmem:[#allocation6 + $0x68] sm:$0xff] %vm5301_vm12, %v5232_v26  ;;  %5314 = vst.msk [vmem:[#allocation6 + $0x60] sm:$0xff] %vm5301_vm12, %v5230_v56 }
 0x6d6   : > { %5605 = vrot.lane.b32.xlu1 %v5534_v15, %s10499_s25  ;;  %5603 = vrot.lane.b32.xlu0 %v5533_v36, %s10499_s25  ;;  %v5727_v15 = vld [vmem:[#allocation3 + $0x84] sm:$0xff]  ;;  %v5726_v36 = vld [vmem:[#allocation3 + $0x7c] sm:$0xff] }
 0x6d8   : > { %v5236_v30 = vpop.permute.xlu1 %5235  ;;  %v5234_v34 = vpop.permute.xlu0 %5233 }
 0x6d9   : > { %5317 = vst.msk [vmem:[#allocation6 + $0x78] sm:$0xff] %vm5301_vm12, %v5236_v30  ;;  %5316 = vst.msk [vmem:[#allocation6 + $0x70] sm:$0xff] %vm5301_vm12, %v5234_v34 }
 0x6da   : > { %5609 = vrot.lane.b32.xlu1 %v5536_v20, %s10499_s25  ;;  %5607 = vrot.lane.b32.xlu0 %v5535_v45, %s10499_s25  ;;  %v5729_v20 = vld [vmem:[#allocation3 + $0x9c] sm:$0xff]  ;;  %v5728_v45 = vld [vmem:[#allocation3 + $0x94] sm:$0xff] }
 0x6dc   : > { %v5240_v39 = vpop.permute.xlu1 %5239  ;;  %v5238_v53 = vpop.permute.xlu0 %5237 }
 0x6dd   : > { %5319 = vst.msk [vmem:[#allocation6 + $0x88] sm:$0xff] %vm5301_vm12, %v5240_v39  ;;  %5318 = vst.msk [vmem:[#allocation6 + $0x80] sm:$0xff] %vm5301_vm12, %v5238_v53 }
 0x6de   : > { %5613 = vrot.lane.b32.xlu1 %v5538_v48, %s10499_s25  ;;  %5611 = vrot.lane.b32.xlu0 %v5537_v6, %s10499_s25  ;;  %v5731_v48 = vld [vmem:[#allocation3 + $0xb4] sm:$0xff]  ;;  %v5730_v6 = vld [vmem:[#allocation3 + $0xac] sm:$0xff] }
 0x6e0   : > { %v5244_v19 = vpop.permute.xlu1 %5243  ;;  %v5242_v63 = vpop.permute.xlu0 %5241 }
 0x6e1   : > { %5321 = vst.msk [vmem:[#allocation6 + $0x98] sm:$0xff] %vm5301_vm12, %v5244_v19  ;;  %5320 = vst.msk [vmem:[#allocation6 + $0x90] sm:$0xff] %vm5301_vm12, %v5242_v63 }
 0x6e2   : > { %5617 = vrot.lane.b32.xlu1 %v5540_v49, %s10499_s25  ;;  %5615 = vrot.lane.b32.xlu0 %v5539_v61, %s10499_s25  ;;  %v5733_v49 = vld [vmem:[#allocation3 + $0xcc] sm:$0xff]  ;;  %v5732_v61 = vld [vmem:[#allocation3 + $0xc4] sm:$0xff] }
 0x6e4   : > { %v5248_v0 = vpop.permute.xlu1 %5247  ;;  %v5246_v10 = vpop.permute.xlu0 %5245 }
 0x6e5   : > { %5323 = vst.msk [vmem:[#allocation6 + $0xa8] sm:$0xff] %vm5301_vm12, %v5248_v0  ;;  %5322 = vst.msk [vmem:[#allocation6 + $0xa0] sm:$0xff] %vm5301_vm12, %v5246_v10 }
 0x6e6   : > { %5621 = vrot.lane.b32.xlu1 %v5542_v17, %s10499_s25  ;;  %5619 = vrot.lane.b32.xlu0 %v5541_v54, %s10499_s25  ;;  %v5735_v17 = vld [vmem:[#allocation3 + $0xe4] sm:$0xff]  ;;  %v5734_v54 = vld [vmem:[#allocation3 + $0xdc] sm:$0xff] }
 0x6e8   : > { %v5252_v41 = vpop.permute.xlu1 %5251  ;;  %v5250_v44 = vpop.permute.xlu0 %5249 }
 0x6e9   : > { %5325 = vst.msk [vmem:[#allocation6 + $0xb8] sm:$0xff] %vm5301_vm12, %v5252_v41  ;;  %5324 = vst.msk [vmem:[#allocation6 + $0xb0] sm:$0xff] %vm5301_vm12, %v5250_v44 }
 0x6ea   : > { %5625 = vrot.lane.b32.xlu1 %v5544_v3, %s10499_s25  ;;  %5623 = vrot.lane.b32.xlu0 %v5543_v1, %s10499_s25  ;;  %v5737_v3 = vld [vmem:[#allocation3 + $0xfc] sm:$0xff]  ;;  %v5736_v1 = vld [vmem:[#allocation3 + $0xf4] sm:$0xff] }
 0x6ec   : > { %v5256_v62 = vpop.permute.xlu1 %5255  ;;  %v5254_v46 = vpop.permute.xlu0 %5253 }
 0x6ed   : > { %5327 = vst.msk [vmem:[#allocation6 + $0xc8] sm:$0xff] %vm5301_vm12, %v5256_v62  ;;  %5326 = vst.msk [vmem:[#allocation6 + $0xc0] sm:$0xff] %vm5301_vm12, %v5254_v46 }
 0x6ee   : > { %5629 = vrot.lane.b32.xlu1 %v5546_v8, %s10499_s25  ;;  %5627 = vrot.lane.b32.xlu0 %v5545_v43, %s10499_s25  ;;  %v5739_v8 = vld [vmem:[#allocation3 + $0x114] sm:$0xff]  ;;  %v5738_v43 = vld [vmem:[#allocation3 + $0x10c] sm:$0xff] }
 0x6f0   : > { %v5260_v23 = vpop.permute.xlu1 %5259  ;;  %v5258_v52 = vpop.permute.xlu0 %5257 }
 0x6f1   : > { %5329 = vst.msk [vmem:[#allocation6 + $0xd8] sm:$0xff] %vm5301_vm12, %v5260_v23  ;;  %5328 = vst.msk [vmem:[#allocation6 + $0xd0] sm:$0xff] %vm5301_vm12, %v5258_v52 }
 0x6f2   : > { %5633 = vrot.lane.b32.xlu1 %v5548_v4, %s10499_s25  ;;  %5631 = vrot.lane.b32.xlu0 %v5547_v7, %s10499_s25  ;;  %v5741_v4 = vld [vmem:[#allocation3 + $0x12c] sm:$0xff]  ;;  %v5740_v7 = vld [vmem:[#allocation3 + $0x124] sm:$0xff] }
 0x6f4   : > { %v5264_v16 = vpop.permute.xlu1 %5263  ;;  %v5262_v33 = vpop.permute.xlu0 %5261 }
 0x6f5   : > { %5331 = vst.msk [vmem:[#allocation6 + $0xe8] sm:$0xff] %vm5301_vm12, %v5264_v16  ;;  %5330 = vst.msk [vmem:[#allocation6 + $0xe0] sm:$0xff] %vm5301_vm12, %v5262_v33 }
 0x6f6   : > { %5637 = vrot.lane.b32.xlu1 %v5550_v27, %s10499_s25  ;;  %5635 = vrot.lane.b32.xlu0 %v5549_v51, %s10499_s25  ;;  %v5743_v27 = vld [vmem:[#allocation3 + $0x144] sm:$0xff]  ;;  %v5742_v51 = vld [vmem:[#allocation3 + $0x13c] sm:$0xff] }
 0x6f8   : > { %v5268_v31 = vpop.permute.xlu1 %5267  ;;  %v5266_v57 = vpop.permute.xlu0 %5265 }
 0x6f9   : > { %5333 = vst.msk [vmem:[#allocation6 + $0xf8] sm:$0xff] %vm5301_vm12, %v5268_v31  ;;  %5332 = vst.msk [vmem:[#allocation6 + $0xf0] sm:$0xff] %vm5301_vm12, %v5266_v57  ;;  %vm7426_vm12 = vcmask 376160  }
 0x6fa   : > { %5641 = vrot.lane.b32.xlu1 %v5552_v9, %s10499_s25  ;;  %5639 = vrot.lane.b32.xlu0 %v5551_v18, %s10499_s25  ;;  %v5745_v9 = vld [vmem:[#allocation3 + $0x15c] sm:$0xff]  ;;  %v5744_v18 = vld [vmem:[#allocation3 + $0x154] sm:$0xff] }
 0x6fc   : > { %v5401_v11 = vpop.permute.xlu1 %5400  ;;  %v5399_v24 = vpop.permute.xlu0 %5398 }
 0x6fd   : > { %5496 = vst.msk [vmem:[#allocation6 + $0x8] sm:$0xff] %vm5494_vm13, %v5401_v11  ;;  %5495 = vst.msk [vmem:[#allocation6] sm:$0xff] %vm5494_vm13, %v5399_v24 }
 0x6fe   : > { %5645 = vrot.lane.b32.xlu1 %v5554_v47, %s10499_s25  ;;  %5643 = vrot.lane.b32.xlu0 %v5553_v21, %s10499_s25  ;;  %v5747_v47 = vld [vmem:[#allocation3 + $0x174] sm:$0xff]  ;;  %v5746_v21 = vld [vmem:[#allocation3 + $0x16c] sm:$0xff] }
 0x700   : > { %v5405_v12 = vpop.permute.xlu1 %5404  ;;  %v5403_v32 = vpop.permute.xlu0 %5402 }
 0x701   : > { %5498 = vst.msk [vmem:[#allocation6 + $0x18] sm:$0xff] %vm5494_vm13, %v5405_v12  ;;  %5497 = vst.msk [vmem:[#allocation6 + $0x10] sm:$0xff] %vm5494_vm13, %v5403_v32 }
 0x702   : > { %5649 = vrot.lane.b32.xlu1 %v5556_v60, %s10499_s25  ;;  %5647 = vrot.lane.b32.xlu0 %v5555_v29, %s10499_s25  ;;  %v5749_v60 = vld [vmem:[#allocation3 + $0x18c] sm:$0xff]  ;;  %v5748_v29 = vld [vmem:[#allocation3 + $0x184] sm:$0xff] }
 0x704   : > { %v5409_v55 = vpop.permute.xlu1 %5408  ;;  %v5407_v58 = vpop.permute.xlu0 %5406 }
 0x705   : > { %5500 = vst.msk [vmem:[#allocation6 + $0x28] sm:$0xff] %vm5494_vm13, %v5409_v55  ;;  %5499 = vst.msk [vmem:[#allocation6 + $0x20] sm:$0xff] %vm5494_vm13, %v5407_v58 }
 0x706   : > { %5653 = vrot.lane.b32.xlu1 %v5558_v59, %s10499_s25  ;;  %5651 = vrot.lane.b32.xlu0 %v5557_v13, %s10499_s25  ;;  %v5751_v59 = vld [vmem:[#allocation3 + $0x1a4] sm:$0xff]  ;;  %v5750_v13 = vld [vmem:[#allocation3 + $0x19c] sm:$0xff] }
 0x708   : > { %v5413_v25 = vpop.permute.xlu1 %5412  ;;  %v5411_v37 = vpop.permute.xlu0 %5410 }
 0x709   : > { %5502 = vst.msk [vmem:[#allocation6 + $0x38] sm:$0xff] %vm5494_vm13, %v5413_v25  ;;  %5501 = vst.msk [vmem:[#allocation6 + $0x30] sm:$0xff] %vm5494_vm13, %v5411_v37 }
 0x70a   : > { %5786 = vrot.lane.b32.xlu1 %v5721_v28, %s10490_s16  ;;  %5784 = vrot.lane.b32.xlu0 %v5720_v5, %s10490_s16  ;;  %v5915_v28 = vld [vmem:[#allocation3 + $0x50] sm:$0xff]  ;;  %v5914_v5 = vld [vmem:[#allocation3 + $0x48] sm:$0xff] }
 0x70c   : > { %v5417_v38 = vpop.permute.xlu1 %5416  ;;  %v5415_v42 = vpop.permute.xlu0 %5414 }
 0x70d   : > { %5504 = vst.msk [vmem:[#allocation6 + $0x48] sm:$0xff] %vm5494_vm13, %v5417_v38  ;;  %5503 = vst.msk [vmem:[#allocation6 + $0x40] sm:$0xff] %vm5494_vm13, %v5415_v42 }
 0x70e   : > { %5790 = vrot.lane.b32.xlu1 %v5723_v40, %s10490_s16  ;;  %5788 = vrot.lane.b32.xlu0 %v5722_v14, %s10490_s16  ;;  %v5917_v40 = vld [vmem:[#allocation3 + $0x68] sm:$0xff]  ;;  %v5916_v14 = vld [vmem:[#allocation3 + $0x60] sm:$0xff] }
 0x710   : > { %v5421_v2 = vpop.permute.xlu1 %5420  ;;  %v5419_v35 = vpop.permute.xlu0 %5418 }
 0x711   : > { %5506 = vst.msk [vmem:[#allocation6 + $0x58] sm:$0xff] %vm5494_vm13, %v5421_v2  ;;  %5505 = vst.msk [vmem:[#allocation6 + $0x50] sm:$0xff] %vm5494_vm13, %v5419_v35 }
 0x712   : > { %5794 = vrot.lane.b32.xlu1 %v5725_v50, %s10490_s16  ;;  %5792 = vrot.lane.b32.xlu0 %v5724_v22, %s10490_s16  ;;  %v5919_v50 = vld [vmem:[#allocation3 + $0x80] sm:$0xff]  ;;  %v5918_v22 = vld [vmem:[#allocation3 + $0x78] sm:$0xff] }
 0x714   : > { %v5425_v26 = vpop.permute.xlu1 %5424  ;;  %v5423_v56 = vpop.permute.xlu0 %5422 }
 0x715   : > { %5508 = vst.msk [vmem:[#allocation6 + $0x68] sm:$0xff] %vm5494_vm13, %v5425_v26  ;;  %5507 = vst.msk [vmem:[#allocation6 + $0x60] sm:$0xff] %vm5494_vm13, %v5423_v56 }
 0x716   : > { %5798 = vrot.lane.b32.xlu1 %v5727_v15, %s10490_s16  ;;  %5796 = vrot.lane.b32.xlu0 %v5726_v36, %s10490_s16  ;;  %v5921_v15 = vld [vmem:[#allocation3 + $0x98] sm:$0xff]  ;;  %v5920_v36 = vld [vmem:[#allocation3 + $0x90] sm:$0xff] }
 0x718   : > { %v5429_v30 = vpop.permute.xlu1 %5428  ;;  %v5427_v34 = vpop.permute.xlu0 %5426 }
 0x719   : > { %5510 = vst.msk [vmem:[#allocation6 + $0x78] sm:$0xff] %vm5494_vm13, %v5429_v30  ;;  %5509 = vst.msk [vmem:[#allocation6 + $0x70] sm:$0xff] %vm5494_vm13, %v5427_v34 }
 0x71a   : > { %5802 = vrot.lane.b32.xlu1 %v5729_v20, %s10490_s16  ;;  %5800 = vrot.lane.b32.xlu0 %v5728_v45, %s10490_s16  ;;  %v5923_v20 = vld [vmem:[#allocation3 + $0xb0] sm:$0xff]  ;;  %v5922_v45 = vld [vmem:[#allocation3 + $0xa8] sm:$0xff] }
 0x71c   : > { %v5433_v39 = vpop.permute.xlu1 %5432  ;;  %v5431_v53 = vpop.permute.xlu0 %5430 }
 0x71d   : > { %5512 = vst.msk [vmem:[#allocation6 + $0x88] sm:$0xff] %vm5494_vm13, %v5433_v39  ;;  %5511 = vst.msk [vmem:[#allocation6 + $0x80] sm:$0xff] %vm5494_vm13, %v5431_v53 }
 0x71e   : > { %5806 = vrot.lane.b32.xlu1 %v5731_v48, %s10490_s16  ;;  %5804 = vrot.lane.b32.xlu0 %v5730_v6, %s10490_s16  ;;  %v5925_v48 = vld [vmem:[#allocation3 + $0xc8] sm:$0xff]  ;;  %v5924_v6 = vld [vmem:[#allocation3 + $0xc0] sm:$0xff] }
 0x720   : > { %v5437_v19 = vpop.permute.xlu1 %5436  ;;  %v5435_v63 = vpop.permute.xlu0 %5434 }
 0x721   : > { %5514 = vst.msk [vmem:[#allocation6 + $0x98] sm:$0xff] %vm5494_vm13, %v5437_v19  ;;  %5513 = vst.msk [vmem:[#allocation6 + $0x90] sm:$0xff] %vm5494_vm13, %v5435_v63 }
 0x722   : > { %5810 = vrot.lane.b32.xlu1 %v5733_v49, %s10490_s16  ;;  %5808 = vrot.lane.b32.xlu0 %v5732_v61, %s10490_s16  ;;  %v5927_v49 = vld [vmem:[#allocation3 + $0xe0] sm:$0xff]  ;;  %v5926_v61 = vld [vmem:[#allocation3 + $0xd8] sm:$0xff] }
 0x724   : > { %v5441_v0 = vpop.permute.xlu1 %5440  ;;  %v5439_v10 = vpop.permute.xlu0 %5438 }
 0x725   : > { %5516 = vst.msk [vmem:[#allocation6 + $0xa8] sm:$0xff] %vm5494_vm13, %v5441_v0  ;;  %5515 = vst.msk [vmem:[#allocation6 + $0xa0] sm:$0xff] %vm5494_vm13, %v5439_v10 }
 0x726   : > { %5814 = vrot.lane.b32.xlu1 %v5735_v17, %s10490_s16  ;;  %5812 = vrot.lane.b32.xlu0 %v5734_v54, %s10490_s16  ;;  %v5929_v17 = vld [vmem:[#allocation3 + $0xf8] sm:$0xff]  ;;  %v5928_v54 = vld [vmem:[#allocation3 + $0xf0] sm:$0xff] }
 0x728   : > { %v5445_v41 = vpop.permute.xlu1 %5444  ;;  %v5443_v44 = vpop.permute.xlu0 %5442 }
 0x729   : > { %5518 = vst.msk [vmem:[#allocation6 + $0xb8] sm:$0xff] %vm5494_vm13, %v5445_v41  ;;  %5517 = vst.msk [vmem:[#allocation6 + $0xb0] sm:$0xff] %vm5494_vm13, %v5443_v44 }
 0x72a   : > { %5818 = vrot.lane.b32.xlu1 %v5737_v3, %s10490_s16  ;;  %5816 = vrot.lane.b32.xlu0 %v5736_v1, %s10490_s16  ;;  %v5931_v3 = vld [vmem:[#allocation3 + $0x110] sm:$0xff]  ;;  %v5930_v1 = vld [vmem:[#allocation3 + $0x108] sm:$0xff] }
 0x72c   : > { %v5449_v62 = vpop.permute.xlu1 %5448  ;;  %v5447_v46 = vpop.permute.xlu0 %5446 }
 0x72d   : > { %5520 = vst.msk [vmem:[#allocation6 + $0xc8] sm:$0xff] %vm5494_vm13, %v5449_v62  ;;  %5519 = vst.msk [vmem:[#allocation6 + $0xc0] sm:$0xff] %vm5494_vm13, %v5447_v46 }
 0x72e   : > { %5822 = vrot.lane.b32.xlu1 %v5739_v8, %s10490_s16  ;;  %5820 = vrot.lane.b32.xlu0 %v5738_v43, %s10490_s16  ;;  %v5933_v8 = vld [vmem:[#allocation3 + $0x128] sm:$0xff]  ;;  %v5932_v43 = vld [vmem:[#allocation3 + $0x120] sm:$0xff] }
 0x730   : > { %v5453_v23 = vpop.permute.xlu1 %5452  ;;  %v5451_v52 = vpop.permute.xlu0 %5450 }
 0x731   : > { %5522 = vst.msk [vmem:[#allocation6 + $0xd8] sm:$0xff] %vm5494_vm13, %v5453_v23  ;;  %5521 = vst.msk [vmem:[#allocation6 + $0xd0] sm:$0xff] %vm5494_vm13, %v5451_v52 }
 0x732   : > { %5826 = vrot.lane.b32.xlu1 %v5741_v4, %s10490_s16  ;;  %5824 = vrot.lane.b32.xlu0 %v5740_v7, %s10490_s16  ;;  %v5935_v4 = vld [vmem:[#allocation3 + $0x140] sm:$0xff]  ;;  %v5934_v7 = vld [vmem:[#allocation3 + $0x138] sm:$0xff] }
 0x734   : > { %v5457_v16 = vpop.permute.xlu1 %5456  ;;  %v5455_v33 = vpop.permute.xlu0 %5454 }
 0x735   : > { %5524 = vst.msk [vmem:[#allocation6 + $0xe8] sm:$0xff] %vm5494_vm13, %v5457_v16  ;;  %5523 = vst.msk [vmem:[#allocation6 + $0xe0] sm:$0xff] %vm5494_vm13, %v5455_v33 }
 0x736   : > { %5830 = vrot.lane.b32.xlu1 %v5743_v27, %s10490_s16  ;;  %5828 = vrot.lane.b32.xlu0 %v5742_v51, %s10490_s16  ;;  %v5937_v27 = vld [vmem:[#allocation3 + $0x158] sm:$0xff]  ;;  %v5936_v51 = vld [vmem:[#allocation3 + $0x150] sm:$0xff] }
 0x738   : > { %v5461_v31 = vpop.permute.xlu1 %5460  ;;  %v5459_v57 = vpop.permute.xlu0 %5458 }
 0x739   : > { %5526 = vst.msk [vmem:[#allocation6 + $0xf8] sm:$0xff] %vm5494_vm13, %v5461_v31  ;;  %5525 = vst.msk [vmem:[#allocation6 + $0xf0] sm:$0xff] %vm5494_vm13, %v5459_v57  ;;  %vm7619_vm13 = vcmask 392560  }
 0x73a   : > { %5834 = vrot.lane.b32.xlu1 %v5745_v9, %s10490_s16  ;;  %5832 = vrot.lane.b32.xlu0 %v5744_v18, %s10490_s16  ;;  %v5939_v9 = vld [vmem:[#allocation3 + $0x170] sm:$0xff]  ;;  %v5938_v18 = vld [vmem:[#allocation3 + $0x168] sm:$0xff] }
 0x73c   : > { %v5594_v11 = vpop.permute.xlu1 %5593  ;;  %v5592_v24 = vpop.permute.xlu0 %5591 }
 0x73d   : > { %5689 = vst.msk [vmem:[#allocation6 + $0x8] sm:$0xff] %vm5687_vm14, %v5594_v11  ;;  %5688 = vst.msk [vmem:[#allocation6] sm:$0xff] %vm5687_vm14, %v5592_v24 }
 0x73e   : > { %5838 = vrot.lane.b32.xlu1 %v5747_v47, %s10490_s16  ;;  %5836 = vrot.lane.b32.xlu0 %v5746_v21, %s10490_s16  ;;  %v5941_v47 = vld [vmem:[#allocation3 + $0x188] sm:$0xff]  ;;  %v5940_v21 = vld [vmem:[#allocation3 + $0x180] sm:$0xff] }
 0x740   : > { %v5598_v12 = vpop.permute.xlu1 %5597  ;;  %v5596_v32 = vpop.permute.xlu0 %5595 }
 0x741   : > { %5691 = vst.msk [vmem:[#allocation6 + $0x18] sm:$0xff] %vm5687_vm14, %v5598_v12  ;;  %5690 = vst.msk [vmem:[#allocation6 + $0x10] sm:$0xff] %vm5687_vm14, %v5596_v32 }
 0x742   : > { %5842 = vrot.lane.b32.xlu1 %v5749_v60, %s10490_s16  ;;  %5840 = vrot.lane.b32.xlu0 %v5748_v29, %s10490_s16  ;;  %v5943_v60 = vld [vmem:[#allocation3 + $0x1a0] sm:$0xff]  ;;  %v5942_v29 = vld [vmem:[#allocation3 + $0x198] sm:$0xff] }
 0x744   : > { %v5602_v55 = vpop.permute.xlu1 %5601  ;;  %v5600_v58 = vpop.permute.xlu0 %5599 }
 0x745   : > { %5693 = vst.msk [vmem:[#allocation6 + $0x28] sm:$0xff] %vm5687_vm14, %v5602_v55  ;;  %5692 = vst.msk [vmem:[#allocation6 + $0x20] sm:$0xff] %vm5687_vm14, %v5600_v58  ;;  %v5945_v55 = vld [vmem:[#allocation3 + $0x1b8] sm:$0xff]  ;;  %v5944_v58 = vld [vmem:[#allocation3 + $0x1b0] sm:$0xff] }
 0x746   : > { %5846 = vrot.lane.b32.xlu1 %v5751_v59, %s10490_s16  ;;  %5844 = vrot.lane.b32.xlu0 %v5750_v13, %s10490_s16  ;;  %s10501_s16 = smov 34  }
 0x748   : > { %v5606_v25 = vpop.permute.xlu1 %5605  ;;  %v5604_v37 = vpop.permute.xlu0 %5603 }
 0x749   : > { %5695 = vst.msk [vmem:[#allocation6 + $0x38] sm:$0xff] %vm5687_vm14, %v5606_v25  ;;  %5694 = vst.msk [vmem:[#allocation6 + $0x30] sm:$0xff] %vm5687_vm14, %v5604_v37 }
 0x74a   : > { %5980 = vrot.lane.b32.xlu1 %v5915_v28, %s10500_s27  ;;  %5978 = vrot.lane.b32.xlu0 %v5914_v5, %s10500_s27  ;;  %v6108_v28 = vld [vmem:[#allocation3 + $0x51] sm:$0xff]  ;;  %v6107_v5 = vld [vmem:[#allocation3 + $0x49] sm:$0xff] }
 0x74c   : > { %v5610_v38 = vpop.permute.xlu1 %5609  ;;  %v5608_v42 = vpop.permute.xlu0 %5607 }
 0x74d   : > { %5697 = vst.msk [vmem:[#allocation6 + $0x48] sm:$0xff] %vm5687_vm14, %v5610_v38  ;;  %5696 = vst.msk [vmem:[#allocation6 + $0x40] sm:$0xff] %vm5687_vm14, %v5608_v42 }
 0x74e   : > { %5984 = vrot.lane.b32.xlu1 %v5917_v40, %s10500_s27  ;;  %5982 = vrot.lane.b32.xlu0 %v5916_v14, %s10500_s27  ;;  %v6110_v40 = vld [vmem:[#allocation3 + $0x69] sm:$0xff]  ;;  %v6109_v14 = vld [vmem:[#allocation3 + $0x61] sm:$0xff] }
 0x750   : > { %v5614_v2 = vpop.permute.xlu1 %5613  ;;  %v5612_v35 = vpop.permute.xlu0 %5611 }
 0x751   : > { %5699 = vst.msk [vmem:[#allocation6 + $0x58] sm:$0xff] %vm5687_vm14, %v5614_v2  ;;  %5698 = vst.msk [vmem:[#allocation6 + $0x50] sm:$0xff] %vm5687_vm14, %v5612_v35 }
 0x752   : > { %5988 = vrot.lane.b32.xlu1 %v5919_v50, %s10500_s27  ;;  %5986 = vrot.lane.b32.xlu0 %v5918_v22, %s10500_s27  ;;  %v6112_v50 = vld [vmem:[#allocation3 + $0x81] sm:$0xff]  ;;  %v6111_v22 = vld [vmem:[#allocation3 + $0x79] sm:$0xff] }
 0x754   : > { %v5618_v26 = vpop.permute.xlu1 %5617  ;;  %v5616_v56 = vpop.permute.xlu0 %5615 }
 0x755   : > { %5701 = vst.msk [vmem:[#allocation6 + $0x68] sm:$0xff] %vm5687_vm14, %v5618_v26  ;;  %5700 = vst.msk [vmem:[#allocation6 + $0x60] sm:$0xff] %vm5687_vm14, %v5616_v56 }
 0x756   : > { %5992 = vrot.lane.b32.xlu1 %v5921_v15, %s10500_s27  ;;  %5990 = vrot.lane.b32.xlu0 %v5920_v36, %s10500_s27  ;;  %v6114_v15 = vld [vmem:[#allocation3 + $0x99] sm:$0xff]  ;;  %v6113_v36 = vld [vmem:[#allocation3 + $0x91] sm:$0xff] }
 0x758   : > { %v5622_v30 = vpop.permute.xlu1 %5621  ;;  %v5620_v34 = vpop.permute.xlu0 %5619 }
 0x759   : > { %5703 = vst.msk [vmem:[#allocation6 + $0x78] sm:$0xff] %vm5687_vm14, %v5622_v30  ;;  %5702 = vst.msk [vmem:[#allocation6 + $0x70] sm:$0xff] %vm5687_vm14, %v5620_v34 }
 0x75a   : > { %5996 = vrot.lane.b32.xlu1 %v5923_v20, %s10500_s27  ;;  %5994 = vrot.lane.b32.xlu0 %v5922_v45, %s10500_s27  ;;  %v6116_v20 = vld [vmem:[#allocation3 + $0xb1] sm:$0xff]  ;;  %v6115_v45 = vld [vmem:[#allocation3 + $0xa9] sm:$0xff] }
 0x75c   : > { %v5626_v39 = vpop.permute.xlu1 %5625  ;;  %v5624_v53 = vpop.permute.xlu0 %5623 }
 0x75d   : > { %5705 = vst.msk [vmem:[#allocation6 + $0x88] sm:$0xff] %vm5687_vm14, %v5626_v39  ;;  %5704 = vst.msk [vmem:[#allocation6 + $0x80] sm:$0xff] %vm5687_vm14, %v5624_v53 }
 0x75e   : > { %6000 = vrot.lane.b32.xlu1 %v5925_v48, %s10500_s27  ;;  %5998 = vrot.lane.b32.xlu0 %v5924_v6, %s10500_s27  ;;  %v6118_v48 = vld [vmem:[#allocation3 + $0xc9] sm:$0xff]  ;;  %v6117_v6 = vld [vmem:[#allocation3 + $0xc1] sm:$0xff] }
 0x760   : > { %v5630_v19 = vpop.permute.xlu1 %5629  ;;  %v5628_v63 = vpop.permute.xlu0 %5627 }
 0x761   : > { %5707 = vst.msk [vmem:[#allocation6 + $0x98] sm:$0xff] %vm5687_vm14, %v5630_v19  ;;  %5706 = vst.msk [vmem:[#allocation6 + $0x90] sm:$0xff] %vm5687_vm14, %v5628_v63 }
 0x762   : > { %6004 = vrot.lane.b32.xlu1 %v5927_v49, %s10500_s27  ;;  %6002 = vrot.lane.b32.xlu0 %v5926_v61, %s10500_s27  ;;  %v6120_v49 = vld [vmem:[#allocation3 + $0xe1] sm:$0xff]  ;;  %v6119_v61 = vld [vmem:[#allocation3 + $0xd9] sm:$0xff] }
 0x764   : > { %v5634_v0 = vpop.permute.xlu1 %5633  ;;  %v5632_v10 = vpop.permute.xlu0 %5631 }
 0x765   : > { %5709 = vst.msk [vmem:[#allocation6 + $0xa8] sm:$0xff] %vm5687_vm14, %v5634_v0  ;;  %5708 = vst.msk [vmem:[#allocation6 + $0xa0] sm:$0xff] %vm5687_vm14, %v5632_v10 }
 0x766   : > { %6008 = vrot.lane.b32.xlu1 %v5929_v17, %s10500_s27  ;;  %6006 = vrot.lane.b32.xlu0 %v5928_v54, %s10500_s27  ;;  %v6122_v17 = vld [vmem:[#allocation3 + $0xf9] sm:$0xff]  ;;  %v6121_v54 = vld [vmem:[#allocation3 + $0xf1] sm:$0xff] }
 0x768   : > { %v5638_v41 = vpop.permute.xlu1 %5637  ;;  %v5636_v44 = vpop.permute.xlu0 %5635 }
 0x769   : > { %5711 = vst.msk [vmem:[#allocation6 + $0xb8] sm:$0xff] %vm5687_vm14, %v5638_v41  ;;  %5710 = vst.msk [vmem:[#allocation6 + $0xb0] sm:$0xff] %vm5687_vm14, %v5636_v44 }
 0x76a   : > { %6012 = vrot.lane.b32.xlu1 %v5931_v3, %s10500_s27  ;;  %6010 = vrot.lane.b32.xlu0 %v5930_v1, %s10500_s27  ;;  %v6124_v3 = vld [vmem:[#allocation3 + $0x111] sm:$0xff]  ;;  %v6123_v1 = vld [vmem:[#allocation3 + $0x109] sm:$0xff] }
 0x76c   : > { %v5642_v62 = vpop.permute.xlu1 %5641  ;;  %v5640_v46 = vpop.permute.xlu0 %5639 }
 0x76d   : > { %5713 = vst.msk [vmem:[#allocation6 + $0xc8] sm:$0xff] %vm5687_vm14, %v5642_v62  ;;  %5712 = vst.msk [vmem:[#allocation6 + $0xc0] sm:$0xff] %vm5687_vm14, %v5640_v46 }
 0x76e   : > { %6016 = vrot.lane.b32.xlu1 %v5933_v8, %s10500_s27  ;;  %6014 = vrot.lane.b32.xlu0 %v5932_v43, %s10500_s27  ;;  %v6126_v8 = vld [vmem:[#allocation3 + $0x129] sm:$0xff]  ;;  %v6125_v43 = vld [vmem:[#allocation3 + $0x121] sm:$0xff] }
 0x770   : > { %v5646_v23 = vpop.permute.xlu1 %5645  ;;  %v5644_v52 = vpop.permute.xlu0 %5643 }
 0x771   : > { %5715 = vst.msk [vmem:[#allocation6 + $0xd8] sm:$0xff] %vm5687_vm14, %v5646_v23  ;;  %5714 = vst.msk [vmem:[#allocation6 + $0xd0] sm:$0xff] %vm5687_vm14, %v5644_v52 }
 0x772   : > { %6020 = vrot.lane.b32.xlu1 %v5935_v4, %s10500_s27  ;;  %6018 = vrot.lane.b32.xlu0 %v5934_v7, %s10500_s27  ;;  %v6128_v4 = vld [vmem:[#allocation3 + $0x141] sm:$0xff]  ;;  %v6127_v7 = vld [vmem:[#allocation3 + $0x139] sm:$0xff] }
 0x774   : > { %v5650_v16 = vpop.permute.xlu1 %5649  ;;  %v5648_v33 = vpop.permute.xlu0 %5647 }
 0x775   : > { %5717 = vst.msk [vmem:[#allocation6 + $0xe8] sm:$0xff] %vm5687_vm14, %v5650_v16  ;;  %5716 = vst.msk [vmem:[#allocation6 + $0xe0] sm:$0xff] %vm5687_vm14, %v5648_v33 }
 0x776   : > { %6024 = vrot.lane.b32.xlu1 %v5937_v27, %s10500_s27  ;;  %6022 = vrot.lane.b32.xlu0 %v5936_v51, %s10500_s27  ;;  %v6130_v27 = vld [vmem:[#allocation3 + $0x159] sm:$0xff]  ;;  %v6129_v51 = vld [vmem:[#allocation3 + $0x151] sm:$0xff] }
 0x778   : > { %v5654_v31 = vpop.permute.xlu1 %5653  ;;  %v5652_v57 = vpop.permute.xlu0 %5651 }
 0x779   : > { %5719 = vst.msk [vmem:[#allocation6 + $0xf8] sm:$0xff] %vm5687_vm14, %v5654_v31  ;;  %5718 = vst.msk [vmem:[#allocation6 + $0xf0] sm:$0xff] %vm5687_vm14, %v5652_v57  ;;  %vm7812_vm14 = vcmask 408960  }
 0x77a   : > { %6028 = vrot.lane.b32.xlu1 %v5939_v9, %s10500_s27  ;;  %6026 = vrot.lane.b32.xlu0 %v5938_v18, %s10500_s27  ;;  %v6132_v9 = vld [vmem:[#allocation3 + $0x171] sm:$0xff]  ;;  %v6131_v18 = vld [vmem:[#allocation3 + $0x169] sm:$0xff] }
 0x77c   : > { %v5787_v11 = vpop.permute.xlu1 %5786  ;;  %v5785_v24 = vpop.permute.xlu0 %5784 }
 0x77d   : > { %5882 = vst.msk [vmem:[#allocation6 + $0x8] sm:$0xff] %vm5880_vm15, %v5787_v11  ;;  %5881 = vst.msk [vmem:[#allocation6] sm:$0xff] %vm5880_vm15, %v5785_v24 }
 0x77e   : > { %6032 = vrot.lane.b32.xlu1 %v5941_v47, %s10500_s27  ;;  %6030 = vrot.lane.b32.xlu0 %v5940_v21, %s10500_s27  ;;  %v6134_v47 = vld [vmem:[#allocation3 + $0x189] sm:$0xff]  ;;  %v6133_v21 = vld [vmem:[#allocation3 + $0x181] sm:$0xff] }
 0x780   : > { %v5791_v12 = vpop.permute.xlu1 %5790  ;;  %v5789_v32 = vpop.permute.xlu0 %5788 }
 0x781   : > { %5884 = vst.msk [vmem:[#allocation6 + $0x18] sm:$0xff] %vm5880_vm15, %v5791_v12  ;;  %5883 = vst.msk [vmem:[#allocation6 + $0x10] sm:$0xff] %vm5880_vm15, %v5789_v32 }
 0x782   : > { %6036 = vrot.lane.b32.xlu1 %v5943_v60, %s10500_s27  ;;  %6034 = vrot.lane.b32.xlu0 %v5942_v29, %s10500_s27  ;;  %v6136_v60 = vld [vmem:[#allocation3 + $0x1a1] sm:$0xff]  ;;  %v6135_v29 = vld [vmem:[#allocation3 + $0x199] sm:$0xff] }
 0x784   : > { %v5795_v59 = vpop.permute.xlu1 %5794  ;;  %v5793_v13 = vpop.permute.xlu0 %5792 }
 0x785   : > { %5886 = vst.msk [vmem:[#allocation6 + $0x28] sm:$0xff] %vm5880_vm15, %v5795_v59  ;;  %5885 = vst.msk [vmem:[#allocation6 + $0x20] sm:$0xff] %vm5880_vm15, %v5793_v13 }
 0x786   : > { %6040 = vrot.lane.b32.xlu1 %v5945_v55, %s10500_s27  ;;  %6038 = vrot.lane.b32.xlu0 %v5944_v58, %s10500_s27  ;;  %v6138_v55 = vld [vmem:[#allocation3 + $0x1b9] sm:$0xff]  ;;  %v6137_v58 = vld [vmem:[#allocation3 + $0x1b1] sm:$0xff] }
 0x788   : > { %v5799_v25 = vpop.permute.xlu1 %5798  ;;  %v5797_v37 = vpop.permute.xlu0 %5796 }
 0x789   : > { %5888 = vst.msk [vmem:[#allocation6 + $0x38] sm:$0xff] %vm5880_vm15, %v5799_v25  ;;  %5887 = vst.msk [vmem:[#allocation6 + $0x30] sm:$0xff] %vm5880_vm15, %v5797_v37 }
 0x78a   : > { %6173 = vrot.lane.b32.xlu1 %v6108_v28, %s10491_s14  ;;  %6171 = vrot.lane.b32.xlu0 %v6107_v5, %s10491_s14  ;;  %v6301_v28 = vld [vmem:[#allocation3 + $0x52] sm:$0xff]  ;;  %v6300_v5 = vld [vmem:[#allocation3 + $0x4a] sm:$0xff] }
 0x78c   : > { %v5803_v38 = vpop.permute.xlu1 %5802  ;;  %v5801_v42 = vpop.permute.xlu0 %5800 }
 0x78d   : > { %5890 = vst.msk [vmem:[#allocation6 + $0x48] sm:$0xff] %vm5880_vm15, %v5803_v38  ;;  %5889 = vst.msk [vmem:[#allocation6 + $0x40] sm:$0xff] %vm5880_vm15, %v5801_v42 }
 0x78e   : > { %6177 = vrot.lane.b32.xlu1 %v6110_v40, %s10491_s14  ;;  %6175 = vrot.lane.b32.xlu0 %v6109_v14, %s10491_s14  ;;  %v6303_v40 = vld [vmem:[#allocation3 + $0x6a] sm:$0xff]  ;;  %v6302_v14 = vld [vmem:[#allocation3 + $0x62] sm:$0xff] }
 0x790   : > { %v5807_v2 = vpop.permute.xlu1 %5806  ;;  %v5805_v35 = vpop.permute.xlu0 %5804 }
 0x791   : > { %5892 = vst.msk [vmem:[#allocation6 + $0x58] sm:$0xff] %vm5880_vm15, %v5807_v2  ;;  %5891 = vst.msk [vmem:[#allocation6 + $0x50] sm:$0xff] %vm5880_vm15, %v5805_v35 }
 0x792   : > { %6181 = vrot.lane.b32.xlu1 %v6112_v50, %s10491_s14  ;;  %6179 = vrot.lane.b32.xlu0 %v6111_v22, %s10491_s14  ;;  %v6305_v50 = vld [vmem:[#allocation3 + $0x82] sm:$0xff]  ;;  %v6304_v22 = vld [vmem:[#allocation3 + $0x7a] sm:$0xff] }
 0x794   : > { %v5811_v26 = vpop.permute.xlu1 %5810  ;;  %v5809_v56 = vpop.permute.xlu0 %5808 }
 0x795   : > { %5894 = vst.msk [vmem:[#allocation6 + $0x68] sm:$0xff] %vm5880_vm15, %v5811_v26  ;;  %5893 = vst.msk [vmem:[#allocation6 + $0x60] sm:$0xff] %vm5880_vm15, %v5809_v56 }
 0x796   : > { %6185 = vrot.lane.b32.xlu1 %v6114_v15, %s10491_s14  ;;  %6183 = vrot.lane.b32.xlu0 %v6113_v36, %s10491_s14  ;;  %v6307_v15 = vld [vmem:[#allocation3 + $0x9a] sm:$0xff]  ;;  %v6306_v36 = vld [vmem:[#allocation3 + $0x92] sm:$0xff] }
 0x798   : > { %v5815_v30 = vpop.permute.xlu1 %5814  ;;  %v5813_v34 = vpop.permute.xlu0 %5812 }
 0x799   : > { %5896 = vst.msk [vmem:[#allocation6 + $0x78] sm:$0xff] %vm5880_vm15, %v5815_v30  ;;  %5895 = vst.msk [vmem:[#allocation6 + $0x70] sm:$0xff] %vm5880_vm15, %v5813_v34 }
 0x79a   : > { %6189 = vrot.lane.b32.xlu1 %v6116_v20, %s10491_s14  ;;  %6187 = vrot.lane.b32.xlu0 %v6115_v45, %s10491_s14  ;;  %v6309_v20 = vld [vmem:[#allocation3 + $0xb2] sm:$0xff]  ;;  %v6308_v45 = vld [vmem:[#allocation3 + $0xaa] sm:$0xff] }
 0x79c   : > { %v5819_v39 = vpop.permute.xlu1 %5818  ;;  %v5817_v53 = vpop.permute.xlu0 %5816 }
 0x79d   : > { %5898 = vst.msk [vmem:[#allocation6 + $0x88] sm:$0xff] %vm5880_vm15, %v5819_v39  ;;  %5897 = vst.msk [vmem:[#allocation6 + $0x80] sm:$0xff] %vm5880_vm15, %v5817_v53 }
 0x79e   : > { %6193 = vrot.lane.b32.xlu1 %v6118_v48, %s10491_s14  ;;  %6191 = vrot.lane.b32.xlu0 %v6117_v6, %s10491_s14  ;;  %v6311_v48 = vld [vmem:[#allocation3 + $0xca] sm:$0xff]  ;;  %v6310_v6 = vld [vmem:[#allocation3 + $0xc2] sm:$0xff] }
 0x7a0   : > { %v5823_v19 = vpop.permute.xlu1 %5822  ;;  %v5821_v63 = vpop.permute.xlu0 %5820 }
 0x7a1   : > { %5900 = vst.msk [vmem:[#allocation6 + $0x98] sm:$0xff] %vm5880_vm15, %v5823_v19  ;;  %5899 = vst.msk [vmem:[#allocation6 + $0x90] sm:$0xff] %vm5880_vm15, %v5821_v63 }
 0x7a2   : > { %6197 = vrot.lane.b32.xlu1 %v6120_v49, %s10491_s14  ;;  %6195 = vrot.lane.b32.xlu0 %v6119_v61, %s10491_s14  ;;  %v6313_v49 = vld [vmem:[#allocation3 + $0xe2] sm:$0xff]  ;;  %v6312_v61 = vld [vmem:[#allocation3 + $0xda] sm:$0xff] }
 0x7a4   : > { %v5827_v0 = vpop.permute.xlu1 %5826  ;;  %v5825_v10 = vpop.permute.xlu0 %5824 }
 0x7a5   : > { %5902 = vst.msk [vmem:[#allocation6 + $0xa8] sm:$0xff] %vm5880_vm15, %v5827_v0  ;;  %5901 = vst.msk [vmem:[#allocation6 + $0xa0] sm:$0xff] %vm5880_vm15, %v5825_v10 }
 0x7a6   : > { %6201 = vrot.lane.b32.xlu1 %v6122_v17, %s10491_s14  ;;  %6199 = vrot.lane.b32.xlu0 %v6121_v54, %s10491_s14  ;;  %v6315_v17 = vld [vmem:[#allocation3 + $0xfa] sm:$0xff]  ;;  %v6314_v54 = vld [vmem:[#allocation3 + $0xf2] sm:$0xff] }
 0x7a8   : > { %v5831_v41 = vpop.permute.xlu1 %5830  ;;  %v5829_v44 = vpop.permute.xlu0 %5828 }
 0x7a9   : > { %5904 = vst.msk [vmem:[#allocation6 + $0xb8] sm:$0xff] %vm5880_vm15, %v5831_v41  ;;  %5903 = vst.msk [vmem:[#allocation6 + $0xb0] sm:$0xff] %vm5880_vm15, %v5829_v44 }
 0x7aa   : > { %6205 = vrot.lane.b32.xlu1 %v6124_v3, %s10491_s14  ;;  %6203 = vrot.lane.b32.xlu0 %v6123_v1, %s10491_s14  ;;  %v6317_v3 = vld [vmem:[#allocation3 + $0x112] sm:$0xff]  ;;  %v6316_v1 = vld [vmem:[#allocation3 + $0x10a] sm:$0xff] }
 0x7ac   : > { %v5835_v62 = vpop.permute.xlu1 %5834  ;;  %v5833_v46 = vpop.permute.xlu0 %5832 }
 0x7ad   : > { %5906 = vst.msk [vmem:[#allocation6 + $0xc8] sm:$0xff] %vm5880_vm15, %v5835_v62  ;;  %5905 = vst.msk [vmem:[#allocation6 + $0xc0] sm:$0xff] %vm5880_vm15, %v5833_v46 }
 0x7ae   : > { %6209 = vrot.lane.b32.xlu1 %v6126_v8, %s10491_s14  ;;  %6207 = vrot.lane.b32.xlu0 %v6125_v43, %s10491_s14  ;;  %v6319_v8 = vld [vmem:[#allocation3 + $0x12a] sm:$0xff]  ;;  %v6318_v43 = vld [vmem:[#allocation3 + $0x122] sm:$0xff] }
 0x7b0   : > { %v5839_v23 = vpop.permute.xlu1 %5838  ;;  %v5837_v52 = vpop.permute.xlu0 %5836 }
 0x7b1   : > { %5908 = vst.msk [vmem:[#allocation6 + $0xd8] sm:$0xff] %vm5880_vm15, %v5839_v23  ;;  %5907 = vst.msk [vmem:[#allocation6 + $0xd0] sm:$0xff] %vm5880_vm15, %v5837_v52 }
 0x7b2   : > { %6213 = vrot.lane.b32.xlu1 %v6128_v4, %s10491_s14  ;;  %6211 = vrot.lane.b32.xlu0 %v6127_v7, %s10491_s14  ;;  %v6321_v4 = vld [vmem:[#allocation3 + $0x142] sm:$0xff]  ;;  %v6320_v7 = vld [vmem:[#allocation3 + $0x13a] sm:$0xff] }
 0x7b4   : > { %v5843_v16 = vpop.permute.xlu1 %5842  ;;  %v5841_v33 = vpop.permute.xlu0 %5840 }
 0x7b5   : > { %5910 = vst.msk [vmem:[#allocation6 + $0xe8] sm:$0xff] %vm5880_vm15, %v5843_v16  ;;  %5909 = vst.msk [vmem:[#allocation6 + $0xe0] sm:$0xff] %vm5880_vm15, %v5841_v33 }
 0x7b6   : > { %6217 = vrot.lane.b32.xlu1 %v6130_v27, %s10491_s14  ;;  %6215 = vrot.lane.b32.xlu0 %v6129_v51, %s10491_s14  ;;  %v6323_v27 = vld [vmem:[#allocation3 + $0x15a] sm:$0xff]  ;;  %v6322_v51 = vld [vmem:[#allocation3 + $0x152] sm:$0xff] }
 0x7b8   : > { %v5847_v31 = vpop.permute.xlu1 %5846  ;;  %v5845_v57 = vpop.permute.xlu0 %5844 }
 0x7b9   : > { %5912 = vst.msk [vmem:[#allocation6 + $0xf8] sm:$0xff] %vm5880_vm15, %v5847_v31  ;;  %5911 = vst.msk [vmem:[#allocation6 + $0xf0] sm:$0xff] %vm5880_vm15, %v5845_v57  ;;  %vm7891_vm15 = vcmask 408576  }
 0x7ba   : > { %6221 = vrot.lane.b32.xlu1 %v6132_v9, %s10491_s14  ;;  %6219 = vrot.lane.b32.xlu0 %v6131_v18, %s10491_s14  ;;  %v6325_v9 = vld [vmem:[#allocation3 + $0x172] sm:$0xff]  ;;  %v6324_v18 = vld [vmem:[#allocation3 + $0x16a] sm:$0xff] }
 0x7bc   : > { %v5981_v11 = vpop.permute.xlu1 %5980  ;;  %v5979_v24 = vpop.permute.xlu0 %5978 }
 0x7bd   : > { %6076 = vst.msk [vmem:[#allocation6 + $0x8] sm:$0xff] %vm6074_vm2, %v5981_v11  ;;  %6075 = vst.msk [vmem:[#allocation6] sm:$0xff] %vm6074_vm2, %v5979_v24 }
 0x7be   : > { %6225 = vrot.lane.b32.xlu1 %v6134_v47, %s10491_s14  ;;  %6223 = vrot.lane.b32.xlu0 %v6133_v21, %s10491_s14  ;;  %v6327_v47 = vld [vmem:[#allocation3 + $0x18a] sm:$0xff]  ;;  %v6326_v21 = vld [vmem:[#allocation3 + $0x182] sm:$0xff] }
 0x7c0   : > { %v5985_v12 = vpop.permute.xlu1 %5984  ;;  %v5983_v32 = vpop.permute.xlu0 %5982 }
 0x7c1   : > { %6078 = vst.msk [vmem:[#allocation6 + $0x18] sm:$0xff] %vm6074_vm2, %v5985_v12  ;;  %6077 = vst.msk [vmem:[#allocation6 + $0x10] sm:$0xff] %vm6074_vm2, %v5983_v32 }
 0x7c2   : > { %6229 = vrot.lane.b32.xlu1 %v6136_v60, %s10491_s14  ;;  %6227 = vrot.lane.b32.xlu0 %v6135_v29, %s10491_s14  ;;  %v6329_v60 = vld [vmem:[#allocation3 + $0x1a2] sm:$0xff]  ;;  %v6328_v29 = vld [vmem:[#allocation3 + $0x19a] sm:$0xff] }
 0x7c4   : > { %v5989_v59 = vpop.permute.xlu1 %5988  ;;  %v5987_v13 = vpop.permute.xlu0 %5986 }
 0x7c5   : > { %6080 = vst.msk [vmem:[#allocation6 + $0x28] sm:$0xff] %vm6074_vm2, %v5989_v59  ;;  %6079 = vst.msk [vmem:[#allocation6 + $0x20] sm:$0xff] %vm6074_vm2, %v5987_v13 }
 0x7c6   : > { %6233 = vrot.lane.b32.xlu1 %v6138_v55, %s10491_s14  ;;  %6231 = vrot.lane.b32.xlu0 %v6137_v58, %s10491_s14  ;;  %v6331_v55 = vld [vmem:[#allocation3 + $0x1ba] sm:$0xff]  ;;  %v6330_v58 = vld [vmem:[#allocation3 + $0x1b2] sm:$0xff]  ;;  %s10502_s14 = smov 36  }
 0x7c8   : > { %v5993_v25 = vpop.permute.xlu1 %5992  ;;  %v5991_v37 = vpop.permute.xlu0 %5990 }
 0x7c9   : > { %6082 = vst.msk [vmem:[#allocation6 + $0x38] sm:$0xff] %vm6074_vm2, %v5993_v25  ;;  %6081 = vst.msk [vmem:[#allocation6 + $0x30] sm:$0xff] %vm6074_vm2, %v5991_v37 }
 0x7ca   : > { %6366 = vrot.lane.b32.xlu1 %v6301_v28, %s10501_s16  ;;  %6364 = vrot.lane.b32.xlu0 %v6300_v5, %s10501_s16  ;;  %v6494_v28 = vld [vmem:[#allocation3 + $0x53] sm:$0xff]  ;;  %v6493_v5 = vld [vmem:[#allocation3 + $0x4b] sm:$0xff] }
 0x7cc   : > { %v5997_v38 = vpop.permute.xlu1 %5996  ;;  %v5995_v42 = vpop.permute.xlu0 %5994 }
 0x7cd   : > { %6084 = vst.msk [vmem:[#allocation6 + $0x48] sm:$0xff] %vm6074_vm2, %v5997_v38  ;;  %6083 = vst.msk [vmem:[#allocation6 + $0x40] sm:$0xff] %vm6074_vm2, %v5995_v42 }
 0x7ce   : > { %6370 = vrot.lane.b32.xlu1 %v6303_v40, %s10501_s16  ;;  %6368 = vrot.lane.b32.xlu0 %v6302_v14, %s10501_s16  ;;  %v6496_v40 = vld [vmem:[#allocation3 + $0x6b] sm:$0xff]  ;;  %v6495_v14 = vld [vmem:[#allocation3 + $0x63] sm:$0xff] }
 0x7d0   : > { %v6001_v2 = vpop.permute.xlu1 %6000  ;;  %v5999_v35 = vpop.permute.xlu0 %5998 }
 0x7d1   : > { %6086 = vst.msk [vmem:[#allocation6 + $0x58] sm:$0xff] %vm6074_vm2, %v6001_v2  ;;  %6085 = vst.msk [vmem:[#allocation6 + $0x50] sm:$0xff] %vm6074_vm2, %v5999_v35 }
 0x7d2   : > { %6374 = vrot.lane.b32.xlu1 %v6305_v50, %s10501_s16  ;;  %6372 = vrot.lane.b32.xlu0 %v6304_v22, %s10501_s16  ;;  %v6498_v50 = vld [vmem:[#allocation3 + $0x83] sm:$0xff]  ;;  %v6497_v22 = vld [vmem:[#allocation3 + $0x7b] sm:$0xff] }
 0x7d4   : > { %v6005_v26 = vpop.permute.xlu1 %6004  ;;  %v6003_v56 = vpop.permute.xlu0 %6002 }
 0x7d5   : > { %6088 = vst.msk [vmem:[#allocation6 + $0x68] sm:$0xff] %vm6074_vm2, %v6005_v26  ;;  %6087 = vst.msk [vmem:[#allocation6 + $0x60] sm:$0xff] %vm6074_vm2, %v6003_v56 }
 0x7d6   : > { %6378 = vrot.lane.b32.xlu1 %v6307_v15, %s10501_s16  ;;  %6376 = vrot.lane.b32.xlu0 %v6306_v36, %s10501_s16  ;;  %v6500_v15 = vld [vmem:[#allocation3 + $0x9b] sm:$0xff]  ;;  %v6499_v36 = vld [vmem:[#allocation3 + $0x93] sm:$0xff] }
 0x7d8   : > { %v6009_v30 = vpop.permute.xlu1 %6008  ;;  %v6007_v34 = vpop.permute.xlu0 %6006 }
 0x7d9   : > { %6090 = vst.msk [vmem:[#allocation6 + $0x78] sm:$0xff] %vm6074_vm2, %v6009_v30  ;;  %6089 = vst.msk [vmem:[#allocation6 + $0x70] sm:$0xff] %vm6074_vm2, %v6007_v34 }
 0x7da   : > { %6382 = vrot.lane.b32.xlu1 %v6309_v20, %s10501_s16  ;;  %6380 = vrot.lane.b32.xlu0 %v6308_v45, %s10501_s16  ;;  %v6502_v20 = vld [vmem:[#allocation3 + $0xb3] sm:$0xff]  ;;  %v6501_v45 = vld [vmem:[#allocation3 + $0xab] sm:$0xff] }
 0x7dc   : > { %v6013_v39 = vpop.permute.xlu1 %6012  ;;  %v6011_v53 = vpop.permute.xlu0 %6010 }
 0x7dd   : > { %6092 = vst.msk [vmem:[#allocation6 + $0x88] sm:$0xff] %vm6074_vm2, %v6013_v39  ;;  %6091 = vst.msk [vmem:[#allocation6 + $0x80] sm:$0xff] %vm6074_vm2, %v6011_v53 }
 0x7de   : > { %6386 = vrot.lane.b32.xlu1 %v6311_v48, %s10501_s16  ;;  %6384 = vrot.lane.b32.xlu0 %v6310_v6, %s10501_s16  ;;  %v6504_v48 = vld [vmem:[#allocation3 + $0xcb] sm:$0xff]  ;;  %v6503_v6 = vld [vmem:[#allocation3 + $0xc3] sm:$0xff] }
 0x7e0   : > { %v6017_v19 = vpop.permute.xlu1 %6016  ;;  %v6015_v63 = vpop.permute.xlu0 %6014 }
 0x7e1   : > { %6094 = vst.msk [vmem:[#allocation6 + $0x98] sm:$0xff] %vm6074_vm2, %v6017_v19  ;;  %6093 = vst.msk [vmem:[#allocation6 + $0x90] sm:$0xff] %vm6074_vm2, %v6015_v63 }
 0x7e2   : > { %6390 = vrot.lane.b32.xlu1 %v6313_v49, %s10501_s16  ;;  %6388 = vrot.lane.b32.xlu0 %v6312_v61, %s10501_s16  ;;  %v6506_v49 = vld [vmem:[#allocation3 + $0xe3] sm:$0xff]  ;;  %v6505_v61 = vld [vmem:[#allocation3 + $0xdb] sm:$0xff] }
 0x7e4   : > { %v6021_v0 = vpop.permute.xlu1 %6020  ;;  %v6019_v10 = vpop.permute.xlu0 %6018 }
 0x7e5   : > { %6096 = vst.msk [vmem:[#allocation6 + $0xa8] sm:$0xff] %vm6074_vm2, %v6021_v0  ;;  %6095 = vst.msk [vmem:[#allocation6 + $0xa0] sm:$0xff] %vm6074_vm2, %v6019_v10 }
 0x7e6   : > { %6394 = vrot.lane.b32.xlu1 %v6315_v17, %s10501_s16  ;;  %6392 = vrot.lane.b32.xlu0 %v6314_v54, %s10501_s16  ;;  %v6508_v17 = vld [vmem:[#allocation3 + $0xfb] sm:$0xff]  ;;  %v6507_v54 = vld [vmem:[#allocation3 + $0xf3] sm:$0xff] }
 0x7e8   : > { %v6025_v41 = vpop.permute.xlu1 %6024  ;;  %v6023_v44 = vpop.permute.xlu0 %6022 }
 0x7e9   : > { %6098 = vst.msk [vmem:[#allocation6 + $0xb8] sm:$0xff] %vm6074_vm2, %v6025_v41  ;;  %6097 = vst.msk [vmem:[#allocation6 + $0xb0] sm:$0xff] %vm6074_vm2, %v6023_v44 }
 0x7ea   : > { %6398 = vrot.lane.b32.xlu1 %v6317_v3, %s10501_s16  ;;  %6396 = vrot.lane.b32.xlu0 %v6316_v1, %s10501_s16  ;;  %v6510_v3 = vld [vmem:[#allocation3 + $0x113] sm:$0xff]  ;;  %v6509_v1 = vld [vmem:[#allocation3 + $0x10b] sm:$0xff] }
 0x7ec   : > { %v6029_v62 = vpop.permute.xlu1 %6028  ;;  %v6027_v46 = vpop.permute.xlu0 %6026 }
 0x7ed   : > { %6100 = vst.msk [vmem:[#allocation6 + $0xc8] sm:$0xff] %vm6074_vm2, %v6029_v62  ;;  %6099 = vst.msk [vmem:[#allocation6 + $0xc0] sm:$0xff] %vm6074_vm2, %v6027_v46 }
 0x7ee   : > { %6402 = vrot.lane.b32.xlu1 %v6319_v8, %s10501_s16  ;;  %6400 = vrot.lane.b32.xlu0 %v6318_v43, %s10501_s16  ;;  %v6512_v8 = vld [vmem:[#allocation3 + $0x12b] sm:$0xff]  ;;  %v6511_v43 = vld [vmem:[#allocation3 + $0x123] sm:$0xff] }
 0x7f0   : > { %v6033_v23 = vpop.permute.xlu1 %6032  ;;  %v6031_v52 = vpop.permute.xlu0 %6030 }
 0x7f1   : > { %6102 = vst.msk [vmem:[#allocation6 + $0xd8] sm:$0xff] %vm6074_vm2, %v6033_v23  ;;  %6101 = vst.msk [vmem:[#allocation6 + $0xd0] sm:$0xff] %vm6074_vm2, %v6031_v52 }
 0x7f2   : > { %6406 = vrot.lane.b32.xlu1 %v6321_v4, %s10501_s16  ;;  %6404 = vrot.lane.b32.xlu0 %v6320_v7, %s10501_s16  ;;  %v6514_v4 = vld [vmem:[#allocation3 + $0x143] sm:$0xff]  ;;  %v6513_v7 = vld [vmem:[#allocation3 + $0x13b] sm:$0xff] }
 0x7f4   : > { %v6037_v16 = vpop.permute.xlu1 %6036  ;;  %v6035_v33 = vpop.permute.xlu0 %6034 }
 0x7f5   : > { %6104 = vst.msk [vmem:[#allocation6 + $0xe8] sm:$0xff] %vm6074_vm2, %v6037_v16  ;;  %6103 = vst.msk [vmem:[#allocation6 + $0xe0] sm:$0xff] %vm6074_vm2, %v6035_v33 }
 0x7f6   : > { %6410 = vrot.lane.b32.xlu1 %v6323_v27, %s10501_s16  ;;  %6408 = vrot.lane.b32.xlu0 %v6322_v51, %s10501_s16  ;;  %v6516_v27 = vld [vmem:[#allocation3 + $0x15b] sm:$0xff]  ;;  %v6515_v51 = vld [vmem:[#allocation3 + $0x153] sm:$0xff] }
 0x7f8   : > { %v6041_v31 = vpop.permute.xlu1 %6040  ;;  %v6039_v57 = vpop.permute.xlu0 %6038 }
 0x7f9   : > { %6106 = vst.msk [vmem:[#allocation6 + $0xf8] sm:$0xff] %vm6074_vm2, %v6041_v31  ;;  %6105 = vst.msk [vmem:[#allocation6 + $0xf0] sm:$0xff] %vm6074_vm2, %v6039_v57 }
 0x7fa   : > { %6414 = vrot.lane.b32.xlu1 %v6325_v9, %s10501_s16  ;;  %6412 = vrot.lane.b32.xlu0 %v6324_v18, %s10501_s16  ;;  %v6518_v9 = vld [vmem:[#allocation3 + $0x173] sm:$0xff]  ;;  %v6517_v18 = vld [vmem:[#allocation3 + $0x16b] sm:$0xff] }
 0x7fc   : > { %v6174_v11 = vpop.permute.xlu1 %6173  ;;  %v6172_v24 = vpop.permute.xlu0 %6171 }
 0x7fd   : > { %6269 = vst.msk [vmem:[#allocation6 + $0x8] sm:$0xff] %vm6267_vm3, %v6174_v11  ;;  %6268 = vst.msk [vmem:[#allocation6] sm:$0xff] %vm6267_vm3, %v6172_v24 }
 0x7fe   : > { %6418 = vrot.lane.b32.xlu1 %v6327_v47, %s10501_s16  ;;  %6416 = vrot.lane.b32.xlu0 %v6326_v21, %s10501_s16  ;;  %v6520_v47 = vld [vmem:[#allocation3 + $0x18b] sm:$0xff]  ;;  %v6519_v21 = vld [vmem:[#allocation3 + $0x183] sm:$0xff] }
 0x800   : > { %v6178_v12 = vpop.permute.xlu1 %6177  ;;  %v6176_v32 = vpop.permute.xlu0 %6175 }
 0x801   : > { %6271 = vst.msk [vmem:[#allocation6 + $0x18] sm:$0xff] %vm6267_vm3, %v6178_v12  ;;  %6270 = vst.msk [vmem:[#allocation6 + $0x10] sm:$0xff] %vm6267_vm3, %v6176_v32 }
 0x802   : > { %6422 = vrot.lane.b32.xlu1 %v6329_v60, %s10501_s16  ;;  %6420 = vrot.lane.b32.xlu0 %v6328_v29, %s10501_s16  ;;  %v6522_v60 = vld [vmem:[#allocation3 + $0x1a3] sm:$0xff]  ;;  %v6521_v29 = vld [vmem:[#allocation3 + $0x19b] sm:$0xff] }
 0x804   : > { %v6182_v59 = vpop.permute.xlu1 %6181  ;;  %v6180_v13 = vpop.permute.xlu0 %6179 }
 0x805   : > { %6273 = vst.msk [vmem:[#allocation6 + $0x28] sm:$0xff] %vm6267_vm3, %v6182_v59  ;;  %6272 = vst.msk [vmem:[#allocation6 + $0x20] sm:$0xff] %vm6267_vm3, %v6180_v13 }
 0x806   : > { %6426 = vrot.lane.b32.xlu1 %v6331_v55, %s10501_s16  ;;  %6424 = vrot.lane.b32.xlu0 %v6330_v58, %s10501_s16  ;;  %v6524_v55 = vld [vmem:[#allocation3 + $0x1bb] sm:$0xff]  ;;  %v6523_v58 = vld [vmem:[#allocation3 + $0x1b3] sm:$0xff]  ;;  %s10506_s16 = smov 44  }
 0x808   : > { %v6186_v25 = vpop.permute.xlu1 %6185  ;;  %v6184_v37 = vpop.permute.xlu0 %6183 }
 0x809   : > { %6275 = vst.msk [vmem:[#allocation6 + $0x38] sm:$0xff] %vm6267_vm3, %v6186_v25  ;;  %6274 = vst.msk [vmem:[#allocation6 + $0x30] sm:$0xff] %vm6267_vm3, %v6184_v37 }
 0x80a   : > { %6559 = vrot.lane.b32.xlu1 %v6494_v28, %s10502_s14  ;;  %6557 = vrot.lane.b32.xlu0 %v6493_v5, %s10502_s14  ;;  %v6687_v28 = vld [vmem:[#allocation3 + $0x54] sm:$0xff]  ;;  %v6686_v5 = vld [vmem:[#allocation3 + $0x4c] sm:$0xff] }
 0x80c   : > { %v6190_v38 = vpop.permute.xlu1 %6189  ;;  %v6188_v42 = vpop.permute.xlu0 %6187 }
 0x80d   : > { %6277 = vst.msk [vmem:[#allocation6 + $0x48] sm:$0xff] %vm6267_vm3, %v6190_v38  ;;  %6276 = vst.msk [vmem:[#allocation6 + $0x40] sm:$0xff] %vm6267_vm3, %v6188_v42 }
 0x80e   : > { %6563 = vrot.lane.b32.xlu1 %v6496_v40, %s10502_s14  ;;  %6561 = vrot.lane.b32.xlu0 %v6495_v14, %s10502_s14  ;;  %v13495_v40 = vld [vmem:[#allocation3 + $0x6c] sm:$0xff]  ;;  %v13497_v14 = vld [vmem:[#allocation3 + $0x64] sm:$0xff] }
 0x810   : > { %v6194_v2 = vpop.permute.xlu1 %6193  ;;  %v6192_v35 = vpop.permute.xlu0 %6191 }
 0x811   : > { %6279 = vst.msk [vmem:[#allocation6 + $0x58] sm:$0xff] %vm6267_vm3, %v6194_v2  ;;  %6278 = vst.msk [vmem:[#allocation6 + $0x50] sm:$0xff] %vm6267_vm3, %v6192_v35 }
 0x812   : > { %6567 = vrot.lane.b32.xlu1 %v6498_v50, %s10502_s14  ;;  %6565 = vrot.lane.b32.xlu0 %v6497_v22, %s10502_s14  ;;  %v13505_v50 = vld [vmem:[#allocation3 + $0x84] sm:$0xff]  ;;  %v13507_v22 = vld [vmem:[#allocation3 + $0x7c] sm:$0xff] }
 0x814   : > { %v6198_v26 = vpop.permute.xlu1 %6197  ;;  %v6196_v56 = vpop.permute.xlu0 %6195 }
 0x815   : > { %6281 = vst.msk [vmem:[#allocation6 + $0x68] sm:$0xff] %vm6267_vm3, %v6198_v26  ;;  %6280 = vst.msk [vmem:[#allocation6 + $0x60] sm:$0xff] %vm6267_vm3, %v6196_v56 }
 0x816   : > { %6571 = vrot.lane.b32.xlu1 %v6500_v15, %s10502_s14  ;;  %6569 = vrot.lane.b32.xlu0 %v6499_v36, %s10502_s14  ;;  %v13515_v15 = vld [vmem:[#allocation3 + $0x9c] sm:$0xff]  ;;  %v13517_v36 = vld [vmem:[#allocation3 + $0x94] sm:$0xff] }
 0x818   : > { %v6202_v30 = vpop.permute.xlu1 %6201  ;;  %v6200_v34 = vpop.permute.xlu0 %6199 }
 0x819   : > { %6283 = vst.msk [vmem:[#allocation6 + $0x78] sm:$0xff] %vm6267_vm3, %v6202_v30  ;;  %6282 = vst.msk [vmem:[#allocation6 + $0x70] sm:$0xff] %vm6267_vm3, %v6200_v34 }
 0x81a   : > { %6575 = vrot.lane.b32.xlu1 %v6502_v20, %s10502_s14  ;;  %6573 = vrot.lane.b32.xlu0 %v6501_v45, %s10502_s14  ;;  %v13525_v20 = vld [vmem:[#allocation3 + $0xb4] sm:$0xff]  ;;  %v13527_v45 = vld [vmem:[#allocation3 + $0xac] sm:$0xff] }
 0x81c   : > { %v6206_v39 = vpop.permute.xlu1 %6205  ;;  %v6204_v53 = vpop.permute.xlu0 %6203 }
 0x81d   : > { %6285 = vst.msk [vmem:[#allocation6 + $0x88] sm:$0xff] %vm6267_vm3, %v6206_v39  ;;  %6284 = vst.msk [vmem:[#allocation6 + $0x80] sm:$0xff] %vm6267_vm3, %v6204_v53 }
 0x81e   : > { %6579 = vrot.lane.b32.xlu1 %v6504_v48, %s10502_s14  ;;  %6577 = vrot.lane.b32.xlu0 %v6503_v6, %s10502_s14  ;;  %v13535_v48 = vld [vmem:[#allocation3 + $0xcc] sm:$0xff]  ;;  %v13537_v6 = vld [vmem:[#allocation3 + $0xc4] sm:$0xff] }
 0x820   : > { %v6210_v19 = vpop.permute.xlu1 %6209  ;;  %v6208_v63 = vpop.permute.xlu0 %6207 }
 0x821   : > { %6287 = vst.msk [vmem:[#allocation6 + $0x98] sm:$0xff] %vm6267_vm3, %v6210_v19  ;;  %6286 = vst.msk [vmem:[#allocation6 + $0x90] sm:$0xff] %vm6267_vm3, %v6208_v63 }
 0x822   : > { %6583 = vrot.lane.b32.xlu1 %v6506_v49, %s10502_s14  ;;  %6581 = vrot.lane.b32.xlu0 %v6505_v61, %s10502_s14  ;;  %v13545_v49 = vld [vmem:[#allocation3 + $0xe4] sm:$0xff]  ;;  %v13547_v61 = vld [vmem:[#allocation3 + $0xdc] sm:$0xff] }
 0x824   : > { %v6214_v0 = vpop.permute.xlu1 %6213  ;;  %v6212_v10 = vpop.permute.xlu0 %6211 }
 0x825   : > { %6289 = vst.msk [vmem:[#allocation6 + $0xa8] sm:$0xff] %vm6267_vm3, %v6214_v0  ;;  %6288 = vst.msk [vmem:[#allocation6 + $0xa0] sm:$0xff] %vm6267_vm3, %v6212_v10 }
 0x826   : > { %6587 = vrot.lane.b32.xlu1 %v6508_v17, %s10502_s14  ;;  %6585 = vrot.lane.b32.xlu0 %v6507_v54, %s10502_s14  ;;  %v13555_v17 = vld [vmem:[#allocation3 + $0xfc] sm:$0xff]  ;;  %v13557_v54 = vld [vmem:[#allocation3 + $0xf4] sm:$0xff] }
 0x828   : > { %v6218_v41 = vpop.permute.xlu1 %6217  ;;  %v6216_v44 = vpop.permute.xlu0 %6215 }
 0x829   : > { %6291 = vst.msk [vmem:[#allocation6 + $0xb8] sm:$0xff] %vm6267_vm3, %v6218_v41  ;;  %6290 = vst.msk [vmem:[#allocation6 + $0xb0] sm:$0xff] %vm6267_vm3, %v6216_v44 }
 0x82a   : > { %6591 = vrot.lane.b32.xlu1 %v6510_v3, %s10502_s14  ;;  %6589 = vrot.lane.b32.xlu0 %v6509_v1, %s10502_s14  ;;  %v6703_v3 = vld [vmem:[#allocation3 + $0x114] sm:$0xff]  ;;  %v13565_v1 = vld [vmem:[#allocation3 + $0x10c] sm:$0xff] }
 0x82c   : > { %v6222_v62 = vpop.permute.xlu1 %6221  ;;  %v6220_v46 = vpop.permute.xlu0 %6219 }
 0x82d   : > { %6293 = vst.msk [vmem:[#allocation6 + $0xc8] sm:$0xff] %vm6267_vm3, %v6222_v62  ;;  %6292 = vst.msk [vmem:[#allocation6 + $0xc0] sm:$0xff] %vm6267_vm3, %v6220_v46 }
 0x82e   : > { %6595 = vrot.lane.b32.xlu1 %v6512_v8, %s10502_s14  ;;  %6593 = vrot.lane.b32.xlu0 %v6511_v43, %s10502_s14  ;;  %v6705_v8 = vld [vmem:[#allocation3 + $0x12c] sm:$0xff]  ;;  %v6704_v43 = vld [vmem:[#allocation3 + $0x124] sm:$0xff] }
 0x830   : > { %v6226_v23 = vpop.permute.xlu1 %6225  ;;  %v6224_v52 = vpop.permute.xlu0 %6223 }
 0x831   : > { %6295 = vst.msk [vmem:[#allocation6 + $0xd8] sm:$0xff] %vm6267_vm3, %v6226_v23  ;;  %6294 = vst.msk [vmem:[#allocation6 + $0xd0] sm:$0xff] %vm6267_vm3, %v6224_v52 }
 0x832   : > { %6599 = vrot.lane.b32.xlu1 %v6514_v4, %s10502_s14  ;;  %6597 = vrot.lane.b32.xlu0 %v6513_v7, %s10502_s14  ;;  %v6707_v4 = vld [vmem:[#allocation3 + $0x144] sm:$0xff]  ;;  %v6706_v7 = vld [vmem:[#allocation3 + $0x13c] sm:$0xff] }
 0x834   : > { %v6230_v16 = vpop.permute.xlu1 %6229  ;;  %v6228_v33 = vpop.permute.xlu0 %6227 }
 0x835   : > { %6297 = vst.msk [vmem:[#allocation6 + $0xe8] sm:$0xff] %vm6267_vm3, %v6230_v16  ;;  %6296 = vst.msk [vmem:[#allocation6 + $0xe0] sm:$0xff] %vm6267_vm3, %v6228_v33 }
 0x836   : > { %6603 = vrot.lane.b32.xlu1 %v6516_v27, %s10502_s14  ;;  %6601 = vrot.lane.b32.xlu0 %v6515_v51, %s10502_s14  ;;  %v6709_v27 = vld [vmem:[#allocation3 + $0x15c] sm:$0xff]  ;;  %v6708_v51 = vld [vmem:[#allocation3 + $0x154] sm:$0xff] }
 0x838   : > { %v6234_v31 = vpop.permute.xlu1 %6233  ;;  %v6232_v57 = vpop.permute.xlu0 %6231 }
 0x839   : > { %6299 = vst.msk [vmem:[#allocation6 + $0xf8] sm:$0xff] %vm6267_vm3, %v6234_v31  ;;  %6298 = vst.msk [vmem:[#allocation6 + $0xf0] sm:$0xff] %vm6267_vm3, %v6232_v57 }
 0x83a   : > { %6607 = vrot.lane.b32.xlu1 %v6518_v9, %s10502_s14  ;;  %6605 = vrot.lane.b32.xlu0 %v6517_v18, %s10502_s14  ;;  %v6711_v9 = vld [vmem:[#allocation3 + $0x174] sm:$0xff]  ;;  %v6710_v18 = vld [vmem:[#allocation3 + $0x16c] sm:$0xff] }
 0x83c   : > { %v6367_v11 = vpop.permute.xlu1 %6366  ;;  %v6365_v24 = vpop.permute.xlu0 %6364 }
 0x83d   : > { %6462 = vst.msk [vmem:[#allocation6 + $0x8] sm:$0xff] %vm6460_vm4, %v6367_v11  ;;  %6461 = vst.msk [vmem:[#allocation6] sm:$0xff] %vm6460_vm4, %v6365_v24 }
 0x83e   : > { %6611 = vrot.lane.b32.xlu1 %v6520_v47, %s10502_s14  ;;  %6609 = vrot.lane.b32.xlu0 %v6519_v21, %s10502_s14  ;;  %v6713_v47 = vld [vmem:[#allocation3 + $0x18c] sm:$0xff]  ;;  %v6712_v21 = vld [vmem:[#allocation3 + $0x184] sm:$0xff] }
 0x840   : > { %v6371_v12 = vpop.permute.xlu1 %6370  ;;  %v6369_v32 = vpop.permute.xlu0 %6368 }
 0x841   : > { %6464 = vst.msk [vmem:[#allocation6 + $0x18] sm:$0xff] %vm6460_vm4, %v6371_v12  ;;  %6463 = vst.msk [vmem:[#allocation6 + $0x10] sm:$0xff] %vm6460_vm4, %v6369_v32 }
 0x842   : > { %6615 = vrot.lane.b32.xlu1 %v6522_v60, %s10502_s14  ;;  %6613 = vrot.lane.b32.xlu0 %v6521_v29, %s10502_s14  ;;  %v6715_v60 = vld [vmem:[#allocation3 + $0x1a4] sm:$0xff]  ;;  %v6714_v29 = vld [vmem:[#allocation3 + $0x19c] sm:$0xff] }
 0x844   : > { %v6375_v59 = vpop.permute.xlu1 %6374  ;;  %v6373_v13 = vpop.permute.xlu0 %6372 }
 0x845   : > { %6466 = vst.msk [vmem:[#allocation6 + $0x28] sm:$0xff] %vm6460_vm4, %v6375_v59  ;;  %6465 = vst.msk [vmem:[#allocation6 + $0x20] sm:$0xff] %vm6460_vm4, %v6373_v13 }
 0x846   : > { %6619 = vrot.lane.b32.xlu1 %v6524_v55, %s10502_s14  ;;  %6617 = vrot.lane.b32.xlu0 %v6523_v58, %s10502_s14  ;;  %v6717_v55 = vld [vmem:[#allocation3 + $0x1bc] sm:$0xff]  ;;  %v6716_v58 = vld [vmem:[#allocation3 + $0x1b4] sm:$0xff] }
 0x848   : > { %v6379_v25 = vpop.permute.xlu1 %6378  ;;  %v6377_v37 = vpop.permute.xlu0 %6376 }
 0x849   : > { %6468 = vst.msk [vmem:[#allocation6 + $0x38] sm:$0xff] %vm6460_vm4, %v6379_v25  ;;  %6467 = vst.msk [vmem:[#allocation6 + $0x30] sm:$0xff] %vm6460_vm4, %v6377_v37 }
 0x84a   : > { %6752 = vrot.lane.b32.xlu1 %v6687_v28, %s10503_s17  ;;  %6750 = vrot.lane.b32.xlu0 %v6686_v5, %s10503_s17  ;;  %v6881_v28 = vld [vmem:[#allocation3 + $0x68] sm:$0xff]  ;;  %v6880_v5 = vld [vmem:[#allocation3 + $0x60] sm:$0xff] }
 0x84c   : > { %v6383_v38 = vpop.permute.xlu1 %6382  ;;  %v6381_v42 = vpop.permute.xlu0 %6380 }
 0x84d   : > { %6470 = vst.msk [vmem:[#allocation6 + $0x48] sm:$0xff] %vm6460_vm4, %v6383_v38  ;;  %6469 = vst.msk [vmem:[#allocation6 + $0x40] sm:$0xff] %vm6460_vm4, %v6381_v42 }
 0x84e   : > { %6756 = vrot.lane.b32.xlu1 %v13495_v40, %s10503_s17  ;;  %6754 = vrot.lane.b32.xlu0 %v13497_v14, %s10503_s17 }
 0x850   : > { %v6387_v2 = vpop.permute.xlu1 %6386  ;;  %v6385_v35 = vpop.permute.xlu0 %6384 }
 0x851   : > { %6472 = vst.msk [vmem:[#allocation6 + $0x58] sm:$0xff] %vm6460_vm4, %v6387_v2  ;;  %6471 = vst.msk [vmem:[#allocation6 + $0x50] sm:$0xff] %vm6460_vm4, %v6385_v35  ;;  %v6883_v2 = vld [vmem:[#allocation3 + $0x80] sm:$0xff]  ;;  %v6882_v35 = vld [vmem:[#allocation3 + $0x78] sm:$0xff] }
 0x852   : > { %6760 = vrot.lane.b32.xlu1 %v13505_v50, %s10503_s17  ;;  %6758 = vrot.lane.b32.xlu0 %v13507_v22, %s10503_s17 }
 0x854   : > { %v6391_v26 = vpop.permute.xlu1 %6390  ;;  %v6389_v56 = vpop.permute.xlu0 %6388 }
 0x855   : > { %6474 = vst.msk [vmem:[#allocation6 + $0x68] sm:$0xff] %vm6460_vm4, %v6391_v26  ;;  %6473 = vst.msk [vmem:[#allocation6 + $0x60] sm:$0xff] %vm6460_vm4, %v6389_v56 }
 0x856   : > { %6764 = vrot.lane.b32.xlu1 %v13515_v15, %s10503_s17  ;;  %6762 = vrot.lane.b32.xlu0 %v13517_v36, %s10503_s17 }
 0x858   : > { %v6395_v30 = vpop.permute.xlu1 %6394  ;;  %v6393_v34 = vpop.permute.xlu0 %6392 }
 0x859   : > { %6476 = vst.msk [vmem:[#allocation6 + $0x78] sm:$0xff] %vm6460_vm4, %v6395_v30  ;;  %6475 = vst.msk [vmem:[#allocation6 + $0x70] sm:$0xff] %vm6460_vm4, %v6393_v34  ;;  %v6885_v30 = vld [vmem:[#allocation3 + $0x98] sm:$0xff]  ;;  %v6884_v34 = vld [vmem:[#allocation3 + $0x90] sm:$0xff] }
 0x85a   : > { %6768 = vrot.lane.b32.xlu1 %v13525_v20, %s10503_s17  ;;  %6766 = vrot.lane.b32.xlu0 %v13527_v45, %s10503_s17 }
 0x85c   : > { %v6399_v39 = vpop.permute.xlu1 %6398  ;;  %v6397_v53 = vpop.permute.xlu0 %6396 }
 0x85d   : > { %6478 = vst.msk [vmem:[#allocation6 + $0x88] sm:$0xff] %vm6460_vm4, %v6399_v39  ;;  %6477 = vst.msk [vmem:[#allocation6 + $0x80] sm:$0xff] %vm6460_vm4, %v6397_v53 }
 0x85e   : > { %6772 = vrot.lane.b32.xlu1 %v13535_v48, %s10503_s17  ;;  %6770 = vrot.lane.b32.xlu0 %v13537_v6, %s10503_s17 }
 0x860   : > { %v6403_v19 = vpop.permute.xlu1 %6402  ;;  %v6401_v63 = vpop.permute.xlu0 %6400 }
 0x861   : > { %6480 = vst.msk [vmem:[#allocation6 + $0x98] sm:$0xff] %vm6460_vm4, %v6403_v19  ;;  %6479 = vst.msk [vmem:[#allocation6 + $0x90] sm:$0xff] %vm6460_vm4, %v6401_v63  ;;  %v6887_v19 = vld [vmem:[#allocation3 + $0xb0] sm:$0xff]  ;;  %v6886_v63 = vld [vmem:[#allocation3 + $0xa8] sm:$0xff] }
 0x862   : > { %6776 = vrot.lane.b32.xlu1 %v13545_v49, %s10503_s17  ;;  %6774 = vrot.lane.b32.xlu0 %v13547_v61, %s10503_s17 }
 0x864   : > { %v6407_v0 = vpop.permute.xlu1 %6406  ;;  %v6405_v10 = vpop.permute.xlu0 %6404 }
 0x865   : > { %6482 = vst.msk [vmem:[#allocation6 + $0xa8] sm:$0xff] %vm6460_vm4, %v6407_v0  ;;  %6481 = vst.msk [vmem:[#allocation6 + $0xa0] sm:$0xff] %vm6460_vm4, %v6405_v10 }
 0x866   : > { %6780 = vrot.lane.b32.xlu1 %v13555_v17, %s10503_s17  ;;  %6778 = vrot.lane.b32.xlu0 %v13557_v54, %s10503_s17 }
 0x868   : > { %v6411_v41 = vpop.permute.xlu1 %6410  ;;  %v6409_v44 = vpop.permute.xlu0 %6408 }
 0x869   : > { %6484 = vst.msk [vmem:[#allocation6 + $0xb8] sm:$0xff] %vm6460_vm4, %v6411_v41  ;;  %6483 = vst.msk [vmem:[#allocation6 + $0xb0] sm:$0xff] %vm6460_vm4, %v6409_v44  ;;  %v6889_v41 = vld [vmem:[#allocation3 + $0xc8] sm:$0xff]  ;;  %v6888_v44 = vld [vmem:[#allocation3 + $0xc0] sm:$0xff] }
 0x86a   : > { %6784 = vrot.lane.b32.xlu1 %v6703_v3, %s10503_s17  ;;  %6782 = vrot.lane.b32.xlu0 %v13565_v1, %s10503_s17 }
 0x86c   : > { %v6415_v62 = vpop.permute.xlu1 %6414  ;;  %v6413_v46 = vpop.permute.xlu0 %6412 }
 0x86d   : > { %6486 = vst.msk [vmem:[#allocation6 + $0xc8] sm:$0xff] %vm6460_vm4, %v6415_v62  ;;  %6485 = vst.msk [vmem:[#allocation6 + $0xc0] sm:$0xff] %vm6460_vm4, %v6413_v46  ;;  %v6891_v46 = vld [vmem:[#allocation3 + $0xe0] sm:$0xff] }
 0x86e   : > { %6788 = vrot.lane.b32.xlu1 %v6705_v8, %s10503_s17  ;;  %6786 = vrot.lane.b32.xlu0 %v6704_v43, %s10503_s17  ;;  %v6890_v8 = vld [vmem:[#allocation3 + $0xd8] sm:$0xff] }
 0x870   : > { %v6419_v23 = vpop.permute.xlu1 %6418  ;;  %v6417_v52 = vpop.permute.xlu0 %6416 }
 0x871   : > { %6488 = vst.msk [vmem:[#allocation6 + $0xd8] sm:$0xff] %vm6460_vm4, %v6419_v23  ;;  %6487 = vst.msk [vmem:[#allocation6 + $0xd0] sm:$0xff] %vm6460_vm4, %v6417_v52  ;;  %v6893_v52 = vld [vmem:[#allocation3 + $0xf8] sm:$0xff] }
 0x872   : > { %6792 = vrot.lane.b32.xlu1 %v6707_v4, %s10503_s17  ;;  %6790 = vrot.lane.b32.xlu0 %v6706_v7, %s10503_s17  ;;  %v6892_v4 = vld [vmem:[#allocation3 + $0xf0] sm:$0xff] }
 0x874   : > { %v6423_v16 = vpop.permute.xlu1 %6422  ;;  %v6421_v33 = vpop.permute.xlu0 %6420 }
 0x875   : > { %6490 = vst.msk [vmem:[#allocation6 + $0xe8] sm:$0xff] %vm6460_vm4, %v6423_v16  ;;  %6489 = vst.msk [vmem:[#allocation6 + $0xe0] sm:$0xff] %vm6460_vm4, %v6421_v33  ;;  %v6895_v33 = vld [vmem:[#allocation3 + $0x110] sm:$0xff] }
 0x876   : > { %6796 = vrot.lane.b32.xlu1 %v6709_v27, %s10503_s17  ;;  %6794 = vrot.lane.b32.xlu0 %v6708_v51, %s10503_s17  ;;  %v6894_v27 = vld [vmem:[#allocation3 + $0x108] sm:$0xff] }
 0x878   : > { %v6427_v31 = vpop.permute.xlu1 %6426  ;;  %v6425_v57 = vpop.permute.xlu0 %6424 }
 0x879   : > { %6492 = vst.msk [vmem:[#allocation6 + $0xf8] sm:$0xff] %vm6460_vm4, %v6427_v31  ;;  %6491 = vst.msk [vmem:[#allocation6 + $0xf0] sm:$0xff] %vm6460_vm4, %v6425_v57  ;;  %v6897_v57 = vld [vmem:[#allocation3 + $0x128] sm:$0xff] }
 0x87a   : > { %6800 = vrot.lane.b32.xlu1 %v6711_v9, %s10503_s17  ;;  %6798 = vrot.lane.b32.xlu0 %v6710_v18, %s10503_s17  ;;  %v6896_v9 = vld [vmem:[#allocation3 + $0x120] sm:$0xff] }
 0x87c   : > { %v6560_v11 = vpop.permute.xlu1 %6559  ;;  %v6558_v24 = vpop.permute.xlu0 %6557 }
 0x87d   : > { %6655 = vst.msk [vmem:[#allocation6 + $0x8] sm:$0xff] %vm6653_vm7, %v6560_v11  ;;  %6654 = vst.msk [vmem:[#allocation6] sm:$0xff] %vm6653_vm7, %v6558_v24  ;;  %v6899_v24 = vld [vmem:[#allocation3 + $0x140] sm:$0xff] }
 0x87e   : > { %6804 = vrot.lane.b32.xlu1 %v6713_v47, %s10503_s17  ;;  %6802 = vrot.lane.b32.xlu0 %v6712_v21, %s10503_s17  ;;  %v6898_v47 = vld [vmem:[#allocation3 + $0x138] sm:$0xff] }
 0x880   : > { %v6564_v12 = vpop.permute.xlu1 %6563  ;;  %v6562_v32 = vpop.permute.xlu0 %6561 }
 0x881   : > { %6657 = vst.msk [vmem:[#allocation6 + $0x18] sm:$0xff] %vm6653_vm7, %v6564_v12  ;;  %6656 = vst.msk [vmem:[#allocation6 + $0x10] sm:$0xff] %vm6653_vm7, %v6562_v32  ;;  %v6901_v32 = vld [vmem:[#allocation3 + $0x158] sm:$0xff] }
 0x882   : > { %6808 = vrot.lane.b32.xlu1 %v6715_v60, %s10503_s17  ;;  %6806 = vrot.lane.b32.xlu0 %v6714_v29, %s10503_s17  ;;  %v6900_v60 = vld [vmem:[#allocation3 + $0x150] sm:$0xff] }
 0x884   : > { %v6568_v59 = vpop.permute.xlu1 %6567  ;;  %v6566_v13 = vpop.permute.xlu0 %6565 }
 0x885   : > { %6659 = vst.msk [vmem:[#allocation6 + $0x28] sm:$0xff] %vm6653_vm7, %v6568_v59  ;;  %6658 = vst.msk [vmem:[#allocation6 + $0x20] sm:$0xff] %vm6653_vm7, %v6566_v13  ;;  %v6902_v59 = vld [vmem:[#allocation3 + $0x168] sm:$0xff] }
 0x886   : > { %6812 = vrot.lane.b32.xlu1 %v6717_v55, %s10503_s17  ;;  %6810 = vrot.lane.b32.xlu0 %v6716_v58, %s10503_s17  ;;  %v6903_v58 = vld [vmem:[#allocation3 + $0x170] sm:$0xff] }
 0x888   : > { %v6572_v25 = vpop.permute.xlu1 %6571  ;;  %v6570_v37 = vpop.permute.xlu0 %6569 }
 0x889   : > { %6661 = vst.msk [vmem:[#allocation6 + $0x38] sm:$0xff] %vm6653_vm7, %v6572_v25  ;;  %6660 = vst.msk [vmem:[#allocation6 + $0x30] sm:$0xff] %vm6653_vm7, %v6570_v37  ;;  %v6905_v37 = vld [vmem:[#allocation3 + $0x188] sm:$0xff] }
 0x88a   : > { %6946 = vrot.lane.b32.xlu1 %v6881_v28, %s10504_s21  ;;  %6944 = vrot.lane.b32.xlu0 %v6880_v5, %s10504_s21  ;;  %v6904_v28 = vld [vmem:[#allocation3 + $0x180] sm:$0xff] }
 0x88c   : > { %v6576_v38 = vpop.permute.xlu1 %6575  ;;  %v6574_v42 = vpop.permute.xlu0 %6573 }
 0x88d   : > { %6663 = vst.msk [vmem:[#allocation6 + $0x48] sm:$0xff] %vm6653_vm7, %v6576_v38  ;;  %6662 = vst.msk [vmem:[#allocation6 + $0x40] sm:$0xff] %vm6653_vm7, %v6574_v42  ;;  %v6907_v42 = vld [vmem:[#allocation3 + $0x1a0] sm:$0xff] }
 0x88e   : > { %6950 = vrot.lane.b32.xlu1 %v6883_v2, %s10504_s21  ;;  %6948 = vrot.lane.b32.xlu0 %v6882_v35, %s10504_s21  ;;  %v6906_v2 = vld [vmem:[#allocation3 + $0x198] sm:$0xff] }
 0x88f   : > { %v6909_v35 = vld [vmem:[#allocation3 + $0x1b8] sm:$0xff] }
 0x890   : > { %v6580_v26 = vpop.permute.xlu1 %6579  ;;  %v6578_v56 = vpop.permute.xlu0 %6577 }
 0x891   : > { %6665 = vst.msk [vmem:[#allocation6 + $0x58] sm:$0xff] %vm6653_vm7, %v6580_v26  ;;  %6664 = vst.msk [vmem:[#allocation6 + $0x50] sm:$0xff] %vm6653_vm7, %v6578_v56  ;;  %v6908_v26 = vld [vmem:[#allocation3 + $0x1b0] sm:$0xff] }
 0x892   : > { %6954 = vrot.lane.b32.xlu1 %v6885_v30, %s10504_s21  ;;  %6952 = vrot.lane.b32.xlu0 %v6884_v34, %s10504_s21  ;;  %v6911_v34 = vld [vmem:[#allocation3 + $0x1d0] sm:$0xff] }
 0x894   : > { %v6584_v39 = vpop.permute.xlu1 %6583  ;;  %v6582_v53 = vpop.permute.xlu0 %6581 }
 0x895   : > { %6667 = vst.msk [vmem:[#allocation6 + $0x68] sm:$0xff] %vm6653_vm7, %v6584_v39  ;;  %6666 = vst.msk [vmem:[#allocation6 + $0x60] sm:$0xff] %vm6653_vm7, %v6582_v53  ;;  %v6910_v39 = vld [vmem:[#allocation3 + $0x1c8] sm:$0xff] }
 0x896   : > { %6958 = vrot.lane.b32.xlu1 %v6887_v19, %s10504_s21  ;;  %6956 = vrot.lane.b32.xlu0 %v6886_v63, %s10504_s21 }
 0x898   : > { %v6588_v0 = vpop.permute.xlu1 %6587  ;;  %v6586_v10 = vpop.permute.xlu0 %6585 }
 0x899   : > { %6669 = vst.msk [vmem:[#allocation6 + $0x78] sm:$0xff] %vm6653_vm7, %v6588_v0  ;;  %6668 = vst.msk [vmem:[#allocation6 + $0x70] sm:$0xff] %vm6653_vm7, %v6586_v10  ;;  %v7074_v10 = vld [vmem:[#allocation3 + $0x69] sm:$0xff] }
 0x89a   : > { %6962 = vrot.lane.b32.xlu1 %v6889_v41, %s10504_s21  ;;  %6960 = vrot.lane.b32.xlu0 %v6888_v44, %s10504_s21  ;;  %v7073_v41 = vld [vmem:[#allocation3 + $0x61] sm:$0xff] }
 0x89c   : > { %v6592_v3 = vpop.permute.xlu1 %6591  ;;  %v6590_v62 = vpop.permute.xlu0 %6589 }
 0x89d   : > { %6671 = vst.msk [vmem:[#allocation6 + $0x88] sm:$0xff] %vm6653_vm7, %v6592_v3  ;;  %6670 = vst.msk [vmem:[#allocation6 + $0x80] sm:$0xff] %vm6653_vm7, %v6590_v62  ;;  %v7076_v62 = vld [vmem:[#allocation3 + $0x81] sm:$0xff] }
 0x89e   : > { %6966 = vrot.lane.b32.xlu1 %v6891_v46, %s10504_s21  ;;  %6964 = vrot.lane.b32.xlu0 %v6890_v8, %s10504_s21  ;;  %v7075_v46 = vld [vmem:[#allocation3 + $0x79] sm:$0xff] }
 0x8a0   : > { %v6596_v43 = vpop.permute.xlu1 %6595  ;;  %v6594_v23 = vpop.permute.xlu0 %6593 }
 0x8a1   : > { %6673 = vst.msk [vmem:[#allocation6 + $0x98] sm:$0xff] %vm6653_vm7, %v6596_v43  ;;  %6672 = vst.msk [vmem:[#allocation6 + $0x90] sm:$0xff] %vm6653_vm7, %v6594_v23  ;;  %v7078_v23 = vld [vmem:[#allocation3 + $0x99] sm:$0xff] }
 0x8a2   : > { %6970 = vrot.lane.b32.xlu1 %v6893_v52, %s10504_s21  ;;  %6968 = vrot.lane.b32.xlu0 %v6892_v4, %s10504_s21  ;;  %v7077_v52 = vld [vmem:[#allocation3 + $0x91] sm:$0xff] }
 0x8a4   : > { %v6600_v7 = vpop.permute.xlu1 %6599  ;;  %v6598_v16 = vpop.permute.xlu0 %6597 }
 0x8a5   : > { %6675 = vst.msk [vmem:[#allocation6 + $0xa8] sm:$0xff] %vm6653_vm7, %v6600_v7  ;;  %6674 = vst.msk [vmem:[#allocation6 + $0xa0] sm:$0xff] %vm6653_vm7, %v6598_v16  ;;  %v7080_v16 = vld [vmem:[#allocation3 + $0xb1] sm:$0xff] }
 0x8a6   : > { %6974 = vrot.lane.b32.xlu1 %v6895_v33, %s10504_s21  ;;  %6972 = vrot.lane.b32.xlu0 %v6894_v27, %s10504_s21  ;;  %v7079_v33 = vld [vmem:[#allocation3 + $0xa9] sm:$0xff] }
 0x8a8   : > { %v6604_v51 = vpop.permute.xlu1 %6603  ;;  %v6602_v31 = vpop.permute.xlu0 %6601 }
 0x8a9   : > { %6677 = vst.msk [vmem:[#allocation6 + $0xb8] sm:$0xff] %vm6653_vm7, %v6604_v51  ;;  %6676 = vst.msk [vmem:[#allocation6 + $0xb0] sm:$0xff] %vm6653_vm7, %v6602_v31  ;;  %v7082_v31 = vld [vmem:[#allocation3 + $0xc9] sm:$0xff] }
 0x8aa   : > { %6978 = vrot.lane.b32.xlu1 %v6897_v57, %s10504_s21  ;;  %6976 = vrot.lane.b32.xlu0 %v6896_v9, %s10504_s21  ;;  %v7081_v57 = vld [vmem:[#allocation3 + $0xc1] sm:$0xff] }
 0x8ac   : > { %v6608_v18 = vpop.permute.xlu1 %6607  ;;  %v6606_v11 = vpop.permute.xlu0 %6605 }
 0x8ad   : > { %6679 = vst.msk [vmem:[#allocation6 + $0xc8] sm:$0xff] %vm6653_vm7, %v6608_v18  ;;  %6678 = vst.msk [vmem:[#allocation6 + $0xc0] sm:$0xff] %vm6653_vm7, %v6606_v11  ;;  %v7084_v11 = vld [vmem:[#allocation3 + $0xe1] sm:$0xff] }
 0x8ae   : > { %6982 = vrot.lane.b32.xlu1 %v6899_v24, %s10504_s21  ;;  %6980 = vrot.lane.b32.xlu0 %v6898_v47, %s10504_s21  ;;  %v7083_v24 = vld [vmem:[#allocation3 + $0xd9] sm:$0xff] }
 0x8b0   : > { %v6612_v21 = vpop.permute.xlu1 %6611  ;;  %v6610_v12 = vpop.permute.xlu0 %6609 }
 0x8b1   : > { %6681 = vst.msk [vmem:[#allocation6 + $0xd8] sm:$0xff] %vm6653_vm7, %v6612_v21  ;;  %6680 = vst.msk [vmem:[#allocation6 + $0xd0] sm:$0xff] %vm6653_vm7, %v6610_v12  ;;  %v7086_v12 = vld [vmem:[#allocation3 + $0xf9] sm:$0xff] }
 0x8b2   : > { %6986 = vrot.lane.b32.xlu1 %v6901_v32, %s10504_s21  ;;  %6984 = vrot.lane.b32.xlu0 %v6900_v60, %s10504_s21  ;;  %v7085_v32 = vld [vmem:[#allocation3 + $0xf1] sm:$0xff] }
 0x8b4   : > { %v6616_v29 = vpop.permute.xlu1 %6615  ;;  %v6614_v55 = vpop.permute.xlu0 %6613 }
 0x8b5   : > { %6683 = vst.msk [vmem:[#allocation6 + $0xe8] sm:$0xff] %vm6653_vm7, %v6616_v29  ;;  %6682 = vst.msk [vmem:[#allocation6 + $0xe0] sm:$0xff] %vm6653_vm7, %v6614_v55  ;;  %v7088_v55 = vld [vmem:[#allocation3 + $0x111] sm:$0xff] }
 0x8b6   : > { %6990 = vrot.lane.b32.xlu1 %v6903_v58, %s10504_s21  ;;  %6988 = vrot.lane.b32.xlu0 %v6902_v59, %s10504_s21  ;;  %v7087_v58 = vld [vmem:[#allocation3 + $0x109] sm:$0xff] }
 0x8b8   : > { %v6620_v13 = vpop.permute.xlu1 %6619  ;;  %v6618_v25 = vpop.permute.xlu0 %6617 }
 0x8b9   : > { %6685 = vst.msk [vmem:[#allocation6 + $0xf8] sm:$0xff] %vm6653_vm7, %v6620_v13  ;;  %6684 = vst.msk [vmem:[#allocation6 + $0xf0] sm:$0xff] %vm6653_vm7, %v6618_v25  ;;  %v7090_v25 = vld [vmem:[#allocation3 + $0x129] sm:$0xff] }
 0x8ba   : > { %6994 = vrot.lane.b32.xlu1 %v6905_v37, %s10504_s21  ;;  %6992 = vrot.lane.b32.xlu0 %v6904_v28, %s10504_s21  ;;  %v7089_v37 = vld [vmem:[#allocation3 + $0x121] sm:$0xff] }
 0x8bc   : > { %v6753_v5 = vpop.permute.xlu1 %6752  ;;  %v6751_v38 = vpop.permute.xlu0 %6750 }
 0x8bd   : > { %6848 = vst.msk [vmem:[#allocation6 + $0x8] sm:$0xff] %vm6846_vm8, %v6753_v5  ;;  %6847 = vst.msk [vmem:[#allocation6] sm:$0xff] %vm6846_vm8, %v6751_v38  ;;  %v7092_v38 = vld [vmem:[#allocation3 + $0x141] sm:$0xff] }
 0x8be   : > { %6998 = vrot.lane.b32.xlu1 %v6907_v42, %s10504_s21  ;;  %6996 = vrot.lane.b32.xlu0 %v6906_v2, %s10504_s21  ;;  %v7091_v42 = vld [vmem:[#allocation3 + $0x139] sm:$0xff] }
 0x8c0   : > { %v6757_v56 = vpop.permute.xlu1 %6756  ;;  %v6755_v30 = vpop.permute.xlu0 %6754 }
 0x8c1   : > { %6850 = vst.msk [vmem:[#allocation6 + $0x18] sm:$0xff] %vm6846_vm8, %v6757_v56  ;;  %6849 = vst.msk [vmem:[#allocation6 + $0x10] sm:$0xff] %vm6846_vm8, %v6755_v30  ;;  %v7093_v56 = vld [vmem:[#allocation3 + $0x151] sm:$0xff] }
 0x8c2   : > { %7002 = vrot.lane.b32.xlu1 %v6909_v35, %s10504_s21  ;;  %7000 = vrot.lane.b32.xlu0 %v6908_v26, %s10504_s21  ;;  %v7094_v26 = vld [vmem:[#allocation3 + $0x159] sm:$0xff] }
 0x8c4   : > { %v6761_v53 = vpop.permute.xlu1 %6760  ;;  %v6759_v19 = vpop.permute.xlu0 %6758 }
 0x8c5   : > { %6852 = vst.msk [vmem:[#allocation6 + $0x28] sm:$0xff] %vm6846_vm8, %v6761_v53  ;;  %6851 = vst.msk [vmem:[#allocation6 + $0x20] sm:$0xff] %vm6846_vm8, %v6759_v19  ;;  %v7095_v53 = vld [vmem:[#allocation3 + $0x169] sm:$0xff] }
 0x8c6   : > { %7006 = vrot.lane.b32.xlu1 %v6911_v34, %s10504_s21  ;;  %7004 = vrot.lane.b32.xlu0 %v6910_v39, %s10504_s21  ;;  %v7096_v39 = vld [vmem:[#allocation3 + $0x171] sm:$0xff]  ;;  %s10507_s21 = smov 46  }
 0x8c8   : > { %v6765_v63 = vpop.permute.xlu1 %6764  ;;  %v6763_v0 = vpop.permute.xlu0 %6762 }
 0x8c9   : > { %6854 = vst.msk [vmem:[#allocation6 + $0x38] sm:$0xff] %vm6846_vm8, %v6765_v63  ;;  %6853 = vst.msk [vmem:[#allocation6 + $0x30] sm:$0xff] %vm6846_vm8, %v6763_v0  ;;  %v7098_v0 = vld [vmem:[#allocation3 + $0x189] sm:$0xff] }
 0x8ca   : > { %7139 = vrot.lane.b32.xlu1 %v7074_v10, %s10505_s23  ;;  %7137 = vrot.lane.b32.xlu0 %v7073_v41, %s10505_s23  ;;  %v7097_v10 = vld [vmem:[#allocation3 + $0x181] sm:$0xff] }
 0x8cb   : > { %v7883_v41 = vld [vmem:[%s14926_s5 + $0x30] sm:$0x3] }
 0x8cc   : > { %v6769_v44 = vpop.permute.xlu1 %6768  ;;  %v6767_v3 = vpop.permute.xlu0 %6766  ;;  %10234 = vmatprep.subr.msk.mxu0 %vm7988_vm10, %v7883_v41 }
 0x8cd   : > { %6856 = vst.msk [vmem:[#allocation6 + $0x48] sm:$0xff] %vm6846_vm8, %v6769_v44  ;;  %6855 = vst.msk [vmem:[#allocation6 + $0x40] sm:$0xff] %vm6846_vm8, %v6767_v3  ;;  %10235 = vmatpush3.msk.msra.mxu0 %vm7988_vm10, %v7883_v41 }
 0x8ce   : > { %7143 = vrot.lane.b32.xlu1 %v7076_v62, %s10505_s23  ;;  %7141 = vrot.lane.b32.xlu0 %v7075_v46, %s10505_s23  ;;  %v7100_v62 = vld [vmem:[#allocation3 + $0x1a1] sm:$0xff]  ;;  %v7099_v46 = vld [vmem:[#allocation3 + $0x199] sm:$0xff] }
 0x8d0   : > { %v6773_v8 = vpop.permute.xlu1 %6772  ;;  %v6771_v43 = vpop.permute.xlu0 %6770 }
 0x8d1   : > { %6858 = vst.msk [vmem:[#allocation6 + $0x58] sm:$0xff] %vm6846_vm8, %v6773_v8  ;;  %6857 = vst.msk [vmem:[#allocation6 + $0x50] sm:$0xff] %vm6846_vm8, %v6771_v43  ;;  %v7882_v8 = vld [vmem:[%s14926_s5 + $0x28] sm:$0xff]  ;;  %v7881_v43 = vld [vmem:[%s14926_s5 + $0x20] sm:$0xff] }
 0x8d2   : > { %7147 = vrot.lane.b32.xlu1 %v7078_v23, %s10505_s23  ;;  %7145 = vrot.lane.b32.xlu0 %v7077_v52, %s10505_s23  ;;  %v7101_v23 = vld [vmem:[#allocation3 + $0x1b1] sm:$0xff] }
 0x8d3   : > { %10236 = vmatprep.subr.mxu0 %v7882_v8 }
 0x8d4   : > { %v6777_v4 = vpop.permute.xlu1 %6776  ;;  %v6775_v7 = vpop.permute.xlu0 %6774  ;;  %10237 = vmatpush3.msra.mxu0 %v7882_v8  ;;  %v7468_v8 = vld [vmem:[#allocation3 + $0xcb] sm:$0xff] }
 0x8d5   : > { %6860 = vst.msk [vmem:[#allocation6 + $0x68] sm:$0xff] %vm6846_vm8, %v6777_v4  ;;  %6859 = vst.msk [vmem:[#allocation6 + $0x60] sm:$0xff] %vm6846_vm8, %v6775_v7  ;;  %v7266_v7 = vld [vmem:[#allocation3 + $0x62] sm:$0xff]  ;;  %10238 = vmatprep.subr.mxu0 %v7881_v43 }
 0x8d6   : > { %7151 = vrot.lane.b32.xlu1 %v7080_v16, %s10505_s23  ;;  %7149 = vrot.lane.b32.xlu0 %v7079_v33, %s10505_s23  ;;  %v7880_v16 = vld [vmem:[%s14926_s5 + $0x18] sm:$0xff] }
 0x8d7   : > { %10239 = vmatpush3.msra.mxu0 %v7881_v43 }
 0x8d8   : > { %v6781_v27 = vpop.permute.xlu1 %6780  ;;  %v6779_v51 = vpop.permute.xlu0 %6778  ;;  %10240 = vmatprep.subr.mxu0 %v7880_v16 }
 0x8d9   : > { %6862 = vst.msk [vmem:[#allocation6 + $0x78] sm:$0xff] %vm6846_vm8, %v6781_v27  ;;  %6861 = vst.msk [vmem:[#allocation6 + $0x70] sm:$0xff] %vm6846_vm8, %v6779_v51  ;;  %v7879_v51 = vld [vmem:[%s14926_s5 + $0x10] sm:$0xff]  ;;  %10241 = vmatpush3.msra.mxu0 %v7880_v16 }
 0x8da   : > { %7155 = vrot.lane.b32.xlu1 %v7082_v31, %s10505_s23  ;;  %7153 = vrot.lane.b32.xlu0 %v7081_v57, %s10505_s23  ;;  %v7267_v31 = vld [vmem:[#allocation3 + $0x6a] sm:$0xff] }
 0x8db   : > { %v10416_v57 = vld [vmem:[#allocation3 + $0x63] sm:$0xff]  ;;  %10242 = vmatprep.subr.mxu0 %v7879_v51 }
 0x8dc   : > { %v6785_v9 = vpop.permute.xlu1 %6784  ;;  %v6783_v18 = vpop.permute.xlu0 %6782  ;;  %10243 = vmatpush3.msra.mxu0 %v7879_v51 }
 0x8dd   : > { %6864 = vst.msk [vmem:[#allocation6 + $0x88] sm:$0xff] %vm6846_vm8, %v6785_v9  ;;  %6863 = vst.msk [vmem:[#allocation6 + $0x80] sm:$0xff] %vm6846_vm8, %v6783_v18  ;;  %v7878_v9 = vld [vmem:[%s14926_s5 + $0x8] sm:$0xff] }
 0x8de   : > { %7159 = vrot.lane.b32.xlu1 %v7084_v11, %s10505_s23  ;;  %7157 = vrot.lane.b32.xlu0 %v7083_v24, %s10505_s23  ;;  %v7460_v24 = vld [vmem:[#allocation3 + $0x6b] sm:$0xff] }
 0x8df   : > { %10244 = vmatprep.subr.mxu0 %v7878_v9 }
 0x8e0   : > { %v6789_v47 = vpop.permute.xlu1 %6788  ;;  %v6787_v21 = vpop.permute.xlu0 %6786  ;;  %10245 = vmatpush3.msra.mxu0 %v7878_v9 }
 0x8e1   : > { %6866 = vst.msk [vmem:[#allocation6 + $0x98] sm:$0xff] %vm6846_vm8, %v6789_v47  ;;  %6865 = vst.msk [vmem:[#allocation6 + $0x90] sm:$0xff] %vm6846_vm8, %v6787_v21  ;;  %v7877_v47 = vld [vmem:[%s14926_s5] sm:$0xff] }
 0x8e2   : > { %7163 = vrot.lane.b32.xlu1 %v7086_v12, %s10505_s23  ;;  %7161 = vrot.lane.b32.xlu0 %v7085_v32, %s10505_s23  ;;  %v7268_v32 = vld [vmem:[#allocation3 + $0x7a] sm:$0xff] }
 0x8e3   : > { %10246 = vmatprep.subr.mxu0 %v7877_v47 }
 0x8e4   : > { %v6793_v60 = vpop.permute.xlu1 %6792  ;;  %v6791_v29 = vpop.permute.xlu0 %6790  ;;  %10247 = vmatpush3.msra.mxu0 %v7877_v47  ;;  %v7472_v47 = vld [vmem:[#allocation3 + $0xfb] sm:$0xff] }
 0x8e5   : > { %6868 = vst.msk [vmem:[#allocation6 + $0xa8] sm:$0xff] %vm6846_vm8, %v6793_v60  ;;  %6867 = vst.msk [vmem:[#allocation6 + $0xa0] sm:$0xff] %vm6846_vm8, %v6791_v29 }
 0x8e6   : > { %7167 = vrot.lane.b32.xlu1 %v7088_v55, %s10505_s23  ;;  %7165 = vrot.lane.b32.xlu0 %v7087_v58, %s10505_s23  ;;  %v7269_v55 = vld [vmem:[#allocation3 + $0x82] sm:$0xff] }
 0x8e8   : > { %v6797_v59 = vpop.permute.xlu1 %6796  ;;  %v6795_v13 = vpop.permute.xlu0 %6794 }
 0x8e9   : > { %6870 = vst.msk [vmem:[#allocation6 + $0xb8] sm:$0xff] %vm6846_vm8, %v6797_v59  ;;  %6869 = vst.msk [vmem:[#allocation6 + $0xb0] sm:$0xff] %vm6846_vm8, %v6795_v13  ;;  %v7462_v13 = vld [vmem:[#allocation3 + $0x83] sm:$0xff] }
 0x8ea   : > { %7171 = vrot.lane.b32.xlu1 %v7090_v25, %s10505_s23  ;;  %7169 = vrot.lane.b32.xlu0 %v7089_v37, %s10505_s23  ;;  %v7270_v37 = vld [vmem:[#allocation3 + $0x92] sm:$0xff] }
 0x8ec   : > { %v6801_v28 = vpop.permute.xlu1 %6800  ;;  %v6799_v5 = vpop.permute.xlu0 %6798 }
 0x8ed   : > { %6872 = vst.msk [vmem:[#allocation6 + $0xc8] sm:$0xff] %vm6846_vm8, %v6801_v28  ;;  %6871 = vst.msk [vmem:[#allocation6 + $0xc0] sm:$0xff] %vm6846_vm8, %v6799_v5 }
 0x8ee   : > { %7175 = vrot.lane.b32.xlu1 %v7092_v38, %s10505_s23  ;;  %7173 = vrot.lane.b32.xlu0 %v7091_v42, %s10505_s23  ;;  %v7271_v38 = vld [vmem:[#allocation3 + $0x9a] sm:$0xff] }
 0x8f0   : > { %v6805_v2 = vpop.permute.xlu1 %6804  ;;  %v6803_v35 = vpop.permute.xlu0 %6802 }
 0x8f1   : > { %6874 = vst.msk [vmem:[#allocation6 + $0xd8] sm:$0xff] %vm6846_vm8, %v6805_v2  ;;  %6873 = vst.msk [vmem:[#allocation6 + $0xd0] sm:$0xff] %vm6846_vm8, %v6803_v35  ;;  %v7464_v35 = vld [vmem:[#allocation3 + $0x9b] sm:$0xff] }
 0x8f2   : > { %7179 = vrot.lane.b32.xlu1 %v7094_v26, %s10505_s23  ;;  %7177 = vrot.lane.b32.xlu0 %v7093_v56, %s10505_s23  ;;  %v7272_v56 = vld [vmem:[#allocation3 + $0xaa] sm:$0xff] }
 0x8f4   : > { %v6809_v30 = vpop.permute.xlu1 %6808  ;;  %v6807_v34 = vpop.permute.xlu0 %6806 }
 0x8f5   : > { %6876 = vst.msk [vmem:[#allocation6 + $0xe8] sm:$0xff] %vm6846_vm8, %v6809_v30  ;;  %6875 = vst.msk [vmem:[#allocation6 + $0xe0] sm:$0xff] %vm6846_vm8, %v6807_v34 }
 0x8f6   : > { %7183 = vrot.lane.b32.xlu1 %v7096_v39, %s10505_s23  ;;  %7181 = vrot.lane.b32.xlu0 %v7095_v53, %s10505_s23  ;;  %v7273_v39 = vld [vmem:[#allocation3 + $0xb2] sm:$0xff] }
 0x8f8   : > { %v6813_v19 = vpop.permute.xlu1 %6812  ;;  %v6811_v63 = vpop.permute.xlu0 %6810 }
 0x8f9   : > { %6878 = vst.msk [vmem:[#allocation6 + $0xf8] sm:$0xff] %vm6846_vm8, %v6813_v19  ;;  %6877 = vst.msk [vmem:[#allocation6 + $0xf0] sm:$0xff] %vm6846_vm8, %v6811_v63  ;;  %v7466_v63 = vld [vmem:[#allocation3 + $0xb3] sm:$0xff] }
 0x8fa   : > { %7187 = vrot.lane.b32.xlu1 %v7098_v0, %s10505_s23  ;;  %7185 = vrot.lane.b32.xlu0 %v7097_v10, %s10505_s23  ;;  %v7274_v10 = vld [vmem:[#allocation3 + $0xc2] sm:$0xff] }
 0x8fc   : > { %v6947_v44 = vpop.permute.xlu1 %6946  ;;  %v6945_v3 = vpop.permute.xlu0 %6944 }
 0x8fd   : > { %7042 = vst.msk [vmem:[#allocation6 + $0x8] sm:$0xff] %vm7040_vm9, %v6947_v44  ;;  %7041 = vst.msk [vmem:[#allocation6] sm:$0xff] %vm7040_vm9, %v6945_v3  ;;  %v7275_v3 = vld [vmem:[#allocation3 + $0xca] sm:$0xff] }
 0x8fe   : > { %7191 = vrot.lane.b32.xlu1 %v7100_v62, %s10505_s23  ;;  %7189 = vrot.lane.b32.xlu0 %v7099_v46, %s10505_s23 }
 0x900   : > { %v6951_v52 = vpop.permute.xlu1 %6950  ;;  %v6949_v4 = vpop.permute.xlu0 %6948 }
 0x901   : > { %7044 = vst.msk [vmem:[#allocation6 + $0x18] sm:$0xff] %vm7040_vm9, %v6951_v52  ;;  %7043 = vst.msk [vmem:[#allocation6 + $0x10] sm:$0xff] %vm7040_vm9, %v6949_v4 }
 0x902   : > { %7330 = vrot.lane.b32.xlu1 %v7266_v7, %s10506_s16  ;;  %7193 = vrot.lane.b32.xlu0 %v7101_v23, %s10505_s23  ;;  %v7276_v23 = vld [vmem:[#allocation3 + $0xda] sm:$0xff]  ;;  %v7277_v7 = vld [vmem:[#allocation3 + $0xe2] sm:$0xff] }
 0x904   : > { %v6955_v33 = vpop.permute.xlu1 %6954  ;;  %v6953_v27 = vpop.permute.xlu0 %6952 }
 0x905   : > { %7046 = vst.msk [vmem:[#allocation6 + $0x28] sm:$0xff] %vm7040_vm9, %v6955_v33  ;;  %7045 = vst.msk [vmem:[#allocation6 + $0x20] sm:$0xff] %vm7040_vm9, %v6953_v27  ;;  %v7470_v27 = vld [vmem:[#allocation3 + $0xe3] sm:$0xff] }
 0x906   : > { %7523 = vrot.lane.b32.xlu1 %v10416_v57, %s10507_s21  ;;  %7332 = vrot.lane.b32.xlu0 %v7267_v31, %s10506_s16  ;;  %v7278_v31 = vld [vmem:[#allocation3 + $0xf2] sm:$0xff] }
 0x908   : > { %v6959_v18 = vpop.permute.xlu1 %6958  ;;  %v6957_v11 = vpop.permute.xlu0 %6956 }
 0x909   : > { %7048 = vst.msk [vmem:[#allocation6 + $0x38] sm:$0xff] %vm7040_vm9, %v6959_v18  ;;  %7047 = vst.msk [vmem:[#allocation6 + $0x30] sm:$0xff] %vm7040_vm9, %v6957_v11  ;;  %v7279_v18 = vld [vmem:[#allocation3 + $0xfa] sm:$0xff] }
 0x90a   : > { %7716 = vrot.lane.b32.xlu1 %v13497_v14, %s10508_s29  ;;  %7525 = vrot.lane.b32.xlu0 %v7460_v24, %s10507_s21  ;;  %v7461_v14 = vld [vmem:[#allocation3 + $0x7b] sm:$0xff] }
 0x90c   : > { %v6963_v21 = vpop.permute.xlu1 %6962  ;;  %v6961_v12 = vpop.permute.xlu0 %6960 }
 0x90d   : > { %7050 = vst.msk [vmem:[#allocation6 + $0x48] sm:$0xff] %vm7040_vm9, %v6963_v21  ;;  %7049 = vst.msk [vmem:[#allocation6 + $0x40] sm:$0xff] %vm7040_vm9, %v6961_v12  ;;  %v7280_v12 = vld [vmem:[#allocation3 + $0x10a] sm:$0xff] }
 0x90e   : > { %7334 = vrot.lane.b32.xlu1 %v7268_v32, %s10506_s16  ;;  %7718 = vrot.lane.b32.xlu0 %v13495_v40, %s10508_s29  ;;  %v13838_v32 = vpop.f32.mrf.mxu1 }
 0x910   : > { %v6967_v60 = vpop.permute.xlu1 %6966  ;;  %v6965_v29 = vpop.permute.xlu0 %6964 }
 0x911   : > { %7052 = vst.msk [vmem:[#allocation6 + $0x58] sm:$0xff] %vm7040_vm9, %v6967_v60  ;;  %7051 = vst.msk [vmem:[#allocation6 + $0x50] sm:$0xff] %vm7040_vm9, %v6965_v29 }
 0x912   : > { %7527 = vrot.lane.b32.xlu1 %v7461_v14, %s10507_s21  ;;  %7336 = vrot.lane.b32.xlu0 %v7269_v55, %s10506_s16  ;;  %v7281_v14 = vld [vmem:[#allocation3 + $0x112] sm:$0xff]  ;;  %v13845_v55 = vpop.f32.mrf.mxu1 }
 0x914   : > { %v6971_v58 = vpop.permute.xlu1 %6970  ;;  %v6969_v59 = vpop.permute.xlu0 %6968 }
 0x915   : > { %7054 = vst.msk [vmem:[#allocation6 + $0x68] sm:$0xff] %vm7040_vm9, %v6971_v58  ;;  %7053 = vst.msk [vmem:[#allocation6 + $0x60] sm:$0xff] %vm7040_vm9, %v6969_v59 }
 0x916   : > { %7720 = vrot.lane.b32.xlu1 %v13507_v22, %s10508_s29  ;;  %7529 = vrot.lane.b32.xlu0 %v7462_v13, %s10507_s21  ;;  %v7463_v22 = vld [vmem:[#allocation3 + $0x93] sm:$0xff]  ;;  %v13851_v13 = vpop.f32.mrf.mxu1 }
 0x918   : > { %v6975_v40 = vpop.permute.xlu1 %6974  ;;  %v6973_v25 = vpop.permute.xlu0 %6972 }
 0x919   : > { %7056 = vst.msk [vmem:[#allocation6 + $0x78] sm:$0xff] %vm7040_vm9, %v6975_v40  ;;  %7055 = vst.msk [vmem:[#allocation6 + $0x70] sm:$0xff] %vm7040_vm9, %v6973_v25 }
 0x91a   : > { %7338 = vrot.lane.b32.xlu1 %v7270_v37, %s10506_s16  ;;  %7722 = vrot.lane.b32.xlu0 %v13505_v50, %s10508_s29  ;;  %v7282_v37 = vld [vmem:[#allocation3 + $0x122] sm:$0xff] }
 0x91c   : > { %v6979_v28 = vpop.permute.xlu1 %6978  ;;  %v6977_v5 = vpop.permute.xlu0 %6976 }
 0x91d   : > { %7058 = vst.msk [vmem:[#allocation6 + $0x88] sm:$0xff] %vm7040_vm9, %v6979_v28  ;;  %7057 = vst.msk [vmem:[#allocation6 + $0x80] sm:$0xff] %vm7040_vm9, %v6977_v5  ;;  %v13858_v28 = vpop.f32.mrf.mxu1  ;;  %v10417_v5 = vld [vmem:[#allocation3 + $0x114] sm:$0xff] }
 0x91e   : > { %7531 = vrot.lane.b32.xlu1 %v7463_v22, %s10507_s21  ;;  %7340 = vrot.lane.b32.xlu0 %v7271_v38, %s10506_s16 }
 0x920   : > { %v6983_v42 = vpop.permute.xlu1 %6982  ;;  %v6981_v2 = vpop.permute.xlu0 %6980 }
 0x921   : > { %7060 = vst.msk [vmem:[#allocation6 + $0x98] sm:$0xff] %vm7040_vm9, %v6983_v42  ;;  %7059 = vst.msk [vmem:[#allocation6 + $0x90] sm:$0xff] %vm7040_vm9, %v6981_v2  ;;  %v7283_v42 = vld [vmem:[#allocation3 + $0x12a] sm:$0xff]  ;;  %v13864_v2 = vpop.f32.mrf.mxu1 }
 0x922   : > { %7724 = vrot.lane.b32.xlu1 %v13517_v36, %s10508_s29  ;;  %7533 = vrot.lane.b32.xlu0 %v7464_v35, %s10507_s21  ;;  %v7465_v36 = vld [vmem:[#allocation3 + $0xab] sm:$0xff] }
 0x924   : > { %v6987_v50 = vpop.permute.xlu1 %6986  ;;  %v6985_v26 = vpop.permute.xlu0 %6984 }
 0x925   : > { %7062 = vst.msk [vmem:[#allocation6 + $0xa8] sm:$0xff] %vm7040_vm9, %v6987_v50  ;;  %7061 = vst.msk [vmem:[#allocation6 + $0xa0] sm:$0xff] %vm7040_vm9, %v6985_v26  ;;  %v7476_v26 = vld [vmem:[#allocation3 + $0x12b] sm:$0xff] }
 0x926   : > { %7342 = vrot.lane.b32.xlu1 %v7272_v56, %s10506_s16  ;;  %7726 = vrot.lane.b32.xlu0 %v13515_v15, %s10508_s29  ;;  %v13870_v56 = vpop.f32.mrf.mxu1 }
 0x928   : > { %v6991_v30 = vpop.permute.xlu1 %6990  ;;  %v6989_v34 = vpop.permute.xlu0 %6988 }
 0x929   : > { %7064 = vst.msk [vmem:[#allocation6 + $0xb8] sm:$0xff] %vm7040_vm9, %v6991_v30  ;;  %7063 = vst.msk [vmem:[#allocation6 + $0xb0] sm:$0xff] %vm7040_vm9, %v6989_v34  ;;  %v10418_v30 = vld [vmem:[#allocation3 + $0x124] sm:$0xff] }
 0x92a   : > { %7535 = vrot.lane.b32.xlu1 %v7465_v36, %s10507_s21  ;;  %7344 = vrot.lane.b32.xlu0 %v7273_v39, %s10506_s16  ;;  %v7284_v39 = vld [vmem:[#allocation3 + $0x13a] sm:$0xff] }
 0x92c   : > { %v6995_v53 = vpop.permute.xlu1 %6994  ;;  %v6993_v19 = vpop.permute.xlu0 %6992 }
 0x92d   : > { %7066 = vst.msk [vmem:[#allocation6 + $0xc8] sm:$0xff] %vm7040_vm9, %v6995_v53  ;;  %7065 = vst.msk [vmem:[#allocation6 + $0xc0] sm:$0xff] %vm7040_vm9, %v6993_v19  ;;  %v7669_v53 = vld [vmem:[#allocation3 + $0x12c] sm:$0xff]  ;;  %v13876_v19 = vpop.f32.mrf.mxu1 }
 0x92e   : > { %7728 = vrot.lane.b32.xlu1 %v13527_v45, %s10508_s29  ;;  %7537 = vrot.lane.b32.xlu0 %v7466_v63, %s10507_s21  ;;  %v7467_v45 = vld [vmem:[#allocation3 + $0xc3] sm:$0xff] }
 0x930   : > { %v6999_v15 = vpop.permute.xlu1 %6998  ;;  %v6997_v0 = vpop.permute.xlu0 %6996 }
 0x931   : > { %7068 = vst.msk [vmem:[#allocation6 + $0xd8] sm:$0xff] %vm7040_vm9, %v6999_v15  ;;  %7067 = vst.msk [vmem:[#allocation6 + $0xd0] sm:$0xff] %vm7040_vm9, %v6997_v0  ;;  %v7477_v0 = vld [vmem:[#allocation3 + $0x13b] sm:$0xff] }
 0x932   : > { %7346 = vrot.lane.b32.xlu1 %v7274_v10, %s10506_s16  ;;  %7730 = vrot.lane.b32.xlu0 %v13525_v20, %s10508_s29  ;;  %v7285_v10 = vld [vmem:[#allocation3 + $0x142] sm:$0xff] }
 0x934   : > { %v7003_v41 = vpop.permute.xlu1 %7002  ;;  %v7001_v44 = vpop.permute.xlu0 %7000 }
 0x935   : > { %7070 = vst.msk [vmem:[#allocation6 + $0xe8] sm:$0xff] %vm7040_vm9, %v7003_v41  ;;  %7069 = vst.msk [vmem:[#allocation6 + $0xe0] sm:$0xff] %vm7040_vm9, %v7001_v44  ;;  %v13882_v41 = vpop.f32.mrf.mxu1 }
 0x936   : > { %7539 = vrot.lane.b32.xlu1 %v7467_v45, %s10507_s21  ;;  %7348 = vrot.lane.b32.xlu0 %v7275_v3, %s10506_s16  ;;  %v7670_v3 = vld [vmem:[#allocation3 + $0x13c] sm:$0xff] }
 0x938   : > { %v7007_v62 = vpop.permute.xlu1 %7006  ;;  %v7005_v46 = vpop.permute.xlu0 %7004 }
 0x939   : > { %7072 = vst.msk [vmem:[#allocation6 + $0xf8] sm:$0xff] %vm7040_vm9, %v7007_v62  ;;  %7071 = vst.msk [vmem:[#allocation6 + $0xf0] sm:$0xff] %vm7040_vm9, %v7005_v46  ;;  %v7478_v62 = vld [vmem:[#allocation3 + $0x143] sm:$0xff]  ;;  %v13888_v46 = vpop.f32.mrf.mxu1 }
 0x93a   : > { %7732 = vrot.lane.b32.xlu1 %v13537_v6, %s10508_s29  ;;  %7541 = vrot.lane.b32.xlu0 %v7468_v8, %s10507_s21  ;;  %v7469_v6 = vld [vmem:[#allocation3 + $0xdb] sm:$0xff] }
 0x93c   : > { %v7140_v20 = vpop.permute.xlu1 %7139  ;;  %v7138_v43 = vpop.permute.xlu0 %7137 }
 0x93d   : > { %7235 = vst.msk [vmem:[#allocation6 + $0x8] sm:$0xff] %vm7233_vm11, %v7140_v20  ;;  %7234 = vst.msk [vmem:[#allocation6] sm:$0xff] %vm7233_vm11, %v7138_v43  ;;  %v7286_v43 = vld [vmem:[#allocation3 + $0x152] sm:$0xff] }
 0x93e   : > { %7350 = vrot.lane.b32.xlu1 %v7276_v23, %s10506_s16  ;;  %7734 = vrot.lane.b32.xlu0 %v13535_v48, %s10508_s29  ;;  %v7671_v23 = vld [vmem:[#allocation3 + $0x144] sm:$0xff] }
 0x940   : > { %v7144_v52 = vpop.permute.xlu1 %7143  ;;  %v7142_v4 = vpop.permute.xlu0 %7141 }
 0x941   : > { %7237 = vst.msk [vmem:[#allocation6 + $0x18] sm:$0xff] %vm7233_vm11, %v7144_v52  ;;  %7236 = vst.msk [vmem:[#allocation6 + $0x10] sm:$0xff] %vm7233_vm11, %v7142_v4  ;;  %v13894_v52 = vpop.f32.mrf.mxu1 }
 0x942   : > { %7543 = vrot.lane.b32.xlu1 %v7469_v6, %s10507_s21  ;;  %7352 = vrot.lane.b32.xlu0 %v7277_v7, %s10506_s16  ;;  %v7479_v7 = vld [vmem:[#allocation3 + $0x153] sm:$0xff] }
 0x944   : > { %v7148_v16 = vpop.permute.xlu1 %7147  ;;  %v7146_v33 = vpop.permute.xlu0 %7145 }
 0x945   : > { %7239 = vst.msk [vmem:[#allocation6 + $0x28] sm:$0xff] %vm7233_vm11, %v7148_v16  ;;  %7238 = vst.msk [vmem:[#allocation6 + $0x20] sm:$0xff] %vm7233_vm11, %v7146_v33  ;;  %v7287_v16 = vld [vmem:[#allocation3 + $0x15a] sm:$0xff]  ;;  %v13900_v33 = vpop.f32.mrf.mxu1 }
 0x946   : > { %7736 = vrot.lane.b32.xlu1 %v13547_v61, %s10508_s29  ;;  %7545 = vrot.lane.b32.xlu0 %v7470_v27, %s10507_s21  ;;  %v7471_v61 = vld [vmem:[#allocation3 + $0xf3] sm:$0xff] }
 0x948   : > { %v7152_v48 = vpop.permute.xlu1 %7151  ;;  %v7150_v51 = vpop.permute.xlu0 %7149 }
 0x949   : > { %7241 = vst.msk [vmem:[#allocation6 + $0x38] sm:$0xff] %vm7233_vm11, %v7152_v48  ;;  %7240 = vst.msk [vmem:[#allocation6 + $0x30] sm:$0xff] %vm7233_vm11, %v7150_v51  ;;  %v7672_v51 = vld [vmem:[#allocation3 + $0x154] sm:$0xff] }
 0x94a   : > { %7354 = vrot.lane.b32.xlu1 %v7278_v31, %s10506_s16  ;;  %7738 = vrot.lane.b32.xlu0 %v13545_v49, %s10508_s29  ;;  %v7480_v31 = vld [vmem:[#allocation3 + $0x15b] sm:$0xff] }
 0x94c   : > { %v7156_v57 = vpop.permute.xlu1 %7155  ;;  %v7154_v9 = vpop.permute.xlu0 %7153 }
 0x94d   : > { %7243 = vst.msk [vmem:[#allocation6 + $0x48] sm:$0xff] %vm7233_vm11, %v7156_v57  ;;  %7242 = vst.msk [vmem:[#allocation6 + $0x40] sm:$0xff] %vm7233_vm11, %v7154_v9  ;;  %v13906_v57 = vpop.f32.mrf.mxu1 }
 0x94e   : > { %7547 = vrot.lane.b32.xlu1 %v7471_v61, %s10507_s21  ;;  %7356 = vrot.lane.b32.xlu0 %v7279_v18, %s10506_s16 }
 0x950   : > { %v7160_v11 = vpop.permute.xlu1 %7159  ;;  %v7158_v24 = vpop.permute.xlu0 %7157 }
 0x951   : > { %7245 = vst.msk [vmem:[#allocation6 + $0x58] sm:$0xff] %vm7233_vm11, %v7160_v11  ;;  %7244 = vst.msk [vmem:[#allocation6 + $0x50] sm:$0xff] %vm7233_vm11, %v7158_v24  ;;  %v7288_v11 = vld [vmem:[#allocation3 + $0x16a] sm:$0xff]  ;;  %v7673_v24 = vld [vmem:[#allocation3 + $0x15c] sm:$0xff] }
 0x952   : > { %7740 = vrot.lane.b32.xlu1 %v13557_v54, %s10508_s29  ;;  %7549 = vrot.lane.b32.xlu0 %v7472_v47, %s10507_s21  ;;  %v7473_v54 = vld [vmem:[#allocation3 + $0x10b] sm:$0xff] }
 0x953   : > { %v8881_v47 = vld [vmem:[%s14928_s7] sm:$0xf] }
 0x954   : > { %v7164_v49 = vpop.permute.xlu1 %7163  ;;  %v7162_v21 = vpop.permute.xlu0 %7161  ;;  %10296 = vmatprep.subr.msk.mxu0 %vm468_vm0, %v8881_v47  ;;  %10346 = vmatprep.subr.msk.mxu1 %vm468_vm0, %v8881_v47 }
 0x955   : > { %7247 = vst.msk [vmem:[#allocation6 + $0x68] sm:$0xff] %vm7233_vm11, %v7164_v49  ;;  %7246 = vst.msk [vmem:[#allocation6 + $0x60] sm:$0xff] %vm7233_vm11, %v7162_v21  ;;  %v13916_v49 = vpop.f32.mrf.mxu1  ;;  %10347 = vmatpush3.msk.msra.mxu1 %vm468_vm0, %v8881_v47 }
 0x956   : > { %7358 = vrot.lane.b32.xlu1 %v7280_v12, %s10506_s16  ;;  %7742 = vrot.lane.b32.xlu0 %v13555_v17, %s10508_s29  ;;  %v7474_v17 = vld [vmem:[#allocation3 + $0x113] sm:$0xff] }
 0x958   : > { %v7168_v60 = vpop.permute.xlu1 %7167  ;;  %v7166_v29 = vpop.permute.xlu0 %7165 }
 0x959   : > { %7249 = vst.msk [vmem:[#allocation6 + $0x78] sm:$0xff] %vm7233_vm11, %v7168_v60  ;;  %7248 = vst.msk [vmem:[#allocation6 + $0x70] sm:$0xff] %vm7233_vm11, %v7166_v29  ;;  %v7481_v29 = vld [vmem:[#allocation3 + $0x16b] sm:$0xff] }
 0x95a   : > { %7551 = vrot.lane.b32.xlu1 %v7473_v54, %s10507_s21  ;;  %7360 = vrot.lane.b32.xlu0 %v7281_v14, %s10506_s16  ;;  %v7289_v54 = vld [vmem:[#allocation3 + $0x172] sm:$0xff]  ;;  %v13926_v14 = vpop.f32.mrf.mxu1 }
 0x95c   : > { %v7172_v58 = vpop.permute.xlu1 %7171  ;;  %v7170_v59 = vpop.permute.xlu0 %7169 }
 0x95d   : > { %7251 = vst.msk [vmem:[#allocation6 + $0x88] sm:$0xff] %vm7233_vm11, %v7172_v58  ;;  %7250 = vst.msk [vmem:[#allocation6 + $0x80] sm:$0xff] %vm7233_vm11, %v7170_v59 }
 0x95e   : > { %7744 = vrot.lane.b32.xlu1 %v13565_v1, %s10508_s29  ;;  %7553 = vrot.lane.b32.xlu0 %v7474_v17, %s10507_s21  ;;  %v7475_v1 = vld [vmem:[#allocation3 + $0x123] sm:$0xff]  ;;  %v7674_v17 = vld [vmem:[#allocation3 + $0x16c] sm:$0xff] }
 0x960   : > { %v7176_v40 = vpop.permute.xlu1 %7175  ;;  %v7174_v25 = vpop.permute.xlu0 %7173 }
 0x961   : > { %7253 = vst.msk [vmem:[#allocation6 + $0x98] sm:$0xff] %vm7233_vm11, %v7176_v40  ;;  %7252 = vst.msk [vmem:[#allocation6 + $0x90] sm:$0xff] %vm7233_vm11, %v7174_v25  ;;  %v7482_v40 = vld [vmem:[#allocation3 + $0x173] sm:$0xff]  ;;  %v13933_v25 = vpop.f32.mrf.mxu1 }
 0x962   : > { %7362 = vrot.lane.b32.xlu1 %v7282_v37, %s10506_s16  ;;  %7746 = vrot.lane.b32.xlu0 %v10417_v5, %s10508_s29 }
 0x964   : > { %v7180_v22 = vpop.permute.xlu1 %7179  ;;  %v7178_v38 = vpop.permute.xlu0 %7177 }
 0x965   : > { %7255 = vst.msk [vmem:[#allocation6 + $0xa8] sm:$0xff] %vm7233_vm11, %v7180_v22  ;;  %7254 = vst.msk [vmem:[#allocation6 + $0xa0] sm:$0xff] %vm7233_vm11, %v7178_v38  ;;  %v7290_v38 = vld [vmem:[#allocation3 + $0x182] sm:$0xff] }
 0x966   : > { %7555 = vrot.lane.b32.xlu1 %v7475_v1, %s10507_s21  ;;  %7364 = vrot.lane.b32.xlu0 %v7283_v42, %s10506_s16  ;;  %v7675_v1 = vld [vmem:[#allocation3 + $0x174] sm:$0xff]  ;;  %v13940_v42 = vpop.f32.mrf.mxu1 }
 0x968   : > { %v7184_v35 = vpop.permute.xlu1 %7183  ;;  %v7182_v50 = vpop.permute.xlu0 %7181 }
 0x969   : > { %7257 = vst.msk [vmem:[#allocation6 + $0xb8] sm:$0xff] %vm7233_vm11, %v7184_v35  ;;  %7256 = vst.msk [vmem:[#allocation6 + $0xb0] sm:$0xff] %vm7233_vm11, %v7182_v50 }
 0x96a   : > { %7748 = vrot.lane.b32.xlu1 %v10418_v30, %s10508_s29  ;;  %7557 = vrot.lane.b32.xlu0 %v7476_v26, %s10507_s21  ;;  %v7483_v30 = vld [vmem:[#allocation3 + $0x183] sm:$0xff] }
 0x96c   : > { %v7188_v34 = vpop.permute.xlu1 %7187  ;;  %v7186_v36 = vpop.permute.xlu0 %7185 }
 0x96d   : > { %7259 = vst.msk [vmem:[#allocation6 + $0xc8] sm:$0xff] %vm7233_vm11, %v7188_v34  ;;  %7258 = vst.msk [vmem:[#allocation6 + $0xc0] sm:$0xff] %vm7233_vm11, %v7186_v36  ;;  %v7291_v34 = vld [vmem:[#allocation3 + $0x18a] sm:$0xff]  ;;  %v13947_v36 = vpop.f32.mrf.mxu1 }
 0x96e   : > { %7366 = vrot.lane.b32.xlu1 %v7284_v39, %s10506_s16  ;;  %7750 = vrot.lane.b32.xlu0 %v7669_v53, %s10508_s29 }
 0x970   : > { %v7192_v63 = vpop.permute.xlu1 %7191  ;;  %v7190_v15 = vpop.permute.xlu0 %7189 }
 0x971   : > { %7261 = vst.msk [vmem:[#allocation6 + $0xd8] sm:$0xff] %vm7233_vm11, %v7192_v63  ;;  %7260 = vst.msk [vmem:[#allocation6 + $0xd0] sm:$0xff] %vm7233_vm11, %v7190_v15  ;;  %v7676_v63 = vld [vmem:[#allocation3 + $0x184] sm:$0xff] }
 0x972   : > { %7559 = vrot.lane.b32.xlu1 %v7477_v0, %s10507_s21  ;;  %7368 = vrot.lane.b32.xlu0 %v7285_v10, %s10506_s16  ;;  %v7484_v15 = vld [vmem:[#allocation3 + $0x18b] sm:$0xff]  ;;  %v13953_v0 = vpop.f32.mrf.mxu1 }
 0x974   : > { %v7331_v44 = vpop.permute.xlu1 %7330  ;;  %v7194_v45 = vpop.permute.xlu0 %7193 }
 0x975   : > { %7427 = vst.msk [vmem:[#allocation6] sm:$0xff] %vm7426_vm12, %v7331_v44 }
 0x976   : > { %7262 = vst.msk [vmem:[#allocation6 + $0xe0] sm:$0xff] %vm7233_vm11, %v7194_v45  ;;  %7752 = vrot.lane.b32.xlu1 %v7670_v3, %s10508_s29  ;;  %7561 = vrot.lane.b32.xlu0 %v7478_v62, %s10507_s21  ;;  %v7292_v3 = vld [vmem:[#allocation3 + $0x19a] sm:$0xff]  ;;  %v7677_v62 = vld [vmem:[#allocation3 + $0x18c] sm:$0xff] }
 0x978   : > { %v7524_v8 = vpop.permute.xlu1 %7523  ;;  %v7333_v20 = vpop.permute.xlu0 %7332 }
 0x979   : > { %7620 = vst.msk [vmem:[#allocation6] sm:$0xff] %vm7619_vm13, %v7524_v8  ;;  %v13960_v8 = vpop.f32.mrf.mxu1 }
 0x97a   : > { %7428 = vst.msk [vmem:[#allocation6 + $0x8] sm:$0xff] %vm7426_vm12, %v7333_v20  ;;  %7370 = vrot.lane.b32.xlu1 %v7286_v43, %s10506_s16  ;;  %7754 = vrot.lane.b32.xlu0 %v7671_v23, %s10508_s29 }
 0x97c   : > { %v7717_v4 = vpop.permute.xlu1 %7716  ;;  %v7526_v6 = vpop.permute.xlu0 %7525 }
 0x97d   : > { %7813 = vst.msk [vmem:[#allocation6] sm:$0xff] %vm7812_vm14, %v7717_v4  ;;  %v7485_v4 = vld [vmem:[#allocation3 + $0x19b] sm:$0xff] }
 0x97e   : > { %7621 = vst.msk [vmem:[#allocation6 + $0x8] sm:$0xff] %vm7619_vm13, %v7526_v6  ;;  %7563 = vrot.lane.b32.xlu1 %v7479_v7, %s10507_s21  ;;  %7372 = vrot.lane.b32.xlu0 %v7287_v16, %s10506_s16  ;;  %v7293_v6 = vld [vmem:[#allocation3 + $0x1a2] sm:$0xff]  ;;  %v13967_v7 = vpop.f32.mrf.mxu1 }
 0x980   : > { %v7335_v27 = vpop.permute.xlu1 %7334  ;;  %v7719_v48 = vpop.permute.xlu0 %7718 }
 0x981   : > { %7429 = vst.msk [vmem:[#allocation6 + $0x10] sm:$0xff] %vm7426_vm12, %v7335_v27 }
 0x982   : > { %7814 = vst.msk [vmem:[#allocation6 + $0x8] sm:$0xff] %vm7812_vm14, %v7719_v48  ;;  %7756 = vrot.lane.b32.xlu1 %v7672_v51, %s10508_s29  ;;  %7565 = vrot.lane.b32.xlu0 %v7480_v31, %s10507_s21  ;;  %v7678_v48 = vld [vmem:[#allocation3 + $0x19c] sm:$0xff]  ;;  %v13973_v31 = vpop.f32.mrf.mxu1 }
 0x983   : > { %v7486_v51 = vld [vmem:[#allocation3 + $0x1a3] sm:$0xff] }
 0x984   : > { %v7528_v9 = vpop.permute.xlu1 %7527  ;;  %v7337_v61 = vpop.permute.xlu0 %7336  ;;  %v7845_v18 = vld [vmem:[#allocation6] sm:$0xff] }
 0x985   : > { %7622 = vst.msk [vmem:[#allocation6 + $0x10] sm:$0xff] %vm7619_vm13, %v7528_v9  ;;  %10248 = vmatprep.mubr.msk.f32.mxu0 %vm7891_vm15, %v7845_v18  ;;  %v7102_v9 = vld [vmem:[#allocation3 + $0x1b9] sm:$0xff] }
 0x986   : > { %7430 = vst.msk [vmem:[#allocation6 + $0x18] sm:$0xff] %vm7426_vm12, %v7337_v61  ;;  %7374 = vrot.lane.b32.xlu1 %v7288_v11, %s10506_s16  ;;  %7758 = vrot.lane.b32.xlu0 %v7673_v24, %s10508_s29  ;;  %v7679_v24 = vld [vmem:[#allocation3 + $0x1a4] sm:$0xff] }
 0x988   : > { %v7721_v21 = vpop.permute.xlu1 %7720  ;;  %v7530_v12 = vpop.permute.xlu0 %7529 }
 0x989   : > { %v7846_v60 = vld [vmem:[#allocation6 + $0x8] sm:$0xff]  ;;  %7815 = vst.msk [vmem:[#allocation6 + $0x10] sm:$0xff] %vm7812_vm14, %v7721_v21 }
 0x98a   : > { %7623 = vst.msk [vmem:[#allocation6 + $0x18] sm:$0xff] %vm7619_vm13, %v7530_v12  ;;  %10249 = vmatmul.mubr.msk.f32.vlgmr.msra.gmra.mxu0 %vm7891_vm15, %v7846_v60  ;;  %7567 = vrot.lane.b32.xlu1 %v7481_v29, %s10507_s21  ;;  %v7295_v21 = vld [vmem:[#allocation3 + $0x1ba] sm:$0xff]  ;;  %v7294_v12 = vld [vmem:[#allocation3 + $0x1b2] sm:$0xff] }
 0x98b   : > { %7376 = vrot.lane.b32.xlu0 %v7289_v54, %s10506_s16  ;;  %10297 = vmatpush3.msk.msra.mxu0 %vm468_vm0, %v8881_v47  ;;  %v13980_v47 = vpop.f32.mrf.mxu1  ;;  %vm9405_vm0 = vcmask 97312  }
 0x98c   : > { %v7339_v58 = vpop.permute.xlu1 %7338  ;;  %v7723_v59 = vpop.permute.xlu0 %7722 }
 0x98d   : > { %7431 = vst.msk [vmem:[#allocation6 + $0x20] sm:$0xff] %vm7426_vm12, %v7339_v58  ;;  %v13987_v58 = vpop.f32.mrf.mxu1 }
 0x98e   : > { %7816 = vst.msk [vmem:[#allocation6 + $0x18] sm:$0xff] %vm7812_vm14, %v7723_v59  ;;  %7760 = vrot.lane.b32.xlu1 %v7674_v17, %s10508_s29  ;;  %v7488_v59 = vld [vmem:[#allocation3 + $0x1bb] sm:$0xff]  ;;  %v7487_v17 = vld [vmem:[#allocation3 + $0x1b3] sm:$0xff] }
 0x98f   : > { %7569 = vrot.lane.b32.xlu0 %v7482_v40, %s10507_s21 }
 0x990   : > { %v7532_v37 = vpop.permute.xlu1 %7531  ;;  %v7341_v5 = vpop.permute.xlu0 %7340  ;;  %v7847_v22 = vld [vmem:[#allocation6 + $0x10] sm:$0xff] }
 0x991   : > { %7624 = vst.msk [vmem:[#allocation6 + $0x20] sm:$0xff] %vm7619_vm13, %v7532_v37  ;;  %10251 = vmatprep.mubr.msk.f32.mxu0 %vm7891_vm15, %v7847_v22  ;;  %v7103_v22 = vld [vmem:[#allocation3 + $0x1c9] sm:$0xff] }
 0x992   : > { %7432 = vst.msk [vmem:[#allocation6 + $0x28] sm:$0xff] %vm7426_vm12, %v7341_v5  ;;  %7378 = vrot.lane.b32.xlu1 %v7290_v38, %s10506_s16  ;;  %v13993_v5 = vpop.f32.mrf.mxu1  ;;  %v7680_v38 = vld [vmem:[#allocation3 + $0x1b4] sm:$0xff] }
 0x993   : > { %7762 = vrot.lane.b32.xlu0 %v7675_v1, %s10508_s29 }
 0x994   : > { %v7725_v35 = vpop.permute.xlu1 %7724  ;;  %v7534_v50 = vpop.permute.xlu0 %7533 }
 0x995   : > { %v7848_v26 = vld [vmem:[#allocation6 + $0x18] sm:$0xff]  ;;  %7817 = vst.msk [vmem:[#allocation6 + $0x20] sm:$0xff] %vm7812_vm14, %v7725_v35 }
 0x996   : > { %7625 = vst.msk [vmem:[#allocation6 + $0x28] sm:$0xff] %vm7619_vm13, %v7534_v50  ;;  %10252 = vmatmul.mubr.msk.f32.gmra.mxu0 %vm7891_vm15, %v7848_v26  ;;  %7571 = vrot.lane.b32.xlu1 %v7483_v30, %s10507_s21  ;;  %v14000_v26 = vpop.f32.mrf.mxu1  ;;  %v7104_v30 = vld [vmem:[#allocation3 + $0x1d1] sm:$0xff] }
 0x997   : > { %7380 = vrot.lane.b32.xlu0 %v7291_v34, %s10506_s16  ;;  %v7681_v34 = vld [vmem:[#allocation3 + $0x1bc] sm:$0xff] }
 0x998   : > { %v7343_v39 = vpop.permute.xlu1 %7342  ;;  %v7727_v53 = vpop.permute.xlu0 %7726 }
 0x999   : > { %7433 = vst.msk [vmem:[#allocation6 + $0x30] sm:$0xff] %vm7426_vm12, %v7343_v39 }
 0x99a   : > { %7818 = vst.msk [vmem:[#allocation6 + $0x28] sm:$0xff] %vm7812_vm14, %v7727_v53  ;;  %7764 = vrot.lane.b32.xlu1 %v7676_v63, %s10508_s29 }
 0x99b   : > { %7573 = vrot.lane.b32.xlu0 %v7484_v15, %s10507_s21  ;;  %v14007_v15 = vpop.f32.mrf.mxu1 }
 0x99c   : > { %v7536_v10 = vpop.permute.xlu1 %7535  ;;  %v7345_v44 = vpop.permute.xlu0 %7344  ;;  %v7849_v45 = vld [vmem:[#allocation6 + $0x20] sm:$0xff] }
 0x99d   : > { %7626 = vst.msk [vmem:[#allocation6 + $0x30] sm:$0xff] %vm7619_vm13, %v7536_v10  ;;  %10254 = vmatprep.mubr.msk.f32.mxu0 %vm7891_vm15, %v7849_v45  ;;  %v14014_v10 = vld [vmem:[%s14925_s4] ss:$0 sm:$0xff] }
 0x99e   : > { %7434 = vst.msk [vmem:[#allocation6 + $0x38] sm:$0xff] %vm7426_vm12, %v7345_v44  ;;  %7382 = vrot.lane.b32.xlu1 %v7292_v3, %s10506_s16  ;;  %v7297_v44 = vld [vmem:[#allocation3 + $0x1d2] sm:$0xff]  ;;  %v7296_v45 = vld [vmem:[#allocation3 + $0x1ca] sm:$0xff] }
 0x99f   : > { %7766 = vrot.lane.b32.xlu0 %v7677_v62, %s10508_s29 }
 0x9a0   : > { %v7729_v20 = vpop.permute.xlu1 %7728  ;;  %v7538_v43 = vpop.permute.xlu0 %7537 }
 0x9a1   : > { %v7850_v23 = vld [vmem:[#allocation6 + $0x28] sm:$0xff]  ;;  %7819 = vst.msk [vmem:[#allocation6 + $0x30] sm:$0xff] %vm7812_vm14, %v7729_v20  ;;  %v14020_v20 = vadd.f32 %v13838_v32, %v14014_v10  ;;  %v14040_v32 = vadd.f32 %v13864_v2, %v14014_v10 }
 0x9a2   : > { %7627 = vst.msk [vmem:[#allocation6 + $0x38] sm:$0xff] %vm7619_vm13, %v7538_v43  ;;  %10255 = vmatmul.mubr.msk.f32.gmra.mxu0 %vm7891_vm15, %v7850_v23  ;;  %7575 = vrot.lane.b32.xlu1 %v7485_v4, %s10507_s21  ;;  %v14022_v43 = vpop.f32.mrf.mxu1  ;;  %v14028_v23 = vadd.f32 %v14014_v10, %v13845_v55  ;;  %v14032_v4 = vadd.f32 %v13851_v13, %v14014_v10 }
 0x9a3   : > { %7384 = vrot.lane.b32.xlu0 %v7293_v6, %s10506_s16  ;;  %v14036_v6 = vadd.f32 %v14014_v10, %v13858_v28  ;;  %v14048_v55 = vadd.f32 %v13876_v19, %v14014_v10  ;;  %v14052_v13 = vadd.f32 %v14014_v10, %v13882_v41  ;;  %v14056_v28 = vadd.f32 %v13888_v46, %v14014_v10 }
 0x9a4   : > { %v7347_v16 = vpop.permute.xlu1 %7346  ;;  %v7731_v27 = vpop.permute.xlu0 %7730  ;;  %v14068_v19 = vadd.f32 %v14014_v10, %v13906_v57  ;;  %v2924_v41 = vmax.f32 %v14020_v20, 0.0  ;;  %v14076_v46 = vadd.f32 %v13916_v49, %v14014_v10  ;;  %v2926_v57 = vmax.f32 %v14032_v4, 0.0 }
 0x9a5   : > { %7435 = vst.msk [vmem:[#allocation6 + $0x40] sm:$0xff] %vm7426_vm12, %v7347_v16  ;;  %v7490_v16 = vld [vmem:[#allocation3 + $0x1d3] sm:$0xff]  ;;  %v2930_v49 = vmax.f32 %v14048_v55, 0.0 }
 0x9a6   : > { %7820 = vst.msk [vmem:[#allocation6 + $0x38] sm:$0xff] %vm7812_vm14, %v7731_v27  ;;  %7768 = vrot.lane.b32.xlu1 %v7678_v48, %s10508_s29  ;;  %v7489_v27 = vld [vmem:[#allocation3 + $0x1cb] sm:$0xff]  ;;  %v14044_v48 = vadd.f32 %v14014_v10, %v13870_v56  ;;  %v14064_v56 = vadd.f32 %v13900_v33, %v14014_v10  ;;  %v2923_v33 = vmax.f32 %v14028_v23, 0.0  ;;  %v14125_v23 = vadd.f32 %v13960_v8, %v14014_v10 }
 0x9a7   : > { %7577 = vrot.lane.b32.xlu0 %v7486_v51, %s10507_s21  ;;  %v14141_v8 = vadd.f32 %v13987_v58, %v14014_v10 }
 0x9a8   : > { %v7540_v61 = vpop.permute.xlu1 %7539  ;;  %v7349_v18 = vpop.permute.xlu0 %7348  ;;  %v7851_v11 = vld [vmem:[#allocation6 + $0x30] sm:$0xff] }
 0x9a9   : > { %7628 = vst.msk [vmem:[#allocation6 + $0x40] sm:$0xff] %vm7619_vm13, %v7540_v61  ;;  %10257 = vmatprep.mubr.msk.f32.mxu0 %vm7891_vm15, %v7851_v11  ;;  %v14060_v61 = vadd.f32 %v14014_v10, %v13894_v52  ;;  %v14078_v52 = vpop.f32.mrf.mxu1  ;;  %v2928_v11 = vmax.f32 %v14040_v32, 0.0 }
 0x9aa   : > { %7436 = vst.msk [vmem:[#allocation6 + $0x48] sm:$0xff] %vm7426_vm12, %v7349_v18  ;;  %7195 = vrot.lane.b32.xlu1 %v7102_v9, %s10505_s23  ;;  %v2925_v18 = vmax.f32 %v14036_v6, 0.0 }
 0x9ab   : > { %7770 = vrot.lane.b32.xlu0 %v7679_v24, %s10508_s29  ;;  %v7683_v24 = vld [vmem:[#allocation3 + $0x1d4] sm:$0xff] }
 0x9ac   : > { %v7733_v60 = vpop.permute.xlu1 %7732  ;;  %v7542_v29 = vpop.permute.xlu0 %7541 }
 0x9ad   : > { %v7852_v54 = vld [vmem:[#allocation6 + $0x38] sm:$0xff]  ;;  %7821 = vst.msk [vmem:[#allocation6 + $0x40] sm:$0xff] %vm7812_vm14, %v7733_v60  ;;  %v2929_v60 = vmax.f32 %v14052_v13, 0.0 }
 0x9ae   : > { %7629 = vst.msk [vmem:[#allocation6 + $0x48] sm:$0xff] %vm7619_vm13, %v7542_v29  ;;  %10258 = vmatmul.mubr.msk.f32.gmra.mxu0 %vm7891_vm15, %v7852_v54  ;;  %7388 = vrot.lane.b32.xlu1 %v7295_v21, %s10506_s16  ;;  %v7682_v21 = vld [vmem:[#allocation3 + $0x1cc] sm:$0xff] }
 0x9af   : > { %7386 = vrot.lane.b32.xlu0 %v7294_v12, %s10506_s16  ;;  %v2927_v12 = vmax.f32 %v14044_v48, 0.0 }
 0x9b0   : > { %v7351_v40 = vpop.permute.xlu1 %7350  ;;  %v7735_v37 = vpop.permute.xlu0 %7734 }
 0x9b1   : > { %7437 = vst.msk [vmem:[#allocation6 + $0x50] sm:$0xff] %vm7426_vm12, %v7351_v40  ;;  %v8757_v40 = vld [vmem:[#allocation4 + $0x61] sm:$0xff] }
 0x9b2   : > { %7822 = vst.msk [vmem:[#allocation6 + $0x48] sm:$0xff] %vm7812_vm14, %v7735_v37  ;;  %7581 = vrot.lane.b32.xlu1 %v7488_v59, %s10507_s21 }
 0x9b3   : > { %7579 = vrot.lane.b32.xlu0 %v7487_v17, %s10507_s21 }
 0x9b4   : > { %v7544_v1 = vpop.permute.xlu1 %7543  ;;  %v7353_v35 = vpop.permute.xlu0 %7352  ;;  %v7853_v50 = vld [vmem:[#allocation6 + $0x40] sm:$0xff] }
 0x9b5   : > { %7630 = vst.msk [vmem:[#allocation6 + $0x50] sm:$0xff] %vm7619_vm13, %v7544_v1  ;;  %10260 = vmatprep.mubr.msk.f32.mxu0 %vm7891_vm15, %v7853_v50  ;;  %v8368_v1 = vld [vmem:[#allocation4 + $0x1] sm:$0xff]  ;;  %v14187_v50 = vld [vmem:[#allocation4 + $0x51] sm:$0xff] }
 0x9b6   : > { %7438 = vst.msk [vmem:[#allocation6 + $0x58] sm:$0xff] %vm7426_vm12, %v7353_v35  ;;  %7197 = vrot.lane.b32.xlu1 %v7103_v22, %s10505_s23  ;;  %v8432_v35 = vld [vmem:[#allocation4 + $0x2] sm:$0xff] }
 0x9b7   : > { %7772 = vrot.lane.b32.xlu0 %v7680_v38, %s10508_s29  ;;  %v8336_v38 = vld [vmem:[#allocation4] sm:$0xff] }
 0x9b8   : > { %v7737_v39 = vpop.permute.xlu1 %7736  ;;  %v7546_v53 = vpop.permute.xlu0 %7545 }
 0x9b9   : > { %v7854_v63 = vld [vmem:[#allocation6 + $0x48] sm:$0xff]  ;;  %7823 = vst.msk [vmem:[#allocation6 + $0x50] sm:$0xff] %vm7812_vm14, %v7737_v39  ;;  %v10230_v39 = vpop.f32.mrf.mxu1 }
 0x9ba   : > { %7631 = vst.msk [vmem:[#allocation6 + $0x58] sm:$0xff] %vm7619_vm13, %v7546_v53  ;;  %10261 = vmatmul.mubr.msk.f32.gmra.mxu0 %vm7891_vm15, %v7854_v63  ;;  %7199 = vrot.lane.b32.xlu1 %v7104_v30, %s10505_s23  ;;  %v14099_v30 = vadd.f32 %v14014_v10, %v13926_v14  ;;  %v8400_v53 = vmax.f32 %v8336_v38, %v8368_v1  ;;  %v8496_v63 = vld [vmem:[#allocation4 + $0x18] sm:$0xff] }
 0x9bb   : > { %7774 = vrot.lane.b32.xlu0 %v7681_v34, %s10508_s29  ;;  %v14103_v34 = vadd.f32 %v13933_v25, %v14014_v10  ;;  %v14115_v14 = vadd.f32 %v13947_v36, %v14014_v10  ;;  %v14119_v25 = vadd.f32 %v14014_v10, %v13953_v0  ;;  %v8337_v0 = vld [vmem:[#allocation4 + $0x8] sm:$0xff]  ;;  %v2904_v38 = vpop.f32.mrf.mxu1 }
 0x9bc   : > { %v7355_v3 = vpop.permute.xlu1 %7354  ;;  %v7739_v62 = vpop.permute.xlu0 %7738 }
 0x9bd   : > { %7439 = vst.msk [vmem:[#allocation6 + $0x60] sm:$0xff] %vm7426_vm12, %v7355_v3  ;;  %v14111_v3 = vadd.f32 %v14014_v10, %v13940_v42  ;;  %v14133_v42 = vadd.f32 %v13973_v31, %v14014_v10  ;;  %v8497_v31 = vld [vmem:[#allocation4 + $0x20] sm:$0xff] }
 0x9be   : > { %7824 = vst.msk [vmem:[#allocation6 + $0x58] sm:$0xff] %vm7812_vm14, %v7739_v62  ;;  %7392 = vrot.lane.b32.xlu1 %v7297_v44, %s10506_s16  ;;  %v8560_v44 = vld [vmem:[#allocation4 + $0x19] sm:$0xff]  ;;  %v14121_v62 = vld [vmem:[#allocation4 + $0x30] sm:$0xff] }
 0x9bf   : > { %7390 = vrot.lane.b32.xlu0 %v7296_v45, %s10506_s16  ;;  %v14107_v45 = vld [vmem:[#allocation4 + $0x1a] sm:$0xff]  ;;  %v8402_v20 = vmax.f32 %v8496_v63, %v8560_v44 }
 0x9c0   : > { %v7548_v2 = vpop.permute.xlu1 %7547  ;;  %v7357_v51 = vpop.permute.xlu0 %7356  ;;  %v7855_v9 = vld [vmem:[#allocation6 + $0x50] sm:$0xff] }
 0x9c1   : > { %7632 = vst.msk [vmem:[#allocation6 + $0x60] sm:$0xff] %vm7619_vm13, %v7548_v2  ;;  %10263 = vmatprep.mubr.msk.f32.mxu0 %vm7891_vm15, %v7855_v9  ;;  %v8464_v2 = vmax.f32 %v8400_v53, %v8432_v35  ;;  %v8433_v9 = vld [vmem:[#allocation4 + $0xa] sm:$0xff]  ;;  %v14157_v35 = vadd.f32 %v14000_v26, %v14014_v10  ;;  %v14161_v53 = vadd.f32 %v14014_v10, %v14007_v15 }
 0x9c2   : > { %7440 = vst.msk [vmem:[#allocation6 + $0x68] sm:$0xff] %vm7426_vm12, %v7357_v51  ;;  %7585 = vrot.lane.b32.xlu1 %v7490_v16, %s10507_s21  ;;  %v14129_v16 = vadd.f32 %v14014_v10, %v13967_v7  ;;  %v8369_v51 = vld [vmem:[#allocation4 + $0x9] sm:$0xff]  ;;  %v14174_v26 = vadd.f32 %v14014_v10, %v14078_v52 }
 0x9c3   : > { %7583 = vrot.lane.b32.xlu0 %v7489_v27, %s10507_s21  ;;  %v8401_v7 = vmax.f32 %v8337_v0, %v8369_v51  ;;  %v8528_v58 = vmax.f32 %v8464_v2, %v8496_v63  ;;  %v8691_v51 = vld [vmem:[#allocation4 + $0x48] sm:$0xff] }
 0x9c4   : > { %v7741_v54 = vpop.permute.xlu1 %7740  ;;  %v7550_v59 = vpop.permute.xlu0 %7549 }
 0x9c5   : > { %v7856_v17 = vld [vmem:[#allocation6 + $0x58] sm:$0xff]  ;;  %7825 = vst.msk [vmem:[#allocation6 + $0x60] sm:$0xff] %vm7812_vm14, %v7741_v54  ;;  %v8592_v0 = vmax.f32 %v8528_v58, %v8560_v44  ;;  %v8692_v58 = vld [vmem:[#allocation4 + $0x50] sm:$0xff] }
 0x9c6   : > { %7633 = vst.msk [vmem:[#allocation6 + $0x68] sm:$0xff] %vm7619_vm13, %v7550_v59  ;;  %10264 = vmatmul.mubr.msk.f32.gmra.mxu0 %vm7891_vm15, %v7856_v17  ;;  %7778 = vrot.lane.b32.xlu1 %v7683_v24, %s10508_s29  ;;  %v14137_v24 = vadd.f32 %v14014_v10, %v13980_v47  ;;  %v14145_v54 = vld [vmem:[#allocation4 + $0x22] sm:$0xff]  ;;  %v8466_v59 = vmax.f32 %v8402_v20, %v14107_v45  ;;  %v14163_v20 = vld [vmem:[#allocation4 + $0x31] sm:$0xff] }
 0x9c7   : > { %7776 = vrot.lane.b32.xlu0 %v7682_v21, %s10508_s29  ;;  %v8561_v21 = vld [vmem:[#allocation4 + $0x21] sm:$0xff]  ;;  %v14151_v47 = vadd.f32 %v14014_v10, %v13993_v5  ;;  %v8690_v5 = vld [vmem:[#allocation4 + $0x38] sm:$0xff]  ;;  %v8755_v17 = vld [vmem:[#allocation4 + $0x49] sm:$0xff] }
 0x9c8   : > { %v7359_v36 = vpop.permute.xlu1 %7358  ;;  %v7743_v27 = vpop.permute.xlu0 %7742  ;;  %v8403_v1 = vmax.f32 %v8497_v31, %v8561_v21 }
 0x9c9   : > { %7441 = vst.msk [vmem:[#allocation6 + $0x70] sm:$0xff] %vm7426_vm12, %v7359_v36  ;;  %v8465_v36 = vmax.f32 %v8401_v7, %v8433_v9  ;;  %v14178_v7 = vadd.f32 %v10230_v39, %v14014_v10  ;;  %v8656_v39 = vmax.f32 %v8592_v0, %v14107_v45  ;;  %v14204_v0 = vld [vmem:[#allocation4 + $0x60] sm:$0xff] }
 0x9ca   : > { %7826 = vst.msk [vmem:[#allocation6 + $0x68] sm:$0xff] %vm7812_vm14, %v7743_v27  ;;  %9311 = vrot.lane.b32.xlu1 %v2924_v41, %s10483_s28  ;;  %v14165_v27 = vld [vmem:[#allocation4 + $0x39] sm:$0xff]  ;;  %v8530_v41 = vmax.f32 %v8466_v59, %v14121_v62  ;;  %v8467_v9 = vmax.f32 %v8403_v1, %v14145_v54  ;;  %v14181_v59 = vadd.f32 %v14014_v10, %v2904_v38 }
 0x9cb   : > { %9309 = vrot.lane.b32.xlu0 %v2923_v33, %s10483_s28  ;;  %v14170_v33 = vadd.f32 %v14022_v43, %v14014_v10  ;;  %v8817_v43 = vld [vmem:[#allocation4 + $0x32] sm:$0xff]  ;;  %v8529_v52 = vmax.f32 %v8465_v36, %v8497_v31  ;;  %v8818_v38 = vld [vmem:[#allocation4 + $0x3a] sm:$0xff]  ;;  %v8404_v36 = vmax.f32 %v14121_v62, %v14163_v20  ;;  %v8406_v1 = vmax.f32 %v8691_v51, %v8755_v17 }
 0x9cc   : > { %v7552_v63 = vpop.permute.xlu1 %7551  ;;  %v7361_v2 = vpop.permute.xlu0 %7360  ;;  %v7857_v15 = vld [vmem:[#allocation6 + $0x60] sm:$0xff]  ;;  %v8594_v44 = vmax.f32 %v8530_v41, %v14163_v20  ;;  %v8531_v31 = vmax.f32 %v8467_v9, %v8690_v5  ;;  %v8721_v6 = vmax.f32 %v8656_v39, %v14121_v62  ;;  %v8407_v9 = vmax.f32 %v8692_v58, %v14187_v50 }
 0x9cd   : > { %7634 = vst.msk [vmem:[#allocation6 + $0x70] sm:$0xff] %vm7619_vm13, %v7552_v63  ;;  %10266 = vmatprep.mubr.msk.f32.mxu0 %vm7891_vm15, %v7857_v15  ;;  %v14197_v63 = vld [vmem:[#allocation4 + $0x4a] sm:$0xff]  ;;  %v8593_v41 = vmax.f32 %v8529_v52, %v8561_v21  ;;  %v8405_v15 = vmax.f32 %v8690_v5, %v14165_v27  ;;  %v8468_v45 = vmax.f32 %v8404_v36, %v8817_v43 }
 0x9ce   : > { %7442 = vst.msk [vmem:[#allocation6 + $0x78] sm:$0xff] %vm7426_vm12, %v7361_v2  ;;  %9315 = vrot.lane.b32.xlu1 %v2926_v57, %s10483_s28  ;;  %v8658_v2 = vmax.f32 %v8594_v44, %v8817_v43  ;;  %v8820_v44 = vld [vmem:[#allocation4 + $0x52] sm:$0xff]  ;;  %v8470_v62 = vmax.f32 %v8406_v1, %v14197_v63  ;;  %v8408_v55 = vmax.f32 %v14204_v0, %v8757_v40 }
 0x9cf   : > { %9313 = vrot.lane.b32.xlu0 %v2925_v18, %s10483_s28  ;;  %v8595_v18 = vmax.f32 %v8531_v31, %v14165_v27  ;;  %v8657_v21 = vmax.f32 %v8593_v41, %v14145_v54  ;;  %v8469_v37 = vmax.f32 %v8405_v15, %v8818_v38  ;;  %v8785_v31 = vmax.f32 %v8721_v6, %v14163_v20  ;;  %v8694_v15 = vld [vmem:[#allocation4 + $0x68] sm:$0xff] }
 0x9d0   : > { %v7745_v4 = vpop.permute.xlu1 %7744  ;;  %v7554_v57 = vpop.permute.xlu0 %7553  ;;  %v8723_v52 = vmax.f32 %v8658_v2, %v8691_v51  ;;  %v8532_v36 = vmax.f32 %v8468_v45, %v8691_v51  ;;  %v8534_v1 = vmax.f32 %v8470_v62, %v14204_v0  ;;  %v8471_v29 = vmax.f32 %v8407_v9, %v8820_v44  ;;  %v8758_v20 = vld [vmem:[#allocation4 + $0x69] sm:$0xff] }
 0x9d1   : > { %v7858_v22 = vld [vmem:[#allocation6 + $0x68] sm:$0xff]  ;;  %7827 = vst.msk [vmem:[#allocation6 + $0x70] sm:$0xff] %vm7812_vm14, %v7745_v4  ;;  %v8722_v54 = vmax.f32 %v8657_v21, %v8690_v5  ;;  %v8533_v2 = vmax.f32 %v8469_v37, %v8692_v58  ;;  %v14221_v39 = vmax.f32 %v8785_v31, %v8817_v43  ;;  %v2940_v51 = vmax.f32 %v14115_v14, 0.0  ;;  %v10233_v43 = vpop.f32.mrf.mxu1  ;;  %v8822_v9 = vld [vmem:[#allocation4 + $0x6a] sm:$0xff] }
 0x9d2   : > { %7635 = vst.msk [vmem:[#allocation6 + $0x78] sm:$0xff] %vm7619_vm13, %v7554_v57  ;;  %10267 = vmatmul.mubr.msk.f32.gmra.mxu0 %vm7891_vm15, %v7858_v22  ;;  %9319 = vrot.lane.b32.xlu1 %v2928_v11, %s10483_s28  ;;  %v8659_v22 = vmax.f32 %v8595_v18, %v8818_v38  ;;  %v8787_v41 = vmax.f32 %v8723_v52, %v8755_v17  ;;  %v8759_v31 = vld [vmem:[#allocation4 + $0x79] sm:$0xff] }
 0x9d3   : > { %9317 = vrot.lane.b32.xlu0 %v2927_v12, %s10483_s28  ;;  %v8596_v11 = vmax.f32 %v8532_v36, %v8755_v17  ;;  %v8786_v48 = vmax.f32 %v8722_v54, %v14165_v27  ;;  %v8597_v37 = vmax.f32 %v8533_v2, %v14187_v50  ;;  %v8598_v5 = vmax.f32 %v8534_v1, %v8757_v40  ;;  %v8696_v54 = vld [vmem:[#allocation4 + $0x80] sm:$0xff] }
 0x9d4   : > { %v7363_v4 = vpop.permute.xlu1 %7362  ;;  %v7747_v57 = vpop.permute.xlu0 %7746  ;;  %v8724_v32 = vmax.f32 %v8659_v22, %v8692_v58  ;;  %v8851_v12 = vmax.f32 %v8787_v41, %v14197_v63  ;;  %v8821_v58 = vld [vmem:[#allocation4 + $0x62] sm:$0xff]  ;;  %v8535_v6 = vmax.f32 %v8471_v29, %v8694_v15  ;;  %v8409_v22 = vmax.f32 %v8694_v15, %v8758_v20 }
 0x9d5   : > { %7443 = vst.msk [vmem:[#allocation6 + $0x80] sm:$0xff] %vm7426_vm12, %v7363_v4  ;;  %v8660_v27 = vmax.f32 %v8596_v11, %v14197_v63  ;;  %v14237_v18 = vmax.f32 %v8786_v48, %v8818_v38  ;;  %v8661_v45 = vmax.f32 %v8597_v37, %v8820_v44  ;;  %v8662_v21 = vmax.f32 %v8598_v5, %v8821_v58  ;;  %v8760_v41 = vld [vmem:[#allocation4 + $0x81] sm:$0xff]  ;;  %v8697_v5 = vld [vmem:[#allocation4 + $0x90] sm:$0xff] }
 0x9d6   : > { %7828 = vst.msk [vmem:[#allocation6 + $0x78] sm:$0xff] %vm7812_vm14, %v7747_v57  ;;  %9323 = vrot.lane.b32.xlu1 %v2930_v49, %s10483_s28  ;;  %v8788_v17 = vmax.f32 %v8724_v32, %v14187_v50  ;;  %10301 = vmatprep.mubr.msk.f32.mxu1 %vm371_vm1, %v8851_v12  ;;  %v8695_v50 = vld [vmem:[#allocation4 + $0x78] sm:$0xff]  ;;  %v8599_v63 = vmax.f32 %v8535_v6, %v8758_v20  ;;  %v15001_v2 = vmax.f32 %v14056_v28, 0.0  ;;  %v15002_v1 = vmax.f32 %v14060_v61, 0.0  ;;  %v8824_v12 = vld [vmem:[#allocation4 + $0x82] sm:$0xff] }
 0x9d7   : > { %9321 = vrot.lane.b32.xlu0 %v2929_v60, %s10483_s28  ;;  %v8725_v60 = vmax.f32 %v8660_v27, %v14204_v0  ;;  %v14243_v29 = vadd.f32 %v10233_v43, %v14014_v10  ;;  %v8726_v38 = vmax.f32 %v8661_v45, %v8694_v15  ;;  %v8727_v36 = vmax.f32 %v8662_v21, %v8695_v50  ;;  %v8823_v57 = vld [vmem:[#allocation4 + $0x7a] sm:$0xff]  ;;  %v14256_v43 = vld [vmem:[#allocation4 + $0x91] sm:$0xff] }
 0x9d8   : > { %v7556_v49 = vpop.permute.xlu1 %7555  ;;  %v7365_v52 = vpop.permute.xlu0 %7364  ;;  %v7859_v62 = vld [vmem:[#allocation6 + $0x70] sm:$0xff]  ;;  %v8852_v13 = vmax.f32 %v8788_v17, %v8820_v44  ;;  %v8472_v44 = vmax.f32 %v8408_v55, %v8821_v58  ;;  %v2939_v0 = vmax.f32 %v14119_v25, 0.0  ;;  %v8663_v32 = vmax.f32 %v8599_v63, %v8822_v9  ;;  %v14335_v25 = vld [vmem:[#allocation4 + $0xf1] sm:$0xff] }
 0x9d9   : > { %7636 = vst.msk [vmem:[#allocation6 + $0x80] sm:$0xff] %vm7619_vm13, %v7556_v49  ;;  %10269 = vmatprep.mubr.msk.f32.mxu0 %vm7891_vm15, %v7859_v62  ;;  %v8789_v4 = vmax.f32 %v8725_v60, %v8757_v40  ;;  %v8473_v11 = vmax.f32 %v8409_v22, %v8822_v9  ;;  %v8790_v15 = vmax.f32 %v8726_v38, %v8758_v20  ;;  %v8698_v40 = vld [vmem:[#allocation4 + $0x98] sm:$0xff]  ;;  %v8699_v60 = vld [vmem:[#allocation4 + $0xa8] sm:$0xff]  ;;  %v15003_v63 = vmax.f32 %v14064_v56, 0.0 }
 0x9da   : > { %7444 = vst.msk [vmem:[#allocation6 + $0x88] sm:$0xff] %vm7426_vm12, %v7365_v52  ;;  %9327 = vrot.lane.b32.xlu1 %v15001_v2, %s10483_s28  ;;  %10302 = vmatmul.mubr.msk.f32.vlgmr.msra.gmra.mxu1 %vm371_vm1, %v8852_v13  ;;  %v8791_v48 = vmax.f32 %v8727_v36, %v8759_v31  ;;  %v8536_v37 = vmax.f32 %v8472_v44, %v8695_v50  ;;  %v14258_v55 = vld [vmem:[#allocation4 + $0x99] sm:$0xff]  ;;  %v15004_v22 = vmax.f32 %v14068_v19, 0.0 }
 0x9db   : > { %9325 = vrot.lane.b32.xlu0 %v15002_v1, %s10483_s28  ;;  %v8410_v17 = vmax.f32 %v8695_v50, %v8759_v31  ;;  %v8853_v45 = vmax.f32 %v8789_v4, %v8821_v58  ;;  %v8728_v61 = vmax.f32 %v8663_v32, %v8696_v54  ;;  %v8537_v21 = vmax.f32 %v8473_v11, %v8696_v54  ;;  %v14263_v50 = vld [vmem:[#allocation4 + $0xa9] sm:$0xff]  ;;  %v8825_v36 = vld [vmem:[#allocation4 + $0x92] sm:$0xff] }
 0x9dc   : > { %v7749_v28 = vpop.permute.xlu1 %7748  ;;  %v7558_v27 = vpop.permute.xlu0 %7557  ;;  %v8411_v49 = vmax.f32 %v8696_v54, %v8760_v41  ;;  %v8854_v20 = vmax.f32 %v8790_v15, %v8822_v9  ;;  %v8855_v52 = vmax.f32 %v8791_v48, %v8823_v57  ;;  %v8600_v62 = vmax.f32 %v8536_v37, %v8759_v31  ;;  %v8826_v9 = vld [vmem:[#allocation4 + $0x9a] sm:$0xff]  ;;  %v14273_v1 = vld [vmem:[#allocation4 + $0xaa] sm:$0xff] }
 0x9dd   : > { %v7860_v6 = vld [vmem:[#allocation6 + $0x78] sm:$0xff]  ;;  %7829 = vst.msk [vmem:[#allocation6 + $0x80] sm:$0xff] %vm7812_vm14, %v7749_v28  ;;  %v8474_v13 = vmax.f32 %v8410_v17, %v8823_v57  ;;  %v2942_v58 = vmax.f32 %v14125_v23, 0.0  ;;  %v8792_v38 = vmax.f32 %v8728_v61, %v8760_v41  ;;  %v8601_v54 = vmax.f32 %v8537_v21, %v8760_v41  ;;  %10304 = vmatprep.mubr.msk.f32.mxu1 %vm371_vm1, %v8853_v45  ;;  %v8700_v41 = vld [vmem:[#allocation4 + $0xb0] sm:$0xff] }
 0x9de   : > { %7637 = vst.msk [vmem:[#allocation6 + $0x88] sm:$0xff] %vm7619_vm13, %v7558_v27  ;;  %10270 = vmatmul.mubr.msk.f32.gmra.mxu0 %vm7891_vm15, %v7860_v6  ;;  %9331 = vrot.lane.b32.xlu1 %v15003_v63, %s10483_s28  ;;  %v8475_v44 = vmax.f32 %v8411_v49, %v8824_v12  ;;  %v8664_v31 = vmax.f32 %v8600_v62, %v8823_v57  ;;  %v14283_v28 = vld [vmem:[#allocation4 + $0xb1] sm:$0xff]  ;;  %v14285_v6 = vld [vmem:[#allocation4 + $0xc0] sm:$0xff]  ;;  %v15005_v61 = vmax.f32 %v14076_v46, 0.0  ;;  %v15006_v21 = vmax.f32 %v14099_v30, 0.0 }
 0x9df   : > { %9329 = vrot.lane.b32.xlu0 %v15004_v22, %s10483_s28  ;;  %v8538_v2 = vmax.f32 %v8474_v13, %v8697_v5  ;;  %v8412_v4 = vmax.f32 %v8697_v5, %v14256_v43  ;;  %v8413_v56 = vmax.f32 %v8698_v40, %v14258_v55  ;;  %10305 = vmatmul.mubr.msk.f32.gmra.mxu1 %vm371_vm1, %v8854_v20  ;;  %v8828_v30 = vld [vmem:[#allocation4 + $0xb2] sm:$0xff] }
 0x9e0   : > { %v7367_v32 = vpop.permute.xlu1 %7366  ;;  %v7751_v11 = vpop.permute.xlu0 %7750  ;;  %v8856_v19 = vmax.f32 %v8792_v38, %v8824_v12  ;;  %v8665_v15 = vmax.f32 %v8601_v54, %v8824_v12  ;;  %v8539_v48 = vmax.f32 %v8475_v44, %v8698_v40  ;;  %v8414_v37 = vmax.f32 %v8699_v60, %v14263_v50  ;;  %10307 = vmatprep.mubr.msk.f32.mxu1 %vm371_vm1, %v8855_v52 }
 0x9e1   : > { %7445 = vst.msk [vmem:[#allocation6 + $0x90] sm:$0xff] %vm7426_vm12, %v7367_v32  ;;  %v8729_v57 = vmax.f32 %v8664_v31, %v8697_v5  ;;  %v8602_v17 = vmax.f32 %v8538_v2, %v14256_v43  ;;  %v8476_v27 = vmax.f32 %v8412_v4, %v8825_v36  ;;  %v8477_v45 = vmax.f32 %v8413_v56, %v8826_v9  ;;  %v8765_v56 = vld [vmem:[#allocation4 + $0xc1] sm:$0xff] }
 0x9e2   : > { %7830 = vst.msk [vmem:[#allocation6 + $0x88] sm:$0xff] %vm7812_vm14, %v7751_v11  ;;  %v2941_v12 = vmax.f32 %v14129_v16, 0.0  ;;  %9335 = vrot.lane.b32.xlu1 %v15005_v61, %s10483_s28  ;;  %v8730_v49 = vmax.f32 %v8665_v15, %v8698_v40  ;;  %v8603_v5 = vmax.f32 %v8539_v48, %v14258_v55  ;;  %v8478_v20 = vmax.f32 %v8414_v37, %v14273_v1  ;;  %v8766_v11 = vld [vmem:[#allocation4 + $0xc9] sm:$0xff] }
 0x9e3   : > { %9333 = vrot.lane.b32.xlu0 %v15006_v21, %s10483_s28  ;;  %v8793_v52 = vmax.f32 %v8729_v57, %v14256_v43  ;;  %v8666_v62 = vmax.f32 %v8602_v17, %v8825_v36  ;;  %v8540_v13 = vmax.f32 %v8476_v27, %v8699_v60  ;;  %v8541_v63 = vmax.f32 %v8477_v45, %v8700_v41  ;;  %v8829_v27 = vld [vmem:[#allocation4 + $0xc2] sm:$0xff] }
 0x9e4   : > { %v7560_v22 = vpop.permute.xlu1 %7559  ;;  %v7369_v38 = vpop.permute.xlu0 %7368  ;;  %v7861_v54 = vld [vmem:[#allocation6 + $0x80] sm:$0xff]  ;;  %10308 = vmatmul.mubr.msk.f32.gmra.mxu1 %vm371_vm1, %v8856_v19  ;;  %v8794_v46 = vmax.f32 %v8730_v49, %v14258_v55  ;;  %v8667_v44 = vmax.f32 %v8603_v5, %v8826_v9  ;;  %v8542_v40 = vmax.f32 %v8478_v20, %v14285_v6  ;;  %v8415_v31 = vmax.f32 %v8700_v41, %v14283_v28  ;;  %v8702_v55 = vld [vmem:[#allocation4 + $0xc8] sm:$0xff] }
 0x9e5   : > { %7638 = vst.msk [vmem:[#allocation6 + $0x90] sm:$0xff] %vm7619_vm13, %v7560_v22  ;;  %10272 = vmatprep.mubr.msk.f32.mxu0 %vm7891_vm15, %v7861_v54  ;;  %v8857_v43 = vmax.f32 %v8793_v52, %v8825_v36  ;;  %v8731_v2 = vmax.f32 %v8666_v62, %v8699_v60  ;;  %v8604_v4 = vmax.f32 %v8540_v13, %v14263_v50  ;;  %v2944_v19 = vmax.f32 %v14133_v42, 0.0  ;;  %v8830_v5 = vld [vmem:[#allocation4 + $0xca] sm:$0xff] }
 0x9e6   : > { %7446 = vst.msk [vmem:[#allocation6 + $0x98] sm:$0xff] %vm7426_vm12, %v7369_v38  ;;  %v8605_v32 = vmax.f32 %v8541_v63, %v14283_v28  ;;  %v15007_v15 = vmax.f32 %v14103_v34, 0.0  ;;  %v15008_v48 = vmax.f32 %v14111_v3, 0.0  ;;  %v8858_v37 = vmax.f32 %v8794_v46, %v8826_v9  ;;  %v8767_v63 = vld [vmem:[#allocation4 + $0xd9] sm:$0xff]  ;;  %v14324_v38 = vld [vmem:[#allocation4 + $0xe1] sm:$0xff] }
 0x9e7   : > { %v8732_v36 = vmax.f32 %v8667_v44, %v8700_v41  ;;  %v8606_v60 = vmax.f32 %v8542_v40, %v8765_v56  ;;  %10310 = vmatprep.mubr.msk.f32.mxu1 %vm371_vm1, %v8857_v43  ;;  %v8795_v57 = vmax.f32 %v8731_v2, %v14263_v50  ;;  %v8668_v17 = vmax.f32 %v8604_v4, %v14273_v1  ;;  %v8703_v41 = vld [vmem:[#allocation4 + $0xd8] sm:$0xff] }
 0x9e8   : > { %9339 = vrot.lane.b32.xlu1 %v15007_v15, %s10483_s28  ;;  %9337 = vrot.lane.b32.xlu0 %v15008_v48, %s10483_s28  ;;  %v8669_v45 = vmax.f32 %v8605_v32, %v8828_v30  ;;  %v8479_v61 = vmax.f32 %v8415_v31, %v8828_v30  ;;  %v7753_v21 = vpop.permute.xlu1 %7752  ;;  %v7562_v49 = vpop.permute.xlu0 %7561  ;;  %v8416_v20 = vmax.f32 %v14285_v6, %v8765_v56  ;;  %v2943_v54 = vmax.f32 %v14137_v24, 0.0  ;;  %v8831_v31 = vld [vmem:[#allocation4 + $0xda] sm:$0xff]  ;;  %v8705_v15 = vld [vmem:[#allocation4 + $0xf0] sm:$0xff] }
 0x9e9   : > { %v7862_v34 = vld [vmem:[#allocation6 + $0x88] sm:$0xff]  ;;  %10311 = vmatmul.mubr.msk.f32.gmra.mxu1 %vm371_vm1, %v8858_v37  ;;  %v8796_v3 = vmax.f32 %v8732_v36, %v14283_v28  ;;  %v8670_v9 = vmax.f32 %v8606_v60, %v8829_v27  ;;  %v8417_v52 = vmax.f32 %v8702_v55, %v8766_v11  ;;  %7831 = vst.msk [vmem:[#allocation6 + $0x90] sm:$0xff] %vm7812_vm14, %v7753_v21  ;;  %v8704_v28 = vld [vmem:[#allocation4 + $0xe0] sm:$0xff]  ;;  %v2914_v48 = vpop.f32.mrf.mxu1 }
 0x9ea   : > { %7639 = vst.msk [vmem:[#allocation6 + $0x98] sm:$0xff] %vm7619_vm13, %v7562_v49  ;;  %10273 = vmatmul.mubr.msk.f32.gmra.mxu0 %vm7891_vm15, %v7862_v34  ;;  %v8859_v50 = vmax.f32 %v8795_v57, %v14273_v1  ;;  %v8733_v62 = vmax.f32 %v8668_v17, %v14285_v6  ;;  %v8734_v13 = vmax.f32 %v8669_v45, %v8702_v55  ;;  %v8706_v60 = vld [vmem:[#allocation4 + $0xf8] sm:$0xff]  ;;  %v2946_v17 = vmax.f32 %v14141_v8, 0.0 }
 0x9eb   : > { %v8543_v22 = vmax.f32 %v8479_v61, %v8702_v55  ;;  %v8860_v46 = vmax.f32 %v8796_v3, %v8828_v30  ;;  %v8735_v1 = vmax.f32 %v8670_v9, %v8703_v41  ;;  %v8480_v44 = vmax.f32 %v8416_v20, %v8829_v27  ;;  %v14340_v57 = vld [vmem:[#allocation4 + $0xf9] sm:$0xff] }
 0x9ec   : > { %9343 = vrot.lane.b32.xlu1 %v2940_v51, %s10483_s28  ;;  %9341 = vrot.lane.b32.xlu0 %v2939_v0, %s10483_s28  ;;  %v8797_v6 = vmax.f32 %v8733_v62, %v8765_v56  ;;  %v8798_v40 = vmax.f32 %v8734_v13, %v8766_v11  ;;  %v8481_v2 = vmax.f32 %v8417_v52, %v8830_v5  ;;  %v7371_v4 = vpop.permute.xlu1 %7370  ;;  %v7755_v32 = vpop.permute.xlu0 %7754  ;;  %v8832_v51 = vld [vmem:[#allocation4 + $0xe2] sm:$0xff]  ;;  %v8833_v49 = vld [vmem:[#allocation4 + $0xf2] sm:$0xff]  ;;  %v2945_v52 = vmax.f32 %v14151_v47, 0.0 }
 0x9ed   : > { %10313 = vmatprep.mubr.msk.f32.mxu1 %vm371_vm1, %v8859_v50  ;;  %v8607_v43 = vmax.f32 %v8543_v22, %v8766_v11  ;;  %v8799_v14 = vmax.f32 %v8735_v1, %v8767_v63  ;;  %v8544_v55 = vmax.f32 %v8480_v44, %v8703_v41  ;;  %v8418_v0 = vmax.f32 %v8703_v41, %v8767_v63  ;;  %v8707_v62 = vld [vmem:[#allocation4 + $0x108] sm:$0xff] }
 0x9ee   : > { %10314 = vmatmul.mubr.msk.f32.gmra.mxu1 %vm371_vm1, %v8860_v46  ;;  %v8419_v30 = vmax.f32 %v8704_v28, %v14324_v38  ;;  %7447 = vst.msk [vmem:[#allocation6 + $0xa0] sm:$0xff] %vm7426_vm12, %v7371_v4  ;;  %v8861_v56 = vmax.f32 %v8797_v6, %v8829_v27  ;;  %v8862_v11 = vmax.f32 %v8798_v40, %v8830_v5  ;;  %v14363_v13 = vld [vmem:[#allocation4 + $0x109] sm:$0xff]  ;;  %v2948_v22 = vmax.f32 %v14157_v35, 0.0 }
 0x9ef   : > { %7832 = vst.msk [vmem:[#allocation6 + $0x98] sm:$0xff] %vm7812_vm14, %v7755_v32  ;;  %v8671_v37 = vmax.f32 %v8607_v43, %v8830_v5  ;;  %v8545_v36 = vmax.f32 %v8481_v2, %v8704_v28  ;;  %v8863_v45 = vmax.f32 %v8799_v14, %v8831_v31  ;;  %v8608_v61 = vmax.f32 %v8544_v55, %v8767_v63  ;;  %v8708_v46 = vld [vmem:[#allocation4 + $0x110] sm:$0xff]  ;;  %v8709_v55 = vld [vmem:[#allocation4 + $0x120] sm:$0xff] }
 0x9f0   : > { %9347 = vrot.lane.b32.xlu1 %v2942_v58, %s10483_s28  ;;  %9345 = vrot.lane.b32.xlu0 %v2941_v12, %s10483_s28  ;;  %v8482_v21 = vmax.f32 %v8418_v0, %v8831_v31  ;;  %v8483_v3 = vmax.f32 %v8419_v30, %v8832_v51  ;;  %v8420_v8 = vmax.f32 %v8705_v15, %v14335_v25  ;;  %v7564_v23 = vpop.permute.xlu1 %7563  ;;  %v7373_v58 = vpop.permute.xlu0 %7372  ;;  %v7863_v9 = vld [vmem:[#allocation6 + $0x90] sm:$0xff]  ;;  %v8835_v2 = vld [vmem:[#allocation4 + $0x10a] sm:$0xff]  ;;  %v2950_v0 = vmax.f32 %v14170_v33, 0.0 }
 0x9f1   : > { %10316 = vmatprep.mubr.msk.f32.mxu1 %vm371_vm1, %v8861_v56  ;;  %v8736_v27 = vmax.f32 %v8671_v37, %v8704_v28  ;;  %v8609_v34 = vmax.f32 %v8545_v36, %v14324_v38  ;;  %v14353_v5 = vadd.f32 %v14014_v10, %v2914_v48  ;;  %v8672_v16 = vmax.f32 %v8608_v61, %v8831_v31  ;;  %v8834_v12 = vld [vmem:[#allocation4 + $0xfa] sm:$0xff]  ;;  %v8710_v56 = vld [vmem:[#allocation4 + $0x128] sm:$0xff] }
 0x9f2   : > { %10317 = vmatmul.mubr.msk.f32.gmra.mxu1 %vm371_vm1, %v8862_v11  ;;  %v8546_v41 = vmax.f32 %v8482_v21, %v8705_v15  ;;  %v8421_v20 = vmax.f32 %v8706_v60, %v14340_v57  ;;  %7640 = vst.msk [vmem:[#allocation6 + $0xa0] sm:$0xff] %vm7619_vm13, %v7564_v23  ;;  %10275 = vmatprep.mubr.msk.f32.mxu0 %vm7891_vm15, %v7863_v9  ;;  %v8774_v11 = vld [vmem:[#allocation4 + $0x129] sm:$0xff]  ;;  %v8711_v9 = vld [vmem:[#allocation4 + $0x138] sm:$0xff] }
 0x9f3   : > { %7448 = vst.msk [vmem:[#allocation6 + $0xa8] sm:$0xff] %vm7426_vm12, %v7373_v58  ;;  %10319 = vmatprep.mubr.msk.f32.mxu1 %vm371_vm1, %v8863_v45  ;;  %v8800_v10 = vmax.f32 %v8736_v27, %v14324_v38  ;;  %v8673_v50 = vmax.f32 %v8609_v34, %v8832_v51  ;;  %v8547_v63 = vmax.f32 %v8483_v3, %v8706_v60  ;;  %v8837_v27 = vld [vmem:[#allocation4 + $0x122] sm:$0xff]  ;;  %v14394_v23 = vld [vmem:[#allocation4 + $0x12a] sm:$0xff] }
 0x9f4   : > { %9351 = vrot.lane.b32.xlu1 %v2944_v19, %s10483_s28  ;;  %9349 = vrot.lane.b32.xlu0 %v2943_v54, %s10483_s28  ;;  %v8737_v47 = vmax.f32 %v8672_v16, %v8705_v15  ;;  %v8610_v28 = vmax.f32 %v8546_v41, %v14335_v25  ;;  %v8484_v38 = vmax.f32 %v8420_v8, %v8833_v49  ;;  %v7757_v31 = vpop.permute.xlu1 %7756  ;;  %v7566_v35 = vpop.permute.xlu0 %7565  ;;  %v2947_v54 = vmax.f32 %v14161_v53, 0.0  ;;  %v14382_v15 = vld [vmem:[#allocation4 + $0x121] sm:$0xff]  ;;  %v14396_v16 = vld [vmem:[#allocation4 + $0x139] sm:$0xff] }
 0x9f5   : > { %v8864_v1 = vmax.f32 %v8800_v10, %v8832_v51  ;;  %v8738_v44 = vmax.f32 %v8673_v50, %v8706_v60  ;;  %v8611_v6 = vmax.f32 %v8547_v63, %v14340_v57  ;;  %v8485_v40 = vmax.f32 %v8421_v20, %v8834_v12  ;;  %7833 = vst.msk [vmem:[#allocation6 + $0xa0] sm:$0xff] %vm7812_vm14, %v7757_v31  ;;  %v8772_v51 = vld [vmem:[#allocation4 + $0x111] sm:$0xff]  ;;  %v8712_v63 = vld [vmem:[#allocation4 + $0x140] sm:$0xff] }
 0x9f6   : > { %v7864_v43 = vld [vmem:[#allocation6 + $0x98] sm:$0xff]  ;;  %v8801_v42 = vmax.f32 %v8737_v47, %v14335_v25  ;;  %v8674_v19 = vmax.f32 %v8610_v28, %v8833_v49  ;;  %v8548_v4 = vmax.f32 %v8484_v38, %v8707_v62  ;;  %v8422_v24 = vmax.f32 %v8707_v62, %v14363_v13  ;;  %7641 = vst.msk [vmem:[#allocation6 + $0xa8] sm:$0xff] %vm7619_vm13, %v7566_v35  ;;  %v8836_v60 = vld [vmem:[#allocation4 + $0x112] sm:$0xff] }
 0x9f7   : > { %10276 = vmatmul.mubr.msk.f32.gmra.mxu0 %vm7891_vm15, %v7864_v43  ;;  %10320 = vmatmul.mubr.msk.f32.gmra.mxu1 %vm371_vm1, %v8864_v1  ;;  %v8802_v32 = vmax.f32 %v8738_v44, %v14340_v57  ;;  %v8675_v14 = vmax.f32 %v8611_v6, %v8834_v12  ;;  %v8549_v25 = vmax.f32 %v8485_v40, %v8708_v46  ;;  %v2949_v41 = vmax.f32 %v14174_v26, 0.0  ;;  %v8839_v1 = vld [vmem:[#allocation4 + $0x13a] sm:$0xff] }
 0x9f8   : > { %9355 = vrot.lane.b32.xlu1 %v2946_v17, %s10483_s28  ;;  %9353 = vrot.lane.b32.xlu0 %v2945_v52, %s10483_s28  ;;  %v8865_v53 = vmax.f32 %v8801_v42, %v8833_v49  ;;  %v8739_v30 = vmax.f32 %v8674_v19, %v8707_v62  ;;  %v8612_v48 = vmax.f32 %v8548_v4, %v14363_v13  ;;  %v7375_v61 = vpop.permute.xlu1 %7374  ;;  %v7759_v21 = vpop.permute.xlu0 %7758  ;;  %v2952_v40 = vmax.f32 %v14178_v7, 0.0  ;;  %v14411_v43 = vld [vmem:[#allocation4 + $0x141] sm:$0xff]  ;;  %v8713_v19 = vld [vmem:[#allocation4 + $0x150] sm:$0xff] }
 0x9f9   : > { %v8866_v37 = vmax.f32 %v8802_v32, %v8834_v12  ;;  %v8740_v36 = vmax.f32 %v8675_v14, %v8708_v46  ;;  %v8613_v57 = vmax.f32 %v8549_v25, %v8772_v51  ;;  %v8486_v45 = vmax.f32 %v8422_v24, %v8835_v2  ;;  %7449 = vst.msk [vmem:[#allocation6 + $0xb0] sm:$0xff] %vm7426_vm12, %v7375_v61 }
 0x9fa   : > { %10322 = vmatprep.mubr.msk.f32.mxu1 %vm371_vm1, %v8865_v53  ;;  %v8803_v33 = vmax.f32 %v8739_v30, %v14363_v13  ;;  %v8676_v17 = vmax.f32 %v8612_v48, %v8835_v2  ;;  %v8423_v34 = vmax.f32 %v8708_v46, %v8772_v51  ;;  %v8424_v49 = vmax.f32 %v8709_v55, %v14382_v15 }
 0x9fb   : > { %7834 = vst.msk [vmem:[#allocation6 + $0xa8] sm:$0xff] %vm7812_vm14, %v7759_v21  ;;  %10323 = vmatmul.mubr.msk.f32.gmra.mxu1 %vm371_vm1, %v8866_v37  ;;  %v8804_v3 = vmax.f32 %v8740_v36, %v8772_v51  ;;  %v8677_v8 = vmax.f32 %v8613_v57, %v8836_v60  ;;  %v8550_v58 = vmax.f32 %v8486_v45, %v8709_v55  ;;  %v2951_v4 = vmax.f32 %v14181_v59, 0.0  ;;  %v8840_v51 = vld [vmem:[#allocation4 + $0x142] sm:$0xff]  ;;  %v8714_v57 = vld [vmem:[#allocation4 + $0x158] sm:$0xff] }
 0x9fc   : > { %v8425_v12 = vmax.f32 %v8710_v56, %v8774_v11  ;;  %9359 = vrot.lane.b32.xlu1 %v2948_v22, %s10483_s28  ;;  %9357 = vrot.lane.b32.xlu0 %v2947_v54, %s10483_s28  ;;  %v8867_v20 = vmax.f32 %v8803_v33, %v8835_v2  ;;  %v8741_v52 = vmax.f32 %v8676_v17, %v8709_v55  ;;  %v7568_v28 = vpop.permute.xlu1 %7567  ;;  %v7865_v38 = vld [vmem:[#allocation6 + $0xa0] sm:$0xff]  ;;  %v2954_v37 = vmax.f32 %v14243_v29, 0.0  ;;  %v8778_v45 = vld [vmem:[#allocation4 + $0x159] sm:$0xff]  ;;  %v8715_v17 = vld [vmem:[#allocation4 + $0x168] sm:$0xff] }
 0x9fd   : > { %v8487_v10 = vmax.f32 %v8423_v34, %v8836_v60  ;;  %v8868_v50 = vmax.f32 %v8804_v3, %v8836_v60  ;;  %v8742_v62 = vmax.f32 %v8677_v8, %v8710_v56  ;;  %v8614_v13 = vmax.f32 %v8550_v58, %v14382_v15  ;;  %v7377_v46 = vpop.permute.xlu0 %7376  ;;  %7642 = vst.msk [vmem:[#allocation6 + $0xb0] sm:$0xff] %vm7619_vm13, %v7568_v28  ;;  %v14413_v2 = vld [vmem:[#allocation4 + $0x151] sm:$0xff] }
 0x9fe   : > { %v8488_v47 = vmax.f32 %v8424_v49, %v8837_v27  ;;  %10325 = vmatprep.mubr.msk.f32.mxu1 %vm371_vm1, %v8867_v20  ;;  %v8805_v26 = vmax.f32 %v8741_v52, %v14382_v15  ;;  %v8489_v44 = vmax.f32 %v8425_v12, %v14394_v23  ;;  %v8426_v6 = vmax.f32 %v8711_v9, %v14396_v16 }
 0x9ff   : > { %v8551_v22 = vmax.f32 %v8487_v10, %v8710_v56  ;;  %7450 = vst.msk [vmem:[#allocation6 + $0xb8] sm:$0xff] %vm7426_vm12, %v7377_v46  ;;  %10278 = vmatprep.mubr.msk.f32.mxu0 %vm7891_vm15, %v7865_v38  ;;  %10326 = vmatmul.mubr.msk.f32.gmra.mxu1 %vm371_vm1, %v8868_v50  ;;  %v8806_v31 = vmax.f32 %v8742_v62, %v8774_v11  ;;  %v2953_v21 = vmax.f32 %v14353_v5, 0.0  ;;  %v8842_v5 = vld [vmem:[#allocation4 + $0x15a] sm:$0xff]  ;;  %v8843_v50 = vld [vmem:[#allocation4 + $0x16a] sm:$0xff] }
 0xa00   : > { %v8678_v35 = vmax.f32 %v8614_v13, %v8837_v27  ;;  %v8552_v42 = vmax.f32 %v8488_v47, %v8711_v9  ;;  %9363 = vrot.lane.b32.xlu1 %v2950_v0, %s10483_s28  ;;  %9361 = vrot.lane.b32.xlu0 %v2949_v41, %s10483_s28  ;;  %v8869_v7 = vmax.f32 %v8805_v26, %v8837_v27  ;;  %v7761_v25 = vpop.permute.xlu1 %7760  ;;  %v8841_v0 = vld [vmem:[#allocation4 + $0x152] sm:$0xff]  ;;  %v8779_v27 = vld [vmem:[#allocation4 + $0x169] sm:$0xff] }
 0xa01   : > { %v8615_v24 = vmax.f32 %v8551_v22, %v8774_v11  ;;  %v8553_v54 = vmax.f32 %v8489_v44, %v8712_v63  ;;  %v8870_v32 = vmax.f32 %v8806_v31, %v14394_v23  ;;  %v8490_v15 = vmax.f32 %v8426_v6, %v8839_v1  ;;  %v7570_v53 = vpop.permute.xlu0 %7569  ;;  %7835 = vst.msk [vmem:[#allocation6 + $0xb0] sm:$0xff] %vm7812_vm14, %v7761_v25  ;;  %v8716_v62 = vld [vmem:[#allocation4 + $0x170] sm:$0xff]  ;;  %v8717_v6 = vld [vmem:[#allocation4 + $0x180] sm:$0xff] }
 0xa02   : > { %v8743_v14 = vmax.f32 %v8678_v35, %v8711_v9  ;;  %v8616_v55 = vmax.f32 %v8552_v42, %v14396_v16  ;;  %v7866_v30 = vld [vmem:[#allocation6 + $0xa8] sm:$0xff]  ;;  %10328 = vmatprep.mubr.msk.f32.mxu1 %vm371_vm1, %v8869_v7  ;;  %v8427_v56 = vmax.f32 %v8712_v63, %v14411_v43  ;;  %v8428_v11 = vmax.f32 %v8713_v19, %v14413_v2 }
 0xa03   : > { %v8679_v59 = vmax.f32 %v8615_v24, %v14394_v23  ;;  %v8617_v48 = vmax.f32 %v8553_v54, %v14411_v43  ;;  %7643 = vst.msk [vmem:[#allocation6 + $0xb8] sm:$0xff] %vm7619_vm13, %v7570_v53  ;;  %10279 = vmatmul.mubr.msk.f32.gmra.mxu0 %vm7891_vm15, %v7866_v30  ;;  %10329 = vmatmul.mubr.msk.f32.gmra.mxu1 %vm371_vm1, %v8870_v32  ;;  %v8780_v13 = vld [vmem:[#allocation4 + $0x171] sm:$0xff]  ;;  %v8781_v54 = vld [vmem:[#allocation4 + $0x181] sm:$0xff] }
 0xa04   : > { %v8807_v36 = vmax.f32 %v8743_v14, %v14396_v16  ;;  %v8680_v60 = vmax.f32 %v8616_v55, %v8839_v1  ;;  %v8554_v61 = vmax.f32 %v8490_v15, %v8713_v19  ;;  %9367 = vrot.lane.b32.xlu1 %v2952_v40, %s10483_s28  ;;  %9365 = vrot.lane.b32.xlu0 %v2951_v4, %s10483_s28  ;;  %v7379_v58 = vpop.permute.xlu1 %7378  ;;  %v8844_v22 = vld [vmem:[#allocation4 + $0x172] sm:$0xff]  ;;  %v8718_v14 = vld [vmem:[#allocation4 + $0x188] sm:$0xff] }
 0xa05   : > { %v8744_v29 = vmax.f32 %v8679_v59, %v8712_v63  ;;  %v8681_v33 = vmax.f32 %v8617_v48, %v8840_v51  ;;  %v8491_v34 = vmax.f32 %v8427_v56, %v8840_v51  ;;  %v8492_v23 = vmax.f32 %v8428_v11, %v8841_v0  ;;  %v7763_v9 = vpop.permute.xlu0 %7762  ;;  %7451 = vst.msk [vmem:[#allocation6 + $0xc0] sm:$0xff] %vm7426_vm12, %v7379_v58  ;;  %v8845_v30 = vld [vmem:[#allocation4 + $0x182] sm:$0xff] }
 0xa06   : > { %v8871_v49 = vmax.f32 %v8807_v36, %v8839_v1  ;;  %v8745_v3 = vmax.f32 %v8680_v60, %v8713_v19  ;;  %v8618_v8 = vmax.f32 %v8554_v61, %v14413_v2  ;;  %v8429_v20 = vmax.f32 %v8714_v57, %v8778_v45  ;;  %7836 = vst.msk [vmem:[#allocation6 + $0xb8] sm:$0xff] %vm7812_vm14, %v7763_v9  ;;  %v8846_v61 = vld [vmem:[#allocation4 + $0x18a] sm:$0xff] }
 0xa07   : > { %v8808_v16 = vmax.f32 %v8744_v29, %v14411_v43  ;;  %v8746_v12 = vmax.f32 %v8681_v33, %v8714_v57  ;;  %v8555_v41 = vmax.f32 %v8491_v34, %v8714_v57  ;;  %v8556_v63 = vmax.f32 %v8492_v23, %v8715_v17 }
 0xa08   : > { %10331 = vmatprep.mubr.msk.f32.mxu1 %vm371_vm1, %v8871_v49  ;;  %v8809_v52 = vmax.f32 %v8745_v3, %v14413_v2  ;;  %v8682_v10 = vmax.f32 %v8618_v8, %v8841_v0  ;;  %v8430_v47 = vmax.f32 %v8715_v17, %v8779_v27  ;;  %9371 = vrot.lane.b32.xlu1 %v2954_v37, %s10483_s28  ;;  %v7572_v31 = vpop.permute.xlu1 %7571  ;;  %v7867_v43 = vld [vmem:[#allocation6 + $0xb0] sm:$0xff] }
 0xa09   : > { %9369 = vrot.lane.b32.xlu0 %v2953_v21, %s10483_s28  ;;  %v8872_v28 = vmax.f32 %v8808_v16, %v8840_v51  ;;  %v8810_v46 = vmax.f32 %v8746_v12, %v8778_v45  ;;  %v8619_v38 = vmax.f32 %v8555_v41, %v8778_v45  ;;  %v8620_v44 = vmax.f32 %v8556_v63, %v8779_v27  ;;  %v7381_v35 = vpop.permute.xlu0 %7380  ;;  %v8719_v21 = vld [vmem:[#allocation4 + $0x198] sm:$0xff]  ;;  %v8720_v3 = vld [vmem:[#allocation4 + $0x1a0] sm:$0xff]  ;;  %s10509_s28 = smov [#allocation7]  }
 0xa0a   : > { %v8873_v26 = vmax.f32 %v8809_v52, %v8841_v0  ;;  %v8747_v1 = vmax.f32 %v8682_v10, %v8715_v17  ;;  %v8493_v40 = vmax.f32 %v8429_v20, %v8842_v5  ;;  %v8494_v2 = vmax.f32 %v8430_v47, %v8843_v50  ;;  %7644 = vst.msk [vmem:[#allocation6 + $0xc0] sm:$0xff] %vm7619_vm13, %v7572_v31  ;;  %v8782_v0 = vld [vmem:[#allocation4 + $0x189] sm:$0xff]  ;;  %v8783_v49 = vld [vmem:[#allocation4 + $0x199] sm:$0xff]  ;;  %s10423_s29 = sshll.u32 %s10509_s28, 4  ;;  %s10424_s29 = int_to_ptr.vmem [resolvable:$false] %s10423_s29 }
 0xa0b   : > { %10332 = vmatmul.mubr.msk.f32.gmra.mxu1 %vm371_vm1, %v8872_v28  ;;  %v8874_v42 = vmax.f32 %v8810_v46, %v8842_v5  ;;  %v8683_v19 = vmax.f32 %v8619_v38, %v8842_v5  ;;  %v8431_v4 = vmax.f32 %v8716_v62, %v8780_v13  ;;  %7452 = vst.msk [vmem:[#allocation6 + $0xc8] sm:$0xff] %vm7426_vm12, %v7381_v35  ;;  %v8847_v12 = vld [vmem:[#allocation4 + $0x19a] sm:$0xff]  ;;  %v8848_v10 = vld [vmem:[#allocation4 + $0x1a2] sm:$0xff]  ;;  %s10425_s23 = scalar_lea.vmem %s10424_s29, 8192 }
 0xa0c   : > { %10281 = vmatprep.mubr.msk.f32.mxu0 %vm7891_vm15, %v7867_v43  ;;  %10334 = vmatprep.mubr.msk.f32.mxu1 %vm371_vm1, %v8873_v26  ;;  %v8811_v7 = vmax.f32 %v8747_v1, %v8779_v27  ;;  %v8684_v24 = vmax.f32 %v8620_v44, %v8843_v50  ;;  %v8557_v32 = vmax.f32 %v8493_v40, %v8716_v62  ;;  %v7765_v48 = vpop.permute.xlu1 %7764  ;;  %v8784_v5 = vld [vmem:[#allocation4 + $0x1a1] sm:$0xff] }
 0xa0d   : > { %v8748_v51 = vmax.f32 %v8683_v19, %v8716_v62  ;;  %v8558_v55 = vmax.f32 %v8494_v2, %v8717_v6  ;;  %v8495_v15 = vmax.f32 %v8431_v4, %v8844_v22  ;;  %v7574_v56 = vpop.permute.xlu0 %7573  ;;  %v7868_v11 = vld [vmem:[#allocation6 + $0xb8] sm:$0xff]  ;;  %7837 = vst.msk [vmem:[#allocation6 + $0xc0] sm:$0xff] %vm7812_vm14, %v7765_v48 }
 0xa0e   : > { %v8875_v25 = vmax.f32 %v8811_v7, %v8843_v50  ;;  %v8749_v53 = vmax.f32 %v8684_v24, %v8717_v6  ;;  %v8621_v59 = vmax.f32 %v8557_v32, %v8780_v13  ;;  %7645 = vst.msk [vmem:[#allocation6 + $0xc8] sm:$0xff] %vm7619_vm13, %v7574_v56  ;;  %10282 = vmatmul.mubr.msk.f32.gmra.mxu0 %vm7891_vm15, %v7868_v11 }
 0xa0f   : > { %10335 = vmatmul.mubr.msk.f32.gmra.mxu1 %vm371_vm1, %v8874_v42  ;;  %v8812_v37 = vmax.f32 %v8748_v51, %v8780_v13  ;;  %v8622_v36 = vmax.f32 %v8558_v55, %v8781_v54  ;;  %v8559_v60 = vmax.f32 %v8495_v15, %v8718_v14 }
 0xa10   : > { %10337 = vmatprep.mubr.msk.f32.mxu1 %vm371_vm1, %v8875_v25  ;;  %v8813_v57 = vmax.f32 %v8749_v53, %v8781_v54  ;;  %v8685_v45 = vmax.f32 %v8621_v59, %v8844_v22  ;;  %v7383_v8 = vpop.permute.xlu1 %7382 }
 0xa11   : > { %v8876_v29 = vmax.f32 %v8812_v37, %v8844_v22  ;;  %v8686_v33 = vmax.f32 %v8622_v36, %v8845_v30  ;;  %v8623_v17 = vmax.f32 %v8559_v60, %v8782_v0  ;;  %v7767_v23 = vpop.permute.xlu0 %7766  ;;  %7453 = vst.msk [vmem:[#allocation6 + $0xd0] sm:$0xff] %vm7426_vm12, %v7383_v8  ;;  %v14506_v37 = vld [vmem:[%s14927_s6] ss:$0 sm:$0xff] }
 0xa12   : > { %v8877_v27 = vmax.f32 %v8813_v57, %v8845_v30  ;;  %v8750_v34 = vmax.f32 %v8685_v45, %v8718_v14  ;;  %7838 = vst.msk [vmem:[#allocation6 + $0xc8] sm:$0xff] %vm7812_vm14, %v7767_v23 }
 0xa13   : > { %10338 = vmatmul.mubr.msk.f32.gmra.mxu1 %vm371_vm1, %v8876_v29  ;;  %v8751_v58 = vmax.f32 %v8686_v33, %v8719_v21  ;;  %v8687_v9 = vmax.f32 %v8623_v17, %v8846_v61 }
 0xa14   : > { %10340 = vmatprep.mubr.msk.f32.mxu1 %vm371_vm1, %v8877_v27  ;;  %v8814_v16 = vmax.f32 %v8750_v34, %v8782_v0  ;;  %v7576_v50 = vpop.permute.xlu1 %7575  ;;  %v7869_v13 = vld [vmem:[#allocation6 + $0xc0] sm:$0xff] }
 0xa15   : > { %v8815_v41 = vmax.f32 %v8751_v58, %v8783_v49  ;;  %v8752_v20 = vmax.f32 %v8687_v9, %v8720_v3  ;;  %v7385_v62 = vpop.permute.xlu0 %7384  ;;  %7646 = vst.msk [vmem:[#allocation6 + $0xd0] sm:$0xff] %vm7619_vm13, %v7576_v50  ;;  %10284 = vmatprep.mubr.msk.f32.mxu0 %vm7891_vm15, %v7869_v13 }
 0xa16   : > { %v8878_v52 = vmax.f32 %v8814_v16, %v8846_v61  ;;  %7454 = vst.msk [vmem:[#allocation6 + $0xd8] sm:$0xff] %vm7426_vm12, %v7385_v62 }
 0xa17   : > { %v8879_v63 = vmax.f32 %v8815_v41, %v8847_v12  ;;  %v8816_v47 = vmax.f32 %v8752_v20, %v8784_v5 }
 0xa18   : > { %10341 = vmatmul.mubr.msk.f32.gmra.mxu1 %vm371_vm1, %v8878_v52  ;;  %v7769_v46 = vpop.permute.xlu1 %7768 }
 0xa19   : > { %10343 = vmatprep.mubr.msk.f32.mxu1 %vm371_vm1, %v8879_v63  ;;  %v8880_v28 = vmax.f32 %v8816_v47, %v8848_v10  ;;  %v7578_v38 = vpop.permute.xlu0 %7577  ;;  %v7870_v26 = vld [vmem:[#allocation6 + $0xc8] sm:$0xff]  ;;  %7839 = vst.msk [vmem:[#allocation6 + $0xd0] sm:$0xff] %vm7812_vm14, %v7769_v46 }
 0xa1a   : > { %7647 = vst.msk [vmem:[#allocation6 + $0xd8] sm:$0xff] %vm7619_vm13, %v7578_v38  ;;  %10285 = vmatmul.mubr.msk.f32.gmra.mxu0 %vm7891_vm15, %v7870_v26 }
 0xa1c   : > { %10344 = vmatmul.mubr.msk.f32.gmra.mxu1 %vm371_vm1, %v8880_v28  ;;  %v7196_v1 = vpop.permute.xlu1 %7195 }
 0xa1d   : > { %v7771_v22 = vpop.permute.xlu0 %7770  ;;  %7263 = vst.msk [vmem:[#allocation6 + $0xe8] sm:$0xff] %vm7233_vm11, %v7196_v1 }
 0xa1e   : > { %7840 = vst.msk [vmem:[#allocation6 + $0xd8] sm:$0xff] %vm7812_vm14, %v7771_v22 }
 0xa20   : > { %v7389_v44 = vpop.permute.xlu1 %7388  ;;  %v7871_v40 = vld [vmem:[#allocation6 + $0xd0] sm:$0xff] }
 0xa21   : > { %v7387_v6 = vpop.permute.xlu0 %7386  ;;  %7456 = vst.msk [vmem:[#allocation6 + $0xe8] sm:$0xff] %vm7426_vm12, %v7389_v44  ;;  %10287 = vmatprep.mubr.msk.f32.mxu0 %vm7891_vm15, %v7871_v40 }
 0xa22   : > { %7455 = vst.msk [vmem:[#allocation6 + $0xe0] sm:$0xff] %vm7426_vm12, %v7387_v6 }
 0xa24   : > { %v7582_v31 = vpop.permute.xlu1 %7581 }
 0xa25   : > { %v7580_v35 = vpop.permute.xlu0 %7579  ;;  %v7872_v43 = vld [vmem:[#allocation6 + $0xd8] sm:$0xff]  ;;  %7649 = vst.msk [vmem:[#allocation6 + $0xe8] sm:$0xff] %vm7619_vm13, %v7582_v31 }
 0xa26   : > { %7648 = vst.msk [vmem:[#allocation6 + $0xe0] sm:$0xff] %vm7619_vm13, %v7580_v35  ;;  %10288 = vmatmul.mubr.msk.f32.gmra.mxu0 %vm7891_vm15, %v7872_v43 }
 0xa28   : > { %v7198_v42 = vpop.permute.xlu1 %7197 }
 0xa29   : > { %v7773_v19 = vpop.permute.xlu0 %7772  ;;  %7264 = vst.msk [vmem:[#allocation6 + $0xf0] sm:$0xff] %vm7233_vm11, %v7198_v42 }
 0xa2a   : > { %7841 = vst.msk [vmem:[#allocation6 + $0xe0] sm:$0xff] %vm7812_vm14, %v7773_v19 }
 0xa2c   : > { %v7200_v2 = vpop.permute.xlu1 %7199 }
 0xa2d   : > { %v7775_v4 = vpop.permute.xlu0 %7774  ;;  %7265 = vst.msk [vmem:[#allocation6 + $0xf8] sm:$0xff] %vm7233_vm11, %v7200_v2 }
 0xa2e   : > { %7842 = vst.msk [vmem:[#allocation6 + $0xe8] sm:$0xff] %vm7812_vm14, %v7775_v4 }
 0xa30   : > { %v7393_v7 = vpop.permute.xlu1 %7392 }
 0xa31   : > { %v7391_v24 = vpop.permute.xlu0 %7390  ;;  %v7873_v54 = vld [vmem:[#allocation6 + $0xe0] sm:$0xff]  ;;  %7458 = vst.msk [vmem:[#allocation6 + $0xf8] sm:$0xff] %vm7426_vm12, %v7393_v7 }
 0xa32   : > { %7457 = vst.msk [vmem:[#allocation6 + $0xf0] sm:$0xff] %vm7426_vm12, %v7391_v24  ;;  %10290 = vmatprep.mubr.msk.f32.mxu0 %vm7891_vm15, %v7873_v54 }
 0xa34   : > { %v7586_v32 = vpop.permute.xlu1 %7585 }
 0xa35   : > { %v7584_v14 = vpop.permute.xlu0 %7583  ;;  %v7874_v51 = vld [vmem:[#allocation6 + $0xe8] sm:$0xff]  ;;  %7651 = vst.msk [vmem:[#allocation6 + $0xf8] sm:$0xff] %vm7619_vm13, %v7586_v32 }
 0xa36   : > { %7650 = vst.msk [vmem:[#allocation6 + $0xf0] sm:$0xff] %vm7619_vm13, %v7584_v14  ;;  %10291 = vmatmul.mubr.msk.f32.gmra.mxu0 %vm7891_vm15, %v7874_v51 }
 0xa38   : > { %v7779_v55 = vpop.permute.xlu1 %7778 }
 0xa39   : > { %v7777_v15 = vpop.permute.xlu0 %7776  ;;  %7844 = vst.msk [vmem:[#allocation6 + $0xf8] sm:$0xff] %vm7812_vm14, %v7779_v55 }
 0xa3a   : > { %7843 = vst.msk [vmem:[#allocation6 + $0xf0] sm:$0xff] %vm7812_vm14, %v7777_v15 }
 0xa3c   : > { %v9312_v25 = vpop.permute.xlu1 %9311 }
 0xa3d   : > { %v9310_v53 = vpop.permute.xlu0 %9309  ;;  %9407 = vst.msk [vmem:[%s10906_s22 + $0x8] sm:$0xff] %vm9405_vm0, %v9312_v25 }
 0xa3e   : > { %9406 = vst.msk [vmem:[%s10906_s22] sm:$0xff] %vm9405_vm0, %v9310_v53 }
 0xa40   : > { %v9316_v30 = vpop.permute.xlu1 %9315  ;;  %v7876_v48 = vld [vmem:[#allocation6 + $0xf8] sm:$0xff] }
 0xa41   : > { %v9314_v59 = vpop.permute.xlu0 %9313  ;;  %v7875_v0 = vld [vmem:[#allocation6 + $0xf0] sm:$0xff]  ;;  %9409 = vst.msk [vmem:[%s10906_s22 + $0x18] sm:$0xff] %vm9405_vm0, %v9316_v30 }
 0xa42   : > { %9408 = vst.msk [vmem:[%s10906_s22 + $0x10] sm:$0xff] %vm9405_vm0, %v9314_v59  ;;  %10293 = vmatprep.mubr.msk.f32.mxu0 %vm7891_vm15, %v7875_v0 }
 0xa43   : > { %10294 = vmatmul.mubr.msk.f32.gmra.mxu0 %vm7891_vm15, %v7876_v48 }
 0xa44   : > { %10298 = vmatprep.mubr.msk.f32.mxu0 %vm371_vm1, %v14221_v39  ;;  %v9320_v56 = vpop.permute.xlu1 %9319 }
 0xa45   : > { %v9318_v11 = vpop.permute.xlu0 %9317  ;;  %9411 = vst.msk [vmem:[%s10906_s22 + $0x28] sm:$0xff] %vm9405_vm0, %v9320_v56 }
 0xa46   : > { %9410 = vst.msk [vmem:[%s10906_s22 + $0x20] sm:$0xff] %vm9405_vm0, %v9318_v11 }
 0xa47   : > { %10299 = vmatmul.mubr.msk.f32.vlgmr.msra.gmra.mxu0 %vm371_vm1, %v14237_v18 }
 0xa48   : > { %v9324_v36 = vpop.permute.xlu1 %9323 }
 0xa49   : > { %v9322_v60 = vpop.permute.xlu0 %9321  ;;  %9413 = vst.msk [vmem:[%s10906_s22 + $0x38] sm:$0xff] %vm9405_vm0, %v9324_v36 }
 0xa4a   : > { %9412 = vst.msk [vmem:[%s10906_s22 + $0x30] sm:$0xff] %vm9405_vm0, %v9322_v60  ;;  %v10250_v39 = vpop.f32.mrf.mxu0 }
 0xa4b   : > { %v8064_v57 = vadd.f32 %v10250_v39, %v14506_v37 }
 0xa4c   : > { %v8058_v45 = vpop.f32.mrf.mxu0  ;;  %v9328_v21 = vpop.permute.xlu1 %9327 }
 0xa4d   : > { %v8218_v61 = vmax.f32 %v8064_v57, 0.0  ;;  %v8059_v18 = vadd.f32 %v14506_v37, %v8058_v45  ;;  %v9326_v29 = vpop.permute.xlu0 %9325  ;;  %9415 = vst.msk [vmem:[%s10906_s22 + $0x48] sm:$0xff] %vm9405_vm0, %v9328_v21 }
 0xa4e   : > { %9414 = vst.msk [vmem:[%s10906_s22 + $0x40] sm:$0xff] %vm9405_vm0, %v9326_v29 }
 0xa4f   : > { %v8217_v33 = vmax.f32 %v8059_v18, 0.0  ;;  %9472 = vrot.lane.b32.xlu1 %v8218_v61, %s10488_s26 }
 0xa50   : > { %v9332_v17 = vpop.permute.xlu1 %9331 }
 0xa51   : > { %9470 = vrot.lane.b32.xlu0 %v8217_v33, %s10488_s26  ;;  %v9330_v27 = vpop.permute.xlu0 %9329  ;;  %9417 = vst.msk [vmem:[%s10906_s22 + $0x58] sm:$0xff] %vm9405_vm0, %v9332_v17 }
 0xa52   : > { %9416 = vst.msk [vmem:[%s10906_s22 + $0x50] sm:$0xff] %vm9405_vm0, %v9330_v27 }
 0xa54   : > { %v9336_v34 = vpop.permute.xlu1 %9335 }
 0xa55   : > { %v9334_v49 = vpop.permute.xlu0 %9333  ;;  %9419 = vst.msk [vmem:[%s10906_s22 + $0x68] sm:$0xff] %vm9405_vm0, %v9336_v34 }
 0xa56   : > { %9418 = vst.msk [vmem:[%s10906_s22 + $0x60] sm:$0xff] %vm9405_vm0, %v9334_v49  ;;  %v10253_v3 = vpop.f32.mrf.mxu0 }
 0xa57   : > { %v8074_v8 = vadd.f32 %v10253_v3, %v14506_v37 }
 0xa58   : > { %v8068_v23 = vpop.f32.mrf.mxu0 }
 0xa59   : > { %v8220_v58 = vmax.f32 %v8074_v8, 0.0  ;;  %v8069_v9 = vadd.f32 %v14506_v37, %v8068_v23 }
 0xa5a   : > { %v9340_v16 = vpop.permute.xlu1 %9339  ;;  %v9338_v12 = vpop.permute.xlu0 %9337 }
 0xa5b   : > { %9421 = vst.msk [vmem:[%s10906_s22 + $0x78] sm:$0xff] %vm9405_vm0, %v9340_v16  ;;  %9420 = vst.msk [vmem:[%s10906_s22 + $0x70] sm:$0xff] %vm9405_vm0, %v9338_v12  ;;  %v8219_v5 = vmax.f32 %v8069_v9, 0.0  ;;  %9476 = vrot.lane.b32.xlu1 %v8220_v58, %s10488_s26 }
 0xa5d   : > { %9474 = vrot.lane.b32.xlu0 %v8219_v5, %s10488_s26 }
 0xa5e   : > { %v9344_v41 = vpop.permute.xlu1 %9343  ;;  %v9342_v20 = vpop.permute.xlu0 %9341 }
 0xa5f   : > { %9423 = vst.msk [vmem:[%s10906_s22 + $0x88] sm:$0xff] %vm9405_vm0, %v9344_v41  ;;  %9422 = vst.msk [vmem:[%s10906_s22 + $0x80] sm:$0xff] %vm9405_vm0, %v9342_v20 }
 0xa62   : > { %v9348_v52 = vpop.permute.xlu1 %9347  ;;  %v9346_v10 = vpop.permute.xlu0 %9345 }
 0xa63   : > { %9425 = vst.msk [vmem:[%s10906_s22 + $0x98] sm:$0xff] %vm9405_vm0, %v9348_v52  ;;  %9424 = vst.msk [vmem:[%s10906_s22 + $0x90] sm:$0xff] %vm9405_vm0, %v9346_v10  ;;  %v10256_v50 = vpop.f32.mrf.mxu0 }
 0xa64   : > { %v8084_v62 = vadd.f32 %v10256_v50, %v14506_v37 }
 0xa65   : > { %v8078_v13 = vpop.f32.mrf.mxu0 }
 0xa66   : > { %v8222_v63 = vmax.f32 %v8084_v62, 0.0  ;;  %v8079_v47 = vadd.f32 %v14506_v37, %v8078_v13  ;;  %v9352_v28 = vpop.permute.xlu1 %9351  ;;  %v9350_v46 = vpop.permute.xlu0 %9349 }
 0xa67   : > { %9427 = vst.msk [vmem:[%s10906_s22 + $0xa8] sm:$0xff] %vm9405_vm0, %v9352_v28  ;;  %9426 = vst.msk [vmem:[%s10906_s22 + $0xa0] sm:$0xff] %vm9405_vm0, %v9350_v46 }
 0xa68   : > { %v8221_v38 = vmax.f32 %v8079_v47, 0.0  ;;  %9480 = vrot.lane.b32.xlu1 %v8222_v63, %s10488_s26 }
 0xa6a   : > { %v9356_v26 = vpop.permute.xlu1 %9355  ;;  %9478 = vrot.lane.b32.xlu0 %v8221_v38, %s10488_s26  ;;  %v9354_v1 = vpop.permute.xlu0 %9353 }
 0xa6b   : > { %9429 = vst.msk [vmem:[%s10906_s22 + $0xb8] sm:$0xff] %vm9405_vm0, %v9356_v26  ;;  %9428 = vst.msk [vmem:[%s10906_s22 + $0xb0] sm:$0xff] %vm9405_vm0, %v9354_v1 }
 0xa6e   : > { %v9360_v22 = vpop.permute.xlu1 %9359  ;;  %v9358_v44 = vpop.permute.xlu0 %9357 }
 0xa6f   : > { %9431 = vst.msk [vmem:[%s10906_s22 + $0xc8] sm:$0xff] %vm9405_vm0, %v9360_v22  ;;  %9430 = vst.msk [vmem:[%s10906_s22 + $0xc0] sm:$0xff] %vm9405_vm0, %v9358_v44  ;;  %v10259_v6 = vpop.f32.mrf.mxu0 }
 0xa70   : > { %v8094_v40 = vadd.f32 %v10259_v6, %v14506_v37 }
 0xa71   : > { %v8088_v31 = vpop.f32.mrf.mxu0 }
 0xa72   : > { %v8224_v35 = vmax.f32 %v8094_v40, 0.0  ;;  %v8089_v43 = vadd.f32 %v14506_v37, %v8088_v31  ;;  %v9364_v42 = vpop.permute.xlu1 %9363  ;;  %v9362_v19 = vpop.permute.xlu0 %9361 }
 0xa73   : > { %9433 = vst.msk [vmem:[%s10906_s22 + $0xd8] sm:$0xff] %vm9405_vm0, %v9364_v42  ;;  %9432 = vst.msk [vmem:[%s10906_s22 + $0xd0] sm:$0xff] %vm9405_vm0, %v9362_v19 }
 0xa74   : > { %v8223_v2 = vmax.f32 %v8089_v43, 0.0  ;;  %9484 = vrot.lane.b32.xlu1 %v8224_v35, %s10488_s26 }
 0xa76   : > { %v9368_v4 = vpop.permute.xlu1 %9367  ;;  %9482 = vrot.lane.b32.xlu0 %v8223_v2, %s10488_s26  ;;  %v9366_v7 = vpop.permute.xlu0 %9365 }
 0xa77   : > { %9435 = vst.msk [vmem:[%s10906_s22 + $0xe8] sm:$0xff] %vm9405_vm0, %v9368_v4  ;;  %9434 = vst.msk [vmem:[%s10906_s22 + $0xe0] sm:$0xff] %vm9405_vm0, %v9366_v7 }
 0xa7a   : > { %v9372_v24 = vpop.permute.xlu1 %9371  ;;  %v10262_v32 = vpop.f32.mrf.mxu0 }
 0xa7b   : > { %v9370_v54 = vpop.permute.xlu0 %9369  ;;  %9437 = vst.msk [vmem:[%s10906_s22 + $0xf8] sm:$0xff] %vm9405_vm0, %v9372_v24  ;;  %v8104_v14 = vadd.f32 %v10262_v32, %v14506_v37 }
 0xa7c   : > { %9436 = vst.msk [vmem:[%s10906_s22 + $0xf0] sm:$0xff] %vm9405_vm0, %v9370_v54  ;;  %v8098_v51 = vpop.f32.mrf.mxu0 }
 0xa7d   : > { %v8226_v55 = vmax.f32 %v8104_v14, 0.0  ;;  %v8099_v15 = vadd.f32 %v14506_v37, %v8098_v51 }
 0xa7f   : > { %v8225_v25 = vmax.f32 %v8099_v15, 0.0  ;;  %9488 = vrot.lane.b32.xlu1 %v8226_v55, %s10488_s26 }
 0xa81   : > { %9486 = vrot.lane.b32.xlu0 %v8225_v25, %s10488_s26 }
 0xa86   : > { %v10265_v53 = vpop.f32.mrf.mxu0 }
 0xa87   : > { %v8114_v30 = vadd.f32 %v10265_v53, %v14506_v37 }
 0xa88   : > { %v8108_v59 = vpop.f32.mrf.mxu0 }
 0xa89   : > { %v8228_v0 = vmax.f32 %v8114_v30, 0.0  ;;  %v8109_v48 = vadd.f32 %v14506_v37, %v8108_v59 }
 0xa8b   : > { %v8227_v56 = vmax.f32 %v8109_v48, 0.0  ;;  %9492 = vrot.lane.b32.xlu1 %v8228_v0, %s10488_s26 }
 0xa8d   : > { %9490 = vrot.lane.b32.xlu0 %v8227_v56, %s10488_s26 }
 0xa92   : > { %v10268_v11 = vpop.f32.mrf.mxu0 }
 0xa93   : > { %v8124_v36 = vadd.f32 %v10268_v11, %v14506_v37 }
 0xa94   : > { %v8118_v60 = vpop.f32.mrf.mxu0 }
 0xa95   : > { %v8230_v39 = vmax.f32 %v8124_v36, 0.0  ;;  %v8119_v57 = vadd.f32 %v14506_v37, %v8118_v60 }
 0xa97   : > { %v8229_v45 = vmax.f32 %v8119_v57, 0.0  ;;  %9496 = vrot.lane.b32.xlu1 %v8230_v39, %s10488_s26 }
 0xa99   : > { %9494 = vrot.lane.b32.xlu0 %v8229_v45, %s10488_s26 }
 0xa9a   : > { %v14608_v28 = vpop.f32.mrf.mxu1 }
 0xa9c   : > { %v14615_v44 = vpop.f32.mrf.mxu1 }
 0xa9e   : > { %v10271_v61 = vpop.f32.mrf.mxu0 }
 0xa9f   : > { %v8134_v18 = vadd.f32 %v10271_v61, %v14506_v37  ;;  %v14619_v35 = vpop.f32.mrf.mxu1 }
 0xaa0   : > { %v8128_v21 = vpop.f32.mrf.mxu0 }
 0xaa1   : > { %v8232_v29 = vmax.f32 %v8134_v18, 0.0  ;;  %v8129_v33 = vadd.f32 %v14506_v37, %v8128_v21  ;;  %v14622_v43 = vpop.f32.mrf.mxu1 }
 0xaa3   : > { %v8231_v17 = vmax.f32 %v8129_v33, 0.0  ;;  %9500 = vrot.lane.b32.xlu1 %v8232_v29, %s10488_s26 }
 0xaa4   : > { %v14629_v24 = vpop.f32.mrf.mxu1 }
 0xaa5   : > { %9498 = vrot.lane.b32.xlu0 %v8231_v17, %s10488_s26 }
 0xaa6   : > { %v14633_v51 = vpop.f32.mrf.mxu1 }
 0xaa9   : > { %v14636_v55 = vpop.f32.mrf.mxu1 }
 0xaaa   : > { %v10274_v27 = vpop.f32.mrf.mxu0 }
 0xaab   : > { %v8144_v34 = vadd.f32 %v10274_v27, %v14506_v37  ;;  %v14643_v0 = vpop.f32.mrf.mxu1 }
 0xaac   : > { %v8138_v49 = vpop.f32.mrf.mxu0 }
 0xaad   : > { %v8234_v3 = vmax.f32 %v8144_v34, 0.0  ;;  %v8139_v8 = vadd.f32 %v14506_v37, %v8138_v49 }
 0xaae   : > { %v14647_v36 = vpop.f32.mrf.mxu1 }
 0xaaf   : > { %v8233_v23 = vmax.f32 %v8139_v8, 0.0  ;;  %9504 = vrot.lane.b32.xlu1 %v8234_v3, %s10488_s26 }
 0xab0   : > { %v14650_v60 = vpop.f32.mrf.mxu1 }
 0xab1   : > { %9502 = vrot.lane.b32.xlu0 %v8233_v23, %s10488_s26 }
 0xab2   : > { %v14656_v45 = vpop.f32.mrf.mxu1 }
 0xab4   : > { %v14659_v29 = vpop.f32.mrf.mxu1 }
 0xab7   : > { %v10277_v58 = vpop.f32.mrf.mxu0  ;;  %v14663_v34 = vpop.f32.mrf.mxu1 }
 0xab8   : > { %v8154_v9 = vadd.f32 %v10277_v58, %v14506_v37 }
 0xab9   : > { %v8148_v16 = vpop.f32.mrf.mxu0  ;;  %v14670_v8 = vpop.f32.mrf.mxu1 }
 0xaba   : > { %v8236_v12 = vmax.f32 %v8154_v9, 0.0  ;;  %v8149_v5 = vadd.f32 %v14506_v37, %v8148_v16 }
 0xabb   : > { %v14673_v9 = vpop.f32.mrf.mxu1 }
 0xabc   : > { %v8235_v41 = vmax.f32 %v8149_v5, 0.0  ;;  %9508 = vrot.lane.b32.xlu1 %v8236_v12, %s10488_s26  ;;  %v14678_v12 = vld [vmem:[%s14929_s8] ss:$0 sm:$0xff] }
 0xabe   : > { %9506 = vrot.lane.b32.xlu0 %v8235_v41, %s10488_s26 }
 0xac1   : > { %v9473_v20 = vpop.permute.xlu1 %9472 }
 0xac2   : > { %9567 = vst.msk [vmem:[%s10906_s22 + $0x8] sm:$0xff] %vm1555_vm5, %v9473_v20 }
 0xac3   : > { %v10280_v52 = vpop.f32.mrf.mxu0  ;;  %v9471_v50 = vpop.permute.xlu0 %9470 }
 0xac4   : > { %v8164_v10 = vadd.f32 %v10280_v52, %v14506_v37  ;;  %9566 = vst.msk [vmem:[%s10906_s22] sm:$0xff] %vm1555_vm5, %v9471_v50  ;;  %v9070_v50 = vadd.f32 %v14608_v28, %v14678_v12  ;;  %v9080_v28 = vadd.f32 %v14619_v35, %v14678_v12 }
 0xac5   : > { %v8158_v62 = vpop.f32.mrf.mxu0 }
 0xac6   : > { %v8238_v13 = vmax.f32 %v8164_v10, 0.0  ;;  %v8159_v63 = vadd.f32 %v14506_v37, %v8158_v62  ;;  %v14685_v62 = vpop.f32.mrf.mxu1 }
 0xac8   : > { %v8237_v47 = vmax.f32 %v8159_v63, 0.0  ;;  %9512 = vrot.lane.b32.xlu1 %v8238_v13, %s10488_s26 }
 0xaca   : > { %9510 = vrot.lane.b32.xlu0 %v8237_v47, %s10488_s26 }
 0xacd   : > { %v9477_v46 = vpop.permute.xlu1 %9476 }
 0xace   : > { %9569 = vst.msk [vmem:[%s10906_s22 + $0x18] sm:$0xff] %vm1555_vm5, %v9477_v46  ;;  %v10283_v38 = vpop.f32.mrf.mxu0 }
 0xacf   : > { %v8174_v26 = vadd.f32 %v10283_v38, %v14506_v37  ;;  %v9475_v1 = vpop.permute.xlu0 %9474  ;;  %v9216_v38 = vmax.f32 %v9070_v50, 0.0 }
 0xad0   : > { %9568 = vst.msk [vmem:[%s10906_s22 + $0x10] sm:$0xff] %vm1555_vm5, %v9475_v1  ;;  %v8168_v22 = vpop.f32.mrf.mxu0  ;;  %v9065_v1 = vadd.f32 %v14678_v12, %v14615_v44  ;;  %v9090_v44 = vadd.f32 %v14629_v24, %v14678_v12 }
 0xad1   : > { %v8240_v6 = vmax.f32 %v8174_v26, 0.0  ;;  %v8169_v40 = vadd.f32 %v14506_v37, %v8168_v22  ;;  %v10327_v22 = vpop.f32.mrf.mxu1 }
 0xad2   : > { %v9220_v35 = vmax.f32 %v9090_v44, 0.0 }
 0xad3   : > { %v8239_v31 = vmax.f32 %v8169_v40, 0.0  ;;  %9516 = vrot.lane.b32.xlu1 %v8240_v6, %s10488_s26  ;;  %v9215_v6 = vmax.f32 %v9065_v1, 0.0  ;;  %v9218_v40 = vmax.f32 %v9080_v28, 0.0 }
 0xad5   : > { %9514 = vrot.lane.b32.xlu0 %v8239_v31, %s10488_s26  ;;  %v9075_v31 = vadd.f32 %v14678_v12, %v14622_v43 }
 0xada   : > { %v9481_v42 = vpop.permute.xlu1 %9480  ;;  %v10286_v19 = vpop.f32.mrf.mxu0 }
 0xadb   : > { %9571 = vst.msk [vmem:[%s10906_s22 + $0x28] sm:$0xff] %vm1555_vm5, %v9481_v42  ;;  %v8184_v2 = vadd.f32 %v10286_v19, %v14506_v37  ;;  %v9144_v42 = vpop.f32.mrf.mxu1  ;;  %v9217_v19 = vmax.f32 %v9075_v31, 0.0 }
 0xadc   : > { %v9479_v4 = vpop.permute.xlu0 %9478  ;;  %v8178_v7 = vpop.f32.mrf.mxu0 }
 0xadd   : > { %9570 = vst.msk [vmem:[%s10906_s22 + $0x20] sm:$0xff] %vm1555_vm5, %v9479_v4  ;;  %v8242_v54 = vmax.f32 %v8184_v2, 0.0  ;;  %v8179_v32 = vadd.f32 %v14506_v37, %v8178_v7  ;;  %v9085_v2 = vadd.f32 %v14678_v12, %v14633_v51  ;;  %v9100_v4 = vadd.f32 %v14636_v55, %v14678_v12  ;;  %v10330_v7 = vpop.f32.mrf.mxu1 }
 0xade   : > { %v9110_v51 = vadd.f32 %v14647_v36, %v14678_v12 }
 0xadf   : > { %v8241_v14 = vmax.f32 %v8179_v32, 0.0  ;;  %9520 = vrot.lane.b32.xlu1 %v8242_v54, %s10488_s26  ;;  %v9219_v54 = vmax.f32 %v9085_v2, 0.0  ;;  %v9222_v32 = vmax.f32 %v9100_v4, 0.0  ;;  %v9154_v55 = vpop.f32.mrf.mxu1 }
 0xae1   : > { %9518 = vrot.lane.b32.xlu0 %v8241_v14, %s10488_s26  ;;  %v9095_v14 = vadd.f32 %v14678_v12, %v14643_v0 }
 0xae6   : > { %v9485_v15 = vpop.permute.xlu1 %9484  ;;  %v10289_v25 = vpop.f32.mrf.mxu0 }
 0xae7   : > { %9573 = vst.msk [vmem:[%s10906_s22 + $0x38] sm:$0xff] %vm1555_vm5, %v9485_v15  ;;  %v8194_v53 = vadd.f32 %v10289_v25, %v14506_v37  ;;  %v9221_v15 = vmax.f32 %v9095_v14, 0.0  ;;  %v9224_v25 = vmax.f32 %v9110_v51, 0.0 }
 0xae8   : > { %v9483_v30 = vpop.permute.xlu0 %9482  ;;  %v8188_v59 = vpop.f32.mrf.mxu0 }
 0xae9   : > { %9572 = vst.msk [vmem:[%s10906_s22 + $0x30] sm:$0xff] %vm1555_vm5, %v9483_v30  ;;  %v8244_v48 = vmax.f32 %v8194_v53, 0.0  ;;  %v8189_v56 = vadd.f32 %v14506_v37, %v8188_v59  ;;  %v9105_v53 = vadd.f32 %v14678_v12, %v14650_v60  ;;  %v9120_v30 = vadd.f32 %v14656_v45, %v14678_v12  ;;  %v10333_v59 = vpop.f32.mrf.mxu1 }
 0xaeb   : > { %v8243_v11 = vmax.f32 %v8189_v56, 0.0  ;;  %9524 = vrot.lane.b32.xlu1 %v8244_v48, %s10488_s26  ;;  %v9223_v0 = vmax.f32 %v9105_v53, 0.0  ;;  %v9226_v48 = vmax.f32 %v9120_v30, 0.0  ;;  %v9115_v56 = vadd.f32 %v14678_v12, %v14659_v29  ;;  %v9164_v60 = vpop.f32.mrf.mxu1 }
 0xaed   : > { %9522 = vrot.lane.b32.xlu0 %v8243_v11, %s10488_s26  ;;  %v9130_v11 = vadd.f32 %v14663_v34, %v14678_v12 }
 0xaef   : > { %v9228_v45 = vmax.f32 %v9130_v11, 0.0 }
 0xaf1   : > { %v9489_v39 = vpop.permute.xlu1 %9488 }
 0xaf2   : > { %9575 = vst.msk [vmem:[%s10906_s22 + $0x48] sm:$0xff] %vm1555_vm5, %v9489_v39 }
 0xaf3   : > { %v9487_v57 = vpop.permute.xlu0 %9486 }
 0xaf4   : > { %9574 = vst.msk [vmem:[%s10906_s22 + $0x40] sm:$0xff] %vm1555_vm5, %v9487_v57  ;;  %v9225_v57 = vmax.f32 %v9115_v56, 0.0 }
 0xaf6   : > { %v10292_v61 = vpop.f32.mrf.mxu0 }
 0xaf7   : > { %v8204_v18 = vadd.f32 %v10292_v61, %v14506_v37  ;;  %v9125_v61 = vadd.f32 %v14678_v12, %v14670_v8  ;;  %v9145_v8 = vadd.f32 %v14678_v12, %v9144_v42 }
 0xaf8   : > { %v8198_v21 = vpop.f32.mrf.mxu0 }
 0xaf9   : > { %v8246_v33 = vmax.f32 %v8204_v18, 0.0  ;;  %v8199_v17 = vadd.f32 %v14506_v37, %v8198_v21  ;;  %v9140_v18 = vadd.f32 %v14673_v9, %v14678_v12  ;;  %v10336_v21 = vpop.f32.mrf.mxu1  ;;  %v9227_v29 = vmax.f32 %v9125_v61, 0.0 }
 0xafb   : > { %v8245_v27 = vmax.f32 %v8199_v17, 0.0  ;;  %9528 = vrot.lane.b32.xlu1 %v8246_v33, %s10488_s26  ;;  %v9230_v33 = vmax.f32 %v9140_v18, 0.0  ;;  %v9135_v17 = vadd.f32 %v14678_v12, %v14685_v62  ;;  %v9174_v34 = vpop.f32.mrf.mxu1 }
 0xafd   : > { %v9493_v49 = vpop.permute.xlu1 %9492  ;;  %9526 = vrot.lane.b32.xlu0 %v8245_v27, %s10488_s26  ;;  %v9150_v27 = vadd.f32 %v10327_v22, %v14678_v12  ;;  %v10339_v9 = vpop.f32.mrf.mxu1 }
 0xafe   : > { %9577 = vst.msk [vmem:[%s10906_s22 + $0x58] sm:$0xff] %vm1555_vm5, %v9493_v49  ;;  %v9229_v49 = vmax.f32 %v9135_v17, 0.0 }
 0xaff   : > { %v9491_v3 = vpop.permute.xlu0 %9490 }
 0xb00   : > { %9576 = vst.msk [vmem:[%s10906_s22 + $0x50] sm:$0xff] %vm1555_vm5, %v9491_v3  ;;  %v9232_v3 = vmax.f32 %v9150_v27, 0.0 }
 0xb03   : > { %v10295_v23 = vpop.f32.mrf.mxu0 }
 0xb04   : > { %v8214_v58 = vadd.f32 %v10295_v23, %v14506_v37  ;;  %v9160_v23 = vadd.f32 %v10330_v7, %v14678_v12 }
 0xb05   : > { %v8208_v16 = vpop.f32.mrf.mxu0 }
 0xb06   : > { %v8248_v5 = vmax.f32 %v8214_v58, 0.0  ;;  %v8209_v41 = vadd.f32 %v14506_v37, %v8208_v16 }
 0xb07   : > { %v10300_v20 = vpop.f32.mrf.mxu0 }
 0xb08   : > { %v8247_v52 = vmax.f32 %v8209_v41, 0.0  ;;  %v9060_v10 = vadd.f32 %v10300_v20, %v14678_v12  ;;  %9532 = vrot.lane.b32.xlu1 %v8248_v5, %s10488_s26  ;;  %v9231_v5 = vmax.f32 %v9145_v8, 0.0  ;;  %v9234_v41 = vmax.f32 %v9160_v23, 0.0 }
 0xb09   : > { %v9497_v13 = vpop.permute.xlu1 %9496  ;;  %v9054_v63 = vpop.f32.mrf.mxu0  ;;  %v9155_v20 = vadd.f32 %v14678_v12, %v9154_v55 }
 0xb0a   : > { %v9214_v47 = vmax.f32 %v9060_v10, 0.0  ;;  %9579 = vst.msk [vmem:[%s10906_s22 + $0x68] sm:$0xff] %vm1555_vm5, %v9497_v13  ;;  %v9055_v46 = vadd.f32 %v14678_v12, %v9054_v63  ;;  %9530 = vrot.lane.b32.xlu0 %v8247_v52, %s10488_s26  ;;  %v9170_v52 = vadd.f32 %v10333_v59, %v14678_v12  ;;  %v9184_v10 = vpop.f32.mrf.mxu1  ;;  %v9165_v13 = vadd.f32 %v14678_v12, %v9164_v60  ;;  %s9772_s26 = sshll.u32 %s10906_s22, 4  ;;  %s14874_s26 = int_to_ptr.vmem [resolvable:$true] %s9772_s26 }
 0xb0b   : > { %v9495_v37 = vpop.permute.xlu0 %9494  ;;  %v9233_v50 = vmax.f32 %v9155_v20, 0.0  ;;  %v9180_v63 = vadd.f32 %v10336_v21, %v14678_v12  ;;  %v9185_v31 = vadd.f32 %v14678_v12, %v9184_v10  ;;  %s10419_s17 = scalar_lea.vmem %s14874_s26, 4096  ;;  %p10426_p0 = scmp.lt.s32.totalorder %s14874_s26, %s10424_s29 }
 0xb0c   : > { %v9213_v26 = vmax.f32 %v9055_v46, 0.0  ;;  %9578 = vst.msk [vmem:[%s10906_s22 + $0x60] sm:$0xff] %vm1555_vm5, %v9495_v37  ;;  %9632 = vrot.lane.b32.xlu1 %v9214_v47, %s10486_s24  ;;  %v9236_v62 = vmax.f32 %v9170_v52, 0.0  ;;  %v10342_v47 = vpop.f32.mrf.mxu1  ;;  %v9235_v46 = vmax.f32 %v9165_v13, 0.0  ;;  %p10420_p11 = scmp.ne.s32.totalorder %s14874_s26, %s10419_s17  ;;  %p10427_p1 = scmp.lt.s32.totalorder %s10425_s23, %s10419_s17 }
 0xb0d   : > { %v9238_v37 = vmax.f32 %v9180_v63, 0.0  ;;  %v9200_v44 = vadd.f32 %v10342_v47, %v14678_v12 }
 0xb0e   : > { %9630 = vrot.lane.b32.xlu0 %v9213_v26, %s10486_s24  ;;  %v9190_v26 = vadd.f32 %v10339_v9, %v14678_v12  ;;  %v9194_v28 = vpop.f32.mrf.mxu1  ;;  %p10421_p12 = pnand %p10420_p11, %p10599_p5  ;;  %p10428_p2 = por %p10427_p1, %p10426_p0 }
 0xb0f   : > { %v9195_v2 = vadd.f32 %v14678_v12, %v9194_v28 }
 0xb10   : > { %9636 = vrot.lane.b32.xlu1 %v9216_v38, %s10486_s24  ;;  %v9175_v38 = vadd.f32 %v14678_v12, %v9174_v34  ;;  %v10345_v42 = vpop.f32.mrf.mxu1  ;;  %p10422_p13 = pneg %p10421_p12 }
 0xb11   : > { %v9210_v4 = vadd.f32 %v10345_v42, %v14678_v12  ;;  %v9241_v7 = vmax.f32 %v9195_v2, 0.0 }
 0xb12   : > { %9634 = vrot.lane.b32.xlu0 %v9215_v6, %s10486_s24  ;;  %v9237_v6 = vmax.f32 %v9175_v38, 0.0  ;;  %p10429_p3 = pnand %p10428_p2, %p10422_p13 }
 0xb14   : > { %9640 = vrot.lane.b32.xlu1 %v9218_v40, %s10486_s24  ;;  %v9240_v40 = vmax.f32 %v9190_v26, 0.0 }
 0xb15   : > { %v9501_v43 = vpop.permute.xlu1 %9500 }
 0xb16   : > { %9581 = vst.msk [vmem:[%s10906_s22 + $0x78] sm:$0xff] %vm1555_vm5, %v9501_v43  ;;  %9638 = vrot.lane.b32.xlu0 %v9217_v19, %s10486_s24  ;;  %v9239_v19 = vmax.f32 %v9185_v31, 0.0  ;;  %v9204_v43 = vpop.f32.mrf.mxu1 }
 0xb17   : > { %v9499_v24 = vpop.permute.xlu0 %9498 }
 0xb18   : > { %9580 = vst.msk [vmem:[%s10906_s22 + $0x70] sm:$0xff] %vm1555_vm5, %v9499_v24  ;;  %9644 = vrot.lane.b32.xlu1 %v9220_v35, %s10486_s24  ;;  %v9242_v35 = vmax.f32 %v9200_v44, 0.0  ;;  %v9244_v24 = vmax.f32 %v9210_v4, 0.0 }
 0xb1a   : > { %9642 = vrot.lane.b32.xlu0 %v9219_v54, %s10486_s24  ;;  %v9205_v54 = vadd.f32 %v14678_v12, %v9204_v43 }
 0xb1c   : > { %9648 = vrot.lane.b32.xlu1 %v9222_v32, %s10486_s24  ;;  %v9243_v51 = vmax.f32 %v9205_v54, 0.0 }
 0xb1e   : > { %9646 = vrot.lane.b32.xlu0 %v9221_v15, %s10486_s24 }
 0xb20   : > { %9652 = vrot.lane.b32.xlu1 %v9224_v25, %s10486_s24 }
 0xb21   : > { %v9505_v36 = vpop.permute.xlu1 %9504 }
 0xb22   : > { %9583 = vst.msk [vmem:[%s10906_s22 + $0x88] sm:$0xff] %vm1555_vm5, %v9505_v36  ;;  %9650 = vrot.lane.b32.xlu0 %v9223_v0, %s10486_s24 }
 0xb23   : > { %v9503_v39 = vpop.permute.xlu0 %9502 }
 0xb24   : > { %9582 = vst.msk [vmem:[%s10906_s22 + $0x80] sm:$0xff] %vm1555_vm5, %v9503_v39  ;;  %9656 = vrot.lane.b32.xlu1 %v9226_v48, %s10486_s24 }
 0xb26   : > { %9654 = vrot.lane.b32.xlu0 %v9225_v57, %s10486_s24 }
 0xb28   : > { %9660 = vrot.lane.b32.xlu1 %v9228_v45, %s10486_s24 }
 0xb2a   : > { %9658 = vrot.lane.b32.xlu0 %v9227_v29, %s10486_s24 }
 0xb2c   : > { %9664 = vrot.lane.b32.xlu1 %v9230_v33, %s10486_s24 }
 0xb2e   : > { %v9509_v58 = vpop.permute.xlu1 %9508  ;;  %9662 = vrot.lane.b32.xlu0 %v9229_v49, %s10486_s24 }
 0xb2f   : > { %9585 = vst.msk [vmem:[%s10906_s22 + $0x98] sm:$0xff] %vm1555_vm5, %v9509_v58 }
 0xb30   : > { %v9507_v16 = vpop.permute.xlu0 %9506  ;;  %9668 = vrot.lane.b32.xlu1 %v9232_v3, %s10486_s24 }
 0xb31   : > { %9584 = vst.msk [vmem:[%s10906_s22 + $0x90] sm:$0xff] %vm1555_vm5, %v9507_v16 }
 0xb32   : > { %9666 = vrot.lane.b32.xlu0 %v9231_v5, %s10486_s24 }
 0xb34   : > { %9672 = vrot.lane.b32.xlu1 %v9234_v41, %s10486_s24 }
 0xb36   : > { %9670 = vrot.lane.b32.xlu0 %v9233_v50, %s10486_s24 }
 0xb38   : > { %9676 = vrot.lane.b32.xlu1 %v9236_v62, %s10486_s24 }
 0xb3a   : > { %v9513_v1 = vpop.permute.xlu1 %9512  ;;  %9674 = vrot.lane.b32.xlu0 %v9235_v46, %s10486_s24 }
 0xb3b   : > { %9587 = vst.msk [vmem:[%s10906_s22 + $0xa8] sm:$0xff] %vm1555_vm5, %v9513_v1 }
 0xb3c   : > { %v9511_v22 = vpop.permute.xlu0 %9510  ;;  %9680 = vrot.lane.b32.xlu1 %v9238_v37, %s10486_s24 }
 0xb3d   : > { %9586 = vst.msk [vmem:[%s10906_s22 + $0xa0] sm:$0xff] %vm1555_vm5, %v9511_v22 }
 0xb3e   : > { %9678 = vrot.lane.b32.xlu0 %v9237_v6, %s10486_s24 }
 0xb40   : > { %9684 = vrot.lane.b32.xlu1 %v9240_v40, %s10486_s24 }
 0xb42   : > { %9682 = vrot.lane.b32.xlu0 %v9239_v19, %s10486_s24 }
 0xb44   : > { %9688 = vrot.lane.b32.xlu1 %v9242_v35, %s10486_s24 }
 0xb45   : > { %v9517_v32 = vpop.permute.xlu1 %9516 }
 0xb46   : > { %9589 = vst.msk [vmem:[%s10906_s22 + $0xb8] sm:$0xff] %vm1555_vm5, %v9517_v32  ;;  %9686 = vrot.lane.b32.xlu0 %v9241_v7, %s10486_s24 }
 0xb47   : > { %v9515_v14 = vpop.permute.xlu0 %9514 }
 0xb48   : > { %9588 = vst.msk [vmem:[%s10906_s22 + $0xb0] sm:$0xff] %vm1555_vm5, %v9515_v14  ;;  %9692 = vrot.lane.b32.xlu1 %v9244_v24, %s10486_s24 }
 0xb4a   : > { %9690 = vrot.lane.b32.xlu0 %v9243_v51, %s10486_s24  ;;  %s9983_s24 = sshll.u32 %s10582_s13, 12  ;;  %s15009_s13 = sand.u32 1, %s10471_s10  }
 0xb4b   : > { %s14870_s27 = scalar_lea.hbm %s14930_s9, %s9983_s24  ;;  %s14880_s14 = scalar_lea.sflag [#allocation8], %s15009_s13 }
 0xb51   : > { %v9521_v12 = vpop.permute.xlu1 %9520 }
 0xb52   : > { %9591 = vst.msk [vmem:[%s10906_s22 + $0xc8] sm:$0xff] %vm1555_vm5, %v9521_v12 }
 0xb53   : > { %v9519_v55 = vpop.permute.xlu0 %9518 }
 0xb54   : > { %9590 = vst.msk [vmem:[%s10906_s22 + $0xc0] sm:$0xff] %vm1555_vm5, %v9519_v55 }
 0xb5d   : > { %v9525_v15 = vpop.permute.xlu1 %9524 }
 0xb5e   : > { %9593 = vst.msk [vmem:[%s10906_s22 + $0xd8] sm:$0xff] %vm1555_vm5, %v9525_v15 }
 0xb5f   : > { %v9523_v25 = vpop.permute.xlu0 %9522 }
 0xb60   : > { %9592 = vst.msk [vmem:[%s10906_s22 + $0xd0] sm:$0xff] %vm1555_vm5, %v9523_v25 }
 0xb6d   : > { %v9529_v53 = vpop.permute.xlu1 %9528 }
 0xb6e   : > { %9595 = vst.msk [vmem:[%s10906_s22 + $0xe8] sm:$0xff] %vm1555_vm5, %v9529_v53 }
 0xb6f   : > { %v9527_v30 = vpop.permute.xlu0 %9526 }
 0xb70   : > { %9594 = vst.msk [vmem:[%s10906_s22 + $0xe0] sm:$0xff] %vm1555_vm5, %v9527_v30 }
 0xb7a   : > { %v9533_v59 = vpop.permute.xlu1 %9532 }
 0xb7b   : > { %9597 = vst.msk [vmem:[%s10906_s22 + $0xf8] sm:$0xff] %vm1555_vm5, %v9533_v59 }
 0xb7c   : > { %v9531_v0 = vpop.permute.xlu0 %9530 }
 0xb7d   : > { %9596 = vst.msk [vmem:[%s10906_s22 + $0xf0] sm:$0xff] %vm1555_vm5, %v9531_v0 }
 0xb7e   : > { %v9633_v48 = vpop.permute.xlu1 %9632 }
 0xb7f   : > { %9727 = vst.msk [vmem:[%s10906_s22 + $0x8] sm:$0xff] %vm1748_vm6, %v9633_v48 }
 0xb80   : > { %v9631_v56 = vpop.permute.xlu0 %9630 }
 0xb81   : > { %9726 = vst.msk [vmem:[%s10906_s22] sm:$0xff] %vm1748_vm6, %v9631_v56 }
 0xb82   : > { %v9637_v11 = vpop.permute.xlu1 %9636 }
 0xb83   : > { %9729 = vst.msk [vmem:[%s10906_s22 + $0x18] sm:$0xff] %vm1748_vm6, %v9637_v11 }
 0xb84   : > { %v9635_v36 = vpop.permute.xlu0 %9634 }
 0xb85   : > { %9728 = vst.msk [vmem:[%s10906_s22 + $0x10] sm:$0xff] %vm1748_vm6, %v9635_v36 }
 0xb86   : > { %v9641_v60 = vpop.permute.xlu1 %9640 }
 0xb87   : > { %9731 = vst.msk [vmem:[%s10906_s22 + $0x28] sm:$0xff] %vm1748_vm6, %v9641_v60 }
 0xb88   : > { %v9639_v39 = vpop.permute.xlu0 %9638 }
 0xb89   : > { %9730 = vst.msk [vmem:[%s10906_s22 + $0x20] sm:$0xff] %vm1748_vm6, %v9639_v39 }
 0xb8a   : > { %v9645_v57 = vpop.permute.xlu1 %9644 }
 0xb8b   : > { %9733 = vst.msk [vmem:[%s10906_s22 + $0x38] sm:$0xff] %vm1748_vm6, %v9645_v57 }
 0xb8c   : > { %v9643_v45 = vpop.permute.xlu0 %9642 }
 0xb8d   : > { %9732 = vst.msk [vmem:[%s10906_s22 + $0x30] sm:$0xff] %vm1748_vm6, %v9643_v45 }
 0xb8e   : > { %v9649_v61 = vpop.permute.xlu1 %9648 }
 0xb8f   : > { %9735 = vst.msk [vmem:[%s10906_s22 + $0x48] sm:$0xff] %vm1748_vm6, %v9649_v61 }
 0xb90   : > { %v9647_v18 = vpop.permute.xlu0 %9646 }
 0xb91   : > { %9734 = vst.msk [vmem:[%s10906_s22 + $0x40] sm:$0xff] %vm1748_vm6, %v9647_v18 }
 0xb92   : > { %v9653_v21 = vpop.permute.xlu1 %9652 }
 0xb93   : > { %9737 = vst.msk [vmem:[%s10906_s22 + $0x58] sm:$0xff] %vm1748_vm6, %v9653_v21 }
 0xb94   : > { %v9651_v29 = vpop.permute.xlu0 %9650 }
 0xb95   : > { %9736 = vst.msk [vmem:[%s10906_s22 + $0x50] sm:$0xff] %vm1748_vm6, %v9651_v29 }
 0xb96   : > { %v9657_v33 = vpop.permute.xlu1 %9656 }
 0xb97   : > { %9739 = vst.msk [vmem:[%s10906_s22 + $0x68] sm:$0xff] %vm1748_vm6, %v9657_v33 }
 0xb98   : > { %v9655_v17 = vpop.permute.xlu0 %9654 }
 0xb99   : > { %9738 = vst.msk [vmem:[%s10906_s22 + $0x60] sm:$0xff] %vm1748_vm6, %v9655_v17 }
 0xb9a   : > { %v9661_v27 = vpop.permute.xlu1 %9660 }
 0xb9b   : > { %9741 = vst.msk [vmem:[%s10906_s22 + $0x78] sm:$0xff] %vm1748_vm6, %v9661_v27 }
 0xb9c   : > { %v9659_v34 = vpop.permute.xlu0 %9658 }
 0xb9d   : > { %9740 = vst.msk [vmem:[%s10906_s22 + $0x70] sm:$0xff] %vm1748_vm6, %v9659_v34 }
 0xb9e   : > { %v9665_v49 = vpop.permute.xlu1 %9664 }
 0xb9f   : > { %9743 = vst.msk [vmem:[%s10906_s22 + $0x88] sm:$0xff] %vm1748_vm6, %v9665_v49 }
 0xba0   : > { %v9663_v3 = vpop.permute.xlu0 %9662 }
 0xba1   : > { %9742 = vst.msk [vmem:[%s10906_s22 + $0x80] sm:$0xff] %vm1748_vm6, %v9663_v3 }
 0xba2   : > { %v9669_v8 = vpop.permute.xlu1 %9668 }
 0xba3   : > { %9745 = vst.msk [vmem:[%s10906_s22 + $0x98] sm:$0xff] %vm1748_vm6, %v9669_v8 }
 0xba4   : > { %v9667_v23 = vpop.permute.xlu0 %9666 }
 0xba5   : > { %9744 = vst.msk [vmem:[%s10906_s22 + $0x90] sm:$0xff] %vm1748_vm6, %v9667_v23 }
 0xba6   : > { %v9673_v58 = vpop.permute.xlu1 %9672 }
 0xba7   : > { %9747 = vst.msk [vmem:[%s10906_s22 + $0xa8] sm:$0xff] %vm1748_vm6, %v9673_v58 }
 0xba8   : > { %v9671_v9 = vpop.permute.xlu0 %9670 }
 0xba9   : > { %9746 = vst.msk [vmem:[%s10906_s22 + $0xa0] sm:$0xff] %vm1748_vm6, %v9671_v9 }
 0xbaa   : > { %v9677_v16 = vpop.permute.xlu1 %9676 }
 0xbab   : > { %9749 = vst.msk [vmem:[%s10906_s22 + $0xb8] sm:$0xff] %vm1748_vm6, %v9677_v16 }
 0xbac   : > { %v9675_v5 = vpop.permute.xlu0 %9674 }
 0xbad   : > { %9748 = vst.msk [vmem:[%s10906_s22 + $0xb0] sm:$0xff] %vm1748_vm6, %v9675_v5 }
 0xbae   : > { %v9681_v41 = vpop.permute.xlu1 %9680 }
 0xbaf   : > { %9751 = vst.msk [vmem:[%s10906_s22 + $0xc8] sm:$0xff] %vm1748_vm6, %v9681_v41 }
 0xbb0   : > { %v9679_v20 = vpop.permute.xlu0 %9678 }
 0xbb1   : > { %9750 = vst.msk [vmem:[%s10906_s22 + $0xc0] sm:$0xff] %vm1748_vm6, %v9679_v20 }
 0xbb2   : > { %v9685_v52 = vpop.permute.xlu1 %9684 }
 0xbb3   : > { %9753 = vst.msk [vmem:[%s10906_s22 + $0xd8] sm:$0xff] %vm1748_vm6, %v9685_v52 }
 0xbb4   : > { %v9683_v10 = vpop.permute.xlu0 %9682 }
 0xbb5   : > { %9752 = vst.msk [vmem:[%s10906_s22 + $0xd0] sm:$0xff] %vm1748_vm6, %v9683_v10 }
 0xbb6   : > { %v9689_v50 = vpop.permute.xlu1 %9688 }
 0xbb7   : > { %9755 = vst.msk [vmem:[%s10906_s22 + $0xe8] sm:$0xff] %vm1748_vm6, %v9689_v50 }
 0xbb8   : > { %v9687_v62 = vpop.permute.xlu0 %9686 }
 0xbb9   : > { %9754 = vst.msk [vmem:[%s10906_s22 + $0xe0] sm:$0xff] %vm1748_vm6, %v9687_v62 }
 0xbba   : > { %v9693_v13 = vpop.permute.xlu1 %9692 }
 0xbbb   : > { %9757 = vst.msk [vmem:[%s10906_s22 + $0xf8] sm:$0xff] %vm1748_vm6, %v9693_v13 }
 0xbbc   : > { %v9691_v63 = vpop.permute.xlu0 %9690 }
 0xbbd   : > { %9756 = vst.msk [vmem:[%s10906_s22 + $0xf0] sm:$0xff] %vm1748_vm6, %v9691_v63 }
 0xbbe   : > { %10432 = shalt.err (!%p10429_p3)
}
 0xbbf   : > { %s10433_s22 = scalar_lea.hbm %s14870_s27, 4096  ;;  %s10437_s21 = scalar_lea.hbm %s14930_s9, 8192 }
 0xbc0   : > { %p10434_p4 = scmp.ne.s32.totalorder %s14870_s27, %s10433_s22  ;;  %p10438_p9 = scmp.lt.s32.totalorder %s14870_s27, %s14930_s9 }
 0xbc1   : > { %p10439_p10 = scmp.lt.s32.totalorder %s10437_s21, %s10433_s22 }
 0xbc2   : > { %p10435_p7 = pnand %p10434_p4, %p10599_p5 }
 0xbc3   : > { %p10440_p11 = por %p10439_p10, %p10438_p9 }
 0xbc4   : > { %p10436_p8 = pneg %p10435_p7 }
 0xbc6   : > { %p10441_p12 = pnand %p10440_p11, %p10436_p8 }
 0xbc8   : > { %10444 = shalt.err (!%p10441_p12)
}
 0xbc9   : > { %s10510_s17 = smov 128   ;;  %s15010_s28 = smov 8  }
 0xbca   : > { %10348 = dma.vmem_to_hbm [thread:$0]  (%p10599_p5), %s14874_s26, 4096, %s14870_s27, %s14880_s14, %s10510_s17, %s10510_s17, %s15010_s28  }
 0xbcb PF: > { %p10354_p13 = scmp.ge.s32.totalorder %s10479_s12, 2  ;;  %s9787_s29 = sand.u32 1, %s10467_s30  }
 0xbcc   : > { %s9788_s23 = scalar_lea.sflag [#allocation8], %s9787_s29 }
 0xbcd   : > { %p10351_p0 = pnand %p10354_p13, %p10603_p6 }
 0xbcf   : > { %p10352_p1 = pneg %p10351_p0 }
 0xbd1   : > { %10462 = dma.done.wait (%p10352_p1), %s9788_s23, 4096  }
 0xbd2   : > { %10464 = vsyncadd (%p10352_p1), %s9788_s23, 4294963200  ;;  %p19_p2 = scmp.ge.s32.totalorder %s10586_s15, 4   ;;  %s15011_s30 = smov %s10471_s10 }
 0xbd3   : > { %s15012_s10 = smov %s10475_s11  ;;  %s15013_s11 = smov %s10597_s18 }
 0xbd4   : > { %s15014_s12 = smov %s10586_s15  ;;  %21 = sbr.rel (!%p19_p2) target bundleno = 3 (0x3), region = 99 }
 0xbd9   :  { %9793 = vsyncpa [#allocation8], 1 }
 0xbda   :  { %9795 = vsyncpa [#allocation8 + $0x1], 1 }

</bundles_post_ra>
